<compile_context>
chip_gen: v5e
topology: v5e:2x2
jax: 0.10.0
libtpu: 0.0.40
codegen_flags: <defaults>
</compile_context>

<pallas_src>
import math

import jax
import jax.numpy as jnp
from jax import lax
from jax.experimental import pallas as pl
from jax.experimental.pallas import tpu as pltpu

D_MODEL = 128
NUM_HEADS = 8
DH = D_MODEL // NUM_HEADS
D_FF = 256
LIG_DIM = 16

# ----------------------------------------------------------------------------
# Packed-parameter layout (single source of truth for wrapper + kernel)
# ----------------------------------------------------------------------------

# bf16 slab #1: all K=128 projection weights, concatenated along columns.
# (sur_w has K=48; it is row-padded to 128 and sliced [:48] in the kernel.)
_W128_LIST = [("sur", 128), ("e_qkv", 384), ("e_wo", 128), ("e_w1", 256),
              ("d_qkv", 384), ("d_wo", 128), ("d_cwq", 128), ("d_cwkv", 256),
              ("d_cwo", 128), ("d_w1", 256)]
_W128_COL = {}
_poff = 0
for _pname, _pwidth in _W128_LIST:
    _W128_COL[_pname] = (_poff, _poff + _pwidth)
    _poff += _pwidth
W128_WIDTH = _poff                       # 2176

# bf16 slab #2: the two K=256 FFN down-projections + the out-MLP Linear(272,512)
WBIG_ROWS = 2 * D_MODEL + LIG_DIM        # 272
WBIG_WIDTH = 2 * D_MODEL + 512           # 768

# bf16 slab #3: out-MLP Linear(512,64) (cols 0:64) and Linear(64,32) (rows 0:64,
# cols 64:96)
WO2_ROWS, WO2_WIDTH = 512, 96

# f32 slab: every bias / LayerNorm gamma-beta / folded BatchNorm scale-shift,
# one row each, padded to 512 lanes.
_VEC_LIST = [
    ("sur_b", 128),
    ("e_bqkv", 384), ("e_bo", 128), ("e_ln1g", 128), ("e_ln1b", 128),
    ("e_b1", 256), ("e_b2", 128), ("e_ln2g", 128), ("e_ln2b", 128),
    ("d_bqkv", 384), ("d_bo", 128), ("d_ln1g", 128), ("d_ln1b", 128),
    ("d_cbq", 128), ("d_cbkv", 256), ("d_cbo", 128), ("d_ln2g", 128),
    ("d_ln2b", 128), ("d_b1", 256), ("d_b2", 128), ("d_ln3g", 128),
    ("d_ln3b", 128),
    ("o_b1", 512), ("bn1_s", 512), ("bn1_h", 512),
    ("o_b2", 64), ("bn2_s", 64), ("bn2_h", 64),
    ("o_b3", 32), ("o_w4", 32), ("o_b4", 1),
]
_VEC_ROW = {name: (i, w) for i, (name, w) in enumerate(_VEC_LIST)}
VEC_WIDTH = 512
VEC_ROWS = ((len(_VEC_LIST) + 7) // 8) * 8


# ----------------------------------------------------------------------------
# In-kernel helpers (operate on loaded values)
# ----------------------------------------------------------------------------


def _mm(x, w_bf16):
    """MXU matmul: bf16 operands, f32 accumulation."""
    return jnp.dot(x.astype(jnp.bfloat16), w_bf16,
                   preferred_element_type=jnp.float32)


def _layernorm(x, g, b):
    mu = jnp.mean(x, axis=-1, keepdims=True)
    xc = x - mu
    var = jnp.mean(xc * xc, axis=-1, keepdims=True)
    return xc * lax.rsqrt(var + 1e-5) * g + b


def _attn(q, k, v, bias):
    """Single-sample multi-head attention core.

    q: f32 [Tq,128] (1/sqrt(Dh) already folded into Wq), k/v: f32 [Tk,128],
    bias: f32 [1,Tk] additive key-padding bias or None.
    Returns the concatenated per-head context [Tq,128] (f32); the Wo output
    projection is applied by the caller on the whole flattened block.
    """
    tq = q.shape[0]
    qb = q.astype(jnp.bfloat16)
    kb = k.astype(jnp.bfloat16)
    vb = v.astype(jnp.bfloat16)
    # Per-head scores stacked along sublanes -> ONE softmax over [H*Tq, Tk].
    s = jnp.concatenate(
        [lax.dot_general(qb[:, h * DH:(h + 1) * DH],
                         kb[:, h * DH:(h + 1) * DH],
                         (((1,), (1,)), ((), ())),
                         preferred_element_type=jnp.float32)
         for h in range(NUM_HEADS)], axis=0)
    if bias is not None:
        s = s + bias
    s = s - jnp.max(s, axis=-1, keepdims=True)
    p = jnp.exp(s)
    p = p * pl.reciprocal(jnp.sum(p, axis=-1, keepdims=True), approx=True)
    # Per-head PV written into lane slices of one [Tq, 128] tile.
    return jnp.concatenate(
        [jnp.dot(p[h * tq:(h + 1) * tq, :].astype(jnp.bfloat16),
                 vb[:, h * DH:(h + 1) * DH],
                 preferred_element_type=jnp.float32)
         for h in range(NUM_HEADS)], axis=-1)


# ----------------------------------------------------------------------------
# Fused kernel: one block of Bt samples per grid step
# ----------------------------------------------------------------------------


def _pli_fused_kernel(p_stru_ref, bias_ref, p_sur_ref, lig_ref,
                      w128_ref, wbig_ref, wo2_ref, vec_ref, out_ref):
    bt, ns, _ = p_stru_ref.shape
    nm = p_sur_ref.shape[1]

    def wcol(name, rows=D_MODEL):
        c0, c1 = _W128_COL[name]
        return w128_ref[:rows, c0:c1]

    def vrow(name):
        r, w = _VEC_ROW[name]
        return vec_ref[r:r + 1, :w]

    # ---- load & flatten activations: all Linears / FFN / LN run on
    # ---- [Bt*T, 128] so the MXU sees M = Bt*T rows, not 8/16.
    x_sur = p_sur_ref[...].reshape(bt * nm, -1)            # [Bt*Nm, 48]  f32
    x_str = p_stru_ref[...].reshape(bt * ns, D_MODEL)      # [Bt*Ns, 128] f32
    bias = bias_ref[...]                                   # [Bt, 1, Ns]  f32
    lig = lig_ref[...].reshape(bt, LIG_DIM)                # [Bt, 16]     f32

    # protein_sur_mpl: Linear(48, 128)
    x_sur = _mm(x_sur, wcol("sur", rows=48)) + vrow("sur_b")

    # ---- sur_layers[0]: TransformerEncoderLayer(128, 8, 256), post-norm ----
    qkv = _mm(x_sur, wcol("e_qkv")) + vrow("e_bqkv")
    q, k, v = (qkv[:, :D_MODEL], qkv[:, D_MODEL:2 * D_MODEL],
               qkv[:, 2 * D_MODEL:])
    a = jnp.concatenate(
        [_attn(q[b * nm:(b + 1) * nm], k[b * nm:(b + 1) * nm],
               v[b * nm:(b + 1) * nm], None) for b in range(bt)], axis=0)
    x = _layernorm(x_sur + _mm(a, wcol("e_wo")) + vrow("e_bo"),
                   vrow("e_ln1g"), vrow("e_ln1b"))
    hff = jnp.maximum(_mm(x, wcol("e_w1")) + vrow("e_b1"), 0.0)
    enc = _layernorm(x + _mm(hff, wbig_ref[:D_FF, :D_MODEL]) + vrow("e_b2"),
                     vrow("e_ln2g"), vrow("e_ln2b"))       # [Bt*Nm, 128]

    # ---- struc_layers[0]: TransformerDecoderLayer(128, 8, 256), post-norm --
    # self-attention over target tokens (key-padding bias per sample)
    qkv = _mm(x_str, wcol("d_qkv")) + vrow("d_bqkv")
    q, k, v = (qkv[:, :D_MODEL], qkv[:, D_MODEL:2 * D_MODEL],
               qkv[:, 2 * D_MODEL:])
    a = jnp.concatenate(
        [_attn(q[b * ns:(b + 1) * ns], k[b * ns:(b + 1) * ns],
               v[b * ns:(b + 1) * ns], bias[b]) for b in range(bt)], axis=0)
    x = _layernorm(x_str + _mm(a, wcol("d_wo")) + vrow("d_bo"),
                   vrow("d_ln1g"), vrow("d_ln1b"))

    # cross-attention against the encoder memory
    cq = _mm(x, wcol("d_cwq")) + vrow("d_cbq")             # [Bt*Ns, 128]
    ckv = _mm(enc, wcol("d_cwkv")) + vrow("d_cbkv")        # [Bt*Nm, 256]
    ck, cv = ckv[:, :D_MODEL], ckv[:, D_MODEL:]
    c = jnp.concatenate(
        [_attn(cq[b * ns:(b + 1) * ns], ck[b * nm:(b + 1) * nm],
               cv[b * nm:(b + 1) * nm], None) for b in range(bt)], axis=0)
    x = _layernorm(x + _mm(c, wcol("d_cwo")) + vrow("d_cbo"),
                   vrow("d_ln2g"), vrow("d_ln2b"))

    hff = jnp.maximum(_mm(x, wcol("d_w1")) + vrow("d_b1"), 0.0)
    dec = _layernorm(
        x + _mm(hff, wbig_ref[:D_FF, D_MODEL:2 * D_MODEL]) + vrow("d_b2"),
        vrow("d_ln3g"), vrow("d_ln3b"))                    # [Bt*Ns, 128]

    # ---- sequence means (padded rows included, as in the reference) --------
    stru_mean = jnp.mean(dec.reshape(bt, ns, D_MODEL), axis=1)   # [Bt, 128]
    sur_mean = jnp.mean(enc.reshape(bt, nm, D_MODEL), axis=1)    # [Bt, 128]

    # ---- out MLP: the K=272 concat matmul is split into 3 partial dots -----
    ow1_c0 = 2 * D_MODEL
    h = (_mm(stru_mean, wbig_ref[:D_MODEL, ow1_c0:])
         + _mm(sur_mean, wbig_ref[D_MODEL:2 * D_MODEL, ow1_c0:])
         + _mm(lig, wbig_ref[2 * D_MODEL:2 * D_MODEL + LIG_DIM, ow1_c0:])
         + vrow("o_b1"))
    h = jnp.maximum(h, 0.0) * vrow("bn1_s") + vrow("bn1_h")
    h = (jnp.maximum(_mm(h, wo2_ref[:, :64]) + vrow("o_b2"), 0.0)
         * vrow("bn2_s") + vrow("bn2_h"))                        # [Bt, 64]
    h = jnp.maximum(_mm(h, wo2_ref[:64, 64:96]) + vrow("o_b3"), 0.0)  # [Bt, 32]
    y = jnp.sum(h * vrow("o_w4"), axis=-1, keepdims=True) + vrow("o_b4")
    y = 1.0 / (1.0 + jnp.exp(-y))                                # sigmoid

    # lane-dense store: broadcast the per-sample scalar over 128 lanes
    out_ref[...] = jnp.broadcast_to(y.reshape(bt, 1, 1), out_ref.shape)


# ----------------------------------------------------------------------------
# One-time parameter preparation / packing
# ----------------------------------------------------------------------------


def pack_params(params):
    """Fold 1/sqrt(Dh) into the Q projections, fold eval-mode BatchNorm into
    scale/shift, and pack everything into 3 bf16 weight slabs + 1 f32 vector
    slab (8 pallas_call inputs total)."""
    pe, pd, po = params["enc"], params["dec"], params["out"]
    scale = 1.0 / math.sqrt(DH)

    def scale_q(w):          # scale the Wq block (first 128 columns)
        return jnp.concatenate([w[:, :D_MODEL] * scale, w[:, D_MODEL:]],
                               axis=-1)

    w128_parts = {
        "sur": jnp.pad(params["sur_w"], ((0, D_MODEL - 48), (0, 0))),
        "e_qkv": scale_q(pe["wqkv"]), "e_wo": pe["wo"], "e_w1": pe["w1"],
        "d_qkv": scale_q(pd["s_wqkv"]), "d_wo": pd["s_wo"],
        "d_cwq": pd["c_wq"] * scale, "d_cwkv": pd["c_wkv"],
        "d_cwo": pd["c_wo"], "d_w1": pd["w1"],
    }
    w128 = jnp.concatenate([w128_parts[n] for n, _ in _W128_LIST],
                           axis=1).astype(jnp.bfloat16)

    def pad_rows(w, rows):
        return jnp.pad(w, ((0, rows - w.shape[0]), (0, 0)))

    wbig = jnp.concatenate(
        [pad_rows(pe["w2"], WBIG_ROWS), pad_rows(pd["w2"], WBIG_ROWS),
         po["w1"]], axis=1).astype(jnp.bfloat16)
    wo2 = jnp.concatenate([po["w2"], pad_rows(po["w3"], WO2_ROWS)],
                          axis=1).astype(jnp.bfloat16)

    # eval-mode BatchNorm1d folded into scale/shift
    bn1_s = po["bn1_g"] * lax.rsqrt(po["bn1_rv"] + 1e-5)
    bn1_h = po["bn1_b"] - po["bn1_rm"] * bn1_s
    bn2_s = po["bn2_g"] * lax.rsqrt(po["bn2_rv"] + 1e-5)
    bn2_h = po["bn2_b"] - po["bn2_rm"] * bn2_s

    vec_vals = {
        "sur_b": params["sur_b"],
        "e_bqkv": scale_q(pe["bqkv"]), "e_bo": pe["bo"],
        "e_ln1g": pe["ln1_g"], "e_ln1b": pe["ln1_b"],
        "e_b1": pe["b1"], "e_b2": pe["b2"],
        "e_ln2g": pe["ln2_g"], "e_ln2b": pe["ln2_b"],
        "d_bqkv": scale_q(pd["s_bqkv"]), "d_bo": pd["s_bo"],
        "d_ln1g": pd["ln1_g"], "d_ln1b": pd["ln1_b"],
        "d_cbq": pd["c_bq"] * scale, "d_cbkv": pd["c_bkv"], "d_cbo": pd["c_bo"],
        "d_ln2g": pd["ln2_g"], "d_ln2b": pd["ln2_b"],
        "d_b1": pd["b1"], "d_b2": pd["b2"],
        "d_ln3g": pd["ln3_g"], "d_ln3b": pd["ln3_b"],
        "o_b1": po["b1"], "bn1_s": bn1_s, "bn1_h": bn1_h,
        "o_b2": po["b2"], "bn2_s": bn2_s, "bn2_h": bn2_h,
        "o_b3": po["b3"], "o_w4": po["w4"], "o_b4": po["b4"],
    }
    rows = []
    for name, width in _VEC_LIST:
        v = vec_vals[name].astype(jnp.float32).reshape(1, -1)
        assert v.shape[1] == width, (name, v.shape)
        rows.append(jnp.pad(v, ((0, 0), (0, VEC_WIDTH - width))))
    vec = jnp.concatenate(rows, axis=0)
    vec = jnp.pad(vec, ((0, VEC_ROWS - vec.shape[0]), (0, 0)))

    return {"w128": w128, "wbig": wbig, "wo2": wo2, "vec": vec}


# ----------------------------------------------------------------------------
# Wrapper
# ----------------------------------------------------------------------------


def pli_predictor_forward(packed, p_stru, p_stru_mask, p_sur, ligand,
                          block_batch=8):
    """
    packed:      dict from pack_params()           (VMEM-resident weight slabs)
    p_stru:      [B, Ns, 128]  dense GVP encoder output (to_dense_batch, padded)
    p_stru_mask: [B, Ns] bool  (True = valid position)
    p_sur:       [B, Nm, 48]   Point_MAE surface encoder output
    ligand:      [B, 16]       AttentiveFP ligand embedding
    returns:     [B]           predicted interaction probability
    """
    B, Ns, _ = p_stru.shape

    bt = max(1, min(block_batch, B))       # samples per grid step
    nblk = -(-B // bt)                     # ceil
    b_pad = nblk * bt

    # additive key-padding bias (broadcast over heads/queries inside kernel)
    stru_bias = jnp.where(p_stru_mask, 0.0, -1e9).astype(jnp.float32)
    stru_bias = stru_bias.reshape(B, 1, Ns)
    lig3 = ligand.astype(jnp.float32).reshape(B, 1, LIG_DIM)
    p_stru = p_stru.astype(jnp.float32)
    p_sur = p_sur.astype(jnp.float32)

    if b_pad != B:                         # pad batch to a whole block
        pad = b_pad - B
        p_stru = jnp.pad(p_stru, ((0, pad), (0, 0), (0, 0)))
        p_sur = jnp.pad(p_sur, ((0, pad), (0, 0), (0, 0)))
        lig3 = jnp.pad(lig3, ((0, pad), (0, 0), (0, 0)))
        stru_bias = jnp.pad(stru_bias, ((0, pad), (0, 0), (0, 0)))

    def data_spec(shape):
        nd = len(shape)
        return pl.BlockSpec((bt,) + tuple(shape[1:]),
                            lambda g: (g,) + (0,) * (nd - 1))

    def weight_spec(shape):
        nd = len(shape)
        return pl.BlockSpec(tuple(shape), lambda g: (0,) * nd)

    data = (p_stru, stru_bias, p_sur, lig3)
    slabs = (packed["w128"], packed["wbig"], packed["wo2"], packed["vec"])

    out = pl.pallas_call(
        _pli_fused_kernel,
        out_shape=jax.ShapeDtypeStruct((b_pad, 1, D_MODEL), jnp.float32),
        grid=(nblk,),
        in_specs=([data_spec(a.shape) for a in data]
                  + [weight_spec(a.shape) for a in slabs]),
        out_specs=pl.BlockSpec((bt, 1, D_MODEL), lambda g: (g, 0, 0)),
        compiler_params=pltpu.CompilerParams(
            dimension_semantics=("parallel",)),
    )(*data, *slabs)

    return out[:B, 0, 0]


# ----------------------------------------------------------------------------
# Deterministic parameter init (f32; packing casts the matmul slabs to bf16)
# ----------------------------------------------------------------------------


class _KeyGen:
    def __init__(self, key):
        self._key = key

    def __call__(self):
        self._key, sub = jax.random.split(self._key)
        return sub


def _w(kg, shape, scale=0.05):
    return (scale * jax.random.normal(kg(), shape)).astype(jnp.float32)


def _z(n):
    return jnp.zeros((1, n), jnp.float32)


def _o(n):
    return jnp.ones((1, n), jnp.float32)


def _encoder_params(kg, d=D_MODEL, dff=D_FF):
    return {
        "wqkv": _w(kg, (d, 3 * d)), "bqkv": _z(3 * d),
        "wo": _w(kg, (d, d)), "bo": _z(d),
        "ln1_g": _o(d), "ln1_b": _z(d),
        "w1": _w(kg, (d, dff)), "b1": _z(dff),
        "w2": _w(kg, (dff, d)), "b2": _z(d),
        "ln2_g": _o(d), "ln2_b": _z(d),
    }


def _decoder_params(kg, d=D_MODEL, dff=D_FF):
    return {
        "s_wqkv": _w(kg, (d, 3 * d)), "s_bqkv": _z(3 * d),
        "s_wo": _w(kg, (d, d)), "s_bo": _z(d),
        "ln1_g": _o(d), "ln1_b": _z(d),
        "c_wq": _w(kg, (d, d)), "c_bq": _z(d),
        "c_wkv": _w(kg, (d, 2 * d)), "c_bkv": _z(2 * d),
        "c_wo": _w(kg, (d, d)), "c_bo": _z(d),
        "ln2_g": _o(d), "ln2_b": _z(d),
        "w1": _w(kg, (d, dff)), "b1": _z(dff),
        "w2": _w(kg, (dff, d)), "b2": _z(d),
        "ln3_g": _o(d), "ln3_b": _z(d),
    }


def _out_params(kg):
    return {
        "w1": _w(kg, (2 * D_MODEL + LIG_DIM, 512)), "b1": _z(512),
        "bn1_g": _o(512), "bn1_b": _z(512), "bn1_rm": _z(512), "bn1_rv": _o(512),
        "w2": _w(kg, (512, 64)), "b2": _z(64),
        "bn2_g": _o(64), "bn2_b": _z(64), "bn2_rm": _z(64), "bn2_rv": _o(64),
        "w3": _w(kg, (64, 32)), "b3": _z(32),
        # final Linear(32,1) weight stored as a [1,32] row (lane reduce)
        "w4": _w(kg, (1, 32)), "b4": _z(1),
    }


def init_params(key):
    kg = _KeyGen(key)
    return {
        "sur_w": _w(kg, (48, 128)),
        "sur_b": _z(128),
        "enc": _encoder_params(kg),
        "dec": _decoder_params(kg),
        "out": _out_params(kg),
    }


# ----------------------------------------------------------------------------
# Main
# ----------------------------------------------------------------------------

if __name__ == "__main__":
    key = jax.random.PRNGKey(0)
    k_par, k_stru, k_sur, k_lig = jax.random.split(key, 4)

    B, Ns, Nm = 2, 8, 16
    params = init_params(k_par)
    packed = pack_params(params)       # one-time parameter preparation

    # Synthetic encoder outputs (GVPModel / Point_MAE / AttentiveFP are
    # external graph / point-cloud modules; see TODO at top).
    p_stru_mask = jnp.array(
        [[True] * Ns, [True] * (Ns - 2) + [False] * 2], dtype=bool)
    p_stru = jax.random.normal(k_stru, (B, Ns, 128), jnp.float32)
    p_stru = p_stru * p_stru_mask[..., None]     # to_dense_batch zero-pads
    p_sur = jax.random.normal(k_sur, (B, Nm, 48), jnp.float32)
    ligand = jax.random.normal(k_lig, (B, LIG_DIM), jnp.float32)

    fwd = jax.jit(pli_predictor_forward)
    y = jax.block_until_ready(fwd(packed, p_stru, p_stru_mask, p_sur, ligand))

    assert y.shape == (B,), y.shape
    assert bool(jnp.all(jnp.isfinite(y)))
    assert bool(jnp.all((y >= 0.0) & (y <= 1.0)))
    print("KERNEL_OK")
</pallas_src>

<mosaic_0001>
module attributes {stable_mosaic.version = 11 : i64} {
  func.func @_pli_fused_kernel(%arg0: i32, %arg1: memref<2x8x128xf32, #tpu.memory_space<vmem>>, %arg2: memref<2x1x8xf32, #tpu.memory_space<vmem>>, %arg3: memref<2x16x48xf32, #tpu.memory_space<vmem>>, %arg4: memref<2x1x16xf32, #tpu.memory_space<vmem>>, %arg5: memref<128x2176xbf16, #tpu.memory_space<vmem>>, %arg6: memref<272x768xbf16, #tpu.memory_space<vmem>>, %arg7: memref<512x96xbf16, #tpu.memory_space<vmem>>, %arg8: memref<32x512xf32, #tpu.memory_space<vmem>>, %arg9: memref<2x1x128xf32, #tpu.memory_space<vmem>>) attributes {dimension_semantics = [#tpu.dimension_semantics<parallel>], iteration_bounds = array<i64: 1>, scalar_prefetch = 0 : i64, scratch_operands = 0 : i64, tpu.core_type = #tpu.core_type<tc>, window_params = [{transform_indices = @transform_0, window_bounds = array<i64: 2, 8, 128>}, {transform_indices = @transform_1, window_bounds = array<i64: 2, 1, 8>}, {transform_indices = @transform_2, window_bounds = array<i64: 2, 16, 48>}, {transform_indices = @transform_3, window_bounds = array<i64: 2, 1, 16>}, {pipeline_mode = #tpu.pipeline_mode<synchronous>, transform_indices = @transform_4, window_bounds = array<i64: 128, 2176>}, {pipeline_mode = #tpu.pipeline_mode<synchronous>, transform_indices = @transform_5, window_bounds = array<i64: 272, 768>}, {pipeline_mode = #tpu.pipeline_mode<synchronous>, transform_indices = @transform_6, window_bounds = array<i64: 512, 96>}, {pipeline_mode = #tpu.pipeline_mode<synchronous>, transform_indices = @transform_7, window_bounds = array<i64: 32, 512>}, {transform_indices = @transform_8, window_bounds = array<i64: 2, 1, 128>}]} {
    %c0 = arith.constant 0 : index
    %c0_0 = arith.constant 0 : index
    %c0_1 = arith.constant 0 : index
    %0 = vector.load %arg3[%c0, %c0_0, %c0_1] : memref<2x16x48xf32, #tpu.memory_space<vmem>>, vector<2x16x48xf32>
    %1 = vector.shape_cast %0 : vector<2x16x48xf32> to vector<32x48xf32>
    %c0_2 = arith.constant 0 : index
    %c0_3 = arith.constant 0 : index
    %c0_4 = arith.constant 0 : index
    %2 = vector.load %arg1[%c0_2, %c0_3, %c0_4] : memref<2x8x128xf32, #tpu.memory_space<vmem>>, vector<2x8x128xf32>
    %3 = vector.shape_cast %2 : vector<2x8x128xf32> to vector<16x128xf32>
    %c0_5 = arith.constant 0 : index
    %c0_6 = arith.constant 0 : index
    %c0_7 = arith.constant 0 : index
    %4 = vector.load %arg2[%c0_5, %c0_6, %c0_7] : memref<2x1x8xf32, #tpu.memory_space<vmem>>, vector<2x1x8xf32>
    %c0_8 = arith.constant 0 : index
    %c0_9 = arith.constant 0 : index
    %c0_10 = arith.constant 0 : index
    %5 = vector.load %arg4[%c0_8, %c0_9, %c0_10] : memref<2x1x16xf32, #tpu.memory_space<vmem>>, vector<2x1x16xf32>
    %6 = vector.shape_cast %5 : vector<2x1x16xf32> to vector<2x16xf32>
    %c0_11 = arith.constant 0 : index
    %c0_12 = arith.constant 0 : index
    %7 = vector.load %arg5[%c0_11, %c0_12] : memref<128x2176xbf16, #tpu.memory_space<vmem>>, vector<48x128xbf16>
    %8 = arith.truncf %1 : vector<32x48xf32> to vector<32x48xbf16>
    %cst = arith.constant dense<0.000000e+00> : vector<32x128xf32>
    %9 = tpu.matmul %8, %7, %cst {dimension_numbers = #tpu.dot_dimension_numbers<[1], [0], [0], [1], [0, 0, 1, 1], [], []>} : vector<32x48xbf16>, vector<48x128xbf16>, vector<32x128xf32> -> vector<32x128xf32>
    %c0_13 = arith.constant 0 : index
    %c0_14 = arith.constant 0 : index
    %10 = vector.load %arg8[%c0_13, %c0_14] : memref<32x512xf32, #tpu.memory_space<vmem>>, vector<1x128xf32>
    %11 = vector.broadcast %10 : vector<1x128xf32> to vector<32x128xf32>
    %12 = arith.addf %9, %11 : vector<32x128xf32>
    %c0_15 = arith.constant 0 : index
    %c128 = arith.constant 128 : index
    %13 = vector.load %arg5[%c0_15, %c128] : memref<128x2176xbf16, #tpu.memory_space<vmem>>, vector<128x384xbf16>
    %14 = arith.truncf %12 : vector<32x128xf32> to vector<32x128xbf16>
    %cst_16 = arith.constant dense<0.000000e+00> : vector<32x384xf32>
    %15 = tpu.matmul %14, %13, %cst_16 {dimension_numbers = #tpu.dot_dimension_numbers<[1], [0], [0], [1], [0, 0, 1, 1], [], []>} : vector<32x128xbf16>, vector<128x384xbf16>, vector<32x384xf32> -> vector<32x384xf32>
    %c1 = arith.constant 1 : index
    %c0_17 = arith.constant 0 : index
    %16 = vector.load %arg8[%c1, %c0_17] : memref<32x512xf32, #tpu.memory_space<vmem>>, vector<1x384xf32>
    %17 = vector.broadcast %16 : vector<1x384xf32> to vector<32x384xf32>
    %18 = arith.addf %15, %17 : vector<32x384xf32>
    %19 = vector.extract_strided_slice %18 {offsets = [0, 0], sizes = [32, 128], strides = [1, 1]} : vector<32x384xf32> to vector<32x128xf32>
    %20 = vector.extract_strided_slice %18 {offsets = [0, 128], sizes = [32, 128], strides = [1, 1]} : vector<32x384xf32> to vector<32x128xf32>
    %21 = vector.extract_strided_slice %18 {offsets = [0, 256], sizes = [32, 128], strides = [1, 1]} : vector<32x384xf32> to vector<32x128xf32>
    %22 = vector.extract_strided_slice %19 {offsets = [0, 0], sizes = [16, 128], strides = [1, 1]} : vector<32x128xf32> to vector<16x128xf32>
    %23 = vector.extract_strided_slice %20 {offsets = [0, 0], sizes = [16, 128], strides = [1, 1]} : vector<32x128xf32> to vector<16x128xf32>
    %24 = vector.extract_strided_slice %21 {offsets = [0, 0], sizes = [16, 128], strides = [1, 1]} : vector<32x128xf32> to vector<16x128xf32>
    %25 = arith.truncf %22 : vector<16x128xf32> to vector<16x128xbf16>
    %26 = arith.truncf %23 : vector<16x128xf32> to vector<16x128xbf16>
    %27 = arith.truncf %24 : vector<16x128xf32> to vector<16x128xbf16>
    %28 = vector.extract_strided_slice %25 {offsets = [0, 0], sizes = [16, 16], strides = [1, 1]} : vector<16x128xbf16> to vector<16x16xbf16>
    %29 = vector.extract_strided_slice %26 {offsets = [0, 0], sizes = [16, 16], strides = [1, 1]} : vector<16x128xbf16> to vector<16x16xbf16>
    %cst_18 = arith.constant dense<0.000000e+00> : vector<16x16xf32>
    %30 = tpu.matmul %28, %29, %cst_18 {dimension_numbers = #tpu.dot_dimension_numbers<[1], [1], [0], [0], [0, 0, 1, 0], [], []>} : vector<16x16xbf16>, vector<16x16xbf16>, vector<16x16xf32> -> vector<16x16xf32>
    %31 = vector.extract_strided_slice %25 {offsets = [0, 16], sizes = [16, 16], strides = [1, 1]} : vector<16x128xbf16> to vector<16x16xbf16>
    %32 = vector.extract_strided_slice %26 {offsets = [0, 16], sizes = [16, 16], strides = [1, 1]} : vector<16x128xbf16> to vector<16x16xbf16>
    %cst_19 = arith.constant dense<0.000000e+00> : vector<16x16xf32>
    %33 = tpu.matmul %31, %32, %cst_19 {dimension_numbers = #tpu.dot_dimension_numbers<[1], [1], [0], [0], [0, 0, 1, 0], [], []>} : vector<16x16xbf16>, vector<16x16xbf16>, vector<16x16xf32> -> vector<16x16xf32>
    %34 = vector.extract_strided_slice %25 {offsets = [0, 32], sizes = [16, 16], strides = [1, 1]} : vector<16x128xbf16> to vector<16x16xbf16>
    %35 = vector.extract_strided_slice %26 {offsets = [0, 32], sizes = [16, 16], strides = [1, 1]} : vector<16x128xbf16> to vector<16x16xbf16>
    %cst_20 = arith.constant dense<0.000000e+00> : vector<16x16xf32>
    %36 = tpu.matmul %34, %35, %cst_20 {dimension_numbers = #tpu.dot_dimension_numbers<[1], [1], [0], [0], [0, 0, 1, 0], [], []>} : vector<16x16xbf16>, vector<16x16xbf16>, vector<16x16xf32> -> vector<16x16xf32>
    %37 = vector.extract_strided_slice %25 {offsets = [0, 48], sizes = [16, 16], strides = [1, 1]} : vector<16x128xbf16> to vector<16x16xbf16>
    %38 = vector.extract_strided_slice %26 {offsets = [0, 48], sizes = [16, 16], strides = [1, 1]} : vector<16x128xbf16> to vector<16x16xbf16>
    %cst_21 = arith.constant dense<0.000000e+00> : vector<16x16xf32>
    %39 = tpu.matmul %37, %38, %cst_21 {dimension_numbers = #tpu.dot_dimension_numbers<[1], [1], [0], [0], [0, 0, 1, 0], [], []>} : vector<16x16xbf16>, vector<16x16xbf16>, vector<16x16xf32> -> vector<16x16xf32>
    %40 = vector.extract_strided_slice %25 {offsets = [0, 64], sizes = [16, 16], strides = [1, 1]} : vector<16x128xbf16> to vector<16x16xbf16>
    %41 = vector.extract_strided_slice %26 {offsets = [0, 64], sizes = [16, 16], strides = [1, 1]} : vector<16x128xbf16> to vector<16x16xbf16>
    %cst_22 = arith.constant dense<0.000000e+00> : vector<16x16xf32>
    %42 = tpu.matmul %40, %41, %cst_22 {dimension_numbers = #tpu.dot_dimension_numbers<[1], [1], [0], [0], [0, 0, 1, 0], [], []>} : vector<16x16xbf16>, vector<16x16xbf16>, vector<16x16xf32> -> vector<16x16xf32>
    %43 = vector.extract_strided_slice %25 {offsets = [0, 80], sizes = [16, 16], strides = [1, 1]} : vector<16x128xbf16> to vector<16x16xbf16>
    %44 = vector.extract_strided_slice %26 {offsets = [0, 80], sizes = [16, 16], strides = [1, 1]} : vector<16x128xbf16> to vector<16x16xbf16>
    %cst_23 = arith.constant dense<0.000000e+00> : vector<16x16xf32>
    %45 = tpu.matmul %43, %44, %cst_23 {dimension_numbers = #tpu.dot_dimension_numbers<[1], [1], [0], [0], [0, 0, 1, 0], [], []>} : vector<16x16xbf16>, vector<16x16xbf16>, vector<16x16xf32> -> vector<16x16xf32>
    %46 = vector.extract_strided_slice %25 {offsets = [0, 96], sizes = [16, 16], strides = [1, 1]} : vector<16x128xbf16> to vector<16x16xbf16>
    %47 = vector.extract_strided_slice %26 {offsets = [0, 96], sizes = [16, 16], strides = [1, 1]} : vector<16x128xbf16> to vector<16x16xbf16>
    %cst_24 = arith.constant dense<0.000000e+00> : vector<16x16xf32>
    %48 = tpu.matmul %46, %47, %cst_24 {dimension_numbers = #tpu.dot_dimension_numbers<[1], [1], [0], [0], [0, 0, 1, 0], [], []>} : vector<16x16xbf16>, vector<16x16xbf16>, vector<16x16xf32> -> vector<16x16xf32>
    %49 = vector.extract_strided_slice %25 {offsets = [0, 112], sizes = [16, 16], strides = [1, 1]} : vector<16x128xbf16> to vector<16x16xbf16>
    %50 = vector.extract_strided_slice %26 {offsets = [0, 112], sizes = [16, 16], strides = [1, 1]} : vector<16x128xbf16> to vector<16x16xbf16>
    %cst_25 = arith.constant dense<0.000000e+00> : vector<16x16xf32>
    %51 = tpu.matmul %49, %50, %cst_25 {dimension_numbers = #tpu.dot_dimension_numbers<[1], [1], [0], [0], [0, 0, 1, 0], [], []>} : vector<16x16xbf16>, vector<16x16xbf16>, vector<16x16xf32> -> vector<16x16xf32>
    %52 = tpu.concatenate %30, %33, %36, %39, %42, %45, %48, %51 in 0 : vector<16x16xf32>, vector<16x16xf32>, vector<16x16xf32>, vector<16x16xf32>, vector<16x16xf32>, vector<16x16xf32>, vector<16x16xf32>, vector<16x16xf32> -> vector<128x16xf32>
    %cst_26 = arith.constant dense<0xFF800000> : vector<128xf32>
    %53 = vector.multi_reduction <maximumf>, %52, %cst_26 [1] : vector<128x16xf32> to vector<128xf32>
    %54 = vector.shape_cast %53 : vector<128xf32> to vector<128x1xf32>
    %55 = vector.broadcast %54 : vector<128x1xf32> to vector<128x16xf32>
    %56 = arith.subf %52, %55 : vector<128x16xf32>
    %57 = math.exp %56 : vector<128x16xf32>
    %cst_27 = arith.constant dense<0.000000e+00> : vector<128xf32>
    %58 = vector.multi_reduction <add>, %57, %cst_27 [1] : vector<128x16xf32> to vector<128xf32>
    %59 = vector.shape_cast %58 : vector<128xf32> to vector<128x1xf32>
    %60 = tpu.reciprocal %59 {approx = true} : vector<128x1xf32> -> vector<128x1xf32>
    %61 = vector.broadcast %60 : vector<128x1xf32> to vector<128x16xf32>
    %62 = arith.mulf %57, %61 : vector<128x16xf32>
    %63 = vector.extract_strided_slice %62 {offsets = [0, 0], sizes = [16, 16], strides = [1, 1]} : vector<128x16xf32> to vector<16x16xf32>
    %64 = arith.truncf %63 : vector<16x16xf32> to vector<16x16xbf16>
    %65 = vector.extract_strided_slice %27 {offsets = [0, 0], sizes = [16, 16], strides = [1, 1]} : vector<16x128xbf16> to vector<16x16xbf16>
    %cst_28 = arith.constant dense<0.000000e+00> : vector<16x16xf32>
    %66 = tpu.matmul %64, %65, %cst_28 {dimension_numbers = #tpu.dot_dimension_numbers<[1], [0], [0], [1], [0, 0, 1, 1], [], []>} : vector<16x16xbf16>, vector<16x16xbf16>, vector<16x16xf32> -> vector<16x16xf32>
    %67 = vector.extract_strided_slice %62 {offsets = [16, 0], sizes = [16, 16], strides = [1, 1]} : vector<128x16xf32> to vector<16x16xf32>
    %68 = arith.truncf %67 : vector<16x16xf32> to vector<16x16xbf16>
    %69 = vector.extract_strided_slice %27 {offsets = [0, 16], sizes = [16, 16], strides = [1, 1]} : vector<16x128xbf16> to vector<16x16xbf16>
    %cst_29 = arith.constant dense<0.000000e+00> : vector<16x16xf32>
    %70 = tpu.matmul %68, %69, %cst_29 {dimension_numbers = #tpu.dot_dimension_numbers<[1], [0], [0], [1], [0, 0, 1, 1], [], []>} : vector<16x16xbf16>, vector<16x16xbf16>, vector<16x16xf32> -> vector<16x16xf32>
    %71 = vector.extract_strided_slice %62 {offsets = [32, 0], sizes = [16, 16], strides = [1, 1]} : vector<128x16xf32> to vector<16x16xf32>
    %72 = arith.truncf %71 : vector<16x16xf32> to vector<16x16xbf16>
    %73 = vector.extract_strided_slice %27 {offsets = [0, 32], sizes = [16, 16], strides = [1, 1]} : vector<16x128xbf16> to vector<16x16xbf16>
    %cst_30 = arith.constant dense<0.000000e+00> : vector<16x16xf32>
    %74 = tpu.matmul %72, %73, %cst_30 {dimension_numbers = #tpu.dot_dimension_numbers<[1], [0], [0], [1], [0, 0, 1, 1], [], []>} : vector<16x16xbf16>, vector<16x16xbf16>, vector<16x16xf32> -> vector<16x16xf32>
    %75 = vector.extract_strided_slice %62 {offsets = [48, 0], sizes = [16, 16], strides = [1, 1]} : vector<128x16xf32> to vector<16x16xf32>
    %76 = arith.truncf %75 : vector<16x16xf32> to vector<16x16xbf16>
    %77 = vector.extract_strided_slice %27 {offsets = [0, 48], sizes = [16, 16], strides = [1, 1]} : vector<16x128xbf16> to vector<16x16xbf16>
    %cst_31 = arith.constant dense<0.000000e+00> : vector<16x16xf32>
    %78 = tpu.matmul %76, %77, %cst_31 {dimension_numbers = #tpu.dot_dimension_numbers<[1], [0], [0], [1], [0, 0, 1, 1], [], []>} : vector<16x16xbf16>, vector<16x16xbf16>, vector<16x16xf32> -> vector<16x16xf32>
    %79 = vector.extract_strided_slice %62 {offsets = [64, 0], sizes = [16, 16], strides = [1, 1]} : vector<128x16xf32> to vector<16x16xf32>
    %80 = arith.truncf %79 : vector<16x16xf32> to vector<16x16xbf16>
    %81 = vector.extract_strided_slice %27 {offsets = [0, 64], sizes = [16, 16], strides = [1, 1]} : vector<16x128xbf16> to vector<16x16xbf16>
    %cst_32 = arith.constant dense<0.000000e+00> : vector<16x16xf32>
    %82 = tpu.matmul %80, %81, %cst_32 {dimension_numbers = #tpu.dot_dimension_numbers<[1], [0], [0], [1], [0, 0, 1, 1], [], []>} : vector<16x16xbf16>, vector<16x16xbf16>, vector<16x16xf32> -> vector<16x16xf32>
    %83 = vector.extract_strided_slice %62 {offsets = [80, 0], sizes = [16, 16], strides = [1, 1]} : vector<128x16xf32> to vector<16x16xf32>
    %84 = arith.truncf %83 : vector<16x16xf32> to vector<16x16xbf16>
    %85 = vector.extract_strided_slice %27 {offsets = [0, 80], sizes = [16, 16], strides = [1, 1]} : vector<16x128xbf16> to vector<16x16xbf16>
    %cst_33 = arith.constant dense<0.000000e+00> : vector<16x16xf32>
    %86 = tpu.matmul %84, %85, %cst_33 {dimension_numbers = #tpu.dot_dimension_numbers<[1], [0], [0], [1], [0, 0, 1, 1], [], []>} : vector<16x16xbf16>, vector<16x16xbf16>, vector<16x16xf32> -> vector<16x16xf32>
    %87 = vector.extract_strided_slice %62 {offsets = [96, 0], sizes = [16, 16], strides = [1, 1]} : vector<128x16xf32> to vector<16x16xf32>
    %88 = arith.truncf %87 : vector<16x16xf32> to vector<16x16xbf16>
    %89 = vector.extract_strided_slice %27 {offsets = [0, 96], sizes = [16, 16], strides = [1, 1]} : vector<16x128xbf16> to vector<16x16xbf16>
    %cst_34 = arith.constant dense<0.000000e+00> : vector<16x16xf32>
    %90 = tpu.matmul %88, %89, %cst_34 {dimension_numbers = #tpu.dot_dimension_numbers<[1], [0], [0], [1], [0, 0, 1, 1], [], []>} : vector<16x16xbf16>, vector<16x16xbf16>, vector<16x16xf32> -> vector<16x16xf32>
    %91 = vector.extract_strided_slice %62 {offsets = [112, 0], sizes = [16, 16], strides = [1, 1]} : vector<128x16xf32> to vector<16x16xf32>
    %92 = arith.truncf %91 : vector<16x16xf32> to vector<16x16xbf16>
    %93 = vector.extract_strided_slice %27 {offsets = [0, 112], sizes = [16, 16], strides = [1, 1]} : vector<16x128xbf16> to vector<16x16xbf16>
    %cst_35 = arith.constant dense<0.000000e+00> : vector<16x16xf32>
    %94 = tpu.matmul %92, %93, %cst_35 {dimension_numbers = #tpu.dot_dimension_numbers<[1], [0], [0], [1], [0, 0, 1, 1], [], []>} : vector<16x16xbf16>, vector<16x16xbf16>, vector<16x16xf32> -> vector<16x16xf32>
    %95 = tpu.concatenate %66, %70, %74, %78, %82, %86, %90, %94 in 1 : vector<16x16xf32>, vector<16x16xf32>, vector<16x16xf32>, vector<16x16xf32>, vector<16x16xf32>, vector<16x16xf32>, vector<16x16xf32>, vector<16x16xf32> -> vector<16x128xf32>
    %96 = vector.extract_strided_slice %19 {offsets = [16, 0], sizes = [16, 128], strides = [1, 1]} : vector<32x128xf32> to vector<16x128xf32>
    %97 = vector.extract_strided_slice %20 {offsets = [16, 0], sizes = [16, 128], strides = [1, 1]} : vector<32x128xf32> to vector<16x128xf32>
    %98 = vector.extract_strided_slice %21 {offsets = [16, 0], sizes = [16, 128], strides = [1, 1]} : vector<32x128xf32> to vector<16x128xf32>
    %99 = arith.truncf %96 : vector<16x128xf32> to vector<16x128xbf16>
    %100 = arith.truncf %97 : vector<16x128xf32> to vector<16x128xbf16>
    %101 = arith.truncf %98 : vector<16x128xf32> to vector<16x128xbf16>
    %102 = vector.extract_strided_slice %99 {offsets = [0, 0], sizes = [16, 16], strides = [1, 1]} : vector<16x128xbf16> to vector<16x16xbf16>
    %103 = vector.extract_strided_slice %100 {offsets = [0, 0], sizes = [16, 16], strides = [1, 1]} : vector<16x128xbf16> to vector<16x16xbf16>
    %cst_36 = arith.constant dense<0.000000e+00> : vector<16x16xf32>
    %104 = tpu.matmul %102, %103, %cst_36 {dimension_numbers = #tpu.dot_dimension_numbers<[1], [1], [0], [0], [0, 0, 1, 0], [], []>} : vector<16x16xbf16>, vector<16x16xbf16>, vector<16x16xf32> -> vector<16x16xf32>
    %105 = vector.extract_strided_slice %99 {offsets = [0, 16], sizes = [16, 16], strides = [1, 1]} : vector<16x128xbf16> to vector<16x16xbf16>
    %106 = vector.extract_strided_slice %100 {offsets = [0, 16], sizes = [16, 16], strides = [1, 1]} : vector<16x128xbf16> to vector<16x16xbf16>
    %cst_37 = arith.constant dense<0.000000e+00> : vector<16x16xf32>
    %107 = tpu.matmul %105, %106, %cst_37 {dimension_numbers = #tpu.dot_dimension_numbers<[1], [1], [0], [0], [0, 0, 1, 0], [], []>} : vector<16x16xbf16>, vector<16x16xbf16>, vector<16x16xf32> -> vector<16x16xf32>
    %108 = vector.extract_strided_slice %99 {offsets = [0, 32], sizes = [16, 16], strides = [1, 1]} : vector<16x128xbf16> to vector<16x16xbf16>
    %109 = vector.extract_strided_slice %100 {offsets = [0, 32], sizes = [16, 16], strides = [1, 1]} : vector<16x128xbf16> to vector<16x16xbf16>
    %cst_38 = arith.constant dense<0.000000e+00> : vector<16x16xf32>
    %110 = tpu.matmul %108, %109, %cst_38 {dimension_numbers = #tpu.dot_dimension_numbers<[1], [1], [0], [0], [0, 0, 1, 0], [], []>} : vector<16x16xbf16>, vector<16x16xbf16>, vector<16x16xf32> -> vector<16x16xf32>
    %111 = vector.extract_strided_slice %99 {offsets = [0, 48], sizes = [16, 16], strides = [1, 1]} : vector<16x128xbf16> to vector<16x16xbf16>
    %112 = vector.extract_strided_slice %100 {offsets = [0, 48], sizes = [16, 16], strides = [1, 1]} : vector<16x128xbf16> to vector<16x16xbf16>
    %cst_39 = arith.constant dense<0.000000e+00> : vector<16x16xf32>
    %113 = tpu.matmul %111, %112, %cst_39 {dimension_numbers = #tpu.dot_dimension_numbers<[1], [1], [0], [0], [0, 0, 1, 0], [], []>} : vector<16x16xbf16>, vector<16x16xbf16>, vector<16x16xf32> -> vector<16x16xf32>
    %114 = vector.extract_strided_slice %99 {offsets = [0, 64], sizes = [16, 16], strides = [1, 1]} : vector<16x128xbf16> to vector<16x16xbf16>
    %115 = vector.extract_strided_slice %100 {offsets = [0, 64], sizes = [16, 16], strides = [1, 1]} : vector<16x128xbf16> to vector<16x16xbf16>
    %cst_40 = arith.constant dense<0.000000e+00> : vector<16x16xf32>
    %116 = tpu.matmul %114, %115, %cst_40 {dimension_numbers = #tpu.dot_dimension_numbers<[1], [1], [0], [0], [0, 0, 1, 0], [], []>} : vector<16x16xbf16>, vector<16x16xbf16>, vector<16x16xf32> -> vector<16x16xf32>
    %117 = vector.extract_strided_slice %99 {offsets = [0, 80], sizes = [16, 16], strides = [1, 1]} : vector<16x128xbf16> to vector<16x16xbf16>
    %118 = vector.extract_strided_slice %100 {offsets = [0, 80], sizes = [16, 16], strides = [1, 1]} : vector<16x128xbf16> to vector<16x16xbf16>
    %cst_41 = arith.constant dense<0.000000e+00> : vector<16x16xf32>
    %119 = tpu.matmul %117, %118, %cst_41 {dimension_numbers = #tpu.dot_dimension_numbers<[1], [1], [0], [0], [0, 0, 1, 0], [], []>} : vector<16x16xbf16>, vector<16x16xbf16>, vector<16x16xf32> -> vector<16x16xf32>
    %120 = vector.extract_strided_slice %99 {offsets = [0, 96], sizes = [16, 16], strides = [1, 1]} : vector<16x128xbf16> to vector<16x16xbf16>
    %121 = vector.extract_strided_slice %100 {offsets = [0, 96], sizes = [16, 16], strides = [1, 1]} : vector<16x128xbf16> to vector<16x16xbf16>
    %cst_42 = arith.constant dense<0.000000e+00> : vector<16x16xf32>
    %122 = tpu.matmul %120, %121, %cst_42 {dimension_numbers = #tpu.dot_dimension_numbers<[1], [1], [0], [0], [0, 0, 1, 0], [], []>} : vector<16x16xbf16>, vector<16x16xbf16>, vector<16x16xf32> -> vector<16x16xf32>
    %123 = vector.extract_strided_slice %99 {offsets = [0, 112], sizes = [16, 16], strides = [1, 1]} : vector<16x128xbf16> to vector<16x16xbf16>
    %124 = vector.extract_strided_slice %100 {offsets = [0, 112], sizes = [16, 16], strides = [1, 1]} : vector<16x128xbf16> to vector<16x16xbf16>
    %cst_43 = arith.constant dense<0.000000e+00> : vector<16x16xf32>
    %125 = tpu.matmul %123, %124, %cst_43 {dimension_numbers = #tpu.dot_dimension_numbers<[1], [1], [0], [0], [0, 0, 1, 0], [], []>} : vector<16x16xbf16>, vector<16x16xbf16>, vector<16x16xf32> -> vector<16x16xf32>
    %126 = tpu.concatenate %104, %107, %110, %113, %116, %119, %122, %125 in 0 : vector<16x16xf32>, vector<16x16xf32>, vector<16x16xf32>, vector<16x16xf32>, vector<16x16xf32>, vector<16x16xf32>, vector<16x16xf32>, vector<16x16xf32> -> vector<128x16xf32>
    %cst_44 = arith.constant dense<0xFF800000> : vector<128xf32>
    %127 = vector.multi_reduction <maximumf>, %126, %cst_44 [1] : vector<128x16xf32> to vector<128xf32>
    %128 = vector.shape_cast %127 : vector<128xf32> to vector<128x1xf32>
    %129 = vector.broadcast %128 : vector<128x1xf32> to vector<128x16xf32>
    %130 = arith.subf %126, %129 : vector<128x16xf32>
    %131 = math.exp %130 : vector<128x16xf32>
    %cst_45 = arith.constant dense<0.000000e+00> : vector<128xf32>
    %132 = vector.multi_reduction <add>, %131, %cst_45 [1] : vector<128x16xf32> to vector<128xf32>
    %133 = vector.shape_cast %132 : vector<128xf32> to vector<128x1xf32>
    %134 = tpu.reciprocal %133 {approx = true} : vector<128x1xf32> -> vector<128x1xf32>
    %135 = vector.broadcast %134 : vector<128x1xf32> to vector<128x16xf32>
    %136 = arith.mulf %131, %135 : vector<128x16xf32>
    %137 = vector.extract_strided_slice %136 {offsets = [0, 0], sizes = [16, 16], strides = [1, 1]} : vector<128x16xf32> to vector<16x16xf32>
    %138 = arith.truncf %137 : vector<16x16xf32> to vector<16x16xbf16>
    %139 = vector.extract_strided_slice %101 {offsets = [0, 0], sizes = [16, 16], strides = [1, 1]} : vector<16x128xbf16> to vector<16x16xbf16>
    %cst_46 = arith.constant dense<0.000000e+00> : vector<16x16xf32>
    %140 = tpu.matmul %138, %139, %cst_46 {dimension_numbers = #tpu.dot_dimension_numbers<[1], [0], [0], [1], [0, 0, 1, 1], [], []>} : vector<16x16xbf16>, vector<16x16xbf16>, vector<16x16xf32> -> vector<16x16xf32>
    %141 = vector.extract_strided_slice %136 {offsets = [16, 0], sizes = [16, 16], strides = [1, 1]} : vector<128x16xf32> to vector<16x16xf32>
    %142 = arith.truncf %141 : vector<16x16xf32> to vector<16x16xbf16>
    %143 = vector.extract_strided_slice %101 {offsets = [0, 16], sizes = [16, 16], strides = [1, 1]} : vector<16x128xbf16> to vector<16x16xbf16>
    %cst_47 = arith.constant dense<0.000000e+00> : vector<16x16xf32>
    %144 = tpu.matmul %142, %143, %cst_47 {dimension_numbers = #tpu.dot_dimension_numbers<[1], [0], [0], [1], [0, 0, 1, 1], [], []>} : vector<16x16xbf16>, vector<16x16xbf16>, vector<16x16xf32> -> vector<16x16xf32>
    %145 = vector.extract_strided_slice %136 {offsets = [32, 0], sizes = [16, 16], strides = [1, 1]} : vector<128x16xf32> to vector<16x16xf32>
    %146 = arith.truncf %145 : vector<16x16xf32> to vector<16x16xbf16>
    %147 = vector.extract_strided_slice %101 {offsets = [0, 32], sizes = [16, 16], strides = [1, 1]} : vector<16x128xbf16> to vector<16x16xbf16>
    %cst_48 = arith.constant dense<0.000000e+00> : vector<16x16xf32>
    %148 = tpu.matmul %146, %147, %cst_48 {dimension_numbers = #tpu.dot_dimension_numbers<[1], [0], [0], [1], [0, 0, 1, 1], [], []>} : vector<16x16xbf16>, vector<16x16xbf16>, vector<16x16xf32> -> vector<16x16xf32>
    %149 = vector.extract_strided_slice %136 {offsets = [48, 0], sizes = [16, 16], strides = [1, 1]} : vector<128x16xf32> to vector<16x16xf32>
    %150 = arith.truncf %149 : vector<16x16xf32> to vector<16x16xbf16>
    %151 = vector.extract_strided_slice %101 {offsets = [0, 48], sizes = [16, 16], strides = [1, 1]} : vector<16x128xbf16> to vector<16x16xbf16>
    %cst_49 = arith.constant dense<0.000000e+00> : vector<16x16xf32>
    %152 = tpu.matmul %150, %151, %cst_49 {dimension_numbers = #tpu.dot_dimension_numbers<[1], [0], [0], [1], [0, 0, 1, 1], [], []>} : vector<16x16xbf16>, vector<16x16xbf16>, vector<16x16xf32> -> vector<16x16xf32>
    %153 = vector.extract_strided_slice %136 {offsets = [64, 0], sizes = [16, 16], strides = [1, 1]} : vector<128x16xf32> to vector<16x16xf32>
    %154 = arith.truncf %153 : vector<16x16xf32> to vector<16x16xbf16>
    %155 = vector.extract_strided_slice %101 {offsets = [0, 64], sizes = [16, 16], strides = [1, 1]} : vector<16x128xbf16> to vector<16x16xbf16>
    %cst_50 = arith.constant dense<0.000000e+00> : vector<16x16xf32>
    %156 = tpu.matmul %154, %155, %cst_50 {dimension_numbers = #tpu.dot_dimension_numbers<[1], [0], [0], [1], [0, 0, 1, 1], [], []>} : vector<16x16xbf16>, vector<16x16xbf16>, vector<16x16xf32> -> vector<16x16xf32>
    %157 = vector.extract_strided_slice %136 {offsets = [80, 0], sizes = [16, 16], strides = [1, 1]} : vector<128x16xf32> to vector<16x16xf32>
    %158 = arith.truncf %157 : vector<16x16xf32> to vector<16x16xbf16>
    %159 = vector.extract_strided_slice %101 {offsets = [0, 80], sizes = [16, 16], strides = [1, 1]} : vector<16x128xbf16> to vector<16x16xbf16>
    %cst_51 = arith.constant dense<0.000000e+00> : vector<16x16xf32>
    %160 = tpu.matmul %158, %159, %cst_51 {dimension_numbers = #tpu.dot_dimension_numbers<[1], [0], [0], [1], [0, 0, 1, 1], [], []>} : vector<16x16xbf16>, vector<16x16xbf16>, vector<16x16xf32> -> vector<16x16xf32>
    %161 = vector.extract_strided_slice %136 {offsets = [96, 0], sizes = [16, 16], strides = [1, 1]} : vector<128x16xf32> to vector<16x16xf32>
    %162 = arith.truncf %161 : vector<16x16xf32> to vector<16x16xbf16>
    %163 = vector.extract_strided_slice %101 {offsets = [0, 96], sizes = [16, 16], strides = [1, 1]} : vector<16x128xbf16> to vector<16x16xbf16>
    %cst_52 = arith.constant dense<0.000000e+00> : vector<16x16xf32>
    %164 = tpu.matmul %162, %163, %cst_52 {dimension_numbers = #tpu.dot_dimension_numbers<[1], [0], [0], [1], [0, 0, 1, 1], [], []>} : vector<16x16xbf16>, vector<16x16xbf16>, vector<16x16xf32> -> vector<16x16xf32>
    %165 = vector.extract_strided_slice %136 {offsets = [112, 0], sizes = [16, 16], strides = [1, 1]} : vector<128x16xf32> to vector<16x16xf32>
    %166 = arith.truncf %165 : vector<16x16xf32> to vector<16x16xbf16>
    %167 = vector.extract_strided_slice %101 {offsets = [0, 112], sizes = [16, 16], strides = [1, 1]} : vector<16x128xbf16> to vector<16x16xbf16>
    %cst_53 = arith.constant dense<0.000000e+00> : vector<16x16xf32>
    %168 = tpu.matmul %166, %167, %cst_53 {dimension_numbers = #tpu.dot_dimension_numbers<[1], [0], [0], [1], [0, 0, 1, 1], [], []>} : vector<16x16xbf16>, vector<16x16xbf16>, vector<16x16xf32> -> vector<16x16xf32>
    %169 = tpu.concatenate %140, %144, %148, %152, %156, %160, %164, %168 in 1 : vector<16x16xf32>, vector<16x16xf32>, vector<16x16xf32>, vector<16x16xf32>, vector<16x16xf32>, vector<16x16xf32>, vector<16x16xf32>, vector<16x16xf32> -> vector<16x128xf32>
    %170 = tpu.concatenate %95, %169 in 0 : vector<16x128xf32>, vector<16x128xf32> -> vector<32x128xf32>
    %c0_54 = arith.constant 0 : index
    %c512 = arith.constant 512 : index
    %171 = vector.load %arg5[%c0_54, %c512] : memref<128x2176xbf16, #tpu.memory_space<vmem>>, vector<128x128xbf16>
    %172 = arith.truncf %170 : vector<32x128xf32> to vector<32x128xbf16>
    %cst_55 = arith.constant dense<0.000000e+00> : vector<32x128xf32>
    %173 = tpu.matmul %172, %171, %cst_55 {dimension_numbers = #tpu.dot_dimension_numbers<[1], [0], [0], [1], [0, 0, 1, 1], [], []>} : vector<32x128xbf16>, vector<128x128xbf16>, vector<32x128xf32> -> vector<32x128xf32>
    %174 = arith.addf %12, %173 : vector<32x128xf32>
    %c2 = arith.constant 2 : index
    %c0_56 = arith.constant 0 : index
    %175 = vector.load %arg8[%c2, %c0_56] : memref<32x512xf32, #tpu.memory_space<vmem>>, vector<1x128xf32>
    %176 = vector.broadcast %175 : vector<1x128xf32> to vector<32x128xf32>
    %177 = arith.addf %174, %176 : vector<32x128xf32>
    %c3 = arith.constant 3 : index
    %c0_57 = arith.constant 0 : index
    %178 = vector.load %arg8[%c3, %c0_57] : memref<32x512xf32, #tpu.memory_space<vmem>>, vector<1x128xf32>
    %c4 = arith.constant 4 : index
    %c0_58 = arith.constant 0 : index
    %179 = vector.load %arg8[%c4, %c0_58] : memref<32x512xf32, #tpu.memory_space<vmem>>, vector<1x128xf32>
    %cst_59 = arith.constant dense<0.000000e+00> : vector<32xf32>
    %180 = vector.multi_reduction <add>, %177, %cst_59 [1] : vector<32x128xf32> to vector<32xf32>
    %181 = vector.shape_cast %180 : vector<32xf32> to vector<32x1xf32>
    %cst_60 = arith.constant 1.280000e+02 : f32
    %182 = vector.broadcast %cst_60 : f32 to vector<32x1xf32>
    %183 = arith.divf %181, %182 : vector<32x1xf32>
    %184 = vector.broadcast %183 : vector<32x1xf32> to vector<32x128xf32>
    %185 = arith.subf %177, %184 : vector<32x128xf32>
    %186 = arith.mulf %185, %185 : vector<32x128xf32>
    %cst_61 = arith.constant dense<0.000000e+00> : vector<32xf32>
    %187 = vector.multi_reduction <add>, %186, %cst_61 [1] : vector<32x128xf32> to vector<32xf32>
    %188 = vector.shape_cast %187 : vector<32xf32> to vector<32x1xf32>
    %cst_62 = arith.constant 1.280000e+02 : f32
    %189 = vector.broadcast %cst_62 : f32 to vector<32x1xf32>
    %190 = arith.divf %188, %189 : vector<32x1xf32>
    %cst_63 = arith.constant 9.99999974E-6 : f32
    %191 = vector.broadcast %cst_63 : f32 to vector<32x1xf32>
    %192 = arith.addf %190, %191 : vector<32x1xf32>
    %193 = math.rsqrt %192 : vector<32x1xf32>
    %194 = vector.broadcast %193 : vector<32x1xf32> to vector<32x128xf32>
    %195 = arith.mulf %185, %194 : vector<32x128xf32>
    %196 = vector.broadcast %178 : vector<1x128xf32> to vector<32x128xf32>
    %197 = arith.mulf %195, %196 : vector<32x128xf32>
    %198 = vector.broadcast %179 : vector<1x128xf32> to vector<32x128xf32>
    %199 = arith.addf %197, %198 : vector<32x128xf32>
    %c0_64 = arith.constant 0 : index
    %c640 = arith.constant 640 : index
    %200 = vector.load %arg5[%c0_64, %c640] : memref<128x2176xbf16, #tpu.memory_space<vmem>>, vector<128x256xbf16>
    %201 = arith.truncf %199 : vector<32x128xf32> to vector<32x128xbf16>
    %cst_65 = arith.constant dense<0.000000e+00> : vector<32x256xf32>
    %202 = tpu.matmul %201, %200, %cst_65 {dimension_numbers = #tpu.dot_dimension_numbers<[1], [0], [0], [1], [0, 0, 1, 1], [], []>} : vector<32x128xbf16>, vector<128x256xbf16>, vector<32x256xf32> -> vector<32x256xf32>
    %c5 = arith.constant 5 : index
    %c0_66 = arith.constant 0 : index
    %203 = vector.load %arg8[%c5, %c0_66] : memref<32x512xf32, #tpu.memory_space<vmem>>, vector<1x256xf32>
    %204 = vector.broadcast %203 : vector<1x256xf32> to vector<32x256xf32>
    %205 = arith.addf %202, %204 : vector<32x256xf32>
    %cst_67 = arith.constant 0.000000e+00 : f32
    %206 = vector.broadcast %cst_67 : f32 to vector<32x256xf32>
    %207 = arith.maximumf %205, %206 : vector<32x256xf32>
    %c0_68 = arith.constant 0 : index
    %c0_69 = arith.constant 0 : index
    %208 = vector.load %arg6[%c0_68, %c0_69] : memref<272x768xbf16, #tpu.memory_space<vmem>>, vector<256x128xbf16>
    %209 = arith.truncf %207 : vector<32x256xf32> to vector<32x256xbf16>
    %cst_70 = arith.constant dense<0.000000e+00> : vector<32x128xf32>
    %210 = tpu.matmul %209, %208, %cst_70 {dimension_numbers = #tpu.dot_dimension_numbers<[1], [0], [0], [1], [0, 0, 1, 1], [], []>} : vector<32x256xbf16>, vector<256x128xbf16>, vector<32x128xf32> -> vector<32x128xf32>
    %211 = arith.addf %199, %210 : vector<32x128xf32>
    %c6 = arith.constant 6 : index
    %c0_71 = arith.constant 0 : index
    %212 = vector.load %arg8[%c6, %c0_71] : memref<32x512xf32, #tpu.memory_space<vmem>>, vector<1x128xf32>
    %213 = vector.broadcast %212 : vector<1x128xf32> to vector<32x128xf32>
    %214 = arith.addf %211, %213 : vector<32x128xf32>
    %c7 = arith.constant 7 : index
    %c0_72 = arith.constant 0 : index
    %215 = vector.load %arg8[%c7, %c0_72] : memref<32x512xf32, #tpu.memory_space<vmem>>, vector<1x128xf32>
    %c8 = arith.constant 8 : index
    %c0_73 = arith.constant 0 : index
    %216 = vector.load %arg8[%c8, %c0_73] : memref<32x512xf32, #tpu.memory_space<vmem>>, vector<1x128xf32>
    %cst_74 = arith.constant dense<0.000000e+00> : vector<32xf32>
    %217 = vector.multi_reduction <add>, %214, %cst_74 [1] : vector<32x128xf32> to vector<32xf32>
    %218 = vector.shape_cast %217 : vector<32xf32> to vector<32x1xf32>
    %cst_75 = arith.constant 1.280000e+02 : f32
    %219 = vector.broadcast %cst_75 : f32 to vector<32x1xf32>
    %220 = arith.divf %218, %219 : vector<32x1xf32>
    %221 = vector.broadcast %220 : vector<32x1xf32> to vector<32x128xf32>
    %222 = arith.subf %214, %221 : vector<32x128xf32>
    %223 = arith.mulf %222, %222 : vector<32x128xf32>
    %cst_76 = arith.constant dense<0.000000e+00> : vector<32xf32>
    %224 = vector.multi_reduction <add>, %223, %cst_76 [1] : vector<32x128xf32> to vector<32xf32>
    %225 = vector.shape_cast %224 : vector<32xf32> to vector<32x1xf32>
    %cst_77 = arith.constant 1.280000e+02 : f32
    %226 = vector.broadcast %cst_77 : f32 to vector<32x1xf32>
    %227 = arith.divf %225, %226 : vector<32x1xf32>
    %cst_78 = arith.constant 9.99999974E-6 : f32
    %228 = vector.broadcast %cst_78 : f32 to vector<32x1xf32>
    %229 = arith.addf %227, %228 : vector<32x1xf32>
    %230 = math.rsqrt %229 : vector<32x1xf32>
    %231 = vector.broadcast %230 : vector<32x1xf32> to vector<32x128xf32>
    %232 = arith.mulf %222, %231 : vector<32x128xf32>
    %233 = vector.broadcast %215 : vector<1x128xf32> to vector<32x128xf32>
    %234 = arith.mulf %232, %233 : vector<32x128xf32>
    %235 = vector.broadcast %216 : vector<1x128xf32> to vector<32x128xf32>
    %236 = arith.addf %234, %235 : vector<32x128xf32>
    %c0_79 = arith.constant 0 : index
    %c896 = arith.constant 896 : index
    %237 = vector.load %arg5[%c0_79, %c896] : memref<128x2176xbf16, #tpu.memory_space<vmem>>, vector<128x384xbf16>
    %238 = arith.truncf %3 : vector<16x128xf32> to vector<16x128xbf16>
    %cst_80 = arith.constant dense<0.000000e+00> : vector<16x384xf32>
    %239 = tpu.matmul %238, %237, %cst_80 {dimension_numbers = #tpu.dot_dimension_numbers<[1], [0], [0], [1], [0, 0, 1, 1], [], []>} : vector<16x128xbf16>, vector<128x384xbf16>, vector<16x384xf32> -> vector<16x384xf32>
    %c9 = arith.constant 9 : index
    %c0_81 = arith.constant 0 : index
    %240 = vector.load %arg8[%c9, %c0_81] : memref<32x512xf32, #tpu.memory_space<vmem>>, vector<1x384xf32>
    %241 = vector.broadcast %240 : vector<1x384xf32> to vector<16x384xf32>
    %242 = arith.addf %239, %241 : vector<16x384xf32>
    %243 = vector.extract_strided_slice %242 {offsets = [0, 0], sizes = [16, 128], strides = [1, 1]} : vector<16x384xf32> to vector<16x128xf32>
    %244 = vector.extract_strided_slice %242 {offsets = [0, 128], sizes = [16, 128], strides = [1, 1]} : vector<16x384xf32> to vector<16x128xf32>
    %245 = vector.extract_strided_slice %242 {offsets = [0, 256], sizes = [16, 128], strides = [1, 1]} : vector<16x384xf32> to vector<16x128xf32>
    %246 = vector.extract_strided_slice %243 {offsets = [0, 0], sizes = [8, 128], strides = [1, 1]} : vector<16x128xf32> to vector<8x128xf32>
    %247 = vector.extract_strided_slice %244 {offsets = [0, 0], sizes = [8, 128], strides = [1, 1]} : vector<16x128xf32> to vector<8x128xf32>
    %248 = vector.extract_strided_slice %245 {offsets = [0, 0], sizes = [8, 128], strides = [1, 1]} : vector<16x128xf32> to vector<8x128xf32>
    %249 = vector.extract_strided_slice %4 {offsets = [0, 0, 0], sizes = [1, 1, 8], strides = [1, 1, 1]} : vector<2x1x8xf32> to vector<1x1x8xf32>
    %250 = vector.shape_cast %249 : vector<1x1x8xf32> to vector<1x8xf32>
    %251 = arith.truncf %246 : vector<8x128xf32> to vector<8x128xbf16>
    %252 = arith.truncf %247 : vector<8x128xf32> to vector<8x128xbf16>
    %253 = arith.truncf %248 : vector<8x128xf32> to vector<8x128xbf16>
    %254 = vector.extract_strided_slice %251 {offsets = [0, 0], sizes = [8, 16], strides = [1, 1]} : vector<8x128xbf16> to vector<8x16xbf16>
    %255 = vector.extract_strided_slice %252 {offsets = [0, 0], sizes = [8, 16], strides = [1, 1]} : vector<8x128xbf16> to vector<8x16xbf16>
    %cst_82 = arith.constant dense<0.000000e+00> : vector<8x8xf32>
    %256 = tpu.matmul %254, %255, %cst_82 {dimension_numbers = #tpu.dot_dimension_numbers<[1], [1], [0], [0], [0, 0, 1, 0], [], []>} : vector<8x16xbf16>, vector<8x16xbf16>, vector<8x8xf32> -> vector<8x8xf32>
    %257 = vector.extract_strided_slice %251 {offsets = [0, 16], sizes = [8, 16], strides = [1, 1]} : vector<8x128xbf16> to vector<8x16xbf16>
    %258 = vector.extract_strided_slice %252 {offsets = [0, 16], sizes = [8, 16], strides = [1, 1]} : vector<8x128xbf16> to vector<8x16xbf16>
    %cst_83 = arith.constant dense<0.000000e+00> : vector<8x8xf32>
    %259 = tpu.matmul %257, %258, %cst_83 {dimension_numbers = #tpu.dot_dimension_numbers<[1], [1], [0], [0], [0, 0, 1, 0], [], []>} : vector<8x16xbf16>, vector<8x16xbf16>, vector<8x8xf32> -> vector<8x8xf32>
    %260 = vector.extract_strided_slice %251 {offsets = [0, 32], sizes = [8, 16], strides = [1, 1]} : vector<8x128xbf16> to vector<8x16xbf16>
    %261 = vector.extract_strided_slice %252 {offsets = [0, 32], sizes = [8, 16], strides = [1, 1]} : vector<8x128xbf16> to vector<8x16xbf16>
    %cst_84 = arith.constant dense<0.000000e+00> : vector<8x8xf32>
    %262 = tpu.matmul %260, %261, %cst_84 {dimension_numbers = #tpu.dot_dimension_numbers<[1], [1], [0], [0], [0, 0, 1, 0], [], []>} : vector<8x16xbf16>, vector<8x16xbf16>, vector<8x8xf32> -> vector<8x8xf32>
    %263 = vector.extract_strided_slice %251 {offsets = [0, 48], sizes = [8, 16], strides = [1, 1]} : vector<8x128xbf16> to vector<8x16xbf16>
    %264 = vector.extract_strided_slice %252 {offsets = [0, 48], sizes = [8, 16], strides = [1, 1]} : vector<8x128xbf16> to vector<8x16xbf16>
    %cst_85 = arith.constant dense<0.000000e+00> : vector<8x8xf32>
    %265 = tpu.matmul %263, %264, %cst_85 {dimension_numbers = #tpu.dot_dimension_numbers<[1], [1], [0], [0], [0, 0, 1, 0], [], []>} : vector<8x16xbf16>, vector<8x16xbf16>, vector<8x8xf32> -> vector<8x8xf32>
    %266 = vector.extract_strided_slice %251 {offsets = [0, 64], sizes = [8, 16], strides = [1, 1]} : vector<8x128xbf16> to vector<8x16xbf16>
    %267 = vector.extract_strided_slice %252 {offsets = [0, 64], sizes = [8, 16], strides = [1, 1]} : vector<8x128xbf16> to vector<8x16xbf16>
    %cst_86 = arith.constant dense<0.000000e+00> : vector<8x8xf32>
    %268 = tpu.matmul %266, %267, %cst_86 {dimension_numbers = #tpu.dot_dimension_numbers<[1], [1], [0], [0], [0, 0, 1, 0], [], []>} : vector<8x16xbf16>, vector<8x16xbf16>, vector<8x8xf32> -> vector<8x8xf32>
    %269 = vector.extract_strided_slice %251 {offsets = [0, 80], sizes = [8, 16], strides = [1, 1]} : vector<8x128xbf16> to vector<8x16xbf16>
    %270 = vector.extract_strided_slice %252 {offsets = [0, 80], sizes = [8, 16], strides = [1, 1]} : vector<8x128xbf16> to vector<8x16xbf16>
    %cst_87 = arith.constant dense<0.000000e+00> : vector<8x8xf32>
    %271 = tpu.matmul %269, %270, %cst_87 {dimension_numbers = #tpu.dot_dimension_numbers<[1], [1], [0], [0], [0, 0, 1, 0], [], []>} : vector<8x16xbf16>, vector<8x16xbf16>, vector<8x8xf32> -> vector<8x8xf32>
    %272 = vector.extract_strided_slice %251 {offsets = [0, 96], sizes = [8, 16], strides = [1, 1]} : vector<8x128xbf16> to vector<8x16xbf16>
    %273 = vector.extract_strided_slice %252 {offsets = [0, 96], sizes = [8, 16], strides = [1, 1]} : vector<8x128xbf16> to vector<8x16xbf16>
    %cst_88 = arith.constant dense<0.000000e+00> : vector<8x8xf32>
    %274 = tpu.matmul %272, %273, %cst_88 {dimension_numbers = #tpu.dot_dimension_numbers<[1], [1], [0], [0], [0, 0, 1, 0], [], []>} : vector<8x16xbf16>, vector<8x16xbf16>, vector<8x8xf32> -> vector<8x8xf32>
    %275 = vector.extract_strided_slice %251 {offsets = [0, 112], sizes = [8, 16], strides = [1, 1]} : vector<8x128xbf16> to vector<8x16xbf16>
    %276 = vector.extract_strided_slice %252 {offsets = [0, 112], sizes = [8, 16], strides = [1, 1]} : vector<8x128xbf16> to vector<8x16xbf16>
    %cst_89 = arith.constant dense<0.000000e+00> : vector<8x8xf32>
    %277 = tpu.matmul %275, %276, %cst_89 {dimension_numbers = #tpu.dot_dimension_numbers<[1], [1], [0], [0], [0, 0, 1, 0], [], []>} : vector<8x16xbf16>, vector<8x16xbf16>, vector<8x8xf32> -> vector<8x8xf32>
    %278 = tpu.concatenate %256, %259, %262, %265, %268, %271, %274, %277 in 0 : vector<8x8xf32>, vector<8x8xf32>, vector<8x8xf32>, vector<8x8xf32>, vector<8x8xf32>, vector<8x8xf32>, vector<8x8xf32>, vector<8x8xf32> -> vector<64x8xf32>
    %279 = vector.broadcast %250 : vector<1x8xf32> to vector<64x8xf32>
    %280 = arith.addf %278, %279 : vector<64x8xf32>
    %cst_90 = arith.constant dense<0xFF800000> : vector<64xf32>
    %281 = vector.multi_reduction <maximumf>, %280, %cst_90 [1] : vector<64x8xf32> to vector<64xf32>
    %282 = vector.shape_cast %281 : vector<64xf32> to vector<64x1xf32>
    %283 = vector.broadcast %282 : vector<64x1xf32> to vector<64x8xf32>
    %284 = arith.subf %280, %283 : vector<64x8xf32>
    %285 = math.exp %284 : vector<64x8xf32>
    %cst_91 = arith.constant dense<0.000000e+00> : vector<64xf32>
    %286 = vector.multi_reduction <add>, %285, %cst_91 [1] : vector<64x8xf32> to vector<64xf32>
    %287 = vector.shape_cast %286 : vector<64xf32> to vector<64x1xf32>
    %288 = tpu.reciprocal %287 {approx = true} : vector<64x1xf32> -> vector<64x1xf32>
    %289 = vector.broadcast %288 : vector<64x1xf32> to vector<64x8xf32>
    %290 = arith.mulf %285, %289 : vector<64x8xf32>
    %291 = vector.extract_strided_slice %290 {offsets = [0, 0], sizes = [8, 8], strides = [1, 1]} : vector<64x8xf32> to vector<8x8xf32>
    %292 = arith.truncf %291 : vector<8x8xf32> to vector<8x8xbf16>
    %293 = vector.extract_strided_slice %253 {offsets = [0, 0], sizes = [8, 16], strides = [1, 1]} : vector<8x128xbf16> to vector<8x16xbf16>
    %cst_92 = arith.constant dense<0.000000e+00> : vector<8x16xf32>
    %294 = tpu.matmul %292, %293, %cst_92 {dimension_numbers = #tpu.dot_dimension_numbers<[1], [0], [0], [1], [0, 0, 1, 1], [], []>} : vector<8x8xbf16>, vector<8x16xbf16>, vector<8x16xf32> -> vector<8x16xf32>
    %295 = vector.extract_strided_slice %290 {offsets = [8, 0], sizes = [8, 8], strides = [1, 1]} : vector<64x8xf32> to vector<8x8xf32>
    %296 = arith.truncf %295 : vector<8x8xf32> to vector<8x8xbf16>
    %297 = vector.extract_strided_slice %253 {offsets = [0, 16], sizes = [8, 16], strides = [1, 1]} : vector<8x128xbf16> to vector<8x16xbf16>
    %cst_93 = arith.constant dense<0.000000e+00> : vector<8x16xf32>
    %298 = tpu.matmul %296, %297, %cst_93 {dimension_numbers = #tpu.dot_dimension_numbers<[1], [0], [0], [1], [0, 0, 1, 1], [], []>} : vector<8x8xbf16>, vector<8x16xbf16>, vector<8x16xf32> -> vector<8x16xf32>
    %299 = vector.extract_strided_slice %290 {offsets = [16, 0], sizes = [8, 8], strides = [1, 1]} : vector<64x8xf32> to vector<8x8xf32>
    %300 = arith.truncf %299 : vector<8x8xf32> to vector<8x8xbf16>
    %301 = vector.extract_strided_slice %253 {offsets = [0, 32], sizes = [8, 16], strides = [1, 1]} : vector<8x128xbf16> to vector<8x16xbf16>
    %cst_94 = arith.constant dense<0.000000e+00> : vector<8x16xf32>
    %302 = tpu.matmul %300, %301, %cst_94 {dimension_numbers = #tpu.dot_dimension_numbers<[1], [0], [0], [1], [0, 0, 1, 1], [], []>} : vector<8x8xbf16>, vector<8x16xbf16>, vector<8x16xf32> -> vector<8x16xf32>
    %303 = vector.extract_strided_slice %290 {offsets = [24, 0], sizes = [8, 8], strides = [1, 1]} : vector<64x8xf32> to vector<8x8xf32>
    %304 = arith.truncf %303 : vector<8x8xf32> to vector<8x8xbf16>
    %305 = vector.extract_strided_slice %253 {offsets = [0, 48], sizes = [8, 16], strides = [1, 1]} : vector<8x128xbf16> to vector<8x16xbf16>
    %cst_95 = arith.constant dense<0.000000e+00> : vector<8x16xf32>
    %306 = tpu.matmul %304, %305, %cst_95 {dimension_numbers = #tpu.dot_dimension_numbers<[1], [0], [0], [1], [0, 0, 1, 1], [], []>} : vector<8x8xbf16>, vector<8x16xbf16>, vector<8x16xf32> -> vector<8x16xf32>
    %307 = vector.extract_strided_slice %290 {offsets = [32, 0], sizes = [8, 8], strides = [1, 1]} : vector<64x8xf32> to vector<8x8xf32>
    %308 = arith.truncf %307 : vector<8x8xf32> to vector<8x8xbf16>
    %309 = vector.extract_strided_slice %253 {offsets = [0, 64], sizes = [8, 16], strides = [1, 1]} : vector<8x128xbf16> to vector<8x16xbf16>
    %cst_96 = arith.constant dense<0.000000e+00> : vector<8x16xf32>
    %310 = tpu.matmul %308, %309, %cst_96 {dimension_numbers = #tpu.dot_dimension_numbers<[1], [0], [0], [1], [0, 0, 1, 1], [], []>} : vector<8x8xbf16>, vector<8x16xbf16>, vector<8x16xf32> -> vector<8x16xf32>
    %311 = vector.extract_strided_slice %290 {offsets = [40, 0], sizes = [8, 8], strides = [1, 1]} : vector<64x8xf32> to vector<8x8xf32>
    %312 = arith.truncf %311 : vector<8x8xf32> to vector<8x8xbf16>
    %313 = vector.extract_strided_slice %253 {offsets = [0, 80], sizes = [8, 16], strides = [1, 1]} : vector<8x128xbf16> to vector<8x16xbf16>
    %cst_97 = arith.constant dense<0.000000e+00> : vector<8x16xf32>
    %314 = tpu.matmul %312, %313, %cst_97 {dimension_numbers = #tpu.dot_dimension_numbers<[1], [0], [0], [1], [0, 0, 1, 1], [], []>} : vector<8x8xbf16>, vector<8x16xbf16>, vector<8x16xf32> -> vector<8x16xf32>
    %315 = vector.extract_strided_slice %290 {offsets = [48, 0], sizes = [8, 8], strides = [1, 1]} : vector<64x8xf32> to vector<8x8xf32>
    %316 = arith.truncf %315 : vector<8x8xf32> to vector<8x8xbf16>
    %317 = vector.extract_strided_slice %253 {offsets = [0, 96], sizes = [8, 16], strides = [1, 1]} : vector<8x128xbf16> to vector<8x16xbf16>
    %cst_98 = arith.constant dense<0.000000e+00> : vector<8x16xf32>
    %318 = tpu.matmul %316, %317, %cst_98 {dimension_numbers = #tpu.dot_dimension_numbers<[1], [0], [0], [1], [0, 0, 1, 1], [], []>} : vector<8x8xbf16>, vector<8x16xbf16>, vector<8x16xf32> -> vector<8x16xf32>
    %319 = vector.extract_strided_slice %290 {offsets = [56, 0], sizes = [8, 8], strides = [1, 1]} : vector<64x8xf32> to vector<8x8xf32>
    %320 = arith.truncf %319 : vector<8x8xf32> to vector<8x8xbf16>
    %321 = vector.extract_strided_slice %253 {offsets = [0, 112], sizes = [8, 16], strides = [1, 1]} : vector<8x128xbf16> to vector<8x16xbf16>
    %cst_99 = arith.constant dense<0.000000e+00> : vector<8x16xf32>
    %322 = tpu.matmul %320, %321, %cst_99 {dimension_numbers = #tpu.dot_dimension_numbers<[1], [0], [0], [1], [0, 0, 1, 1], [], []>} : vector<8x8xbf16>, vector<8x16xbf16>, vector<8x16xf32> -> vector<8x16xf32>
    %323 = tpu.concatenate %294, %298, %302, %306, %310, %314, %318, %322 in 1 : vector<8x16xf32>, vector<8x16xf32>, vector<8x16xf32>, vector<8x16xf32>, vector<8x16xf32>, vector<8x16xf32>, vector<8x16xf32>, vector<8x16xf32> -> vector<8x128xf32>
    %324 = vector.extract_strided_slice %243 {offsets = [8, 0], sizes = [8, 128], strides = [1, 1]} : vector<16x128xf32> to vector<8x128xf32>
    %325 = vector.extract_strided_slice %244 {offsets = [8, 0], sizes = [8, 128], strides = [1, 1]} : vector<16x128xf32> to vector<8x128xf32>
    %326 = vector.extract_strided_slice %245 {offsets = [8, 0], sizes = [8, 128], strides = [1, 1]} : vector<16x128xf32> to vector<8x128xf32>
    %327 = vector.extract_strided_slice %4 {offsets = [1, 0, 0], sizes = [1, 1, 8], strides = [1, 1, 1]} : vector<2x1x8xf32> to vector<1x1x8xf32>
    %328 = vector.shape_cast %327 : vector<1x1x8xf32> to vector<1x8xf32>
    %329 = arith.truncf %324 : vector<8x128xf32> to vector<8x128xbf16>
    %330 = arith.truncf %325 : vector<8x128xf32> to vector<8x128xbf16>
    %331 = arith.truncf %326 : vector<8x128xf32> to vector<8x128xbf16>
    %332 = vector.extract_strided_slice %329 {offsets = [0, 0], sizes = [8, 16], strides = [1, 1]} : vector<8x128xbf16> to vector<8x16xbf16>
    %333 = vector.extract_strided_slice %330 {offsets = [0, 0], sizes = [8, 16], strides = [1, 1]} : vector<8x128xbf16> to vector<8x16xbf16>
    %cst_100 = arith.constant dense<0.000000e+00> : vector<8x8xf32>
    %334 = tpu.matmul %332, %333, %cst_100 {dimension_numbers = #tpu.dot_dimension_numbers<[1], [1], [0], [0], [0, 0, 1, 0], [], []>} : vector<8x16xbf16>, vector<8x16xbf16>, vector<8x8xf32> -> vector<8x8xf32>
    %335 = vector.extract_strided_slice %329 {offsets = [0, 16], sizes = [8, 16], strides = [1, 1]} : vector<8x128xbf16> to vector<8x16xbf16>
    %336 = vector.extract_strided_slice %330 {offsets = [0, 16], sizes = [8, 16], strides = [1, 1]} : vector<8x128xbf16> to vector<8x16xbf16>
    %cst_101 = arith.constant dense<0.000000e+00> : vector<8x8xf32>
    %337 = tpu.matmul %335, %336, %cst_101 {dimension_numbers = #tpu.dot_dimension_numbers<[1], [1], [0], [0], [0, 0, 1, 0], [], []>} : vector<8x16xbf16>, vector<8x16xbf16>, vector<8x8xf32> -> vector<8x8xf32>
    %338 = vector.extract_strided_slice %329 {offsets = [0, 32], sizes = [8, 16], strides = [1, 1]} : vector<8x128xbf16> to vector<8x16xbf16>
    %339 = vector.extract_strided_slice %330 {offsets = [0, 32], sizes = [8, 16], strides = [1, 1]} : vector<8x128xbf16> to vector<8x16xbf16>
    %cst_102 = arith.constant dense<0.000000e+00> : vector<8x8xf32>
    %340 = tpu.matmul %338, %339, %cst_102 {dimension_numbers = #tpu.dot_dimension_numbers<[1], [1], [0], [0], [0, 0, 1, 0], [], []>} : vector<8x16xbf16>, vector<8x16xbf16>, vector<8x8xf32> -> vector<8x8xf32>
    %341 = vector.extract_strided_slice %329 {offsets = [0, 48], sizes = [8, 16], strides = [1, 1]} : vector<8x128xbf16> to vector<8x16xbf16>
    %342 = vector.extract_strided_slice %330 {offsets = [0, 48], sizes = [8, 16], strides = [1, 1]} : vector<8x128xbf16> to vector<8x16xbf16>
    %cst_103 = arith.constant dense<0.000000e+00> : vector<8x8xf32>
    %343 = tpu.matmul %341, %342, %cst_103 {dimension_numbers = #tpu.dot_dimension_numbers<[1], [1], [0], [0], [0, 0, 1, 0], [], []>} : vector<8x16xbf16>, vector<8x16xbf16>, vector<8x8xf32> -> vector<8x8xf32>
    %344 = vector.extract_strided_slice %329 {offsets = [0, 64], sizes = [8, 16], strides = [1, 1]} : vector<8x128xbf16> to vector<8x16xbf16>
    %345 = vector.extract_strided_slice %330 {offsets = [0, 64], sizes = [8, 16], strides = [1, 1]} : vector<8x128xbf16> to vector<8x16xbf16>
    %cst_104 = arith.constant dense<0.000000e+00> : vector<8x8xf32>
    %346 = tpu.matmul %344, %345, %cst_104 {dimension_numbers = #tpu.dot_dimension_numbers<[1], [1], [0], [0], [0, 0, 1, 0], [], []>} : vector<8x16xbf16>, vector<8x16xbf16>, vector<8x8xf32> -> vector<8x8xf32>
    %347 = vector.extract_strided_slice %329 {offsets = [0, 80], sizes = [8, 16], strides = [1, 1]} : vector<8x128xbf16> to vector<8x16xbf16>
    %348 = vector.extract_strided_slice %330 {offsets = [0, 80], sizes = [8, 16], strides = [1, 1]} : vector<8x128xbf16> to vector<8x16xbf16>
    %cst_105 = arith.constant dense<0.000000e+00> : vector<8x8xf32>
    %349 = tpu.matmul %347, %348, %cst_105 {dimension_numbers = #tpu.dot_dimension_numbers<[1], [1], [0], [0], [0, 0, 1, 0], [], []>} : vector<8x16xbf16>, vector<8x16xbf16>, vector<8x8xf32> -> vector<8x8xf32>
    %350 = vector.extract_strided_slice %329 {offsets = [0, 96], sizes = [8, 16], strides = [1, 1]} : vector<8x128xbf16> to vector<8x16xbf16>
    %351 = vector.extract_strided_slice %330 {offsets = [0, 96], sizes = [8, 16], strides = [1, 1]} : vector<8x128xbf16> to vector<8x16xbf16>
    %cst_106 = arith.constant dense<0.000000e+00> : vector<8x8xf32>
    %352 = tpu.matmul %350, %351, %cst_106 {dimension_numbers = #tpu.dot_dimension_numbers<[1], [1], [0], [0], [0, 0, 1, 0], [], []>} : vector<8x16xbf16>, vector<8x16xbf16>, vector<8x8xf32> -> vector<8x8xf32>
    %353 = vector.extract_strided_slice %329 {offsets = [0, 112], sizes = [8, 16], strides = [1, 1]} : vector<8x128xbf16> to vector<8x16xbf16>
    %354 = vector.extract_strided_slice %330 {offsets = [0, 112], sizes = [8, 16], strides = [1, 1]} : vector<8x128xbf16> to vector<8x16xbf16>
    %cst_107 = arith.constant dense<0.000000e+00> : vector<8x8xf32>
    %355 = tpu.matmul %353, %354, %cst_107 {dimension_numbers = #tpu.dot_dimension_numbers<[1], [1], [0], [0], [0, 0, 1, 0], [], []>} : vector<8x16xbf16>, vector<8x16xbf16>, vector<8x8xf32> -> vector<8x8xf32>
    %356 = tpu.concatenate %334, %337, %340, %343, %346, %349, %352, %355 in 0 : vector<8x8xf32>, vector<8x8xf32>, vector<8x8xf32>, vector<8x8xf32>, vector<8x8xf32>, vector<8x8xf32>, vector<8x8xf32>, vector<8x8xf32> -> vector<64x8xf32>
    %357 = vector.broadcast %328 : vector<1x8xf32> to vector<64x8xf32>
    %358 = arith.addf %356, %357 : vector<64x8xf32>
    %cst_108 = arith.constant dense<0xFF800000> : vector<64xf32>
    %359 = vector.multi_reduction <maximumf>, %358, %cst_108 [1] : vector<64x8xf32> to vector<64xf32>
    %360 = vector.shape_cast %359 : vector<64xf32> to vector<64x1xf32>
    %361 = vector.broadcast %360 : vector<64x1xf32> to vector<64x8xf32>
    %362 = arith.subf %358, %361 : vector<64x8xf32>
    %363 = math.exp %362 : vector<64x8xf32>
    %cst_109 = arith.constant dense<0.000000e+00> : vector<64xf32>
    %364 = vector.multi_reduction <add>, %363, %cst_109 [1] : vector<64x8xf32> to vector<64xf32>
    %365 = vector.shape_cast %364 : vector<64xf32> to vector<64x1xf32>
    %366 = tpu.reciprocal %365 {approx = true} : vector<64x1xf32> -> vector<64x1xf32>
    %367 = vector.broadcast %366 : vector<64x1xf32> to vector<64x8xf32>
    %368 = arith.mulf %363, %367 : vector<64x8xf32>
    %369 = vector.extract_strided_slice %368 {offsets = [0, 0], sizes = [8, 8], strides = [1, 1]} : vector<64x8xf32> to vector<8x8xf32>
    %370 = arith.truncf %369 : vector<8x8xf32> to vector<8x8xbf16>
    %371 = vector.extract_strided_slice %331 {offsets = [0, 0], sizes = [8, 16], strides = [1, 1]} : vector<8x128xbf16> to vector<8x16xbf16>
    %cst_110 = arith.constant dense<0.000000e+00> : vector<8x16xf32>
    %372 = tpu.matmul %370, %371, %cst_110 {dimension_numbers = #tpu.dot_dimension_numbers<[1], [0], [0], [1], [0, 0, 1, 1], [], []>} : vector<8x8xbf16>, vector<8x16xbf16>, vector<8x16xf32> -> vector<8x16xf32>
    %373 = vector.extract_strided_slice %368 {offsets = [8, 0], sizes = [8, 8], strides = [1, 1]} : vector<64x8xf32> to vector<8x8xf32>
    %374 = arith.truncf %373 : vector<8x8xf32> to vector<8x8xbf16>
    %375 = vector.extract_strided_slice %331 {offsets = [0, 16], sizes = [8, 16], strides = [1, 1]} : vector<8x128xbf16> to vector<8x16xbf16>
    %cst_111 = arith.constant dense<0.000000e+00> : vector<8x16xf32>
    %376 = tpu.matmul %374, %375, %cst_111 {dimension_numbers = #tpu.dot_dimension_numbers<[1], [0], [0], [1], [0, 0, 1, 1], [], []>} : vector<8x8xbf16>, vector<8x16xbf16>, vector<8x16xf32> -> vector<8x16xf32>
    %377 = vector.extract_strided_slice %368 {offsets = [16, 0], sizes = [8, 8], strides = [1, 1]} : vector<64x8xf32> to vector<8x8xf32>
    %378 = arith.truncf %377 : vector<8x8xf32> to vector<8x8xbf16>
    %379 = vector.extract_strided_slice %331 {offsets = [0, 32], sizes = [8, 16], strides = [1, 1]} : vector<8x128xbf16> to vector<8x16xbf16>
    %cst_112 = arith.constant dense<0.000000e+00> : vector<8x16xf32>
    %380 = tpu.matmul %378, %379, %cst_112 {dimension_numbers = #tpu.dot_dimension_numbers<[1], [0], [0], [1], [0, 0, 1, 1], [], []>} : vector<8x8xbf16>, vector<8x16xbf16>, vector<8x16xf32> -> vector<8x16xf32>
    %381 = vector.extract_strided_slice %368 {offsets = [24, 0], sizes = [8, 8], strides = [1, 1]} : vector<64x8xf32> to vector<8x8xf32>
    %382 = arith.truncf %381 : vector<8x8xf32> to vector<8x8xbf16>
    %383 = vector.extract_strided_slice %331 {offsets = [0, 48], sizes = [8, 16], strides = [1, 1]} : vector<8x128xbf16> to vector<8x16xbf16>
    %cst_113 = arith.constant dense<0.000000e+00> : vector<8x16xf32>
    %384 = tpu.matmul %382, %383, %cst_113 {dimension_numbers = #tpu.dot_dimension_numbers<[1], [0], [0], [1], [0, 0, 1, 1], [], []>} : vector<8x8xbf16>, vector<8x16xbf16>, vector<8x16xf32> -> vector<8x16xf32>
    %385 = vector.extract_strided_slice %368 {offsets = [32, 0], sizes = [8, 8], strides = [1, 1]} : vector<64x8xf32> to vector<8x8xf32>
    %386 = arith.truncf %385 : vector<8x8xf32> to vector<8x8xbf16>
    %387 = vector.extract_strided_slice %331 {offsets = [0, 64], sizes = [8, 16], strides = [1, 1]} : vector<8x128xbf16> to vector<8x16xbf16>
    %cst_114 = arith.constant dense<0.000000e+00> : vector<8x16xf32>
    %388 = tpu.matmul %386, %387, %cst_114 {dimension_numbers = #tpu.dot_dimension_numbers<[1], [0], [0], [1], [0, 0, 1, 1], [], []>} : vector<8x8xbf16>, vector<8x16xbf16>, vector<8x16xf32> -> vector<8x16xf32>
    %389 = vector.extract_strided_slice %368 {offsets = [40, 0], sizes = [8, 8], strides = [1, 1]} : vector<64x8xf32> to vector<8x8xf32>
    %390 = arith.truncf %389 : vector<8x8xf32> to vector<8x8xbf16>
    %391 = vector.extract_strided_slice %331 {offsets = [0, 80], sizes = [8, 16], strides = [1, 1]} : vector<8x128xbf16> to vector<8x16xbf16>
    %cst_115 = arith.constant dense<0.000000e+00> : vector<8x16xf32>
    %392 = tpu.matmul %390, %391, %cst_115 {dimension_numbers = #tpu.dot_dimension_numbers<[1], [0], [0], [1], [0, 0, 1, 1], [], []>} : vector<8x8xbf16>, vector<8x16xbf16>, vector<8x16xf32> -> vector<8x16xf32>
    %393 = vector.extract_strided_slice %368 {offsets = [48, 0], sizes = [8, 8], strides = [1, 1]} : vector<64x8xf32> to vector<8x8xf32>
    %394 = arith.truncf %393 : vector<8x8xf32> to vector<8x8xbf16>
    %395 = vector.extract_strided_slice %331 {offsets = [0, 96], sizes = [8, 16], strides = [1, 1]} : vector<8x128xbf16> to vector<8x16xbf16>
    %cst_116 = arith.constant dense<0.000000e+00> : vector<8x16xf32>
    %396 = tpu.matmul %394, %395, %cst_116 {dimension_numbers = #tpu.dot_dimension_numbers<[1], [0], [0], [1], [0, 0, 1, 1], [], []>} : vector<8x8xbf16>, vector<8x16xbf16>, vector<8x16xf32> -> vector<8x16xf32>
    %397 = vector.extract_strided_slice %368 {offsets = [56, 0], sizes = [8, 8], strides = [1, 1]} : vector<64x8xf32> to vector<8x8xf32>
    %398 = arith.truncf %397 : vector<8x8xf32> to vector<8x8xbf16>
    %399 = vector.extract_strided_slice %331 {offsets = [0, 112], sizes = [8, 16], strides = [1, 1]} : vector<8x128xbf16> to vector<8x16xbf16>
    %cst_117 = arith.constant dense<0.000000e+00> : vector<8x16xf32>
    %400 = tpu.matmul %398, %399, %cst_117 {dimension_numbers = #tpu.dot_dimension_numbers<[1], [0], [0], [1], [0, 0, 1, 1], [], []>} : vector<8x8xbf16>, vector<8x16xbf16>, vector<8x16xf32> -> vector<8x16xf32>
    %401 = tpu.concatenate %372, %376, %380, %384, %388, %392, %396, %400 in 1 : vector<8x16xf32>, vector<8x16xf32>, vector<8x16xf32>, vector<8x16xf32>, vector<8x16xf32>, vector<8x16xf32>, vector<8x16xf32>, vector<8x16xf32> -> vector<8x128xf32>
    %402 = tpu.concatenate %323, %401 in 0 : vector<8x128xf32>, vector<8x128xf32> -> vector<16x128xf32>
    %c0_118 = arith.constant 0 : index
    %c1280 = arith.constant 1280 : index
    %403 = vector.load %arg5[%c0_118, %c1280] : memref<128x2176xbf16, #tpu.memory_space<vmem>>, vector<128x128xbf16>
    %404 = arith.truncf %402 : vector<16x128xf32> to vector<16x128xbf16>
    %cst_119 = arith.constant dense<0.000000e+00> : vector<16x128xf32>
    %405 = tpu.matmul %404, %403, %cst_119 {dimension_numbers = #tpu.dot_dimension_numbers<[1], [0], [0], [1], [0, 0, 1, 1], [], []>} : vector<16x128xbf16>, vector<128x128xbf16>, vector<16x128xf32> -> vector<16x128xf32>
    %406 = arith.addf %3, %405 : vector<16x128xf32>
    %c10 = arith.constant 10 : index
    %c0_120 = arith.constant 0 : index
    %407 = vector.load %arg8[%c10, %c0_120] : memref<32x512xf32, #tpu.memory_space<vmem>>, vector<1x128xf32>
    %408 = vector.broadcast %407 : vector<1x128xf32> to vector<16x128xf32>
    %409 = arith.addf %406, %408 : vector<16x128xf32>
    %c11 = arith.constant 11 : index
    %c0_121 = arith.constant 0 : index
    %410 = vector.load %arg8[%c11, %c0_121] : memref<32x512xf32, #tpu.memory_space<vmem>>, vector<1x128xf32>
    %c12 = arith.constant 12 : index
    %c0_122 = arith.constant 0 : index
    %411 = vector.load %arg8[%c12, %c0_122] : memref<32x512xf32, #tpu.memory_space<vmem>>, vector<1x128xf32>
    %cst_123 = arith.constant dense<0.000000e+00> : vector<16xf32>
    %412 = vector.multi_reduction <add>, %409, %cst_123 [1] : vector<16x128xf32> to vector<16xf32>
    %413 = vector.shape_cast %412 : vector<16xf32> to vector<16x1xf32>
    %cst_124 = arith.constant 1.280000e+02 : f32
    %414 = vector.broadcast %cst_124 : f32 to vector<16x1xf32>
    %415 = arith.divf %413, %414 : vector<16x1xf32>
    %416 = vector.broadcast %415 : vector<16x1xf32> to vector<16x128xf32>
    %417 = arith.subf %409, %416 : vector<16x128xf32>
    %418 = arith.mulf %417, %417 : vector<16x128xf32>
    %cst_125 = arith.constant dense<0.000000e+00> : vector<16xf32>
    %419 = vector.multi_reduction <add>, %418, %cst_125 [1] : vector<16x128xf32> to vector<16xf32>
    %420 = vector.shape_cast %419 : vector<16xf32> to vector<16x1xf32>
    %cst_126 = arith.constant 1.280000e+02 : f32
    %421 = vector.broadcast %cst_126 : f32 to vector<16x1xf32>
    %422 = arith.divf %420, %421 : vector<16x1xf32>
    %cst_127 = arith.constant 9.99999974E-6 : f32
    %423 = vector.broadcast %cst_127 : f32 to vector<16x1xf32>
    %424 = arith.addf %422, %423 : vector<16x1xf32>
    %425 = math.rsqrt %424 : vector<16x1xf32>
    %426 = vector.broadcast %425 : vector<16x1xf32> to vector<16x128xf32>
    %427 = arith.mulf %417, %426 : vector<16x128xf32>
    %428 = vector.broadcast %410 : vector<1x128xf32> to vector<16x128xf32>
    %429 = arith.mulf %427, %428 : vector<16x128xf32>
    %430 = vector.broadcast %411 : vector<1x128xf32> to vector<16x128xf32>
    %431 = arith.addf %429, %430 : vector<16x128xf32>
    %c0_128 = arith.constant 0 : index
    %c1408 = arith.constant 1408 : index
    %432 = vector.load %arg5[%c0_128, %c1408] : memref<128x2176xbf16, #tpu.memory_space<vmem>>, vector<128x128xbf16>
    %433 = arith.truncf %431 : vector<16x128xf32> to vector<16x128xbf16>
    %cst_129 = arith.constant dense<0.000000e+00> : vector<16x128xf32>
    %434 = tpu.matmul %433, %432, %cst_129 {dimension_numbers = #tpu.dot_dimension_numbers<[1], [0], [0], [1], [0, 0, 1, 1], [], []>} : vector<16x128xbf16>, vector<128x128xbf16>, vector<16x128xf32> -> vector<16x128xf32>
    %c13 = arith.constant 13 : index
    %c0_130 = arith.constant 0 : index
    %435 = vector.load %arg8[%c13, %c0_130] : memref<32x512xf32, #tpu.memory_space<vmem>>, vector<1x128xf32>
    %436 = vector.broadcast %435 : vector<1x128xf32> to vector<16x128xf32>
    %437 = arith.addf %434, %436 : vector<16x128xf32>
    %c0_131 = arith.constant 0 : index
    %c1536 = arith.constant 1536 : index
    %438 = vector.load %arg5[%c0_131, %c1536] : memref<128x2176xbf16, #tpu.memory_space<vmem>>, vector<128x256xbf16>
    %439 = arith.truncf %236 : vector<32x128xf32> to vector<32x128xbf16>
    %cst_132 = arith.constant dense<0.000000e+00> : vector<32x256xf32>
    %440 = tpu.matmul %439, %438, %cst_132 {dimension_numbers = #tpu.dot_dimension_numbers<[1], [0], [0], [1], [0, 0, 1, 1], [], []>} : vector<32x128xbf16>, vector<128x256xbf16>, vector<32x256xf32> -> vector<32x256xf32>
    %c14 = arith.constant 14 : index
    %c0_133 = arith.constant 0 : index
    %441 = vector.load %arg8[%c14, %c0_133] : memref<32x512xf32, #tpu.memory_space<vmem>>, vector<1x256xf32>
    %442 = vector.broadcast %441 : vector<1x256xf32> to vector<32x256xf32>
    %443 = arith.addf %440, %442 : vector<32x256xf32>
    %444 = vector.extract_strided_slice %443 {offsets = [0, 0], sizes = [32, 128], strides = [1, 1]} : vector<32x256xf32> to vector<32x128xf32>
    %445 = vector.extract_strided_slice %443 {offsets = [0, 128], sizes = [32, 128], strides = [1, 1]} : vector<32x256xf32> to vector<32x128xf32>
    %446 = vector.extract_strided_slice %437 {offsets = [0, 0], sizes = [8, 128], strides = [1, 1]} : vector<16x128xf32> to vector<8x128xf32>
    %447 = vector.extract_strided_slice %444 {offsets = [0, 0], sizes = [16, 128], strides = [1, 1]} : vector<32x128xf32> to vector<16x128xf32>
    %448 = vector.extract_strided_slice %445 {offsets = [0, 0], sizes = [16, 128], strides = [1, 1]} : vector<32x128xf32> to vector<16x128xf32>
    %449 = arith.truncf %446 : vector<8x128xf32> to vector<8x128xbf16>
    %450 = arith.truncf %447 : vector<16x128xf32> to vector<16x128xbf16>
    %451 = arith.truncf %448 : vector<16x128xf32> to vector<16x128xbf16>
    %452 = vector.extract_strided_slice %449 {offsets = [0, 0], sizes = [8, 16], strides = [1, 1]} : vector<8x128xbf16> to vector<8x16xbf16>
    %453 = vector.extract_strided_slice %450 {offsets = [0, 0], sizes = [16, 16], strides = [1, 1]} : vector<16x128xbf16> to vector<16x16xbf16>
    %cst_134 = arith.constant dense<0.000000e+00> : vector<8x16xf32>
    %454 = tpu.matmul %452, %453, %cst_134 {dimension_numbers = #tpu.dot_dimension_numbers<[1], [1], [0], [0], [0, 0, 1, 0], [], []>} : vector<8x16xbf16>, vector<16x16xbf16>, vector<8x16xf32> -> vector<8x16xf32>
    %455 = vector.extract_strided_slice %449 {offsets = [0, 16], sizes = [8, 16], strides = [1, 1]} : vector<8x128xbf16> to vector<8x16xbf16>
    %456 = vector.extract_strided_slice %450 {offsets = [0, 16], sizes = [16, 16], strides = [1, 1]} : vector<16x128xbf16> to vector<16x16xbf16>
    %cst_135 = arith.constant dense<0.000000e+00> : vector<8x16xf32>
    %457 = tpu.matmul %455, %456, %cst_135 {dimension_numbers = #tpu.dot_dimension_numbers<[1], [1], [0], [0], [0, 0, 1, 0], [], []>} : vector<8x16xbf16>, vector<16x16xbf16>, vector<8x16xf32> -> vector<8x16xf32>
    %458 = vector.extract_strided_slice %449 {offsets = [0, 32], sizes = [8, 16], strides = [1, 1]} : vector<8x128xbf16> to vector<8x16xbf16>
    %459 = vector.extract_strided_slice %450 {offsets = [0, 32], sizes = [16, 16], strides = [1, 1]} : vector<16x128xbf16> to vector<16x16xbf16>
    %cst_136 = arith.constant dense<0.000000e+00> : vector<8x16xf32>
    %460 = tpu.matmul %458, %459, %cst_136 {dimension_numbers = #tpu.dot_dimension_numbers<[1], [1], [0], [0], [0, 0, 1, 0], [], []>} : vector<8x16xbf16>, vector<16x16xbf16>, vector<8x16xf32> -> vector<8x16xf32>
    %461 = vector.extract_strided_slice %449 {offsets = [0, 48], sizes = [8, 16], strides = [1, 1]} : vector<8x128xbf16> to vector<8x16xbf16>
    %462 = vector.extract_strided_slice %450 {offsets = [0, 48], sizes = [16, 16], strides = [1, 1]} : vector<16x128xbf16> to vector<16x16xbf16>
    %cst_137 = arith.constant dense<0.000000e+00> : vector<8x16xf32>
    %463 = tpu.matmul %461, %462, %cst_137 {dimension_numbers = #tpu.dot_dimension_numbers<[1], [1], [0], [0], [0, 0, 1, 0], [], []>} : vector<8x16xbf16>, vector<16x16xbf16>, vector<8x16xf32> -> vector<8x16xf32>
    %464 = vector.extract_strided_slice %449 {offsets = [0, 64], sizes = [8, 16], strides = [1, 1]} : vector<8x128xbf16> to vector<8x16xbf16>
    %465 = vector.extract_strided_slice %450 {offsets = [0, 64], sizes = [16, 16], strides = [1, 1]} : vector<16x128xbf16> to vector<16x16xbf16>
    %cst_138 = arith.constant dense<0.000000e+00> : vector<8x16xf32>
    %466 = tpu.matmul %464, %465, %cst_138 {dimension_numbers = #tpu.dot_dimension_numbers<[1], [1], [0], [0], [0, 0, 1, 0], [], []>} : vector<8x16xbf16>, vector<16x16xbf16>, vector<8x16xf32> -> vector<8x16xf32>
    %467 = vector.extract_strided_slice %449 {offsets = [0, 80], sizes = [8, 16], strides = [1, 1]} : vector<8x128xbf16> to vector<8x16xbf16>
    %468 = vector.extract_strided_slice %450 {offsets = [0, 80], sizes = [16, 16], strides = [1, 1]} : vector<16x128xbf16> to vector<16x16xbf16>
    %cst_139 = arith.constant dense<0.000000e+00> : vector<8x16xf32>
    %469 = tpu.matmul %467, %468, %cst_139 {dimension_numbers = #tpu.dot_dimension_numbers<[1], [1], [0], [0], [0, 0, 1, 0], [], []>} : vector<8x16xbf16>, vector<16x16xbf16>, vector<8x16xf32> -> vector<8x16xf32>
    %470 = vector.extract_strided_slice %449 {offsets = [0, 96], sizes = [8, 16], strides = [1, 1]} : vector<8x128xbf16> to vector<8x16xbf16>
    %471 = vector.extract_strided_slice %450 {offsets = [0, 96], sizes = [16, 16], strides = [1, 1]} : vector<16x128xbf16> to vector<16x16xbf16>
    %cst_140 = arith.constant dense<0.000000e+00> : vector<8x16xf32>
    %472 = tpu.matmul %470, %471, %cst_140 {dimension_numbers = #tpu.dot_dimension_numbers<[1], [1], [0], [0], [0, 0, 1, 0], [], []>} : vector<8x16xbf16>, vector<16x16xbf16>, vector<8x16xf32> -> vector<8x16xf32>
    %473 = vector.extract_strided_slice %449 {offsets = [0, 112], sizes = [8, 16], strides = [1, 1]} : vector<8x128xbf16> to vector<8x16xbf16>
    %474 = vector.extract_strided_slice %450 {offsets = [0, 112], sizes = [16, 16], strides = [1, 1]} : vector<16x128xbf16> to vector<16x16xbf16>
    %cst_141 = arith.constant dense<0.000000e+00> : vector<8x16xf32>
    %475 = tpu.matmul %473, %474, %cst_141 {dimension_numbers = #tpu.dot_dimension_numbers<[1], [1], [0], [0], [0, 0, 1, 0], [], []>} : vector<8x16xbf16>, vector<16x16xbf16>, vector<8x16xf32> -> vector<8x16xf32>
    %476 = tpu.concatenate %454, %457, %460, %463, %466, %469, %472, %475 in 0 : vector<8x16xf32>, vector<8x16xf32>, vector<8x16xf32>, vector<8x16xf32>, vector<8x16xf32>, vector<8x16xf32>, vector<8x16xf32>, vector<8x16xf32> -> vector<64x16xf32>
    %cst_142 = arith.constant dense<0xFF800000> : vector<64xf32>
    %477 = vector.multi_reduction <maximumf>, %476, %cst_142 [1] : vector<64x16xf32> to vector<64xf32>
    %478 = vector.shape_cast %477 : vector<64xf32> to vector<64x1xf32>
    %479 = vector.broadcast %478 : vector<64x1xf32> to vector<64x16xf32>
    %480 = arith.subf %476, %479 : vector<64x16xf32>
    %481 = math.exp %480 : vector<64x16xf32>
    %cst_143 = arith.constant dense<0.000000e+00> : vector<64xf32>
    %482 = vector.multi_reduction <add>, %481, %cst_143 [1] : vector<64x16xf32> to vector<64xf32>
    %483 = vector.shape_cast %482 : vector<64xf32> to vector<64x1xf32>
    %484 = tpu.reciprocal %483 {approx = true} : vector<64x1xf32> -> vector<64x1xf32>
    %485 = vector.broadcast %484 : vector<64x1xf32> to vector<64x16xf32>
    %486 = arith.mulf %481, %485 : vector<64x16xf32>
    %487 = vector.extract_strided_slice %486 {offsets = [0, 0], sizes = [8, 16], strides = [1, 1]} : vector<64x16xf32> to vector<8x16xf32>
    %488 = arith.truncf %487 : vector<8x16xf32> to vector<8x16xbf16>
    %489 = vector.extract_strided_slice %451 {offsets = [0, 0], sizes = [16, 16], strides = [1, 1]} : vector<16x128xbf16> to vector<16x16xbf16>
    %cst_144 = arith.constant dense<0.000000e+00> : vector<8x16xf32>
    %490 = tpu.matmul %488, %489, %cst_144 {dimension_numbers = #tpu.dot_dimension_numbers<[1], [0], [0], [1], [0, 0, 1, 1], [], []>} : vector<8x16xbf16>, vector<16x16xbf16>, vector<8x16xf32> -> vector<8x16xf32>
    %491 = vector.extract_strided_slice %486 {offsets = [8, 0], sizes = [8, 16], strides = [1, 1]} : vector<64x16xf32> to vector<8x16xf32>
    %492 = arith.truncf %491 : vector<8x16xf32> to vector<8x16xbf16>
    %493 = vector.extract_strided_slice %451 {offsets = [0, 16], sizes = [16, 16], strides = [1, 1]} : vector<16x128xbf16> to vector<16x16xbf16>
    %cst_145 = arith.constant dense<0.000000e+00> : vector<8x16xf32>
    %494 = tpu.matmul %492, %493, %cst_145 {dimension_numbers = #tpu.dot_dimension_numbers<[1], [0], [0], [1], [0, 0, 1, 1], [], []>} : vector<8x16xbf16>, vector<16x16xbf16>, vector<8x16xf32> -> vector<8x16xf32>
    %495 = vector.extract_strided_slice %486 {offsets = [16, 0], sizes = [8, 16], strides = [1, 1]} : vector<64x16xf32> to vector<8x16xf32>
    %496 = arith.truncf %495 : vector<8x16xf32> to vector<8x16xbf16>
    %497 = vector.extract_strided_slice %451 {offsets = [0, 32], sizes = [16, 16], strides = [1, 1]} : vector<16x128xbf16> to vector<16x16xbf16>
    %cst_146 = arith.constant dense<0.000000e+00> : vector<8x16xf32>
    %498 = tpu.matmul %496, %497, %cst_146 {dimension_numbers = #tpu.dot_dimension_numbers<[1], [0], [0], [1], [0, 0, 1, 1], [], []>} : vector<8x16xbf16>, vector<16x16xbf16>, vector<8x16xf32> -> vector<8x16xf32>
    %499 = vector.extract_strided_slice %486 {offsets = [24, 0], sizes = [8, 16], strides = [1, 1]} : vector<64x16xf32> to vector<8x16xf32>
    %500 = arith.truncf %499 : vector<8x16xf32> to vector<8x16xbf16>
    %501 = vector.extract_strided_slice %451 {offsets = [0, 48], sizes = [16, 16], strides = [1, 1]} : vector<16x128xbf16> to vector<16x16xbf16>
    %cst_147 = arith.constant dense<0.000000e+00> : vector<8x16xf32>
    %502 = tpu.matmul %500, %501, %cst_147 {dimension_numbers = #tpu.dot_dimension_numbers<[1], [0], [0], [1], [0, 0, 1, 1], [], []>} : vector<8x16xbf16>, vector<16x16xbf16>, vector<8x16xf32> -> vector<8x16xf32>
    %503 = vector.extract_strided_slice %486 {offsets = [32, 0], sizes = [8, 16], strides = [1, 1]} : vector<64x16xf32> to vector<8x16xf32>
    %504 = arith.truncf %503 : vector<8x16xf32> to vector<8x16xbf16>
    %505 = vector.extract_strided_slice %451 {offsets = [0, 64], sizes = [16, 16], strides = [1, 1]} : vector<16x128xbf16> to vector<16x16xbf16>
    %cst_148 = arith.constant dense<0.000000e+00> : vector<8x16xf32>
    %506 = tpu.matmul %504, %505, %cst_148 {dimension_numbers = #tpu.dot_dimension_numbers<[1], [0], [0], [1], [0, 0, 1, 1], [], []>} : vector<8x16xbf16>, vector<16x16xbf16>, vector<8x16xf32> -> vector<8x16xf32>
    %507 = vector.extract_strided_slice %486 {offsets = [40, 0], sizes = [8, 16], strides = [1, 1]} : vector<64x16xf32> to vector<8x16xf32>
    %508 = arith.truncf %507 : vector<8x16xf32> to vector<8x16xbf16>
    %509 = vector.extract_strided_slice %451 {offsets = [0, 80], sizes = [16, 16], strides = [1, 1]} : vector<16x128xbf16> to vector<16x16xbf16>
    %cst_149 = arith.constant dense<0.000000e+00> : vector<8x16xf32>
    %510 = tpu.matmul %508, %509, %cst_149 {dimension_numbers = #tpu.dot_dimension_numbers<[1], [0], [0], [1], [0, 0, 1, 1], [], []>} : vector<8x16xbf16>, vector<16x16xbf16>, vector<8x16xf32> -> vector<8x16xf32>
    %511 = vector.extract_strided_slice %486 {offsets = [48, 0], sizes = [8, 16], strides = [1, 1]} : vector<64x16xf32> to vector<8x16xf32>
    %512 = arith.truncf %511 : vector<8x16xf32> to vector<8x16xbf16>
    %513 = vector.extract_strided_slice %451 {offsets = [0, 96], sizes = [16, 16], strides = [1, 1]} : vector<16x128xbf16> to vector<16x16xbf16>
    %cst_150 = arith.constant dense<0.000000e+00> : vector<8x16xf32>
    %514 = tpu.matmul %512, %513, %cst_150 {dimension_numbers = #tpu.dot_dimension_numbers<[1], [0], [0], [1], [0, 0, 1, 1], [], []>} : vector<8x16xbf16>, vector<16x16xbf16>, vector<8x16xf32> -> vector<8x16xf32>
    %515 = vector.extract_strided_slice %486 {offsets = [56, 0], sizes = [8, 16], strides = [1, 1]} : vector<64x16xf32> to vector<8x16xf32>
    %516 = arith.truncf %515 : vector<8x16xf32> to vector<8x16xbf16>
    %517 = vector.extract_strided_slice %451 {offsets = [0, 112], sizes = [16, 16], strides = [1, 1]} : vector<16x128xbf16> to vector<16x16xbf16>
    %cst_151 = arith.constant dense<0.000000e+00> : vector<8x16xf32>
    %518 = tpu.matmul %516, %517, %cst_151 {dimension_numbers = #tpu.dot_dimension_numbers<[1], [0], [0], [1], [0, 0, 1, 1], [], []>} : vector<8x16xbf16>, vector<16x16xbf16>, vector<8x16xf32> -> vector<8x16xf32>
    %519 = tpu.concatenate %490, %494, %498, %502, %506, %510, %514, %518 in 1 : vector<8x16xf32>, vector<8x16xf32>, vector<8x16xf32>, vector<8x16xf32>, vector<8x16xf32>, vector<8x16xf32>, vector<8x16xf32>, vector<8x16xf32> -> vector<8x128xf32>
    %520 = vector.extract_strided_slice %437 {offsets = [8, 0], sizes = [8, 128], strides = [1, 1]} : vector<16x128xf32> to vector<8x128xf32>
    %521 = vector.extract_strided_slice %444 {offsets = [16, 0], sizes = [16, 128], strides = [1, 1]} : vector<32x128xf32> to vector<16x128xf32>
    %522 = vector.extract_strided_slice %445 {offsets = [16, 0], sizes = [16, 128], strides = [1, 1]} : vector<32x128xf32> to vector<16x128xf32>
    %523 = arith.truncf %520 : vector<8x128xf32> to vector<8x128xbf16>
    %524 = arith.truncf %521 : vector<16x128xf32> to vector<16x128xbf16>
    %525 = arith.truncf %522 : vector<16x128xf32> to vector<16x128xbf16>
    %526 = vector.extract_strided_slice %523 {offsets = [0, 0], sizes = [8, 16], strides = [1, 1]} : vector<8x128xbf16> to vector<8x16xbf16>
    %527 = vector.extract_strided_slice %524 {offsets = [0, 0], sizes = [16, 16], strides = [1, 1]} : vector<16x128xbf16> to vector<16x16xbf16>
    %cst_152 = arith.constant dense<0.000000e+00> : vector<8x16xf32>
    %528 = tpu.matmul %526, %527, %cst_152 {dimension_numbers = #tpu.dot_dimension_numbers<[1], [1], [0], [0], [0, 0, 1, 0], [], []>} : vector<8x16xbf16>, vector<16x16xbf16>, vector<8x16xf32> -> vector<8x16xf32>
    %529 = vector.extract_strided_slice %523 {offsets = [0, 16], sizes = [8, 16], strides = [1, 1]} : vector<8x128xbf16> to vector<8x16xbf16>
    %530 = vector.extract_strided_slice %524 {offsets = [0, 16], sizes = [16, 16], strides = [1, 1]} : vector<16x128xbf16> to vector<16x16xbf16>
    %cst_153 = arith.constant dense<0.000000e+00> : vector<8x16xf32>
    %531 = tpu.matmul %529, %530, %cst_153 {dimension_numbers = #tpu.dot_dimension_numbers<[1], [1], [0], [0], [0, 0, 1, 0], [], []>} : vector<8x16xbf16>, vector<16x16xbf16>, vector<8x16xf32> -> vector<8x16xf32>
    %532 = vector.extract_strided_slice %523 {offsets = [0, 32], sizes = [8, 16], strides = [1, 1]} : vector<8x128xbf16> to vector<8x16xbf16>
    %533 = vector.extract_strided_slice %524 {offsets = [0, 32], sizes = [16, 16], strides = [1, 1]} : vector<16x128xbf16> to vector<16x16xbf16>
    %cst_154 = arith.constant dense<0.000000e+00> : vector<8x16xf32>
    %534 = tpu.matmul %532, %533, %cst_154 {dimension_numbers = #tpu.dot_dimension_numbers<[1], [1], [0], [0], [0, 0, 1, 0], [], []>} : vector<8x16xbf16>, vector<16x16xbf16>, vector<8x16xf32> -> vector<8x16xf32>
    %535 = vector.extract_strided_slice %523 {offsets = [0, 48], sizes = [8, 16], strides = [1, 1]} : vector<8x128xbf16> to vector<8x16xbf16>
    %536 = vector.extract_strided_slice %524 {offsets = [0, 48], sizes = [16, 16], strides = [1, 1]} : vector<16x128xbf16> to vector<16x16xbf16>
    %cst_155 = arith.constant dense<0.000000e+00> : vector<8x16xf32>
    %537 = tpu.matmul %535, %536, %cst_155 {dimension_numbers = #tpu.dot_dimension_numbers<[1], [1], [0], [0], [0, 0, 1, 0], [], []>} : vector<8x16xbf16>, vector<16x16xbf16>, vector<8x16xf32> -> vector<8x16xf32>
    %538 = vector.extract_strided_slice %523 {offsets = [0, 64], sizes = [8, 16], strides = [1, 1]} : vector<8x128xbf16> to vector<8x16xbf16>
    %539 = vector.extract_strided_slice %524 {offsets = [0, 64], sizes = [16, 16], strides = [1, 1]} : vector<16x128xbf16> to vector<16x16xbf16>
    %cst_156 = arith.constant dense<0.000000e+00> : vector<8x16xf32>
    %540 = tpu.matmul %538, %539, %cst_156 {dimension_numbers = #tpu.dot_dimension_numbers<[1], [1], [0], [0], [0, 0, 1, 0], [], []>} : vector<8x16xbf16>, vector<16x16xbf16>, vector<8x16xf32> -> vector<8x16xf32>
    %541 = vector.extract_strided_slice %523 {offsets = [0, 80], sizes = [8, 16], strides = [1, 1]} : vector<8x128xbf16> to vector<8x16xbf16>
    %542 = vector.extract_strided_slice %524 {offsets = [0, 80], sizes = [16, 16], strides = [1, 1]} : vector<16x128xbf16> to vector<16x16xbf16>
    %cst_157 = arith.constant dense<0.000000e+00> : vector<8x16xf32>
    %543 = tpu.matmul %541, %542, %cst_157 {dimension_numbers = #tpu.dot_dimension_numbers<[1], [1], [0], [0], [0, 0, 1, 0], [], []>} : vector<8x16xbf16>, vector<16x16xbf16>, vector<8x16xf32> -> vector<8x16xf32>
    %544 = vector.extract_strided_slice %523 {offsets = [0, 96], sizes = [8, 16], strides = [1, 1]} : vector<8x128xbf16> to vector<8x16xbf16>
    %545 = vector.extract_strided_slice %524 {offsets = [0, 96], sizes = [16, 16], strides = [1, 1]} : vector<16x128xbf16> to vector<16x16xbf16>
    %cst_158 = arith.constant dense<0.000000e+00> : vector<8x16xf32>
    %546 = tpu.matmul %544, %545, %cst_158 {dimension_numbers = #tpu.dot_dimension_numbers<[1], [1], [0], [0], [0, 0, 1, 0], [], []>} : vector<8x16xbf16>, vector<16x16xbf16>, vector<8x16xf32> -> vector<8x16xf32>
    %547 = vector.extract_strided_slice %523 {offsets = [0, 112], sizes = [8, 16], strides = [1, 1]} : vector<8x128xbf16> to vector<8x16xbf16>
    %548 = vector.extract_strided_slice %524 {offsets = [0, 112], sizes = [16, 16], strides = [1, 1]} : vector<16x128xbf16> to vector<16x16xbf16>
    %cst_159 = arith.constant dense<0.000000e+00> : vector<8x16xf32>
    %549 = tpu.matmul %547, %548, %cst_159 {dimension_numbers = #tpu.dot_dimension_numbers<[1], [1], [0], [0], [0, 0, 1, 0], [], []>} : vector<8x16xbf16>, vector<16x16xbf16>, vector<8x16xf32> -> vector<8x16xf32>
    %550 = tpu.concatenate %528, %531, %534, %537, %540, %543, %546, %549 in 0 : vector<8x16xf32>, vector<8x16xf32>, vector<8x16xf32>, vector<8x16xf32>, vector<8x16xf32>, vector<8x16xf32>, vector<8x16xf32>, vector<8x16xf32> -> vector<64x16xf32>
    %cst_160 = arith.constant dense<0xFF800000> : vector<64xf32>
    %551 = vector.multi_reduction <maximumf>, %550, %cst_160 [1] : vector<64x16xf32> to vector<64xf32>
    %552 = vector.shape_cast %551 : vector<64xf32> to vector<64x1xf32>
    %553 = vector.broadcast %552 : vector<64x1xf32> to vector<64x16xf32>
    %554 = arith.subf %550, %553 : vector<64x16xf32>
    %555 = math.exp %554 : vector<64x16xf32>
    %cst_161 = arith.constant dense<0.000000e+00> : vector<64xf32>
    %556 = vector.multi_reduction <add>, %555, %cst_161 [1] : vector<64x16xf32> to vector<64xf32>
    %557 = vector.shape_cast %556 : vector<64xf32> to vector<64x1xf32>
    %558 = tpu.reciprocal %557 {approx = true} : vector<64x1xf32> -> vector<64x1xf32>
    %559 = vector.broadcast %558 : vector<64x1xf32> to vector<64x16xf32>
    %560 = arith.mulf %555, %559 : vector<64x16xf32>
    %561 = vector.extract_strided_slice %560 {offsets = [0, 0], sizes = [8, 16], strides = [1, 1]} : vector<64x16xf32> to vector<8x16xf32>
    %562 = arith.truncf %561 : vector<8x16xf32> to vector<8x16xbf16>
    %563 = vector.extract_strided_slice %525 {offsets = [0, 0], sizes = [16, 16], strides = [1, 1]} : vector<16x128xbf16> to vector<16x16xbf16>
    %cst_162 = arith.constant dense<0.000000e+00> : vector<8x16xf32>
    %564 = tpu.matmul %562, %563, %cst_162 {dimension_numbers = #tpu.dot_dimension_numbers<[1], [0], [0], [1], [0, 0, 1, 1], [], []>} : vector<8x16xbf16>, vector<16x16xbf16>, vector<8x16xf32> -> vector<8x16xf32>
    %565 = vector.extract_strided_slice %560 {offsets = [8, 0], sizes = [8, 16], strides = [1, 1]} : vector<64x16xf32> to vector<8x16xf32>
    %566 = arith.truncf %565 : vector<8x16xf32> to vector<8x16xbf16>
    %567 = vector.extract_strided_slice %525 {offsets = [0, 16], sizes = [16, 16], strides = [1, 1]} : vector<16x128xbf16> to vector<16x16xbf16>
    %cst_163 = arith.constant dense<0.000000e+00> : vector<8x16xf32>
    %568 = tpu.matmul %566, %567, %cst_163 {dimension_numbers = #tpu.dot_dimension_numbers<[1], [0], [0], [1], [0, 0, 1, 1], [], []>} : vector<8x16xbf16>, vector<16x16xbf16>, vector<8x16xf32> -> vector<8x16xf32>
    %569 = vector.extract_strided_slice %560 {offsets = [16, 0], sizes = [8, 16], strides = [1, 1]} : vector<64x16xf32> to vector<8x16xf32>
    %570 = arith.truncf %569 : vector<8x16xf32> to vector<8x16xbf16>
    %571 = vector.extract_strided_slice %525 {offsets = [0, 32], sizes = [16, 16], strides = [1, 1]} : vector<16x128xbf16> to vector<16x16xbf16>
    %cst_164 = arith.constant dense<0.000000e+00> : vector<8x16xf32>
    %572 = tpu.matmul %570, %571, %cst_164 {dimension_numbers = #tpu.dot_dimension_numbers<[1], [0], [0], [1], [0, 0, 1, 1], [], []>} : vector<8x16xbf16>, vector<16x16xbf16>, vector<8x16xf32> -> vector<8x16xf32>
    %573 = vector.extract_strided_slice %560 {offsets = [24, 0], sizes = [8, 16], strides = [1, 1]} : vector<64x16xf32> to vector<8x16xf32>
    %574 = arith.truncf %573 : vector<8x16xf32> to vector<8x16xbf16>
    %575 = vector.extract_strided_slice %525 {offsets = [0, 48], sizes = [16, 16], strides = [1, 1]} : vector<16x128xbf16> to vector<16x16xbf16>
    %cst_165 = arith.constant dense<0.000000e+00> : vector<8x16xf32>
    %576 = tpu.matmul %574, %575, %cst_165 {dimension_numbers = #tpu.dot_dimension_numbers<[1], [0], [0], [1], [0, 0, 1, 1], [], []>} : vector<8x16xbf16>, vector<16x16xbf16>, vector<8x16xf32> -> vector<8x16xf32>
    %577 = vector.extract_strided_slice %560 {offsets = [32, 0], sizes = [8, 16], strides = [1, 1]} : vector<64x16xf32> to vector<8x16xf32>
    %578 = arith.truncf %577 : vector<8x16xf32> to vector<8x16xbf16>
    %579 = vector.extract_strided_slice %525 {offsets = [0, 64], sizes = [16, 16], strides = [1, 1]} : vector<16x128xbf16> to vector<16x16xbf16>
    %cst_166 = arith.constant dense<0.000000e+00> : vector<8x16xf32>
    %580 = tpu.matmul %578, %579, %cst_166 {dimension_numbers = #tpu.dot_dimension_numbers<[1], [0], [0], [1], [0, 0, 1, 1], [], []>} : vector<8x16xbf16>, vector<16x16xbf16>, vector<8x16xf32> -> vector<8x16xf32>
    %581 = vector.extract_strided_slice %560 {offsets = [40, 0], sizes = [8, 16], strides = [1, 1]} : vector<64x16xf32> to vector<8x16xf32>
    %582 = arith.truncf %581 : vector<8x16xf32> to vector<8x16xbf16>
    %583 = vector.extract_strided_slice %525 {offsets = [0, 80], sizes = [16, 16], strides = [1, 1]} : vector<16x128xbf16> to vector<16x16xbf16>
    %cst_167 = arith.constant dense<0.000000e+00> : vector<8x16xf32>
    %584 = tpu.matmul %582, %583, %cst_167 {dimension_numbers = #tpu.dot_dimension_numbers<[1], [0], [0], [1], [0, 0, 1, 1], [], []>} : vector<8x16xbf16>, vector<16x16xbf16>, vector<8x16xf32> -> vector<8x16xf32>
    %585 = vector.extract_strided_slice %560 {offsets = [48, 0], sizes = [8, 16], strides = [1, 1]} : vector<64x16xf32> to vector<8x16xf32>
    %586 = arith.truncf %585 : vector<8x16xf32> to vector<8x16xbf16>
    %587 = vector.extract_strided_slice %525 {offsets = [0, 96], sizes = [16, 16], strides = [1, 1]} : vector<16x128xbf16> to vector<16x16xbf16>
    %cst_168 = arith.constant dense<0.000000e+00> : vector<8x16xf32>
    %588 = tpu.matmul %586, %587, %cst_168 {dimension_numbers = #tpu.dot_dimension_numbers<[1], [0], [0], [1], [0, 0, 1, 1], [], []>} : vector<8x16xbf16>, vector<16x16xbf16>, vector<8x16xf32> -> vector<8x16xf32>
    %589 = vector.extract_strided_slice %560 {offsets = [56, 0], sizes = [8, 16], strides = [1, 1]} : vector<64x16xf32> to vector<8x16xf32>
    %590 = arith.truncf %589 : vector<8x16xf32> to vector<8x16xbf16>
    %591 = vector.extract_strided_slice %525 {offsets = [0, 112], sizes = [16, 16], strides = [1, 1]} : vector<16x128xbf16> to vector<16x16xbf16>
    %cst_169 = arith.constant dense<0.000000e+00> : vector<8x16xf32>
    %592 = tpu.matmul %590, %591, %cst_169 {dimension_numbers = #tpu.dot_dimension_numbers<[1], [0], [0], [1], [0, 0, 1, 1], [], []>} : vector<8x16xbf16>, vector<16x16xbf16>, vector<8x16xf32> -> vector<8x16xf32>
    %593 = tpu.concatenate %564, %568, %572, %576, %580, %584, %588, %592 in 1 : vector<8x16xf32>, vector<8x16xf32>, vector<8x16xf32>, vector<8x16xf32>, vector<8x16xf32>, vector<8x16xf32>, vector<8x16xf32>, vector<8x16xf32> -> vector<8x128xf32>
    %594 = tpu.concatenate %519, %593 in 0 : vector<8x128xf32>, vector<8x128xf32> -> vector<16x128xf32>
    %c0_170 = arith.constant 0 : index
    %c1792 = arith.constant 1792 : index
    %595 = vector.load %arg5[%c0_170, %c1792] : memref<128x2176xbf16, #tpu.memory_space<vmem>>, vector<128x128xbf16>
    %596 = arith.truncf %594 : vector<16x128xf32> to vector<16x128xbf16>
    %cst_171 = arith.constant dense<0.000000e+00> : vector<16x128xf32>
    %597 = tpu.matmul %596, %595, %cst_171 {dimension_numbers = #tpu.dot_dimension_numbers<[1], [0], [0], [1], [0, 0, 1, 1], [], []>} : vector<16x128xbf16>, vector<128x128xbf16>, vector<16x128xf32> -> vector<16x128xf32>
    %598 = arith.addf %431, %597 : vector<16x128xf32>
    %c15 = arith.constant 15 : index
    %c0_172 = arith.constant 0 : index
    %599 = vector.load %arg8[%c15, %c0_172] : memref<32x512xf32, #tpu.memory_space<vmem>>, vector<1x128xf32>
    %600 = vector.broadcast %599 : vector<1x128xf32> to vector<16x128xf32>
    %601 = arith.addf %598, %600 : vector<16x128xf32>
    %c16 = arith.constant 16 : index
    %c0_173 = arith.constant 0 : index
    %602 = vector.load %arg8[%c16, %c0_173] : memref<32x512xf32, #tpu.memory_space<vmem>>, vector<1x128xf32>
    %c17 = arith.constant 17 : index
    %c0_174 = arith.constant 0 : index
    %603 = vector.load %arg8[%c17, %c0_174] : memref<32x512xf32, #tpu.memory_space<vmem>>, vector<1x128xf32>
    %cst_175 = arith.constant dense<0.000000e+00> : vector<16xf32>
    %604 = vector.multi_reduction <add>, %601, %cst_175 [1] : vector<16x128xf32> to vector<16xf32>
    %605 = vector.shape_cast %604 : vector<16xf32> to vector<16x1xf32>
    %cst_176 = arith.constant 1.280000e+02 : f32
    %606 = vector.broadcast %cst_176 : f32 to vector<16x1xf32>
    %607 = arith.divf %605, %606 : vector<16x1xf32>
    %608 = vector.broadcast %607 : vector<16x1xf32> to vector<16x128xf32>
    %609 = arith.subf %601, %608 : vector<16x128xf32>
    %610 = arith.mulf %609, %609 : vector<16x128xf32>
    %cst_177 = arith.constant dense<0.000000e+00> : vector<16xf32>
    %611 = vector.multi_reduction <add>, %610, %cst_177 [1] : vector<16x128xf32> to vector<16xf32>
    %612 = vector.shape_cast %611 : vector<16xf32> to vector<16x1xf32>
    %cst_178 = arith.constant 1.280000e+02 : f32
    %613 = vector.broadcast %cst_178 : f32 to vector<16x1xf32>
    %614 = arith.divf %612, %613 : vector<16x1xf32>
    %cst_179 = arith.constant 9.99999974E-6 : f32
    %615 = vector.broadcast %cst_179 : f32 to vector<16x1xf32>
    %616 = arith.addf %614, %615 : vector<16x1xf32>
    %617 = math.rsqrt %616 : vector<16x1xf32>
    %618 = vector.broadcast %617 : vector<16x1xf32> to vector<16x128xf32>
    %619 = arith.mulf %609, %618 : vector<16x128xf32>
    %620 = vector.broadcast %602 : vector<1x128xf32> to vector<16x128xf32>
    %621 = arith.mulf %619, %620 : vector<16x128xf32>
    %622 = vector.broadcast %603 : vector<1x128xf32> to vector<16x128xf32>
    %623 = arith.addf %621, %622 : vector<16x128xf32>
    %c0_180 = arith.constant 0 : index
    %c1920 = arith.constant 1920 : index
    %624 = vector.load %arg5[%c0_180, %c1920] : memref<128x2176xbf16, #tpu.memory_space<vmem>>, vector<128x256xbf16>
    %625 = arith.truncf %623 : vector<16x128xf32> to vector<16x128xbf16>
    %cst_181 = arith.constant dense<0.000000e+00> : vector<16x256xf32>
    %626 = tpu.matmul %625, %624, %cst_181 {dimension_numbers = #tpu.dot_dimension_numbers<[1], [0], [0], [1], [0, 0, 1, 1], [], []>} : vector<16x128xbf16>, vector<128x256xbf16>, vector<16x256xf32> -> vector<16x256xf32>
    %c18 = arith.constant 18 : index
    %c0_182 = arith.constant 0 : index
    %627 = vector.load %arg8[%c18, %c0_182] : memref<32x512xf32, #tpu.memory_space<vmem>>, vector<1x256xf32>
    %628 = vector.broadcast %627 : vector<1x256xf32> to vector<16x256xf32>
    %629 = arith.addf %626, %628 : vector<16x256xf32>
    %cst_183 = arith.constant 0.000000e+00 : f32
    %630 = vector.broadcast %cst_183 : f32 to vector<16x256xf32>
    %631 = arith.maximumf %629, %630 : vector<16x256xf32>
    %c0_184 = arith.constant 0 : index
    %c128_185 = arith.constant 128 : index
    %632 = vector.load %arg6[%c0_184, %c128_185] : memref<272x768xbf16, #tpu.memory_space<vmem>>, vector<256x128xbf16>
    %633 = arith.truncf %631 : vector<16x256xf32> to vector<16x256xbf16>
    %cst_186 = arith.constant dense<0.000000e+00> : vector<16x128xf32>
    %634 = tpu.matmul %633, %632, %cst_186 {dimension_numbers = #tpu.dot_dimension_numbers<[1], [0], [0], [1], [0, 0, 1, 1], [], []>} : vector<16x256xbf16>, vector<256x128xbf16>, vector<16x128xf32> -> vector<16x128xf32>
    %635 = arith.addf %623, %634 : vector<16x128xf32>
    %c19 = arith.constant 19 : index
    %c0_187 = arith.constant 0 : index
    %636 = vector.load %arg8[%c19, %c0_187] : memref<32x512xf32, #tpu.memory_space<vmem>>, vector<1x128xf32>
    %637 = vector.broadcast %636 : vector<1x128xf32> to vector<16x128xf32>
    %638 = arith.addf %635, %637 : vector<16x128xf32>
    %c20 = arith.constant 20 : index
    %c0_188 = arith.constant 0 : index
    %639 = vector.load %arg8[%c20, %c0_188] : memref<32x512xf32, #tpu.memory_space<vmem>>, vector<1x128xf32>
    %c21 = arith.constant 21 : index
    %c0_189 = arith.constant 0 : index
    %640 = vector.load %arg8[%c21, %c0_189] : memref<32x512xf32, #tpu.memory_space<vmem>>, vector<1x128xf32>
    %cst_190 = arith.constant dense<0.000000e+00> : vector<16xf32>
    %641 = vector.multi_reduction <add>, %638, %cst_190 [1] : vector<16x128xf32> to vector<16xf32>
    %642 = vector.shape_cast %641 : vector<16xf32> to vector<16x1xf32>
    %cst_191 = arith.constant 1.280000e+02 : f32
    %643 = vector.broadcast %cst_191 : f32 to vector<16x1xf32>
    %644 = arith.divf %642, %643 : vector<16x1xf32>
    %645 = vector.broadcast %644 : vector<16x1xf32> to vector<16x128xf32>
    %646 = arith.subf %638, %645 : vector<16x128xf32>
    %647 = arith.mulf %646, %646 : vector<16x128xf32>
    %cst_192 = arith.constant dense<0.000000e+00> : vector<16xf32>
    %648 = vector.multi_reduction <add>, %647, %cst_192 [1] : vector<16x128xf32> to vector<16xf32>
    %649 = vector.shape_cast %648 : vector<16xf32> to vector<16x1xf32>
    %cst_193 = arith.constant 1.280000e+02 : f32
    %650 = vector.broadcast %cst_193 : f32 to vector<16x1xf32>
    %651 = arith.divf %649, %650 : vector<16x1xf32>
    %cst_194 = arith.constant 9.99999974E-6 : f32
    %652 = vector.broadcast %cst_194 : f32 to vector<16x1xf32>
    %653 = arith.addf %651, %652 : vector<16x1xf32>
    %654 = math.rsqrt %653 : vector<16x1xf32>
    %655 = vector.broadcast %654 : vector<16x1xf32> to vector<16x128xf32>
    %656 = arith.mulf %646, %655 : vector<16x128xf32>
    %657 = vector.broadcast %639 : vector<1x128xf32> to vector<16x128xf32>
    %658 = arith.mulf %656, %657 : vector<16x128xf32>
    %659 = vector.broadcast %640 : vector<1x128xf32> to vector<16x128xf32>
    %660 = arith.addf %658, %659 : vector<16x128xf32>
    %661 = vector.shape_cast %660 : vector<16x128xf32> to vector<2x8x128xf32>
    %cst_195 = arith.constant dense<0.000000e+00> : vector<2x128xf32>
    %662 = vector.multi_reduction <add>, %661, %cst_195 [1] : vector<2x8x128xf32> to vector<2x128xf32>
    %cst_196 = arith.constant 8.000000e+00 : f32
    %663 = vector.broadcast %cst_196 : f32 to vector<2x128xf32>
    %664 = arith.divf %662, %663 : vector<2x128xf32>
    %665 = vector.shape_cast %236 : vector<32x128xf32> to vector<2x16x128xf32>
    %cst_197 = arith.constant dense<0.000000e+00> : vector<2x128xf32>
    %666 = vector.multi_reduction <add>, %665, %cst_197 [1] : vector<2x16x128xf32> to vector<2x128xf32>
    %cst_198 = arith.constant 1.600000e+01 : f32
    %667 = vector.broadcast %cst_198 : f32 to vector<2x128xf32>
    %668 = arith.divf %666, %667 : vector<2x128xf32>
    %c0_199 = arith.constant 0 : index
    %c256 = arith.constant 256 : index
    %669 = vector.load %arg6[%c0_199, %c256] : memref<272x768xbf16, #tpu.memory_space<vmem>>, vector<128x512xbf16>
    %670 = arith.truncf %664 : vector<2x128xf32> to vector<2x128xbf16>
    %cst_200 = arith.constant dense<0.000000e+00> : vector<2x512xf32>
    %671 = tpu.matmul %670, %669, %cst_200 {dimension_numbers = #tpu.dot_dimension_numbers<[1], [0], [0], [1], [0, 0, 1, 1], [], []>} : vector<2x128xbf16>, vector<128x512xbf16>, vector<2x512xf32> -> vector<2x512xf32>
    %c128_201 = arith.constant 128 : index
    %c256_202 = arith.constant 256 : index
    %672 = vector.load %arg6[%c128_201, %c256_202] : memref<272x768xbf16, #tpu.memory_space<vmem>>, vector<128x512xbf16>
    %673 = arith.truncf %668 : vector<2x128xf32> to vector<2x128xbf16>
    %cst_203 = arith.constant dense<0.000000e+00> : vector<2x512xf32>
    %674 = tpu.matmul %673, %672, %cst_203 {dimension_numbers = #tpu.dot_dimension_numbers<[1], [0], [0], [1], [0, 0, 1, 1], [], []>} : vector<2x128xbf16>, vector<128x512xbf16>, vector<2x512xf32> -> vector<2x512xf32>
    %675 = arith.addf %671, %674 : vector<2x512xf32>
    %c256_204 = arith.constant 256 : index
    %c256_205 = arith.constant 256 : index
    %676 = vector.load %arg6[%c256_204, %c256_205] : memref<272x768xbf16, #tpu.memory_space<vmem>>, vector<16x512xbf16>
    %677 = arith.truncf %6 : vector<2x16xf32> to vector<2x16xbf16>
    %cst_206 = arith.constant dense<0.000000e+00> : vector<2x512xf32>
    %678 = tpu.matmul %677, %676, %cst_206 {dimension_numbers = #tpu.dot_dimension_numbers<[1], [0], [0], [1], [0, 0, 1, 1], [], []>} : vector<2x16xbf16>, vector<16x512xbf16>, vector<2x512xf32> -> vector<2x512xf32>
    %679 = arith.addf %675, %678 : vector<2x512xf32>
    %c22 = arith.constant 22 : index
    %c0_207 = arith.constant 0 : index
    %680 = vector.load %arg8[%c22, %c0_207] : memref<32x512xf32, #tpu.memory_space<vmem>>, vector<1x512xf32>
    %681 = vector.broadcast %680 : vector<1x512xf32> to vector<2x512xf32>
    %682 = arith.addf %679, %681 : vector<2x512xf32>
    %cst_208 = arith.constant 0.000000e+00 : f32
    %683 = vector.broadcast %cst_208 : f32 to vector<2x512xf32>
    %684 = arith.maximumf %682, %683 : vector<2x512xf32>
    %c23 = arith.constant 23 : index
    %c0_209 = arith.constant 0 : index
    %685 = vector.load %arg8[%c23, %c0_209] : memref<32x512xf32, #tpu.memory_space<vmem>>, vector<1x512xf32>
    %686 = vector.broadcast %685 : vector<1x512xf32> to vector<2x512xf32>
    %687 = arith.mulf %684, %686 : vector<2x512xf32>
    %c24 = arith.constant 24 : index
    %c0_210 = arith.constant 0 : index
    %688 = vector.load %arg8[%c24, %c0_210] : memref<32x512xf32, #tpu.memory_space<vmem>>, vector<1x512xf32>
    %689 = vector.broadcast %688 : vector<1x512xf32> to vector<2x512xf32>
    %690 = arith.addf %687, %689 : vector<2x512xf32>
    %c0_211 = arith.constant 0 : index
    %c0_212 = arith.constant 0 : index
    %691 = vector.load %arg7[%c0_211, %c0_212] : memref<512x96xbf16, #tpu.memory_space<vmem>>, vector<512x64xbf16>
    %692 = arith.truncf %690 : vector<2x512xf32> to vector<2x512xbf16>
    %cst_213 = arith.constant dense<0.000000e+00> : vector<2x64xf32>
    %693 = tpu.matmul %692, %691, %cst_213 {dimension_numbers = #tpu.dot_dimension_numbers<[1], [0], [0], [1], [0, 0, 1, 1], [], []>} : vector<2x512xbf16>, vector<512x64xbf16>, vector<2x64xf32> -> vector<2x64xf32>
    %c25 = arith.constant 25 : index
    %c0_214 = arith.constant 0 : index
    %694 = vector.load %arg8[%c25, %c0_214] : memref<32x512xf32, #tpu.memory_space<vmem>>, vector<1x64xf32>
    %695 = vector.broadcast %694 : vector<1x64xf32> to vector<2x64xf32>
    %696 = arith.addf %693, %695 : vector<2x64xf32>
    %cst_215 = arith.constant 0.000000e+00 : f32
    %697 = vector.broadcast %cst_215 : f32 to vector<2x64xf32>
    %698 = arith.maximumf %696, %697 : vector<2x64xf32>
    %c26 = arith.constant 26 : index
    %c0_216 = arith.constant 0 : index
    %699 = vector.load %arg8[%c26, %c0_216] : memref<32x512xf32, #tpu.memory_space<vmem>>, vector<1x64xf32>
    %700 = vector.broadcast %699 : vector<1x64xf32> to vector<2x64xf32>
    %701 = arith.mulf %698, %700 : vector<2x64xf32>
    %c27 = arith.constant 27 : index
    %c0_217 = arith.constant 0 : index
    %702 = vector.load %arg8[%c27, %c0_217] : memref<32x512xf32, #tpu.memory_space<vmem>>, vector<1x64xf32>
    %703 = vector.broadcast %702 : vector<1x64xf32> to vector<2x64xf32>
    %704 = arith.addf %701, %703 : vector<2x64xf32>
    %c0_218 = arith.constant 0 : index
    %c64 = arith.constant 64 : index
    %705 = vector.load %arg7[%c0_218, %c64] : memref<512x96xbf16, #tpu.memory_space<vmem>>, vector<64x32xbf16>
    %706 = arith.truncf %704 : vector<2x64xf32> to vector<2x64xbf16>
    %cst_219 = arith.constant dense<0.000000e+00> : vector<2x32xf32>
    %707 = tpu.matmul %706, %705, %cst_219 {dimension_numbers = #tpu.dot_dimension_numbers<[1], [0], [0], [1], [0, 0, 1, 1], [], []>} : vector<2x64xbf16>, vector<64x32xbf16>, vector<2x32xf32> -> vector<2x32xf32>
    %c28 = arith.constant 28 : index
    %c0_220 = arith.constant 0 : index
    %708 = vector.load %arg8[%c28, %c0_220] : memref<32x512xf32, #tpu.memory_space<vmem>>, vector<1x32xf32>
    %709 = vector.broadcast %708 : vector<1x32xf32> to vector<2x32xf32>
    %710 = arith.addf %707, %709 : vector<2x32xf32>
    %cst_221 = arith.constant 0.000000e+00 : f32
    %711 = vector.broadcast %cst_221 : f32 to vector<2x32xf32>
    %712 = arith.maximumf %710, %711 : vector<2x32xf32>
    %c29 = arith.constant 29 : index
    %c0_222 = arith.constant 0 : index
    %713 = vector.load %arg8[%c29, %c0_222] : memref<32x512xf32, #tpu.memory_space<vmem>>, vector<1x32xf32>
    %714 = vector.broadcast %713 : vector<1x32xf32> to vector<2x32xf32>
    %715 = arith.mulf %712, %714 : vector<2x32xf32>
    %cst_223 = arith.constant dense<0.000000e+00> : vector<2xf32>
    %716 = vector.multi_reduction <add>, %715, %cst_223 [1] : vector<2x32xf32> to vector<2xf32>
    %717 = vector.shape_cast %716 : vector<2xf32> to vector<2x1xf32>
    %c30 = arith.constant 30 : index
    %c0_224 = arith.constant 0 : index
    %718 = vector.load %arg8[%c30, %c0_224] : memref<32x512xf32, #tpu.memory_space<vmem>>, vector<1x1xf32>
    %719 = vector.broadcast %718 : vector<1x1xf32> to vector<2x1xf32>
    %720 = arith.addf %717, %719 : vector<2x1xf32>
    %cst_225 = arith.constant 0.000000e+00 : f32
    %721 = vector.broadcast %cst_225 : f32 to vector<2x1xf32>
    %722 = arith.subf %721, %720 : vector<2x1xf32>
    %723 = math.exp %722 : vector<2x1xf32>
    %cst_226 = arith.constant 1.000000e+00 : f32
    %724 = vector.broadcast %cst_226 : f32 to vector<2x1xf32>
    %725 = arith.addf %724, %723 : vector<2x1xf32>
    %cst_227 = arith.constant 1.000000e+00 : f32
    %726 = vector.broadcast %cst_227 : f32 to vector<2x1xf32>
    %727 = arith.divf %726, %725 : vector<2x1xf32>
    %728 = vector.shape_cast %727 : vector<2x1xf32> to vector<2x1x1xf32>
    %729 = vector.shape_cast %728 : vector<2x1x1xf32> to vector<2x1x1xf32>
    %730 = vector.broadcast %729 : vector<2x1x1xf32> to vector<2x1x128xf32>
    %c0_228 = arith.constant 0 : index
    %c0_229 = arith.constant 0 : index
    %c0_230 = arith.constant 0 : index
    %731 = vector.load %arg9[%c0_228, %c0_229, %c0_230] : memref<2x1x128xf32, #tpu.memory_space<vmem>>, vector<2x1x128xf32>
    tpu.vector_store %arg9[%c0_228, %c0_229, %c0_230], %730 {strides = array<i32>} : memref<2x1x128xf32, #tpu.memory_space<vmem>>, vector<2x1x128xf32>,
    return
  }
  func.func @transform_0(%arg0: i32) -> (i32, i32, i32) {
    %c0_i32 = arith.constant 0 : i32
    %c0_i32_0 = arith.constant 0 : i32
    %c0_i32_1 = arith.constant 0 : i32
    return %arg0, %c0_i32, %c0_i32_0 : i32, i32, i32
  }
  func.func @transform_1(%arg0: i32) -> (i32, i32, i32) {
    %c0_i32 = arith.constant 0 : i32
    %c0_i32_0 = arith.constant 0 : i32
    %c0_i32_1 = arith.constant 0 : i32
    return %arg0, %c0_i32, %c0_i32_0 : i32, i32, i32
  }
  func.func @transform_2(%arg0: i32) -> (i32, i32, i32) {
    %c0_i32 = arith.constant 0 : i32
    %c0_i32_0 = arith.constant 0 : i32
    %c0_i32_1 = arith.constant 0 : i32
    return %arg0, %c0_i32, %c0_i32_0 : i32, i32, i32
  }
  func.func @transform_3(%arg0: i32) -> (i32, i32, i32) {
    %c0_i32 = arith.constant 0 : i32
    %c0_i32_0 = arith.constant 0 : i32
    %c0_i32_1 = arith.constant 0 : i32
    return %arg0, %c0_i32, %c0_i32_0 : i32, i32, i32
  }
  func.func @transform_4(%arg0: i32) -> (i32, i32) {
    %c0_i32 = arith.constant 0 : i32
    %c0_i32_0 = arith.constant 0 : i32
    %c0_i32_1 = arith.constant 0 : i32
    return %c0_i32, %c0_i32_0 : i32, i32
  }
  func.func @transform_5(%arg0: i32) -> (i32, i32) {
    %c0_i32 = arith.constant 0 : i32
    %c0_i32_0 = arith.constant 0 : i32
    %c0_i32_1 = arith.constant 0 : i32
    return %c0_i32, %c0_i32_0 : i32, i32
  }
  func.func @transform_6(%arg0: i32) -> (i32, i32) {
    %c0_i32 = arith.constant 0 : i32
    %c0_i32_0 = arith.constant 0 : i32
    %c0_i32_1 = arith.constant 0 : i32
    return %c0_i32, %c0_i32_0 : i32, i32
  }
  func.func @transform_7(%arg0: i32) -> (i32, i32) {
    %c0_i32 = arith.constant 0 : i32
    %c0_i32_0 = arith.constant 0 : i32
    %c0_i32_1 = arith.constant 0 : i32
    return %c0_i32, %c0_i32_0 : i32, i32
  }
  func.func @transform_8(%arg0: i32) -> (i32, i32, i32) {
    %c0_i32 = arith.constant 0 : i32
    %c0_i32_0 = arith.constant 0 : i32
    %c0_i32_1 = arith.constant 0 : i32
    return %arg0, %c0_i32, %c0_i32_0 : i32, i32, i32
  }
}

</mosaic_0001>

<bundles_post_ra>
// kernel: pli_predictor_forward.1
= control target key start
LH: loop header
LB: loop body
LE: loop exit
PB: predicated region body
PF: predicated region fallthrough
CT: control target
= control target key end

     0   :  { %13 = vsyncpa [#allocation3], 0  ;;  %s10076_s0 = inlined_call_operand.vmem [shape: f32[2,8,128], index: 0, kind: input, shape index: {}]   ;;  %s10077_s1 = inlined_call_operand.vmem [shape: f32[2,1,8], index: 1, kind: input, shape index: {}]   ;;  %s10078_s2 = inlined_call_operand.vmem [shape: f32[2,16,48], index: 2, kind: input, shape index: {}]   ;;  %s10079_s3 = inlined_call_operand.vmem [shape: f32[2,1,16], index: 3, kind: input, shape index: {}]   ;;  %s10080_s4 = inlined_call_operand.hbm [shape: bf16[128,2176], index: 4, kind: input, shape index: {}]   ;;  %s10081_s5 = inlined_call_operand.hbm [shape: bf16[272,768], index: 5, kind: input, shape index: {}]   ;;  %s10082_s6 = inlined_call_operand.vmem [shape: bf16[512,96], index: 6, kind: input, shape index: {}]   ;;  %s10083_s7 = inlined_call_operand.vmem [shape: f32[32,512], index: 7, kind: input, shape index: {}]   ;;  %s10084_s8 = inlined_call_operand.vmem [shape: f32[2,1,128], index: 8, kind: output, shape index: {}]  }
   0x1   :  { %s27_s29 = sshll.u32 %s10080_s4, 4  ;;  %s28_s29 = int_to_ptr.hbm [resolvable:$true] %s27_s29 }
   0x2   :  { %14 = vsyncpa [#allocation5], 0  ;;  %s8284_s30 = smov [#allocation2]   ;;  %s40_s12 = sshll.u32 %s10081_s5, 4  ;;  %s41_s12 = int_to_ptr.hbm [resolvable:$true] %s40_s12 }
   0x3   :  { %s29_s9 = sshll.u32 %s8284_s30, 4  ;;  %s8285_s13 = smov 1088   ;;  %s30_s9 = int_to_ptr.vmem [resolvable:$true] %s29_s9 }
   0x4   :  { %s8286_s14 = smov 68   ;;  %s8287_s15 = smov [#allocation4]  }
   0x5   :  { %35 = dma.hbm_to_vmem [thread:$0]  %s28_s29, 17408, %s30_s9, [#allocation3], %s8285_s13, %s8285_s13, %s8286_s14  }
   0x6   :  { %s42_s16 = sshll.u32 %s8287_s15, 4  ;;  %s8288_s17 = smov 384   ;;  %s43_s16 = int_to_ptr.vmem [resolvable:$true] %s42_s16 }
   0x7   :  { %s8289_s18 = smov 24  }
   0x8   :  { %48 = dma.hbm_to_vmem [thread:$0]  %s41_s12, 13056, %s43_s16, [#allocation5], %s8288_s17, %s8288_s17, %s8289_s18  }
   0x9   :  { %8280 = dma.done.wait [#allocation3], 17408  }
   0xa   :  { %8281 = vsyncadd [#allocation3], 4294949888 }
   0xb   :  { %8282 = dma.done.wait [#allocation5], 13056  }
   0xc   :  { %8283 = vsyncadd [#allocation5], 4294954240  ;;  %v6338_v0 = vld [vmem:[#allocation2 + $0x110] sm:$0xf]  ;;  %v7509_v1 = vld [vmem:[#allocation2 + $0x150] sm:$0xf0] }
   0xd   :  { %v6334_v2 = vld [vmem:[#allocation2 + $0x88] sm:$0xf]  ;;  %v6339_v3 = vor.u32 %v7509_v1, %v6338_v0  ;;  %v7508_v4 = vld [vmem:[#allocation2 + $0xc8] sm:$0xf0]  ;;  %v6330_v5 = vld [vmem:[#allocation2] sm:$0xf] }
   0xe   :  { %v6335_v6 = vor.u32 %v7508_v4, %v6334_v2  ;;  %v7507_v7 = vld [vmem:[#allocation2 + $0x40] sm:$0xf0]  ;;  %v6429_v8 = vld [vmem:[#allocation2 + $0x3bc] sm:$0xf]  ;;  %v7532_v9 = vld [vmem:[#allocation2 + $0x3fc] sm:$0xf0] }
   0xf   :  { %111 = vmatpush.bf16.msra.mxu0 %v6339_v3  ;;  %v6430_v10 = vor.u32 %v7532_v9, %v6429_v8  ;;  %v7531_v11 = vld [vmem:[#allocation2 + $0x3c0] sm:$0xf]  ;;  %v6431_v12 = vld [vmem:[#allocation2 + $0x400] sm:$0xf0]  ;;  %v63_v15 = vld [vmem:[%s10078_s2 + $0x8] sm:$0xff]  ;;  %v6331_v25 = vor.u32 %v7507_v7, %v6330_v5  ;;  %vm99_vm0 = vcmask 392192  }
  0x10   :  { %v6437_v13 = vld [vmem:[#allocation2 + $0x3c4] sm:$0xf]  ;;  %v6434_v16 = vor.u32 %v7531_v11, %v6431_v12  ;;  %v7533_v17 = vld [vmem:[#allocation2 + $0x404] sm:$0xf0]  ;;  %v6417_v18 = vld [vmem:[#allocation2 + $0x334] sm:$0xf] }
  0x11   :  { %v62_v14 = vld [vmem:[%s10078_s2] sm:$0xff]  ;;  %v7529_v19 = vld [vmem:[#allocation2 + $0x374] sm:$0xf0]  ;;  %296 = vmatpush.bf16.msra.mxu1 %v6430_v10  ;;  %v6438_v20 = vor.u32 %v7533_v17, %v6437_v13  ;;  %v6419_v23 = vld [vmem:[#allocation2 + $0x378] sm:$0xf0]  ;;  %vm369_vm1 = vcmask 130048  }
  0x12   :  { %v6418_v21 = vor.u32 %v7529_v19, %v6417_v18  ;;  %v7528_v22 = vld [vmem:[#allocation2 + $0x338] sm:$0xf]  ;;  %v6425_v24 = vld [vmem:[#allocation2 + $0x33c] sm:$0xf]  ;;  %315 = vmatpush.bf16.msra.mxu2 %v6434_v16  ;;  %v7530_v27 = vld [vmem:[#allocation2 + $0x37c] sm:$0xf0]  ;;  %v78_v35 = vpack.c.bf16 %v63_v15, %v62_v14 }
  0x13   :  { %112 = vmatpush.bf16.msra.mxu0 %v6335_v6  ;;  %v6422_v26 = vor.u32 %v7528_v22, %v6419_v23  ;;  %v6405_v28 = vld [vmem:[#allocation2 + $0x2ac] sm:$0xf]  ;;  %v7526_v29 = vld [vmem:[#allocation2 + $0x2ec] sm:$0xf0]  ;;  %334 = vmatpush.bf16.msra.mxu3 %v6438_v20  ;;  %v6426_v30 = vor.u32 %v7530_v27, %v6425_v24  ;;  %v6407_v32 = vld [vmem:[#allocation2 + $0x2f0] sm:$0xf0] }
  0x14   :  { %v7525_v31 = vld [vmem:[#allocation2 + $0x2b0] sm:$0xf]  ;;  %v6413_v33 = vld [vmem:[#allocation2 + $0x2b4] sm:$0xf]  ;;  %v7527_v34 = vld [vmem:[#allocation2 + $0x2f4] sm:$0xf0]  ;;  %v6406_v36 = vor.u32 %v7526_v29, %v6405_v28 }
  0x15   :  { %297 = vmatpush.bf16.msra.mxu1 %v6418_v21  ;;  %v6410_v37 = vor.u32 %v7525_v31, %v6407_v32  ;;  %v6393_v38 = vld [vmem:[#allocation2 + $0x224] sm:$0xf]  ;;  %v7523_v39 = vld [vmem:[#allocation2 + $0x264] sm:$0xf0]  ;;  %v6414_v40 = vor.u32 %v7527_v34, %v6413_v33  ;;  %v6395_v42 = vld [vmem:[#allocation2 + $0x268] sm:$0xf0] }
  0x16   :  { %316 = vmatpush.bf16.msra.mxu2 %v6422_v26  ;;  %v7522_v41 = vld [vmem:[#allocation2 + $0x228] sm:$0xf]  ;;  %v6401_v43 = vld [vmem:[#allocation2 + $0x22c] sm:$0xf]  ;;  %v7524_v44 = vld [vmem:[#allocation2 + $0x26c] sm:$0xf0]  ;;  %v6394_v45 = vor.u32 %v7523_v39, %v6393_v38 }
  0x17   :  { %113 = vmatpush.bf16.msra.mxu0 %v6331_v25  ;;  %335 = vmatpush.bf16.msra.mxu3 %v6426_v30  ;;  %v6398_v46 = vor.u32 %v7522_v41, %v6395_v42  ;;  %v6381_v47 = vld [vmem:[#allocation2 + $0x19c] sm:$0xf]  ;;  %v7520_v48 = vld [vmem:[#allocation2 + $0x1dc] sm:$0xf0]  ;;  %v6402_v49 = vor.u32 %v7524_v44, %v6401_v43  ;;  %v6383_v51 = vld [vmem:[#allocation2 + $0x1e0] sm:$0xf0] }
  0x18   :  { %v7519_v50 = vld [vmem:[#allocation2 + $0x1a0] sm:$0xf]  ;;  %v6389_v52 = vld [vmem:[#allocation2 + $0x1a4] sm:$0xf]  ;;  %v7521_v53 = vld [vmem:[#allocation2 + $0x1e4] sm:$0xf0]  ;;  %v6382_v54 = vor.u32 %v7520_v48, %v6381_v47 }
  0x19   :  { %298 = vmatpush.bf16.msra.mxu1 %v6406_v36  ;;  %v6386_v55 = vor.u32 %v7519_v50, %v6383_v51  ;;  %v6390_v56 = vor.u32 %v7521_v53, %v6389_v52  ;;  %v64_v57 = vld [vmem:[%s10078_s2 + $0x10] sm:$0xff]  ;;  %v65_v58 = vld [vmem:[%s10078_s2 + $0x18] sm:$0xff]  ;;  %v7518_v2 = vld [vmem:[#allocation2 + $0x15c] sm:$0xf0]  ;;  %s8290_s28 = smov 16   ;;  %s8291_s29 = smov 64  }
  0x1a   :  { %6340 = vmatmul.msk.bf16.vlgmr.msra.gmra.mxu0 %vm99_vm0, %v78_v35  ;;  %317 = vmatpush.bf16.msra.mxu2 %v6410_v37  ;;  %v79_v59 = vpack.c.bf16 %v65_v58, %v64_v57  ;;  %v6369_v60 = vld [vmem:[#allocation2 + $0x114] sm:$0xf]  ;;  %v7517_v61 = vld [vmem:[#allocation2 + $0x154] sm:$0xf0]  ;;  %v6371_v0 = vld [vmem:[#allocation2 + $0x158] sm:$0xf0] }
  0x1b   :  { %336 = vmatpush.bf16.msra.mxu3 %v6414_v40  ;;  %v7516_v62 = vld [vmem:[#allocation2 + $0x118] sm:$0xf]  ;;  %v6370_v63 = vor.u32 %v7517_v61, %v6369_v60  ;;  %v6377_v1 = vld [vmem:[#allocation2 + $0x11c] sm:$0xf]  ;;  %v6357_v5 = vld [vmem:[#allocation2 + $0x8c] sm:$0xf] }
  0x1c   :  { %v6374_v3 = vor.u32 %v7516_v62, %v6371_v0  ;;  %v6378_v4 = vor.u32 %v7518_v2, %v6377_v1  ;;  %v7514_v6 = vld [vmem:[#allocation2 + $0xcc] sm:$0xf0]  ;;  %v6359_v9 = vld [vmem:[#allocation2 + $0xd0] sm:$0xf0]  ;;  %v7515_v11 = vld [vmem:[#allocation2 + $0xd4] sm:$0xf0] }
  0x1d   :  { %299 = vmatpush.bf16.msra.mxu1 %v6394_v45  ;;  %v7513_v7 = vld [vmem:[#allocation2 + $0x90] sm:$0xf]  ;;  %v6358_v8 = vor.u32 %v7514_v6, %v6357_v5  ;;  %v6365_v10 = vld [vmem:[#allocation2 + $0x94] sm:$0xf]  ;;  %v6345_v14 = vld [vmem:[#allocation2 + $0x4] sm:$0xf] }
  0x1e   :  { %318 = vmatpush.bf16.msra.mxu2 %v6398_v46  ;;  %v6362_v12 = vor.u32 %v7513_v7, %v6359_v9  ;;  %v6366_v13 = vor.u32 %v7515_v11, %v6365_v10  ;;  %v7511_v15 = vld [vmem:[#allocation2 + $0x44] sm:$0xf0]  ;;  %v6347_v18 = vld [vmem:[#allocation2 + $0x48] sm:$0xf0]  ;;  %v7512_v20 = vld [vmem:[#allocation2 + $0x4c] sm:$0xf0] }
  0x1f   :  { %337 = vmatpush.bf16.msra.mxu3 %v6402_v49  ;;  %v7510_v16 = vld [vmem:[#allocation2 + $0x8] sm:$0xf]  ;;  %v6346_v17 = vor.u32 %v7511_v15, %v6345_v14  ;;  %v6353_v19 = vld [vmem:[#allocation2 + $0xc] sm:$0xf]  ;;  %v80_v24 = vld [vmem:[%s10083_s7] ss:$0 sm:$0xff] }
  0x20   :  { %v6350_v21 = vor.u32 %v7510_v16, %v6347_v18  ;;  %v6354_v22 = vor.u32 %v7512_v20, %v6353_v19  ;;  %v6342_v35 = vld [vmem:[%s10083_s7 + $0x1] ss:$8 sm:$0x7]  ;;  %s8292_s30 = smov 80   ;;  %s8293_s9 = smov 96   ;;  %vm963_vm2 = vcmask 261120  }
  0x21   :  { %300 = vmatpush.bf16.msra.mxu1 %v6382_v54  ;;  %v163_v37 = vperm.slane %v6342_v35, 1  ;;  %v8384_v43 = vperm.slane %v6342_v35, 0  ;;  %s8294_s10 = smov 112   ;;  %v164_v58 = vperm.slane %v6342_v35, 2  ;;  %s8295_s11 = smov 32   ;;  %vm968_vm3 = vcmask 523264  }
  0x22   :  { %319 = vmatpush.bf16.msra.mxu2 %v6386_v55  ;;  %s8296_s12 = smov 48   ;;  %vm971_vm4 = vcmask 654336   ;;  %vm974_vm5 = vcmask 785408   ;;  %vm977_vm6 = vcmask 916480  }
  0x23   :  { %338 = vmatpush.bf16.msra.mxu3 %v6390_v56 }
  0x25   :  { %301 = vmatpush.bf16.msra.mxu1 %v6370_v63 }
  0x26   :  { %320 = vmatpush.bf16.msra.mxu2 %v6374_v3 }
  0x27   :  { %339 = vmatpush.bf16.msra.mxu3 %v6378_v4 }
  0x29   :  { %302 = vmatpush.bf16.msra.mxu1 %v6358_v8 }
  0x2a   :  { %6341 = vmatmul.msk.bf16.gmra.mxu0 %vm99_vm0, %v79_v59  ;;  %321 = vmatpush.bf16.msra.mxu2 %v6362_v12 }
  0x2b   :  { %340 = vmatpush.bf16.msra.mxu3 %v6366_v13 }
  0x2d   :  { %303 = vmatpush.bf16.msra.mxu1 %v6346_v17 }
  0x2e   :  { %322 = vmatpush.bf16.msra.mxu2 %v6350_v21 }
  0x2f   :  { %341 = vmatpush.bf16.msra.mxu3 %v6354_v22 }
  0x97   :  { %v115_v23 = vpop.f32.mrf.mxu0 }
  0x98   :  { %v8369_v26 = vadd.f32 %v115_v23, %v80_v24 }
  0x9f   :  { %v117_v25 = vpop.f32.mrf.mxu0 }
  0xa0   :  { %v8371_v27 = vadd.f32 %v117_v25, %v80_v24 }
  0xa2   :  { %v157_v28 = vpack.c.bf16 %v8371_v27, %v8369_v26 }
  0xa4   :  { %304 = vmatmul.bf16.vlgmr.msra.gmra.mxu1 %v157_v28  ;;  %323 = vmatmul.bf16.vlgmr.msra.gmra.mxu2 %v157_v28 }
  0xa5   :  { %342 = vmatmul.bf16.vlgmr.msra.gmra.mxu3 %v157_v28 }
  0xa7   :  { %v120_v29 = vpop.f32.mrf.mxu0 }
  0xa8   :  { %v8375_v30 = vadd.f32 %v120_v29, %v80_v24 }
  0xaf   :  { %v122_v31 = vpop.f32.mrf.mxu0 }
  0xb0   :  { %v8377_v32 = vadd.f32 %v122_v31, %v80_v24 }
  0xb2   :  { %v158_v33 = vpack.c.bf16 %v8377_v32, %v8375_v30 }
  0xb4   :  { %309 = vmatmul.bf16.gmra.mxu1 %v158_v33  ;;  %328 = vmatmul.bf16.gmra.mxu2 %v158_v33 }
  0xb5   :  { %347 = vmatmul.bf16.gmra.mxu3 %v158_v33 }
 0x121   :  { %v305_v34 = vpop.f32.mrf.mxu1 }
 0x122   :  { %v306_v48 = vadd.f32 %v305_v34, %v8384_v43 }
 0x124   :  { %v353_v52 = vpack.c.bf16 %v306_v48, %v306_v48 }
 0x126   :  { %v361_v54 = vunpack.c.l.b16 %v353_v52 }
 0x127   :  { %v324_v36 = vpop.f32.mrf.mxu2 }
 0x128   :  { %v325_v38 = vadd.f32 %v324_v36, %v163_v37  ;;  %v343_v55 = vpop.f32.mrf.mxu3 }
 0x129   :  { %v307_v41 = vpop.f32.mrf.mxu1  ;;  %v344_v60 = vadd.f32 %v343_v55, %v164_v58 }
 0x12a   :  { %v355_v40 = vpack.c.bf16 %v325_v38, %v325_v38  ;;  %v308_v45 = vadd.f32 %v307_v41, %v8384_v43 }
 0x12b   :  { %v357_v62 = vpack.c.bf16 %v344_v60, %v344_v60 }
 0x12c   :  { %v366_v46 = vunpack.c.l.b16 %v355_v40  ;;  %v354_v50 = vpack.c.bf16 %v308_v45, %v308_v45 }
 0x12d   :  { %v737_v3 = vunpack.c.l.b16 %v357_v62 }
 0x12e   :  { %v362_v53 = vunpack.c.l.b16 %v354_v50 }
 0x12f   :  { %v326_v39 = vpop.f32.mrf.mxu2 }
 0x130   :  { %v327_v42 = vadd.f32 %v326_v39, %v163_v37  ;;  %v363_v56 = vpack.c.b16 %v362_v53, %v361_v54  ;;  %v345_v57 = vpop.f32.mrf.mxu3 }
 0x131   :  { %v346_v59 = vadd.f32 %v345_v57, %v164_v58  ;;  %v310_v11 = vpop.f32.mrf.mxu1 }
 0x132   :  { %v356_v44 = vpack.c.bf16 %v327_v42, %v327_v42  ;;  %v311_v22 = vadd.f32 %v310_v11, %v8384_v43 }
 0x133   :  { %v358_v61 = vpack.c.bf16 %v346_v59, %v346_v59 }
 0x134   :  { %v367_v47 = vunpack.c.l.b16 %v356_v44  ;;  %v980_v24 = vpack.c.bf16 %v311_v22, %v311_v22 }
 0x135   :  { %v738_v0 = vunpack.c.l.b16 %v358_v61 }
 0x136   :  { %v368_v49 = vpack.c.b16 %v367_v47, %v366_v46  ;;  %v988_v28 = vunpack.c.l.b16 %v980_v24 }
 0x137   :  { %v329_v63 = vpop.f32.mrf.mxu2  ;;  %v739_v4 = vpack.c.b16 %v738_v0, %v737_v3 }
 0x138   :  { %536 = vrot.lane.b32.xlu2 %v368_v49, %s8290_s28  ;;  %464 = vrot.lane.b32.xlu1 %v368_v49, %s8291_s29  ;;  %v374_v51 = vsel %vm369_vm1, %v368_v49, 0  ;;  %v348_v1 = vpop.f32.mrf.mxu3  ;;  %v330_v7 = vadd.f32 %v329_v63, %v163_v37 }
 0x139   :  { %440 = vrot.lane.b32.xlu0 %v368_v49, %s8292_s30  ;;  %383 = vmatpush.bf16.xpose.msrb.mxu0 %v374_v51  ;;  %v349_v2 = vadd.f32 %v348_v1, %v164_v58  ;;  %v312_v20 = vpop.f32.mrf.mxu1 }
 0x13a   :  { %v982_v14 = vpack.c.bf16 %v330_v7, %v330_v7  ;;  %v313_v23 = vadd.f32 %v312_v20, %v8384_v43 }
 0x13b   :  { %v984_v6 = vpack.c.bf16 %v349_v2, %v349_v2 }
 0x13c   :  { %v993_v18 = vunpack.c.l.b16 %v982_v14  ;;  %v981_v25 = vpack.c.bf16 %v313_v23, %v313_v23 }
 0x13d   :  { %v1363_v12 = vunpack.c.l.b16 %v984_v6 }
 0x13e   :  { %v989_v29 = vunpack.c.l.b16 %v981_v25 }
 0x13f   :  { %v331_v5 = vpop.f32.mrf.mxu2 }
 0x140   :  { %416 = vrot.lane.b32.xlu2 %v368_v49, %s8293_s9  ;;  %392 = vrot.lane.b32.xlu1 %v368_v49, %s8294_s10  ;;  %v332_v8 = vadd.f32 %v331_v5, %v163_v37  ;;  %v350_v9 = vpop.f32.mrf.mxu3  ;;  %v8421_v31 = vpack.c.b16 %v989_v29, %v988_v28 }
 0x141   :  { %438 = vrot.lane.b32.xlu0 %v363_v56, %s8292_s30  ;;  %6439 = vmatmul.msk.bf16.vlgmr.msrb.gmra.mxu0 %vm369_vm1, %v363_v56  ;;  %v351_v10 = vadd.f32 %v350_v9, %v164_v58 }
 0x142   :  { %v983_v15 = vpack.c.bf16 %v332_v8, %v332_v8 }
 0x143   :  { %v985_v13 = vpack.c.bf16 %v351_v10, %v351_v10 }
 0x144   :  { %v994_v19 = vunpack.c.l.b16 %v983_v15 }
 0x145   :  { %v1364_v16 = vunpack.c.l.b16 %v985_v13 }
 0x146   :  { %v8410_v21 = vpack.c.b16 %v994_v19, %v993_v18 }
 0x147   :  { %v8408_v17 = vpack.c.b16 %v1364_v16, %v1363_v12 }
 0x148   :  { %534 = vrot.lane.b32.xlu2 %v363_v56, %s8290_s28  ;;  %390 = vrot.lane.b32.xlu1 %v363_v56, %s8294_s10 }
 0x149   :  { %462 = vrot.lane.b32.xlu0 %v363_v56, %s8291_s29 }
 0x150   :  { %512 = vrot.lane.b32.xlu2 %v368_v49, %s8295_s11  ;;  %488 = vrot.lane.b32.xlu1 %v368_v49, %s8296_s12 }
 0x151   :  { %414 = vrot.lane.b32.xlu0 %v363_v56, %s8293_s9 }
 0x158   :  { %759 = vrot.lane.b32.xlu2 %v739_v4, %s8294_s10  ;;  %510 = vrot.lane.b32.xlu1 %v363_v56, %s8295_s11 }
 0x159   :  { %486 = vrot.lane.b32.xlu0 %v363_v56, %s8296_s12 }
 0x160   :  { %822 = vrot.lane.b32.xlu2 %v739_v4, %s8291_s29  ;;  %780 = vrot.lane.b32.xlu1 %v739_v4, %s8293_s9 }
 0x161   :  { %801 = vrot.lane.b32.xlu0 %v739_v4, %s8292_s30 }
 0x168   :  { %885 = vrot.lane.b32.xlu1 %v739_v4, %s8290_s28  ;;  %1066 = vrot.lane.b32.xlu2 %v8410_v21, %s8292_s30 }
 0x169   :  { %843 = vrot.lane.b32.xlu0 %v739_v4, %s8296_s12 }
 0x170   :  { %1018 = vrot.lane.b32.xlu1 %v8410_v21, %s8294_s10 }
 0x171   :  { %864 = vrot.lane.b32.xlu0 %v739_v4, %s8295_s11 }
 0x179   :  { %1064 = vrot.lane.b32.xlu0 %v8421_v31, %s8292_s30 }
 0x181   :  { %1042 = vrot.lane.b32.xlu0 %v8410_v21, %s8293_s9 }
 0x189   :  { %1090 = vrot.lane.b32.xlu0 %v8410_v21, %s8291_s29 }
 0x192   :  { %v537_v33 = vpop.permute.xlu2 %536 }
 0x193   :  { %v542_v43 = vsel %vm369_vm1, %v537_v33, 0 }
 0x19a   :  { %v417_v34 = vpop.permute.xlu2 %416 }
 0x19b   :  { %v422_v35 = vsel %vm369_vm1, %v417_v34, 0 }
 0x19c   :  { %431 = vmatpush.bf16.xpose.msrb.mxu1 %v422_v35 }
 0x1a2   :  { %v535_v36 = vpop.permute.xlu2 %534 }
 0x1aa   :  { %v465_v37 = vpop.permute.xlu1 %464  ;;  %v513_v38 = vpop.permute.xlu2 %512 }
 0x1ab   :  { %v441_v39 = vpop.permute.xlu0 %440  ;;  %v518_v40 = vsel %vm369_vm1, %v513_v38, 0  ;;  %v470_v41 = vsel %vm369_vm1, %v465_v37, 0 }
 0x1ac   :  { %v446_v42 = vsel %vm369_vm1, %v441_v39, 0  ;;  %479 = vmatpush.bf16.xpose.msrb.mxu3 %v470_v41  ;;  %527 = vmatpush.bf16.xpose.msra.mxu1 %v518_v40 }
 0x1ad   :  { %455 = vmatpush.bf16.xpose.msrb.mxu2 %v446_v42 }
 0x1b2   :  { %v393_v44 = vpop.permute.xlu1 %392  ;;  %v760_v45 = vpop.permute.xlu2 %759 }
 0x1b3   :  { %v398_v46 = vsel %vm369_vm1, %v393_v44, 0  ;;  %v439_v47 = vpop.permute.xlu0 %438 }
 0x1b4   :  { %751 = vmatpush.bf16.msra.mxu3 %v739_v4  ;;  %6442 = vmatmul.msk.bf16.vlgmr.msrb.gmra.mxu2 %vm369_vm1, %v439_v47 }
 0x1b5   :  { %551 = vmatpush.bf16.xpose.msra.mxu2 %v542_v43  ;;  %407 = vmatpush.bf16.xpose.msra.mxu0 %v398_v46 }
 0x1ba   :  { %v823_v48 = vpop.permute.xlu2 %822  ;;  %v391_v49 = vpop.permute.xlu1 %390 }
 0x1bb   :  { %v463_v50 = vpop.permute.xlu0 %462 }
 0x1bc   :  { %6440 = vmatmul.msk.bf16.vlgmr.msra.gmra.mxu0 %vm369_vm1, %v391_v49  ;;  %6443 = vmatmul.msk.bf16.vlgmr.msrb.gmra.mxu3 %vm369_vm1, %v463_v50 }
 0x1bd   :  { %835 = vmatpush.bf16.msrb.mxu3 %v823_v48 }
 0x1be   :  { %v385_v51 = vpop.f32.mrf.mxu0 }
 0x1bf   :  { %v558_v52 = vsel %vm369_vm1, %v385_v51, -inf }
 0x1c0   :  { %559 = vmax.xlane.f32.xlu2 %v558_v52 }
 0x1c2   :  { %v489_v53 = vpop.permute.xlu1 %488  ;;  %v8449_v3 = vpop.permute.xlu2 %1066 }
 0x1c3   :  { %v494_v54 = vsel %vm369_vm1, %v489_v53, 0  ;;  %v415_v55 = vpop.permute.xlu0 %414 }
 0x1c4   :  { %6441 = vmatmul.msk.bf16.vlgmr.msrb.gmra.mxu1 %vm369_vm1, %v415_v55  ;;  %6446 = vmatmul.msk.bf16.vlgmr.msra.gmra.mxu2 %vm369_vm1, %v535_v36 }
 0x1c5   :  { %503 = vmatpush.bf16.xpose.msrb.mxu0 %v494_v54 }
 0x1c6   :  { %v387_v56 = vpop.f32.mrf.mxu0 }
 0x1c7   :  { %v561_v57 = vsel %vm369_vm1, %v387_v56, -inf }
 0x1c8   :  { %562 = vmax.xlane.f32.xlu0 %v561_v57 }
 0x1ca   :  { %v511_v58 = vpop.permute.xlu1 %510 }
 0x1cb   :  { %v487_v59 = vpop.permute.xlu0 %486 }
 0x1cc   :  { %6444 = vmatmul.msk.bf16.vlgmr.msrb.gmra.mxu0 %vm369_vm1, %v487_v59 }
 0x1cd   :  { %772 = vmatpush.bf16.msra.mxu0 %v760_v45 }
 0x1d2   :  { %v781_v60 = vpop.permute.xlu1 %780 }
 0x1d3   :  { %v802_v61 = vpop.permute.xlu0 %801  ;;  %793 = vmatpush.bf16.msrb.mxu1 %v781_v60 }
 0x1d4   :  { %6445 = vmatmul.msk.bf16.vlgmr.msra.gmra.mxu1 %vm369_vm1, %v511_v58  ;;  %814 = vmatpush.bf16.msrb.mxu2 %v802_v61 }
 0x1da   :  { %v886_v62 = vpop.permute.xlu1 %885 }
 0x1db   :  { %v844_v63 = vpop.permute.xlu0 %843  ;;  %898 = vmatpush.bf16.msra.mxu2 %v886_v62 }
 0x1dc   :  { %856 = vmatpush.bf16.msrb.mxu0 %v844_v63 }
 0x1e3   :  { %v865_v0 = vpop.permute.xlu0 %864 }
 0x1e4   :  { %877 = vmatpush.bf16.msra.mxu1 %v865_v0 }
 0x1eb   :  { %v8445_v1 = vpop.permute.xlu0 %1064 }
 0x1f3   :  { %v8447_v2 = vpop.permute.xlu0 %1042 }
 0x1fb   :  { %v8452_v7 = vpop.permute.xlu0 %1090 }
 0x233   :  { %v560_v6 = vpop.xlane.xlu2 %559 }
 0x234   :  { %v606_v10 = vsub.f32 %v385_v51, %v560_v6  ;;  %v8512_v51 = vpop.permute.xlu1 %1018 }
 0x236   :  { %v622_v14 = vmul.f32 1.442695, %v606_v10 }
 0x237   :  { %v8458_v12 = vpop.f32.mrf.mxu2 }
 0x238   :  { %7936 = vpow2.f32 %v622_v14  ;;  %v576_v22 = vsel %vm369_vm1, %v8458_v12, -inf }
 0x239   :  { %v409_v4 = vpop.f32.mrf.mxu0 }
 0x23a   :  { %v564_v5 = vsel %vm369_vm1, %v409_v4, -inf }
 0x23b   :  { %565 = vmax.xlane.f32.xlu2 %v564_v5  ;;  %v563_v16 = vpop.xlane.xlu0 %562 }
 0x23c   :  { %v607_v20 = vsub.f32 %v387_v56, %v563_v16 }
 0x23e   :  { %v624_v25 = vmul.f32 1.442695, %v607_v20  ;;  %v8470_v28 = vpop.eup %7936 }
 0x23f   :  { %v8454_v8 = vpop.f32.mrf.mxu3  ;;  %v8468_v24 = vpop.f32.mrf.mxu2  ;;  %v654_v35 = vsel %vm369_vm1, %v8470_v28, 0.0 }
 0x240   :  { %v582_v9 = vsel %vm369_vm1, %v8454_v8, -inf  ;;  %7938 = vpow2.f32 %v624_v25  ;;  %v579_v40 = vsel %vm369_vm1, %v8468_v24, -inf }
 0x241   :  { %v433_v11 = vpop.f32.mrf.mxu1  ;;  %583 = vmax.xlane.f32.xlu0 %v582_v9  ;;  %v411_v15 = vpop.f32.mrf.mxu0 }
 0x242   :  { %v570_v13 = vsel %vm369_vm1, %v433_v11, -inf  ;;  %v567_v18 = vsel %vm369_vm1, %v411_v15, -inf }
 0x243   :  { %571 = vmax.xlane.f32.xlu1 %v570_v13 }
 0x246   :  { %v8486_v39 = vpop.eup %7938 }
 0x247   :  { %v8472_v29 = vpop.f32.mrf.mxu3  ;;  %v8482_v37 = vpop.f32.mrf.mxu2  ;;  %v657_v42 = vsel %vm369_vm1, %v8486_v39, 0.0 }
 0x248   :  { %v585_v34 = vsel %vm369_vm1, %v8472_v29, -inf  ;;  %v600_v45 = vsel %vm369_vm1, %v8482_v37, -inf }
 0x249   :  { %v8462_v19 = vpop.f32.mrf.mxu1  ;;  %568 = vmax.xlane.f32.xlu0 %v567_v18  ;;  %v8484_v38 = vpop.f32.mrf.mxu0 }
 0x24a   :  { %v573_v23 = vsel %vm369_vm1, %v8462_v19, -inf  ;;  %v588_v41 = vsel %vm369_vm1, %v8484_v38, -inf }
 0x24b   :  { %577 = vmax.xlane.f32.xlu1 %v576_v22  ;;  %574 = vmax.xlane.f32.xlu2 %v573_v23 }
 0x24f   :  { %v8496_v44 = vpop.f32.mrf.mxu2 }
 0x250   :  { %v603_v47 = vsel %vm369_vm1, %v8496_v44, -inf }
 0x251   :  { %v8474_v33 = vpop.f32.mrf.mxu1  ;;  %v8508_v48 = vpop.f32.mrf.mxu0 }
 0x252   :  { %v594_v36 = vsel %vm369_vm1, %v8474_v33, -inf  ;;  %v591_v49 = vsel %vm369_vm1, %v8508_v48, -inf }
 0x253   :  { %586 = vmax.xlane.f32.xlu1 %v585_v34  ;;  %655 = vadd.xlane.f32.xlu2 %v654_v35 }
 0x254   :  { %595 = vmax.xlane.f32.xlu0 %v594_v36 }
 0x259   :  { %v8494_v43 = vpop.f32.mrf.mxu1 }
 0x25a   :  { %v597_v46 = vsel %vm369_vm1, %v8494_v43, -inf }
 0x25b   :  { %580 = vmax.xlane.f32.xlu2 %v579_v40  ;;  %589 = vmax.xlane.f32.xlu1 %v588_v41 }
 0x25c   :  { %658 = vadd.xlane.f32.xlu0 %v657_v42 }
 0x263   :  { %601 = vmax.xlane.f32.xlu2 %v600_v45  ;;  %598 = vmax.xlane.f32.xlu1 %v597_v46 }
 0x264   :  { %604 = vmax.xlane.f32.xlu0 %v603_v47 }
 0x278   :  { %1016 = vrot.lane.b32.xlu0 %v8421_v31, %s8294_s10 }
 0x27b   :  { %1162 = vrot.lane.b32.xlu2 %v8410_v21, %s8290_s28 }
 0x2a4   :  { %592 = vmax.xlane.f32.xlu2 %v591_v49 }
 0x2ae   :  { %v566_v50 = vpop.xlane.xlu2 %565 }
 0x2af   :  { %v608_v52 = vsub.f32 %v409_v4, %v566_v50 }
 0x2b1   :  { %v626_v53 = vmul.f32 1.442695, %v608_v52 }
 0x2b3   :  { %7940 = vpow2.f32 %v626_v53 }
 0x2b4   :  { %v584_v54 = vpop.xlane.xlu0 %583 }
 0x2b5   :  { %v614_v9 = vsub.f32 %v8454_v8, %v584_v54 }
 0x2b6   :  { %v572_v55 = vpop.xlane.xlu1 %571 }
 0x2b7   :  { %v610_v56 = vsub.f32 %v433_v11, %v572_v55  ;;  %v638_v14 = vmul.f32 1.442695, %v614_v9 }
 0x2b9   :  { %v8514_v57 = vpop.eup %7940  ;;  %v630_v58 = vmul.f32 1.442695, %v610_v56 }
 0x2ba   :  { %v660_v59 = vsel %vm369_vm1, %v8514_v57, 0.0 }
 0x2bb   :  { %661 = vadd.xlane.f32.xlu1 %v660_v59  ;;  %7942 = vpow2.f32 %v630_v58 }
 0x2bc   :  { %v569_v60 = vpop.xlane.xlu0 %568 }
 0x2bd   :  { %v609_v61 = vsub.f32 %v411_v15, %v569_v60 }
 0x2be   :  { %v578_v62 = vpop.xlane.xlu1 %577  ;;  %v575_v63 = vpop.xlane.xlu2 %574 }
 0x2bf   :  { %v628_v0 = vmul.f32 1.442695, %v609_v61  ;;  %v612_v4 = vsub.f32 %v8458_v12, %v578_v62  ;;  %v611_v5 = vsub.f32 %v8462_v19, %v575_v63 }
 0x2c1   :  { %v8520_v6 = vpop.eup %7942  ;;  %7944 = vpow2.f32 %v628_v0  ;;  %v634_v10 = vmul.f32 1.442695, %v612_v4  ;;  %v632_v13 = vmul.f32 1.442695, %v611_v5 }
 0x2c2   :  { %v666_v11 = vsel %vm369_vm1, %v8520_v6, 0.0 }
 0x2c3   :  { %7946 = vpow2.f32 %v634_v10  ;;  %667 = vadd.xlane.f32.xlu1 %v666_v11 }
 0x2c4   :  { %7948 = vpow2.f32 %v632_v13 }
 0x2c5   :  { %7950 = vpow2.f32 %v638_v14 }
 0x2c6   :  { %v587_v15 = vpop.xlane.xlu1 %586  ;;  %v656_v16 = vpop.xlane.xlu2 %655 }
 0x2c7   :  { %v8525_v18 = vpop.eup %7944  ;;  %v615_v12 = vsub.f32 %v8472_v29, %v587_v15  ;;  %v596_v19 = vpop.xlane.xlu0 %595 }
 0x2c8   :  { %v663_v8 = vsel %vm369_vm1, %v8525_v18, 0.0  ;;  %v618_v23 = vsub.f32 %v8474_v33, %v596_v19 }
 0x2c9   :  { %v8530_v20 = vpop.eup %7946  ;;  %v640_v22 = vmul.f32 1.442695, %v615_v12  ;;  %664 = vadd.xlane.f32.xlu2 %v663_v8 }
 0x2ca   :  { %v672_v25 = vsel %vm369_vm1, %v8530_v20, 0.0  ;;  %v8535_v34 = vpop.eup %7948  ;;  %v646_v35 = vmul.f32 1.442695, %v618_v23 }
 0x2cb   :  { %7952 = vpow2.f32 %v640_v22  ;;  %673 = vadd.xlane.f32.xlu1 %v672_v25  ;;  %v8537_v40 = vpop.eup %7950  ;;  %v669_v33 = vsel %vm369_vm1, %v8535_v34, 0.0 }
 0x2cc   :  { %7954 = vrcp.f32 %v656_v16  ;;  %v678_v52 = vsel %vm369_vm1, %v8537_v40, 0.0 }
 0x2ce   :  { %v581_v29 = vpop.xlane.xlu2 %580  ;;  %v590_v36 = vpop.xlane.xlu1 %589 }
 0x2cf   :  { %v613_v41 = vsub.f32 %v8468_v24, %v581_v29  ;;  %v659_v42 = vpop.xlane.xlu0 %658  ;;  %v616_v45 = vsub.f32 %v8484_v38, %v590_v36 }
 0x2d0   :  { %7956 = vrcp.f32 %v659_v42 }
 0x2d1   :  { %v8543_v46 = vpop.eup %7952  ;;  %7958 = vpow2.f32 %v646_v35  ;;  %v636_v47 = vmul.f32 1.442695, %v613_v41  ;;  %v642_v49 = vmul.f32 1.442695, %v616_v45  ;;  %670 = vadd.xlane.f32.xlu2 %v669_v33 }
 0x2d2   :  { %v681_v50 = vsel %vm369_vm1, %v8543_v46, 0.0  ;;  %v7955_v24 = vpop.eup %7954 }
 0x2d3   :  { %7960 = vpow2.f32 %v636_v47  ;;  %682 = vadd.xlane.f32.xlu0 %v681_v50  ;;  %679 = vadd.xlane.f32.xlu1 %v678_v52  ;;  %v718_v56 = vmul.f32 %v7955_v24, %v8470_v28 }
 0x2d4   :  { %7962 = vpow2.f32 %v642_v49 }
 0x2d6   :  { %v7957_v38 = vpop.eup %7956  ;;  %v602_v53 = vpop.xlane.xlu2 %601 }
 0x2d7   :  { %v599_v54 = vpop.xlane.xlu1 %598  ;;  %v8549_v55 = vpop.eup %7958  ;;  %v719_v58 = vmul.f32 %v7957_v38, %v8486_v39  ;;  %v620_v59 = vsub.f32 %v8482_v37, %v602_v53  ;;  %v1000_v37 = vsel %vm369_vm1, %v8410_v21, 0  ;;  %v1024_v38 = vsel %vm369_vm1, %v8512_v51, 0 }
 0x2d8   :  { %v605_v60 = vpop.xlane.xlu0 %604  ;;  %v619_v61 = vsub.f32 %v8494_v43, %v599_v54  ;;  %v690_v28 = vsel %vm369_vm1, %v8549_v55, 0.0 }
 0x2d9   :  { %v621_v62 = vsub.f32 %v8496_v44, %v605_v60  ;;  %v8556_v63 = vpop.eup %7960  ;;  %v734_v0 = vpack.c.bf16 %v719_v58, %v718_v56  ;;  %v650_v4 = vmul.f32 1.442695, %v620_v59 }
 0x2da   :  { %v648_v5 = vmul.f32 1.442695, %v619_v61  ;;  %v8558_v9 = vpop.eup %7962  ;;  %v675_v39 = vsel %vm369_vm1, %v8556_v63, 0.0 }
 0x2db   :  { %v652_v10 = vmul.f32 1.442695, %v621_v62  ;;  %7964 = vpow2.f32 %v650_v4  ;;  %6447 = vmatmul.msk.bf16.vlgmr.msra.gmra.mxu3 %vm369_vm1, %v734_v0  ;;  %691 = vadd.xlane.f32.xlu1 %v690_v28  ;;  %v684_v43 = vsel %vm369_vm1, %v8558_v9, 0.0  ;;  %v1048_v62 = vsel %vm369_vm1, %v8447_v2, 0 }
 0x2dc   :  { %1009 = vmatpush.bf16.xpose.msra.mxu3 %v1000_v37  ;;  %685 = vadd.xlane.f32.xlu0 %v684_v43  ;;  %v1072_v37 = vsel %vm369_vm1, %v8449_v3, 0 }
 0x2dd   :  { %7966 = vpow2.f32 %v652_v10  ;;  %676 = vadd.xlane.f32.xlu2 %v675_v39 }
 0x2de   :  { %7968 = vpow2.f32 %v648_v5  ;;  %v8593_v12 = vpop.permute.xlu2 %1162 }
 0x2e1   :  { %v8569_v44 = vpop.eup %7964 }
 0x2e2   :  { %v696_v13 = vsel %vm369_vm1, %v8569_v44, 0.0 }
 0x2e3   :  { %v8571_v11 = vpop.eup %7966 }
 0x2e4   :  { %v8575_v14 = vpop.eup %7968  ;;  %v699_v15 = vsel %vm369_vm1, %v8571_v11, 0.0 }
 0x2e5   :  { %700 = vadd.xlane.f32.xlu1 %v699_v15  ;;  %v693_v16 = vsel %vm369_vm1, %v8575_v14, 0.0  ;;  %697 = vadd.xlane.f32.xlu2 %v696_v13 }
 0x2e6   :  { %694 = vadd.xlane.f32.xlu0 %v693_v16 }
 0x2ea   :  { %v8604_v41 = vpop.permute.xlu0 %1016 }
 0x2fa   :  { %1160 = vrot.lane.b32.xlu0 %v8421_v31, %s8290_s28 }
 0x2fe   :  { %1040 = vrot.lane.b32.xlu1 %v8421_v31, %s8293_s9 }
 0x302   :  { %1112 = vrot.lane.b32.xlu0 %v8421_v31, %s8296_s12 }
 0x306   :  { %1114 = vrot.lane.b32.xlu1 %v8410_v21, %s8296_s12 }
 0x30a   :  { %1385 = vrot.lane.b32.xlu0 %v8408_v17, %s8294_s10 }
 0x30e   :  { %1136 = vrot.lane.b32.xlu1 %v8421_v31, %s8295_s11 }
 0x316   :  { %1406 = vrot.lane.b32.xlu1 %v8408_v17, %s8293_s9 }
 0x317   :  { %v593_v19 = vpop.xlane.xlu2 %592 }
 0x318   :  { %v617_v8 = vsub.f32 %v8508_v48, %v593_v19 }
 0x31a   :  { %v644_v22 = vmul.f32 1.442695, %v617_v8 }
 0x31c   :  { %7970 = vpow2.f32 %v644_v22 }
 0x322   :  { %v8598_v23 = vpop.eup %7970 }
 0x323   :  { %v687_v25 = vsel %vm369_vm1, %v8598_v23, 0.0 }
 0x324   :  { %688 = vadd.xlane.f32.xlu2 %v687_v25 }
 0x32e   :  { %v662_v35 = vpop.xlane.xlu1 %661 }
 0x32f   :  { %7972 = vrcp.f32 %v662_v35 }
 0x335   :  { %v7973_v48 = vpop.eup %7972 }
 0x336   :  { %v668_v29 = vpop.xlane.xlu1 %667  ;;  %v720_v33 = vmul.f32 %v7973_v48, %v8514_v57 }
 0x33c   :  { %1088 = vrot.lane.b32.xlu2 %v8421_v31, %s8291_s29  ;;  %v665_v36 = vpop.xlane.xlu2 %664 }
 0x33d   :  { %7974 = vrcp.f32 %v665_v36 }
 0x33e   :  { %v674_v42 = vpop.xlane.xlu1 %673  ;;  %7976 = vrcp.f32 %v668_v29 }
 0x343   :  { %v7975_v45 = vpop.eup %7974 }
 0x344   :  { %v721_v47 = vmul.f32 %v7975_v45, %v8525_v18  ;;  %1138 = vrot.lane.b32.xlu2 %v8410_v21, %s8295_s11  ;;  %v671_v49 = vpop.xlane.xlu2 %670  ;;  %v7977_v53 = vpop.eup %7976 }
 0x345   :  { %7978 = vrcp.f32 %v671_v49  ;;  %v722_v18 = vmul.f32 %v7977_v53, %v8520_v6 }
 0x346   :  { %v758_v50 = vpack.c.bf16 %v721_v47, %v720_v33  ;;  %v683_v52 = vpop.xlane.xlu0 %682  ;;  %v680_v24 = vpop.xlane.xlu1 %679 }
 0x347   :  { %7980 = vrcp.f32 %v683_v52 }
 0x348   :  { %7982 = vrcp.f32 %v680_v24  ;;  %6448 = vmatmul.msk.bf16.vlgmr.msra.gmra.mxu0 %vm369_vm1, %v758_v50 }
 0x349   :  { %1033 = vmatpush.bf16.xpose.msra.mxu0 %v1024_v38  ;;  %7984 = vrcp.f32 %v674_v42 }
 0x34b   :  { %v7979_v57 = vpop.eup %7978 }
 0x34c   :  { %v723_v54 = vmul.f32 %v7979_v57, %v8535_v34  ;;  %1427 = vrot.lane.b32.xlu2 %v8408_v17, %s8292_s30  ;;  %v1096_v34 = vsel %vm369_vm1, %v8452_v7, 0 }
 0x34d   :  { %v7981_v21 = vpop.eup %7980 }
 0x34e   :  { %v7983_v56 = vpop.eup %7982  ;;  %v779_v58 = vpack.c.bf16 %v723_v54, %v722_v18  ;;  %v727_v59 = vmul.f32 %v7981_v21, %v8543_v46  ;;  %v692_v61 = vpop.xlane.xlu1 %691 }
 0x34f   :  { %v726_v51 = vmul.f32 %v7983_v56, %v8537_v40  ;;  %v686_v60 = vpop.xlane.xlu0 %685  ;;  %v7985_v46 = vpop.eup %7984 }
 0x350   :  { %v677_v0 = vpop.xlane.xlu2 %676  ;;  %6449 = vmatmul.msk.bf16.vlgmr.msrb.gmra.mxu1 %vm369_vm1, %v779_v58  ;;  %v724_v40 = vmul.f32 %v7985_v46, %v8530_v20 }
 0x351   :  { %v821_v6 = vpack.c.bf16 %v727_v59, %v726_v51  ;;  %7986 = vrcp.f32 %v677_v0  ;;  %1057 = vmatpush.bf16.xpose.msrb.mxu1 %v1048_v62 }
 0x352   :  { %7988 = vrcp.f32 %v692_v61 }
 0x353   :  { %6451 = vmatmul.msk.bf16.vlgmr.msrb.gmra.mxu3 %vm369_vm1, %v821_v6 }
 0x354   :  { %1105 = vmatpush.bf16.xpose.msrb.mxu3 %v1096_v34 }
 0x357   :  { %v7987_v4 = vpop.eup %7986 }
 0x358   :  { %v725_v5 = vmul.f32 %v7987_v4, %v8556_v63  ;;  %v701_v10 = vpop.xlane.xlu1 %700  ;;  %v698_v39 = vpop.xlane.xlu2 %697 }
 0x359   :  { %v695_v2 = vpop.xlane.xlu0 %694  ;;  %v7989_v7 = vpop.eup %7988 }
 0x35a   :  { %7990 = vrcp.f32 %v695_v2  ;;  %v800_v28 = vpack.c.bf16 %v725_v5, %v724_v40  ;;  %v730_v13 = vmul.f32 %v7989_v7, %v8549_v55  ;;  %v1168_v55 = vsel %vm369_vm1, %v8593_v12, 0 }
 0x35b   :  { %7992 = vrcp.f32 %v701_v10 }
 0x35c   :  { %6450 = vmatmul.msk.bf16.vlgmr.msrb.gmra.mxu2 %vm369_vm1, %v800_v28  ;;  %7994 = vrcp.f32 %v698_v39 }
 0x35d   :  { %1081 = vmatpush.bf16.xpose.msrb.mxu2 %v1072_v37  ;;  %7996 = vrcp.f32 %v686_v60 }
 0x35e   :  { %v8655_v49 = vpop.f32.mrf.mxu3 }
 0x360   :  { %v7991_v43 = vpop.eup %7990 }
 0x361   :  { %v731_v20 = vmul.f32 %v7991_v43, %v8575_v14  ;;  %v7993_v63 = vpop.eup %7992 }
 0x362   :  { %v7995_v16 = vpop.eup %7994  ;;  %v733_v3 = vmul.f32 %v7993_v63, %v8571_v11 }
 0x363   :  { %v863_v15 = vpack.c.bf16 %v731_v20, %v730_v13  ;;  %6455 = vmatmul.msk.bf16.vlgmr.msra.gmra.mxu3 %vm369_vm1, %v8421_v31  ;;  %v732_v19 = vmul.f32 %v7995_v16, %v8569_v44  ;;  %v7997_v44 = vpop.eup %7996 }
 0x364   :  { %1377 = vmatpush.bf16.msra.mxu3 %v8408_v17  ;;  %v728_v12 = vmul.f32 %v7997_v44, %v8558_v9 }
 0x365   :  { %6453 = vmatmul.msk.bf16.vlgmr.msra.gmra.mxu1 %vm369_vm1, %v863_v15  ;;  %v884_v8 = vpack.c.bf16 %v733_v3, %v732_v19 }
 0x366   :  { %v8657_v50 = vpop.f32.mrf.mxu3 }
 0x36c   :  { %6454 = vmatmul.msk.bf16.vlgmr.msra.gmra.mxu2 %vm369_vm1, %v884_v8  ;;  %v1161_v31 = vpop.permute.xlu0 %1160 }
 0x36d   :  { %1177 = vmatpush.bf16.xpose.msra.mxu2 %v1168_v55 }
 0x370   :  { %v1041_v14 = vpop.permute.xlu1 %1040 }
 0x374   :  { %v1113_v33 = vpop.permute.xlu0 %1112 }
 0x375   :  { %6457 = vmatmul.msk.bf16.vlgmr.msrb.gmra.mxu1 %vm369_vm1, %v1041_v14 }
 0x378   :  { %v1115_v22 = vpop.permute.xlu1 %1114 }
 0x37c   :  { %6458 = vmatmul.msk.bf16.vlgmr.msrb.gmra.mxu2 %vm369_vm1, %v8445_v1  ;;  %v1120_v1 = vsel %vm369_vm1, %v1115_v22, 0 }
 0x380   :  { %v1137_v35 = vpop.permute.xlu1 %1136 }
 0x388   :  { %v1407_v47 = vpop.permute.xlu1 %1406 }
 0x38c   :  { %6462 = vmatmul.msk.bf16.vlgmr.msra.gmra.mxu2 %vm369_vm1, %v1161_v31 }
 0x397   :  { %v689_v11 = vpop.xlane.xlu2 %688 }
 0x398   :  { %7998 = vrcp.f32 %v689_v11 }
 0x39e   :  { %v7999_v25 = vpop.eup %7998 }
 0x39f   :  { %v729_v29 = vmul.f32 %v7999_v25, %v8598_v23  ;;  %v1089_v36 = vpop.permute.xlu2 %1088  ;;  %v1386_v23 = vpop.permute.xlu0 %1385 }
 0x3a0   :  { %6459 = vmatmul.msk.bf16.vlgmr.msrb.gmra.mxu3 %vm369_vm1, %v1089_v36 }
 0x3a1   :  { %v842_v42 = vpack.c.bf16 %v729_v29, %v728_v12 }
 0x3a3   :  { %6452 = vmatmul.msk.bf16.vlgmr.msrb.gmra.mxu0 %vm369_vm1, %v842_v42 }
 0x3a4   :  { %1129 = vmatpush.bf16.xpose.msrb.mxu0 %v1120_v1 }
 0x3a7   :  { %v1139_v48 = vpop.permute.xlu2 %1138 }
 0x3a8   :  { %v1144_v45 = vsel %vm369_vm1, %v1139_v48, 0 }
 0x3a9   :  { %1153 = vmatpush.bf16.xpose.msra.mxu1 %v1144_v45 }
 0x3af   :  { %v1428_v9 = vpop.permute.xlu2 %1427 }
 0x3b0   :  { %6461 = vmatmul.msk.bf16.vlgmr.msra.gmra.mxu1 %vm369_vm1, %v1137_v35  ;;  %1440 = vmatpush.bf16.msrb.mxu2 %v1428_v9 }
 0x3b1   :  { %1419 = vmatpush.bf16.msrb.mxu1 %v1407_v47 }
 0x3b3   :  { %6456 = vmatmul.msk.bf16.vlgmr.msra.gmra.mxu0 %vm369_vm1, %v8604_v41 }
 0x3b4   :  { %1398 = vmatpush.bf16.msra.mxu0 %v1386_v23 }
 0x3c3   :  { %6460 = vmatmul.msk.bf16.vlgmr.msrb.gmra.mxu0 %vm369_vm1, %v1113_v33 }
 0x3c5   :  { %v8673_v58 = vpop.f32.mrf.mxu0 }
 0x3cd   :  { %v8659_v52 = vpop.f32.mrf.mxu1  ;;  %v8677_v51 = vpop.f32.mrf.mxu0 }
 0x3d5   :  { %v8663_v38 = vpop.f32.mrf.mxu1 }
 0x3d6   :  { %v8661_v24 = vpop.f32.mrf.mxu3 }
 0x3de   :  { %v8665_v53 = vpop.f32.mrf.mxu3 }
 0x3df   :  { %v8675_v59 = vpop.f32.mrf.mxu2 }
 0x3e2   :  { %v8667_v57 = vpop.f32.mrf.mxu1 }
 0x3e6   :  { %v1011_v18 = vpop.f32.mrf.mxu3 }
 0x3e7   :  { %v1184_v41 = vsel %vm369_vm1, %v1011_v18, -inf  ;;  %v8679_v60 = vpop.f32.mrf.mxu2 }
 0x3e8   :  { %1185 = vmax.xlane.f32.xlu2 %v1184_v41 }
 0x3ea   :  { %v8670_v54 = vpop.f32.mrf.mxu1 }
 0x3ee   :  { %v1013_v4 = vpop.f32.mrf.mxu3 }
 0x3ef   :  { %v8683_v62 = vpop.f32.mrf.mxu2  ;;  %v1187_v2 = vsel %vm369_vm1, %v1013_v4, -inf }
 0x3f2   :  { %v1059_v21 = vpop.f32.mrf.mxu1 }
 0x3f3   :  { %v1196_v56 = vsel %vm369_vm1, %v1059_v21, -inf }
 0x3f4   :  { %1197 = vmax.xlane.f32.xlu2 %v1196_v56 }
 0x3f7   :  { %v8687_v6 = vpop.f32.mrf.mxu2 }
 0x3fa   :  { %v8694_v28 = vpop.f32.mrf.mxu1 }
 0x3fb   :  { %v1199_v37 = vsel %vm369_vm1, %v8694_v28, -inf }
 0x3ff   :  { %v8690_v40 = vpop.f32.mrf.mxu2 }
 0x400   :  { %v1202_v7 = vsel %vm369_vm1, %v8690_v40, -inf }
 0x407   :  { %v8704_v13 = vpop.f32.mrf.mxu2 }
 0x408   :  { %v1205_v3 = vsel %vm369_vm1, %v8704_v13, -inf }
 0x40f   :  { %v8716_v19 = vpop.f32.mrf.mxu2 }
 0x410   :  { %v1226_v14 = vsel %vm369_vm1, %v8716_v19, -inf }
 0x417   :  { %v8728_v11 = vpop.f32.mrf.mxu2 }
 0x418   :  { %v1229_v25 = vsel %vm369_vm1, %v8728_v11, -inf }
 0x420   :  { %v8681_v61 = vpop.f32.mrf.mxu0 }
 0x423   :  { %v8706_v20 = vpop.f32.mrf.mxu3 }
 0x424   :  { %v1208_v16 = vsel %vm369_vm1, %v8706_v20, -inf }
 0x428   :  { %v8685_v0 = vpop.f32.mrf.mxu0 }
 0x42b   :  { %v8720_v55 = vpop.f32.mrf.mxu3 }
 0x42c   :  { %v1211_v22 = vsel %vm369_vm1, %v8720_v55, -inf }
 0x42d   :  { %v8718_v8 = vpop.f32.mrf.mxu1 }
 0x42e   :  { %v1220_v31 = vsel %vm369_vm1, %v8718_v8, -inf }
 0x430   :  { %v1035_v34 = vpop.f32.mrf.mxu0 }
 0x431   :  { %v1190_v46 = vsel %vm369_vm1, %v1035_v34, -inf }
 0x432   :  { %1191 = vmax.xlane.f32.xlu0 %v1190_v46 }
 0x435   :  { %v8730_v44 = vpop.f32.mrf.mxu1 }
 0x436   :  { %v1223_v12 = vsel %vm369_vm1, %v8730_v44, -inf }
 0x438   :  { %v1037_v5 = vpop.f32.mrf.mxu0 }
 0x439   :  { %v1193_v10 = vsel %vm369_vm1, %v1037_v5, -inf }
 0x43a   :  { %1188 = vmax.xlane.f32.xlu0 %v1187_v2  ;;  %1194 = vmax.xlane.f32.xlu1 %v1193_v10 }
 0x440   :  { %v8696_v39 = vpop.f32.mrf.mxu0 }
 0x441   :  { %v1214_v43 = vsel %vm369_vm1, %v8696_v39, -inf }
 0x442   :  { %1200 = vmax.xlane.f32.xlu0 %v1199_v37  ;;  %1203 = vmax.xlane.f32.xlu1 %v1202_v7 }
 0x443   :  { %1215 = vmax.xlane.f32.xlu2 %v1214_v43 }
 0x448   :  { %v8708_v63 = vpop.f32.mrf.mxu0 }
 0x449   :  { %v1217_v15 = vsel %vm369_vm1, %v8708_v63, -inf }
 0x44a   :  { %1218 = vmax.xlane.f32.xlu0 %v1217_v15  ;;  %1209 = vmax.xlane.f32.xlu1 %v1208_v16 }
 0x44b   :  { %1206 = vmax.xlane.f32.xlu2 %v1205_v3 }
 0x452   :  { %1227 = vmax.xlane.f32.xlu0 %v1226_v14  ;;  %1221 = vmax.xlane.f32.xlu1 %v1220_v31 }
 0x453   :  { %1212 = vmax.xlane.f32.xlu2 %v1211_v22 }
 0x45a   :  { %1230 = vmax.xlane.f32.xlu1 %v1229_v25 }
 0x45b   :  { %1224 = vmax.xlane.f32.xlu2 %v1223_v12  ;;  %v1186_v35 = vpop.xlane.xlu2 %1185 }
 0x45c   :  { %v1232_v29 = vsub.f32 %v1011_v18, %v1186_v35 }
 0x45e   :  { %v1248_v36 = vmul.f32 1.442695, %v1232_v29 }
 0x460   :  { %8000 = vpow2.f32 %v1248_v36 }
 0x466   :  { %v8736_v42 = vpop.eup %8000 }
 0x467   :  { %v1198_v1 = vpop.xlane.xlu2 %1197  ;;  %v1280_v45 = vsel %vm369_vm1, %v8736_v42, 0.0 }
 0x468   :  { %v1236_v48 = vsub.f32 %v1059_v21, %v1198_v1  ;;  %1281 = vadd.xlane.f32.xlu0 %v1280_v45 }
 0x46a   :  { %v1256_v33 = vmul.f32 1.442695, %v1236_v48 }
 0x46c   :  { %8002 = vpow2.f32 %v1256_v33 }
 0x472   :  { %v8740_v47 = vpop.eup %8002 }
 0x473   :  { %v1292_v9 = vsel %vm369_vm1, %v8740_v47, 0.0 }
 0x474   :  { %1293 = vadd.xlane.f32.xlu0 %v1292_v9 }
 0x4a5   :  { %v1192_v23 = vpop.xlane.xlu0 %1191 }
 0x4a6   :  { %v1234_v18 = vsub.f32 %v1035_v34, %v1192_v23 }
 0x4a8   :  { %v1252_v41 = vmul.f32 1.442695, %v1234_v18 }
 0x4aa   :  { %8004 = vpow2.f32 %v1252_v41 }
 0x4ad   :  { %v1189_v56 = vpop.xlane.xlu0 %1188  ;;  %v1195_v46 = vpop.xlane.xlu1 %1194 }
 0x4ae   :  { %v1233_v2 = vsub.f32 %v1013_v4, %v1189_v56  ;;  %v1235_v21 = vsub.f32 %v1037_v5, %v1195_v46 }
 0x4b0   :  { %v8744_v10 = vpop.eup %8004  ;;  %v1250_v37 = vmul.f32 1.442695, %v1233_v2  ;;  %v1254_v7 = vmul.f32 1.442695, %v1235_v21 }
 0x4b1   :  { %v1286_v43 = vsel %vm369_vm1, %v8744_v10, 0.0 }
 0x4b2   :  { %8006 = vpow2.f32 %v1250_v37  ;;  %1287 = vadd.xlane.f32.xlu1 %v1286_v43 }
 0x4b3   :  { %8008 = vpow2.f32 %v1254_v7 }
 0x4b5   :  { %v1201_v15 = vpop.xlane.xlu0 %1200  ;;  %v1204_v16 = vpop.xlane.xlu1 %1203 }
 0x4b6   :  { %v1237_v34 = vsub.f32 %v8694_v28, %v1201_v15  ;;  %v1238_v3 = vsub.f32 %v8690_v40, %v1204_v16  ;;  %v1216_v14 = vpop.xlane.xlu2 %1215 }
 0x4b7   :  { %v1242_v22 = vsub.f32 %v8696_v39, %v1216_v14 }
 0x4b8   :  { %v8750_v31 = vpop.eup %8006  ;;  %v1258_v4 = vmul.f32 1.442695, %v1237_v34  ;;  %v1260_v5 = vmul.f32 1.442695, %v1238_v3 }
 0x4b9   :  { %v8753_v25 = vpop.eup %8008  ;;  %v1283_v12 = vsel %vm369_vm1, %v8750_v31, 0.0  ;;  %v1268_v40 = vmul.f32 1.442695, %v1242_v22 }
 0x4ba   :  { %8010 = vpow2.f32 %v1258_v4  ;;  %1284 = vadd.xlane.f32.xlu1 %v1283_v12  ;;  %v1289_v35 = vsel %vm369_vm1, %v8753_v25, 0.0 }
 0x4bb   :  { %8012 = vpow2.f32 %v1260_v5  ;;  %1290 = vadd.xlane.f32.xlu2 %v1289_v35 }
 0x4bc   :  { %8014 = vpow2.f32 %v1268_v40 }
 0x4bd   :  { %v1219_v28 = vpop.xlane.xlu0 %1218  ;;  %v1210_v29 = vpop.xlane.xlu1 %1209 }
 0x4be   :  { %v1243_v36 = vsub.f32 %v8708_v63, %v1219_v28  ;;  %v1240_v1 = vsub.f32 %v8706_v20, %v1210_v29  ;;  %v1207_v39 = vpop.xlane.xlu2 %1206 }
 0x4bf   :  { %v1239_v7 = vsub.f32 %v8704_v13, %v1207_v39  ;;  %v7791_v39 = vpack.i.bf16 %v8677_v51, %v8673_v58 }
 0x4c0   :  { %v8761_v48 = vpop.eup %8010  ;;  %v1270_v45 = vmul.f32 1.442695, %v1243_v36  ;;  %v1264_v33 = vmul.f32 1.442695, %v1240_v1 }
 0x4c1   :  { %v8763_v9 = vpop.eup %8012  ;;  %v1295_v23 = vsel %vm369_vm1, %v8761_v48, 0.0 }
 0x4c2   :  { %8016 = vpow2.f32 %v1270_v45  ;;  %1296 = vadd.xlane.f32.xlu1 %v1295_v23  ;;  %v1298_v18 = vsel %vm369_vm1, %v8763_v9, 0.0  ;;  %v8769_v20 = vpop.eup %8014  ;;  %v7806_v45 = vpack.i.bf16 %v8665_v53, %v8661_v24  ;;  %v7821_v23 = vpack.i.bf16 %v8687_v6, %v8683_v62 }
 0x4c3   :  { %8018 = vpow2.f32 %v1264_v33  ;;  %1299 = vadd.xlane.f32.xlu2 %v1298_v18  ;;  %v1310_v16 = vsel %vm369_vm1, %v8769_v20, 0.0  ;;  %v7796_v33 = vpack.i.bf16 %v8663_v38, %v8659_v52  ;;  %v7811_v24 = vpack.i.bf16 %v8685_v0, %v8681_v61 }
 0x4c5   :  { %v1222_v63 = vpop.xlane.xlu1 %1221  ;;  %v1228_v34 = vpop.xlane.xlu0 %1227 }
 0x4c6   :  { %v1244_v41 = vsub.f32 %v8718_v8, %v1222_v63  ;;  %v1213_v56 = vpop.xlane.xlu2 %1212  ;;  %v1246_v4 = vsub.f32 %v8716_v19, %v1228_v34 }
 0x4c7   :  { %v1241_v46 = vsub.f32 %v8720_v55, %v1213_v56  ;;  %v1262_v55 = vmul.f32 1.442695, %v1239_v7 }
 0x4c8   :  { %v8773_v2 = vpop.eup %8016  ;;  %v1272_v21 = vmul.f32 1.442695, %v1244_v41  ;;  %v1276_v40 = vmul.f32 1.442695, %v1246_v4  ;;  %v7801_v41 = vpack.i.bf16 %v8679_v60, %v8675_v59  ;;  %v7816_v60 = vpack.i.bf16 %v8670_v54, %v8667_v57 }
 0x4c9   :  { %v8775_v37 = vpop.eup %8018  ;;  %v1266_v43 = vmul.f32 1.442695, %v1241_v46  ;;  %v1313_v15 = vsel %vm369_vm1, %v8773_v2, 0.0 }
 0x4ca   :  { %v1304_v8 = vsel %vm369_vm1, %v8775_v37, 0.0  ;;  %1311 = vadd.xlane.f32.xlu1 %v1310_v16  ;;  %8020 = vpow2.f32 %v1272_v21 }
 0x4cb   :  { %1314 = vadd.xlane.f32.xlu2 %v1313_v15  ;;  %1305 = vadd.xlane.f32.xlu0 %v1304_v8  ;;  %8022 = vpow2.f32 %v1266_v43 }
 0x4cc   :  { %8024 = vpow2.f32 %v1262_v55 }
 0x4cd   :  { %v1231_v18 = vpop.xlane.xlu1 %1230 }
 0x4ce   :  { %v1225_v3 = vpop.xlane.xlu2 %1224  ;;  %v1247_v58 = vsub.f32 %v8728_v11, %v1231_v18 }
 0x4cf   :  { %v1245_v13 = vsub.f32 %v8730_v44, %v1225_v3 }
 0x4d0   :  { %v8785_v14 = vpop.eup %8020  ;;  %v1278_v53 = vmul.f32 1.442695, %v1247_v58 }
 0x4d1   :  { %v1274_v5 = vmul.f32 1.442695, %v1245_v13  ;;  %v8788_v22 = vpop.eup %8022  ;;  %v1316_v12 = vsel %vm369_vm1, %v8785_v14, 0.0 }
 0x4d2   :  { %v1307_v35 = vsel %vm369_vm1, %v8788_v22, 0.0  ;;  %v8794_v28 = vpop.eup %8024 }
 0x4d3   :  { %8026 = vpow2.f32 %v1274_v5  ;;  %1317 = vadd.xlane.f32.xlu0 %v1316_v12  ;;  %1308 = vadd.xlane.f32.xlu1 %v1307_v35  ;;  %v1301_v19 = vsel %vm369_vm1, %v8794_v28, 0.0 }
 0x4d4   :  { %8028 = vpow2.f32 %v1276_v40 }
 0x4d5   :  { %8030 = vpow2.f32 %v1278_v53 }
 0x4d9   :  { %v8796_v44 = vpop.eup %8026 }
 0x4da   :  { %v1319_v29 = vsel %vm369_vm1, %v8796_v44, 0.0  ;;  %v8802_v36 = vpop.eup %8028 }
 0x4db   :  { %1302 = vadd.xlane.f32.xlu0 %v1301_v19  ;;  %1320 = vadd.xlane.f32.xlu2 %v1319_v29  ;;  %v1322_v1 = vsel %vm369_vm1, %v8802_v36, 0.0  ;;  %v8828_v51 = vpop.eup %8030  ;;  %v1282_v62 = vpop.xlane.xlu0 %1281 }
 0x4dc   :  { %v1325_v52 = vsel %vm369_vm1, %v8828_v51, 0.0  ;;  %8032 = vrcp.f32 %v1282_v62 }
 0x4e2   :  { %v8033_v11 = vpop.eup %8032 }
 0x4e3   :  { %1323 = vadd.xlane.f32.xlu2 %v1322_v1  ;;  %v1344_v21 = vmul.f32 %v8033_v11, %v8736_v42  ;;  %v6489_v11 = vld [vmem:[#allocation2 + $0x230] sm:$0xf] }
 0x4e7   :  { %v1294_v0 = vpop.xlane.xlu0 %1293 }
 0x4ec   :  { %1448 = vrot.lane.b32.xlu1 %v8408_v17, %s8291_s29 }
 0x4ef   :  { %1511 = vrot.lane.b32.xlu0 %v8408_v17, %s8290_s28 }
 0x4f4   :  { %7792 = vrot.lane.b32.xlu1 %v7791_v39, %s8290_s28 }
 0x4fb   :  { %1469 = vrot.lane.b32.xlu2 %v8408_v17, %s8296_s12 }
 0x4fc   :  { %7807 = vrot.lane.b32.xlu1 %v7806_v45, %s8291_s29 }
 0x503   :  { %7797 = vrot.lane.b32.xlu2 %v7796_v33, %s8295_s11 }
 0x504   :  { %7822 = vrot.lane.b32.xlu1 %v7821_v23, %s8294_s10 }
 0x50b   :  { %7812 = vrot.lane.b32.xlu2 %v7811_v24, %s8292_s30 }
 0x519   :  { %1326 = vadd.xlane.f32.xlu0 %v1325_v52 }
 0x525   :  { %v1288_v38 = vpop.xlane.xlu1 %1287 }
 0x526   :  { %8034 = vrcp.f32 %v1288_v38  ;;  %v6501_v38 = vld [vmem:[#allocation2 + $0x3c8] sm:$0xf] }
 0x52c   :  { %v8035_v63 = vpop.eup %8034 }
 0x52d   :  { %1490 = vrot.lane.b32.xlu0 %v8408_v17, %s8295_s11  ;;  %v1285_v6 = vpop.xlane.xlu1 %1284  ;;  %v1346_v43 = vmul.f32 %v8035_v63, %v8744_v10  ;;  %v7538_v63 = vld [vmem:[#allocation2 + $0x270] sm:$0xf0] }
 0x52e   :  { %8036 = vrcp.f32 %v1285_v6  ;;  %v1291_v61 = vpop.xlane.xlu2 %1290  ;;  %v7540_v6 = vld [vmem:[#allocation2 + $0x380] sm:$0xf0] }
 0x52f   :  { %8038 = vrcp.f32 %v1291_v61  ;;  %v7539_v61 = vld [vmem:[#allocation2 + $0x2f8] sm:$0xf0] }
 0x530   :  { %8040 = vrcp.f32 %v1294_v0 }
 0x534   :  { %v8037_v56 = vpop.eup %8036 }
 0x535   :  { %v8039_v46 = vpop.eup %8038  ;;  %v1345_v7 = vmul.f32 %v8037_v56, %v8750_v31  ;;  %7802 = vrot.lane.b32.xlu0 %v7801_v41, %s8296_s12  ;;  %v1297_v17 = vpop.xlane.xlu1 %1296  ;;  %v6490_v41 = vor.u32 %v7538_v63, %v6489_v11  ;;  %v6485_v56 = vld [vmem:[#allocation2 + $0x1a8] sm:$0xf] }
 0x536   :  { %v1347_v15 = vmul.f32 %v8039_v46, %v8753_v25  ;;  %8042 = vrcp.f32 %v1297_v17  ;;  %v8041_v59 = vpop.eup %8040  ;;  %v1300_v31 = vpop.xlane.xlu2 %1299  ;;  %v7537_v46 = vld [vmem:[#allocation2 + $0x1e8] sm:$0xf0]  ;;  %v7536_v17 = vld [vmem:[#allocation2 + $0x160] sm:$0xf0] }
 0x537   :  { %v1360_v16 = vpack.c.bf16 %v1345_v7, %v1344_v21  ;;  %v1348_v55 = vmul.f32 %v8041_v59, %v8740_v47  ;;  %8044 = vrcp.f32 %v1300_v31  ;;  %v6486_v21 = vor.u32 %v7537_v46, %v6485_v56  ;;  %v6481_v7 = vld [vmem:[#allocation2 + $0x120] sm:$0xf]  ;;  %v7534_v31 = vld [vmem:[#allocation2 + $0x50] sm:$0xf0] }
 0x538   :  { %v1384_v8 = vpack.c.bf16 %v1347_v15, %v1346_v43  ;;  %v6482_v43 = vor.u32 %v7536_v17, %v6481_v7 }
 0x539   :  { %6463 = vmatmul.msk.bf16.vlgmr.msra.gmra.mxu3 %vm369_vm1, %v1360_v16  ;;  %v6477_v16 = vld [vmem:[#allocation2 + $0x98] sm:$0xf] }
 0x53a   :  { %6464 = vmatmul.msk.bf16.vlgmr.msra.gmra.mxu0 %vm369_vm1, %v1384_v8  ;;  %v7535_v8 = vld [vmem:[#allocation2 + $0xd8] sm:$0xf0] }
 0x53b   :  { %v6478_v59 = vor.u32 %v7535_v8, %v6477_v16 }
 0x53c   :  { %v8043_v42 = vpop.eup %8042 }
 0x53d   :  { %v1349_v34 = vmul.f32 %v8043_v42, %v8761_v48  ;;  %7817 = vrot.lane.b32.xlu0 %v7816_v60, %s8293_s9  ;;  %v1312_v4 = vpop.xlane.xlu1 %1311  ;;  %v8045_v54 = vpop.eup %8044  ;;  %v6473_v42 = vld [vmem:[#allocation2 + $0x10] sm:$0xf] }
 0x53e   :  { %v1306_v10 = vpop.xlane.xlu0 %1305  ;;  %v1315_v3 = vpop.xlane.xlu2 %1314  ;;  %v1350_v48 = vmul.f32 %v8045_v54, %v8763_v9 }
 0x53f   :  { %v1405_v25 = vpack.c.bf16 %v1349_v34, %v1348_v55  ;;  %v6474_v34 = vor.u32 %v7534_v31, %v6473_v42 }
 0x541   :  { %6465 = vmatmul.msk.bf16.vlgmr.msrb.gmra.mxu1 %vm369_vm1, %v1405_v25 }
 0x546   :  { %v8849_v13 = vpop.xlane.xlu0 %1317  ;;  %v1309_v57 = vpop.xlane.xlu1 %1308 }
 0x54e   :  { %v1303_v5 = vpop.xlane.xlu0 %1302  ;;  %v8851_v12 = vpop.xlane.xlu2 %1320 }
 0x54f   :  { %8046 = vrcp.f32 %v1303_v5 }
 0x550   :  { %8048 = vrcp.f32 %v1312_v4 }
 0x551   :  { %8050 = vrcp.f32 %v1315_v3 }
 0x552   :  { %8052 = vrcp.f32 %v1309_v57 }
 0x553   :  { %8054 = vrcp.f32 %v1306_v10 }
 0x555   :  { %v8047_v47 = vpop.eup %8046 }
 0x556   :  { %v1351_v35 = vmul.f32 %v8047_v47, %v8794_v28  ;;  %v1324_v40 = vpop.xlane.xlu2 %1323  ;;  %v8049_v19 = vpop.eup %8048 }
 0x557   :  { %v8051_v1 = vpop.eup %8050  ;;  %v1354_v33 = vmul.f32 %v8049_v19, %v8769_v20  ;;  %v7541_v20 = vld [vmem:[#allocation2 + $0x408] sm:$0xf0]  ;;  %8056 = vrcp.f32 %v1324_v40 }
 0x558   :  { %v1426_v29 = vpack.c.bf16 %v1351_v35, %v1350_v48  ;;  %v8053_v39 = vpop.eup %8052  ;;  %v1355_v23 = vmul.f32 %v8051_v1, %v8773_v2  ;;  %v6502_v62 = vor.u32 %v7541_v20, %v6501_v38  ;;  %v6497_v2 = vld [vmem:[#allocation2 + $0x340] sm:$0xf] }
 0x559   :  { %v8055_v45 = vpop.eup %8054  ;;  %v1353_v18 = vmul.f32 %v8053_v39, %v8788_v22  ;;  %v6498_v22 = vor.u32 %v7540_v6, %v6497_v2 }
 0x55a   :  { %6466 = vmatmul.msk.bf16.vlgmr.msrb.gmra.mxu2 %vm369_vm1, %v1426_v29  ;;  %v1352_v9 = vmul.f32 %v8055_v45, %v8775_v37  ;;  %v1468_v28 = vpack.c.bf16 %v1355_v23, %v1354_v33  ;;  %v6493_v37 = vld [vmem:[#allocation2 + $0x2b8] sm:$0xf] }
 0x55b   :  { %v6494_v0 = vor.u32 %v7539_v61, %v6493_v37 }
 0x55c   :  { %v1447_v53 = vpack.c.bf16 %v1353_v18, %v1352_v9 }
 0x55d   :  { %v8057_v60 = vpop.eup %8056 }
 0x55e   :  { %v1470_v58 = vpop.permute.xlu2 %1469  ;;  %v1449_v24 = vpop.permute.xlu1 %1448  ;;  %v1358_v10 = vmul.f32 %v8057_v60, %v8802_v36 }
 0x55f   :  { %1482 = vmatpush.bf16.msrb.mxu0 %v1470_v58  ;;  %1461 = vmatpush.bf16.msrb.mxu3 %v1449_v24 }
 0x561   :  { %v1512_v52 = vpop.permute.xlu0 %1511 }
 0x562   :  { %6468 = vmatmul.msk.bf16.vlgmr.msrb.gmra.mxu0 %vm369_vm1, %v1468_v28  ;;  %1524 = vmatpush.bf16.msra.mxu2 %v1512_v52 }
 0x563   :  { %6467 = vmatmul.msk.bf16.vlgmr.msrb.gmra.mxu3 %vm369_vm1, %v1447_v53 }
 0x564   :  { %1667 = vmatpush.bf16.msra.mxu3 %v6502_v62 }
 0x566   :  { %v7793_v5 = vpop.permute.xlu1 %7792  ;;  %v7798_v35 = vpop.permute.xlu2 %7797 }
 0x567   :  { %v7795_v36 = vunpack.i.h.bf16 %v7793_v5  ;;  %v7794_v40 = vunpack.i.l.bf16 %v7793_v5  ;;  %v7799_v19 = vunpack.i.l.bf16 %v7798_v35 }
 0x568   :  { %1668 = vmatpush.bf16.msra.mxu3 %v6498_v22 }
 0x569   :  { %v962_v29 = vsel %vm369_vm1, %v8657_v50, %v7795_v36  ;;  %v961_v1 = vsel %vm369_vm1, %v8655_v49, %v7794_v40 }
 0x56a   :  { %v964_v33 = vsel %vm963_vm2, %v961_v1, %v7799_v19 }
 0x56c   :  { %1669 = vmatpush.bf16.msra.mxu3 %v6494_v0 }
 0x56e   :  { %v7813_v24 = vpop.permute.xlu2 %7812 }
 0x56f   :  { %v7815_v53 = vunpack.i.h.bf16 %v7813_v24  ;;  %v7814_v52 = vunpack.i.l.bf16 %v7813_v24 }
 0x570   :  { %1670 = vmatpush.bf16.msra.mxu3 %v6490_v41 }
 0x574   :  { %1671 = vmatpush.bf16.msra.mxu3 %v6486_v21 }
 0x578   :  { %1672 = vmatpush.bf16.msra.mxu3 %v6482_v43 }
 0x57c   :  { %1673 = vmatpush.bf16.msra.mxu3 %v6478_v59 }
 0x580   :  { %1674 = vmatpush.bf16.msra.mxu3 %v6474_v34 }
 0x58c   :  { %v1327_v15 = vpop.xlane.xlu0 %1326 }
 0x58d   :  { %8058 = vrcp.f32 %v1327_v15 }
 0x58e   :  { %8060 = vrcp.f32 %v8851_v12 }
 0x58f   :  { %8062 = vrcp.f32 %v8849_v13  ;;  %v7800_v13 = vunpack.i.h.bf16 %v7798_v35 }
 0x591   :  { %v965_v45 = vsel %vm963_vm2, %v962_v29, %v7800_v13 }
 0x593   :  { %v8059_v55 = vpop.eup %8058 }
 0x594   :  { %v1359_v25 = vmul.f32 %v8059_v55, %v8828_v51  ;;  %v8061_v4 = vpop.eup %8060  ;;  %v7808_v51 = vpop.permute.xlu1 %7807 }
 0x595   :  { %v8063_v57 = vpop.eup %8062  ;;  %v1357_v54 = vmul.f32 %v8061_v4, %v8796_v44  ;;  %v7810_v58 = vunpack.i.h.bf16 %v7808_v51  ;;  %v7809_v9 = vunpack.i.l.bf16 %v7808_v51 }
 0x596   :  { %v1510_v3 = vpack.c.bf16 %v1359_v25, %v1358_v10  ;;  %v1356_v47 = vmul.f32 %v8063_v57, %v8785_v14 }
 0x598   :  { %6470 = vmatmul.msk.bf16.vlgmr.msra.gmra.mxu2 %vm369_vm1, %v1510_v3  ;;  %v1489_v12 = vpack.c.bf16 %v1357_v54, %v1356_v47 }
 0x59c   :  { %v7823_v50 = vpop.permute.xlu1 %7822 }
 0x59d   :  { %v7825_v2 = vunpack.i.h.bf16 %v7823_v50  ;;  %v7824_v6 = vunpack.i.l.bf16 %v7823_v50 }
 0x59f   :  { %v1491_v48 = vpop.permute.xlu0 %1490 }
 0x5a0   :  { %1503 = vmatpush.bf16.msra.mxu1 %v1491_v48 }
 0x5a3   :  { %6469 = vmatmul.msk.bf16.vlgmr.msra.gmra.mxu1 %vm369_vm1, %v1489_v12  ;;  %v8896_v12 = vld [vmem:[%s10083_s7 + $0x2] ss:$0 sm:$0xff] }
 0x5a7   :  { %v7803_v44 = vpop.permute.xlu0 %7802 }
 0x5a8   :  { %v7805_v14 = vunpack.i.h.bf16 %v7803_v44  ;;  %v7804_v39 = vunpack.i.l.bf16 %v7803_v44 }
 0x5aa   :  { %v966_v23 = vsel %vm99_vm0, %v964_v33, %v7804_v39  ;;  %v967_v18 = vsel %vm99_vm0, %v965_v45, %v7805_v14 }
 0x5ab   :  { %v969_v28 = vsel %vm968_vm3, %v966_v23, %v7809_v9  ;;  %v970_v49 = vsel %vm968_vm3, %v967_v18, %v7810_v58 }
 0x5ac   :  { %v972_v22 = vsel %vm971_vm4, %v969_v28, %v7814_v52  ;;  %v973_v37 = vsel %vm971_vm4, %v970_v49, %v7815_v53 }
 0x5af   :  { %v7818_v38 = vpop.permute.xlu0 %7817 }
 0x5b0   :  { %v7820_v20 = vunpack.i.h.bf16 %v7818_v38  ;;  %v7819_v62 = vunpack.i.l.bf16 %v7818_v38 }
 0x5b2   :  { %v975_v61 = vsel %vm974_vm5, %v972_v22, %v7819_v62  ;;  %v976_v0 = vsel %vm974_vm5, %v973_v37, %v7820_v20 }
 0x5b3   :  { %v978_v11 = vsel %vm977_vm6, %v975_v61, %v7824_v6  ;;  %v979_v63 = vsel %vm977_vm6, %v976_v0, %v7825_v2 }
 0x5b4   :  { %v1617_v41 = vpack.c.bf16 %v979_v63, %v978_v11 }
 0x5b6   :  { %1675 = vmatmul.bf16.vlgmr.msra.gmra.mxu3 %v1617_v41 }
 0x5b7   :  { %v1400_v56 = vpop.f32.mrf.mxu0 }
 0x5bc   :  { %v1379_v15 = vpop.f32.mrf.mxu3 }
 0x5be   :  { %v1421_v46 = vpop.f32.mrf.mxu1 }
 0x5bf   :  { %v1402_v21 = vpop.f32.mrf.mxu0 }
 0x5c0   :  { %v7826_v7 = vpack.i.bf16 %v1402_v21, %v1400_v56 }
 0x5c2   :  { %7827 = vrot.lane.b32.xlu2 %v7826_v7, %s8290_s28 }
 0x5c4   :  { %v1381_v8 = vpop.f32.mrf.mxu3 }
 0x5c6   :  { %v1423_v17 = vpop.f32.mrf.mxu1 }
 0x5c7   :  { %v7831_v43 = vpack.i.bf16 %v1423_v17, %v1421_v46  ;;  %v8297_v17 = vmov 128.0  }
 0x5c8   :  { %8064 = vrcp.f32 %v8297_v17 }
 0x5c9   :  { %7832 = vrot.lane.b32.xlu0 %v7831_v43, %s8295_s11 }
 0x5ce   :  { %v8065_v43 = vpop.eup %8064 }
 0x5cf   :  { %vm1710_vm7 = vweird.f32 %v8065_v43 }
 0x5dd   :  { %v1442_v16 = vpop.f32.mrf.mxu2 }
 0x5df   :  { %v1484_v59 = vpop.f32.mrf.mxu0 }
 0x5e5   :  { %v1444_v60 = vpop.f32.mrf.mxu2 }
 0x5e6   :  { %v7841_v42 = vpack.i.bf16 %v1444_v60, %v1442_v16  ;;  %v1463_v31 = vpop.f32.mrf.mxu3 }
 0x5e7   :  { %v1486_v55 = vpop.f32.mrf.mxu0 }
 0x5e8   :  { %v7836_v34 = vpack.i.bf16 %v1486_v55, %v1484_v59  ;;  %7842 = vrot.lane.b32.xlu1 %v7841_v42, %s8296_s12 }
 0x5ea   :  { %7837 = vrot.lane.b32.xlu0 %v7836_v34, %s8292_s30 }
 0x5ee   :  { %v1465_v10 = vpop.f32.mrf.mxu3 }
 0x5ef   :  { %v7851_v25 = vpack.i.bf16 %v1465_v10, %v1463_v31 }
 0x5f1   :  { %7852 = vrot.lane.b32.xlu2 %v7851_v25, %s8291_s29 }
 0x61b   :  { %v1526_v3 = vpop.f32.mrf.mxu2 }
 0x61c   :  { %v7828_v19 = vpop.permute.xlu2 %7827 }
 0x61d   :  { %v7830_v44 = vunpack.i.h.bf16 %v7828_v19  ;;  %v7829_v14 = vunpack.i.l.bf16 %v7828_v19  ;;  %v6564_v19 = vld [vmem:[#allocation2 + $0x410] sm:$0xf0] }
 0x61f   :  { %v1588_v18 = vsel %vm369_vm1, %v1381_v8, %v7830_v44  ;;  %v1587_v58 = vsel %vm369_vm1, %v1379_v15, %v7829_v14  ;;  %v1706_v15 = vmul.f32 128.0, %v8065_v43  ;;  %v6556_v14 = vld [vmem:[#allocation2 + $0x388] sm:$0xf0] }
 0x620   :  { %v1505_v4 = vpop.f32.mrf.mxu1 }
 0x621   :  { %v1707_v16 = vsub.f32 1.0, %v1706_v15  ;;  %v6506_v15 = vld [vmem:[#allocation2 + $0x14] sm:$0xf] }
 0x623   :  { %v1528_v5 = vpop.f32.mrf.mxu2  ;;  %v1708_v8 = vmul.f32 %v8065_v43, %v1707_v16  ;;  %v7543_v16 = vld [vmem:[#allocation2 + $0x54] sm:$0xf0] }
 0x624   :  { %v7856_v57 = vpack.i.bf16 %v1528_v5, %v1526_v3 }
 0x625   :  { %v1709_v59 = vadd.f32 %v8065_v43, %v1708_v8 }
 0x626   :  { %7857 = vrot.lane.b32.xlu2 %v7856_v57, %s8294_s10 }
 0x627   :  { %v8919_v60 = vsel %vm1710_vm7, %v8065_v43, %v1709_v59  ;;  %v6516_v43 = vld [vmem:[#allocation2 + $0xe0] sm:$0xf0] }
 0x628   :  { %v1507_v54 = vpop.f32.mrf.mxu1 }
 0x629   :  { %v7846_v47 = vpack.i.bf16 %v1507_v54, %v1505_v4 }
 0x62b   :  { %7847 = vrot.lane.b32.xlu1 %v7846_v47, %s8293_s9 }
 0x639   :  { %v1676_v48 = vpop.f32.mrf.mxu3 }
 0x63a   :  { %v1686_v35 = vadd.f32 %v1676_v48, %v8369_v26 }
 0x63b   :  { %v7833_v29 = vpop.permute.xlu0 %7832 }
 0x63c   :  { %v8900_v36 = vadd.f32 %v8896_v12, %v1686_v35  ;;  %v7835_v39 = vunpack.i.h.bf16 %v7833_v29  ;;  %v7834_v45 = vunpack.i.l.bf16 %v7833_v29 }
 0x63e   :  { %1697 = vadd.xlane.f32.xlu0 %v8900_v36  ;;  %v1589_v9 = vsel %vm963_vm2, %v1587_v58, %v7834_v45  ;;  %v6546_v45 = vld [vmem:[#allocation2 + $0x2bc] sm:$0xf] }
 0x641   :  { %v1678_v40 = vpop.f32.mrf.mxu3 }
 0x642   :  { %v1687_v51 = vadd.f32 %v1678_v40, %v8371_v27  ;;  %v1590_v27 = vsel %vm963_vm2, %v1588_v18, %v7835_v39  ;;  %v7557_v40 = vld [vmem:[#allocation2 + $0x40c] sm:$0xf0]  ;;  %v6548_v18 = vld [vmem:[#allocation2 + $0x300] sm:$0xf0] }
 0x644   :  { %v1692_v13 = vadd.f32 %v8896_v12, %v1687_v51  ;;  %v7556_v51 = vld [vmem:[#allocation2 + $0x3d0] sm:$0xf] }
 0x645   :  { %v6567_v29 = vor.u32 %v7556_v51, %v6564_v19 }
 0x647   :  { %1916 = vmatpush.bf16.msrb.mxu1 %v6567_v29 }
 0x64b   :  { %v7853_v33 = vpop.permute.xlu2 %7852 }
 0x64c   :  { %v7855_v49 = vunpack.i.h.bf16 %v7853_v33  ;;  %v7854_v53 = vunpack.i.l.bf16 %v7853_v33  ;;  %v7553_v33 = vld [vmem:[#allocation2 + $0x2fc] sm:$0xf0] }
 0x655   :  { %1699 = vadd.xlane.f32.xlu1 %v1692_v13 }
 0x65a   :  { %v7843_v1 = vpop.permute.xlu1 %7842 }
 0x65b   :  { %v7845_v26 = vunpack.i.h.bf16 %v7843_v1  ;;  %v7844_v23 = vunpack.i.l.bf16 %v7843_v1  ;;  %v7555_v1 = vld [vmem:[#allocation2 + $0x384] sm:$0xf0] }
 0x65c   :  { %v7838_v24 = vpop.permute.xlu0 %7837 }
 0x65d   :  { %v1591_v50 = vsel %vm99_vm0, %v1589_v9, %v7844_v23  ;;  %v1592_v28 = vsel %vm99_vm0, %v1590_v27, %v7845_v26  ;;  %v7840_v52 = vunpack.i.h.bf16 %v7838_v24  ;;  %v7839_v38 = vunpack.i.l.bf16 %v7838_v24  ;;  %v7552_v26 = vld [vmem:[#allocation2 + $0x2c0] sm:$0xf]  ;;  %v6538_v27 = vld [vmem:[#allocation2 + $0x234] sm:$0xf]  ;;  %v7551_v24 = vld [vmem:[#allocation2 + $0x274] sm:$0xf0] }
 0x65e   :  { %v1593_v62 = vsel %vm968_vm3, %v1591_v50, %v7854_v53  ;;  %v1594_v2 = vsel %vm968_vm3, %v1592_v28, %v7855_v49  ;;  %v6547_v23 = vor.u32 %v7553_v33, %v6546_v45  ;;  %v6551_v58 = vor.u32 %v7552_v26, %v6548_v18  ;;  %v7550_v50 = vld [vmem:[#allocation2 + $0x238] sm:$0xf]  ;;  %v6540_v49 = vld [vmem:[#allocation2 + $0x278] sm:$0xf0]  ;;  %v8960_v26 = vld [vmem:[%s10083_s7 + $0x3] ss:$0 sm:$0xff] }
 0x65f   :  { %v1595_v11 = vsel %vm971_vm4, %v1593_v62, %v7839_v38  ;;  %v1596_v63 = vsel %vm971_vm4, %v1594_v2, %v7840_v52  ;;  %v6539_v28 = vor.u32 %v7551_v24, %v6538_v27  ;;  %v6543_v53 = vor.u32 %v7550_v50, %v6540_v49  ;;  %v6530_v38 = vld [vmem:[#allocation2 + $0x1ac] sm:$0xf]  ;;  %v7548_v62 = vld [vmem:[#allocation2 + $0x1b0] sm:$0xf]  ;;  %v7595_v49 = vld [vmem:[#allocation2 + $0x3d8] sm:$0xf] }
 0x680   :  { %v7858_v20 = vpop.permute.xlu2 %7857 }
 0x681   :  { %v7860_v61 = vunpack.i.h.bf16 %v7858_v20  ;;  %v7859_v0 = vunpack.i.l.bf16 %v7858_v20  ;;  %v7549_v20 = vld [vmem:[#allocation2 + $0x1ec] sm:$0xf0] }
 0x682   :  { %v6531_v2 = vor.u32 %v7549_v20, %v6530_v38  ;;  %v6598_v20 = vld [vmem:[#allocation4 + $0x150] sm:$0xf] }
 0x69d   :  { %v7848_v6 = vpop.permute.xlu1 %7847 }
 0x69e   :  { %v7850_v22 = vunpack.i.h.bf16 %v7848_v6  ;;  %v7849_v37 = vunpack.i.l.bf16 %v7848_v6  ;;  %v6532_v6 = vld [vmem:[#allocation2 + $0x1f0] sm:$0xf0] }
 0x6a0   :  { %v1597_v41 = vsel %vm974_vm5, %v1595_v11, %v7849_v37  ;;  %v1598_v56 = vsel %vm974_vm5, %v1596_v63, %v7850_v22  ;;  %v6535_v22 = vor.u32 %v7548_v62, %v6532_v6  ;;  %v6522_v37 = vld [vmem:[#allocation2 + $0x124] sm:$0xf]  ;;  %v6524_v63 = vld [vmem:[#allocation2 + $0x168] sm:$0xf0]  ;;  %v7565_v62 = vld [vmem:[#allocation4 + $0x164] sm:$0xf0] }
 0x6a1   :  { %v1599_v46 = vsel %vm977_vm6, %v1597_v41, %v7859_v0  ;;  %v1600_v21 = vsel %vm977_vm6, %v1598_v56, %v7860_v61  ;;  %v7547_v61 = vld [vmem:[#allocation2 + $0x164] sm:$0xf0]  ;;  %v6514_v56 = vld [vmem:[#allocation2 + $0x9c] sm:$0xf]  ;;  %v6599_v6 = vor.u32 %v7565_v62, %v6598_v20 }
 0x6a2   :  { %v1618_v7 = vpack.c.bf16 %v1600_v21, %v1599_v46  ;;  %v7546_v0 = vld [vmem:[#allocation2 + $0x128] sm:$0xf]  ;;  %v6523_v11 = vor.u32 %v7547_v61, %v6522_v37  ;;  %v7545_v46 = vld [vmem:[#allocation2 + $0xdc] sm:$0xf0]  ;;  %v6707_v61 = vld [vmem:[#allocation2 + $0x34c] sm:$0xf] }
 0x6a3   :  { %v6527_v41 = vor.u32 %v7546_v0, %v6524_v63  ;;  %v7544_v21 = vld [vmem:[#allocation2 + $0xa0] sm:$0xf]  ;;  %v6515_v17 = vor.u32 %v7545_v46, %v6514_v56  ;;  %v7593_v0 = vld [vmem:[#allocation2 + $0x38c] sm:$0xf0]  ;;  %2075 = vmatpush.bf16.msrb.mxu2 %v6599_v6  ;;  %v7569_v20 = vld [vmem:[#allocation4 + $0x224] sm:$0xf0] }
 0x6a4   :  { %1680 = vmatmul.bf16.gmra.mxu3 %v1618_v7  ;;  %v6708_v63 = vor.u32 %v7593_v0, %v6707_v61  ;;  %v6594_v46 = vld [vmem:[#allocation4 + $0x120] sm:$0xf]  ;;  %v7581_v61 = vld [vmem:[#allocation2 + $0x16c] sm:$0xf0] }
 0x6a5   :  { %v7580_v0 = vld [vmem:[#allocation2 + $0x130] sm:$0xf] }
 0x6b1   :  { %v1698_v10 = vpop.xlane.xlu0 %1697 }
 0x6b2   :  { %v1712_v4 = vmul.f32 %v8919_v60, %v1698_v10  ;;  %v6507_v10 = vor.u32 %v7543_v16, %v6506_v15  ;;  %v6695_v15 = vld [vmem:[#allocation2 + $0x2c4] sm:$0xf]  ;;  %v7590_v16 = vld [vmem:[#allocation2 + $0x304] sm:$0xf0] }
 0x6b4   :  { %v8933_v57 = vsub.f32 %v8900_v36, %v1712_v4  ;;  %v6554_v36 = vld [vmem:[#allocation2 + $0x344] sm:$0xf] }
 0x6b5   :  { %v6555_v44 = vor.u32 %v7555_v1, %v6554_v36 }
 0x6b6   :  { %v1720_v48 = vmul.f32 %v8933_v57, %v8933_v57 }
 0x6c8   :  { %v1700_v42 = vpop.xlane.xlu1 %1699 }
 0x6c9   :  { %v1713_v31 = vmul.f32 %v8919_v60, %v1700_v42  ;;  %v6519_v42 = vor.u32 %v7544_v21, %v6516_v43  ;;  %v7564_v21 = vld [vmem:[#allocation4 + $0x134] sm:$0xf0] }
 0x6ca   :  { %v7572_v43 = vld [vmem:[#allocation4 + $0x2b4] sm:$0xf0] }
 0x6cb   :  { %v8922_v55 = vsub.f32 %v1692_v13, %v1713_v31  ;;  %v7542_v31 = vld [vmem:[#allocation2 + $0x18] sm:$0xf] }
 0x6cd   :  { %v1721_v34 = vmul.f32 %v8922_v55, %v8922_v55 }
 0x6cf   :  { %1726 = vadd.xlane.f32.xlu1 %v1721_v34  ;;  %v6508_v34 = vld [vmem:[#allocation2 + $0x58] sm:$0xf0] }
 0x727   :  { %v1681_v25 = vpop.f32.mrf.mxu3 }
 0x728   :  { %v1688_v3 = vadd.f32 %v1681_v25, %v8375_v30  ;;  %v6562_v30 = vld [vmem:[#allocation2 + $0x3cc] sm:$0xf] }
 0x729   :  { %v6563_v13 = vor.u32 %v7557_v40, %v6562_v30 }
 0x72a   :  { %v8929_v5 = vadd.f32 %v8896_v12, %v1688_v3  ;;  %v6511_v3 = vor.u32 %v7542_v31, %v6508_v34  ;;  %v6697_v31 = vld [vmem:[#allocation2 + $0x308] sm:$0xf0]  ;;  %v6590_v34 = vld [vmem:[#allocation4 + $0xf0] sm:$0xf] }
 0x72b   :  { %1897 = vmatpush.bf16.msra.mxu0 %v6563_v13 }
 0x72c   :  { %1701 = vadd.xlane.f32.xlu2 %v8929_v5 }
 0x72f   :  { %v1683_v54 = vpop.f32.mrf.mxu3  ;;  %1898 = vmatpush.bf16.msra.mxu0 %v6555_v44 }
 0x730   :  { %v1689_v47 = vadd.f32 %v1683_v54, %v8377_v32  ;;  %v7554_v32 = vld [vmem:[#allocation2 + $0x348] sm:$0xf] }
 0x731   :  { %v6559_v39 = vor.u32 %v7554_v32, %v6556_v14 }
 0x732   :  { %v8939_v35 = vadd.f32 %v8896_v12, %v1689_v47 }
 0x733   :  { %1917 = vmatpush.bf16.msrb.mxu1 %v6559_v39  ;;  %1899 = vmatpush.bf16.msra.mxu0 %v6547_v23 }
 0x734   :  { %1724 = vadd.xlane.f32.xlu2 %v1720_v48  ;;  %1703 = vadd.xlane.f32.xlu0 %v8939_v35 }
 0x737   :  { %1918 = vmatpush.bf16.msrb.mxu1 %v6551_v58  ;;  %1900 = vmatpush.bf16.msra.mxu0 %v6539_v28  ;;  %v7596_v28 = vld [vmem:[#allocation2 + $0x414] sm:$0xf0] }
 0x73b   :  { %1919 = vmatpush.bf16.msrb.mxu1 %v6543_v53  ;;  %1901 = vmatpush.bf16.msra.mxu0 %v6531_v2  ;;  %v6630_v2 = vld [vmem:[#allocation4 + $0x2d0] sm:$0xf] }
 0x73f   :  { %1920 = vmatpush.bf16.msrb.mxu1 %v6535_v22  ;;  %1902 = vmatpush.bf16.msra.mxu0 %v6523_v11  ;;  %v7573_v22 = vld [vmem:[#allocation4 + $0x2e4] sm:$0xf0]  ;;  %v7592_v11 = vld [vmem:[#allocation2 + $0x350] sm:$0xf] }
 0x740   :  { %v6631_v37 = vor.u32 %v7573_v22, %v6630_v2  ;;  %v6659_v22 = vld [vmem:[#allocation2 + $0x12c] sm:$0xf] }
 0x742   :  { %v1727_v12 = vpop.xlane.xlu1 %1726  ;;  %2094 = vmatpush.bf16.msrb.mxu3 %v6631_v37 }
 0x743   :  { %v1733_v9 = vmul.f32 %v1727_v12, %v8919_v60  ;;  %1921 = vmatpush.bf16.msrb.mxu1 %v6527_v41  ;;  %1903 = vmatpush.bf16.msra.mxu0 %v6515_v17  ;;  %v6709_v41 = vld [vmem:[#allocation2 + $0x390] sm:$0xf0]  ;;  %v6595_v17 = vor.u32 %v7564_v21, %v6594_v46  ;;  %v7560_v46 = vld [vmem:[#allocation4 + $0x74] sm:$0xf0] }
 0x744   :  { %v6712_v56 = vor.u32 %v7592_v11, %v6709_v41  ;;  %v6661_v11 = vld [vmem:[#allocation2 + $0x170] sm:$0xf0] }
 0x745   :  { %v1737_v52 = vadd.f32 1e-05, %v1733_v9  ;;  %v8967_v9 = vld [vmem:[%s10083_s7 + $0x4] ss:$0 sm:$0xff]  ;;  %2076 = vmatpush.bf16.msrb.mxu2 %v6595_v17  ;;  %v6664_v41 = vor.u32 %v7580_v0, %v6661_v11  ;;  %v6610_v17 = vld [vmem:[#allocation4 + $0x1e0] sm:$0xf] }
 0x747   :  { %8066 = vrsqrt.f32 %v1737_v52  ;;  %1922 = vmatpush.bf16.msrb.mxu1 %v6519_v42  ;;  %1904 = vmatpush.bf16.msra.mxu0 %v6507_v10  ;;  %vm1756_vm9 = vweird.f32 %v1737_v52  ;;  %v7589_v42 = vld [vmem:[#allocation2 + $0x2c8] sm:$0xf] }
 0x74b   :  { %1923 = vmatpush.bf16.msrb.mxu1 %v6511_v3  ;;  %v6700_v3 = vor.u32 %v7589_v42, %v6697_v31  ;;  %v6649_v42 = vld [vmem:[#allocation2 + $0xe8] sm:$0xf0] }
 0x74d   :  { %v8067_v8 = vpop.eup %8066 }
 0x74e   :  { %v1751_v4 = vmul.f32 %v8067_v8, %v1737_v52  ;;  %vm1757_vm8 = vweird.f32 %v8067_v8  ;;  %v6721_v52 = vld [vmem:[#allocation2 + $0x418] sm:$0xf0] }
 0x74f   :  { %vm1758_vm10 = vmor %vm1756_vm9, %vm1757_vm8  ;;  %v6724_v38 = vor.u32 %v7595_v49, %v6721_v52  ;;  %v6582_v49 = vld [vmem:[#allocation4 + $0x90] sm:$0xf] }
 0x750   :  { %v1752_v47 = vmul.f32 %v8067_v8, %v1751_v4  ;;  %v7563_v4 = vld [vmem:[#allocation4 + $0x104] sm:$0xf0] }
 0x751   :  { %2396 = vmatpush.bf16.msra.mxu1 %v6724_v38  ;;  %v6614_v38 = vld [vmem:[#allocation4 + $0x210] sm:$0xf] }
 0x752   :  { %v1753_v19 = vmul.f32 0.5, %v1752_v47  ;;  %v7571_v47 = vld [vmem:[#allocation4 + $0x284] sm:$0xf0]  ;;  %v6615_v6 = vor.u32 %v7569_v20, %v6614_v38 }
 0x754   :  { %v1754_v36 = vsub.f32 1.5, %v1753_v19  ;;  %v7586_v19 = vld [vmem:[#allocation2 + $0x240] sm:$0xf] }
 0x755   :  { %2397 = vmatpush.bf16.msra.mxu1 %v6712_v56  ;;  %v6578_v56 = vld [vmem:[#allocation4 + $0x60] sm:$0xf] }
 0x756   :  { %v1755_v32 = vmul.f32 %v8067_v8, %v1754_v36  ;;  %v6685_v36 = vld [vmem:[#allocation2 + $0x280] sm:$0xf0] }
 0x758   :  { %v1759_v39 = vsel %vm1758_vm10, %v8067_v8, %v1755_v32  ;;  %v7562_v32 = vld [vmem:[#allocation4 + $0xd4] sm:$0xf0] }
 0x759   :  { %2398 = vmatpush.bf16.msra.mxu1 %v6700_v3  ;;  %v6574_v3 = vld [vmem:[#allocation4 + $0x30] sm:$0xf] }
 0x79f   :  { %v1702_v7 = vpop.xlane.xlu2 %1701 }
 0x7a0   :  { %v1714_v59 = vmul.f32 %v8919_v60, %v1702_v7  ;;  %v6626_v7 = vld [vmem:[#allocation4 + $0x2a0] sm:$0xf] }
 0x7a1   :  { %v6627_v8 = vor.u32 %v7572_v43, %v6626_v7  ;;  %v6579_v7 = vor.u32 %v7560_v46, %v6578_v56  ;;  %v7568_v43 = vld [vmem:[#allocation4 + $0x1f4] sm:$0xf0] }
 0x7a2   :  { %v8945_v25 = vsub.f32 %v8929_v5, %v1714_v59  ;;  %v6696_v59 = vor.u32 %v7590_v16, %v6695_v15  ;;  %v6647_v15 = vld [vmem:[#allocation2 + $0xa4] sm:$0xf]  ;;  %v6611_v16 = vor.u32 %v7568_v43, %v6610_v17 }
 0x7a3   :  { %2095 = vmatpush.bf16.msrb.mxu3 %v6627_v8  ;;  %v7578_v8 = vld [vmem:[#allocation2 + $0xe4] sm:$0xf0] }
 0x7a4   :  { %v1722_v54 = vmul.f32 %v8945_v25, %v8945_v25 }
 0x7a6   :  { %1728 = vadd.xlane.f32.xlu0 %v1722_v54  ;;  %v6622_v54 = vld [vmem:[#allocation4 + $0x270] sm:$0xf] }
 0x7a7   :  { %v1725_v48 = vpop.xlane.xlu2 %1724  ;;  %v1704_v30 = vpop.xlane.xlu0 %1703 }
 0x7a8   :  { %v1732_v40 = vmul.f32 %v1725_v48, %v8919_v60  ;;  %v1715_v51 = vmul.f32 %v8919_v60, %v1704_v30  ;;  %v6591_v30 = vor.u32 %v7563_v4, %v6590_v34  ;;  %v6648_v34 = vor.u32 %v7578_v8, %v6647_v15  ;;  %v7559_v4 = vld [vmem:[#allocation4 + $0x44] sm:$0xf0]  ;;  %v6727_v8 = vld [vmem:[#allocation2 + $0x3dc] sm:$0xf] }
 0x7aa   :  { %v1736_v13 = vadd.f32 1e-05, %v1732_v40  ;;  %v8952_v5 = vsub.f32 %v8939_v35, %v1715_v51  ;;  %v1781_v35 = vmul.f32 %v1759_v39, %v8922_v55  ;;  %v6623_v40 = vor.u32 %v7571_v47, %v6622_v54  ;;  %v6683_v51 = vld [vmem:[#allocation2 + $0x23c] sm:$0xf]  ;;  %v6618_v39 = vld [vmem:[#allocation4 + $0x240] sm:$0xf]  ;;  %2077 = vmatpush.bf16.msrb.mxu2 %v6591_v30 }
 0x7ab   :  { %v6606_v54 = vld [vmem:[#allocation4 + $0x1b0] sm:$0xf]  ;;  %v7567_v30 = vld [vmem:[#allocation4 + $0x1c4] sm:$0xf0] }
 0x7ac   :  { %8068 = vrsqrt.f32 %v1736_v13  ;;  %v1723_v29 = vmul.f32 %v8952_v5, %v8952_v5  ;;  %vm1746_vm12 = vweird.f32 %v1736_v13  ;;  %v1785_v58 = vmul.f32 %v1781_v35, %v8960_v26  ;;  %2096 = vmatpush.bf16.msrb.mxu3 %v6623_v40 }
 0x7ae   :  { %1730 = vadd.xlane.f32.xlu2 %v1723_v29  ;;  %v8974_v24 = vadd.f32 %v1785_v58, %v8967_v9 }
 0x7b2   :  { %v8069_v1 = vpop.eup %8068 }
 0x7b3   :  { %v1741_v44 = vmul.f32 %v8069_v1, %v1736_v13  ;;  %vm1747_vm11 = vweird.f32 %v8069_v1  ;;  %v7587_v13 = vld [vmem:[#allocation2 + $0x27c] sm:$0xf0] }
 0x7b4   :  { %vm1748_vm13 = vmor %vm1746_vm12, %vm1747_vm11  ;;  %v6684_v29 = vor.u32 %v7587_v13, %v6683_v51  ;;  %v6607_v51 = vor.u32 %v7567_v30, %v6606_v54  ;;  %v6635_v13 = vld [vmem:[#allocation2 + $0x1c] sm:$0xf]  ;;  %v6691_v30 = vld [vmem:[#allocation2 + $0x244] sm:$0xf]  ;;  %vm2624_vm11 = vcmask 64512   ;;  %vm2717_vm12 = vcmask 1043456  }
 0x7b5   :  { %v1742_v14 = vmul.f32 %v8069_v1, %v1741_v44 }
 0x7b7   :  { %v1743_v12 = vmul.f32 0.5, %v1742_v14  ;;  %v6688_v14 = vor.u32 %v7586_v19, %v6685_v36  ;;  %v7575_v19 = vld [vmem:[#allocation2 + $0x5c] sm:$0xf0] }
 0x7b9   :  { %v1744_v45 = vsub.f32 1.5, %v1743_v12  ;;  %v7570_v12 = vld [vmem:[#allocation4 + $0x254] sm:$0xf0]  ;;  %2399 = vmatpush.bf16.msra.mxu1 %v6688_v14  ;;  %v6637_v14 = vld [vmem:[#allocation2 + $0x60] sm:$0xf0] }
 0x7ba   :  { %v6619_v35 = vor.u32 %v7570_v12, %v6618_v39  ;;  %v6570_v12 = vld [vmem:[#allocation4] sm:$0xf] }
 0x7bb   :  { %v1745_v33 = vmul.f32 %v8069_v1, %v1744_v45 }
 0x7bc   :  { %2097 = vmatpush.bf16.msrb.mxu3 %v6619_v35 }
 0x7bd   :  { %v1749_v23 = vsel %vm1748_vm13, %v8069_v1, %v1745_v33  ;;  %v6586_v1 = vld [vmem:[#allocation4 + $0xc0] sm:$0xf]  ;;  %v6671_v33 = vld [vmem:[#allocation2 + $0x1b4] sm:$0xf] }
 0x7be   :  { %v1780_v18 = vmul.f32 %v1749_v23, %v8933_v57  ;;  %v6719_v57 = vld [vmem:[#allocation2 + $0x3d4] sm:$0xf]  ;;  %v6587_v45 = vor.u32 %v7562_v32, %v6586_v1  ;;  %v7584_v23 = vld [vmem:[#allocation2 + $0x1f4] sm:$0xf0]  ;;  %v6636_v32 = vor.u32 %v7575_v19, %v6635_v13  ;;  %v6679_v13 = vld [vmem:[#allocation2 + $0x1bc] sm:$0xf] }
 0x7bf   :  { %v6720_v53 = vor.u32 %v7596_v28, %v6719_v57  ;;  %v7585_v19 = vld [vmem:[#allocation2 + $0x1fc] sm:$0xf0] }
 0x7c0   :  { %v1784_v55 = vmul.f32 %v1780_v18, %v8960_v26  ;;  %v7583_v18 = vld [vmem:[#allocation2 + $0x1b8] sm:$0xf]  ;;  %2078 = vmatpush.bf16.msrb.mxu2 %v6587_v45  ;;  %2098 = vmatpush.bf16.msrb.mxu3 %v6615_v6 }
 0x7c1   :  { %2382 = vmatpush.bf16.msrb.mxu0 %v6720_v53  ;;  %v7561_v53 = vld [vmem:[#allocation4 + $0xa4] sm:$0xf0]  ;;  %v7558_v45 = vld [vmem:[#allocation4 + $0x14] sm:$0xf0] }
 0x7c2   :  { %v8971_v27 = vadd.f32 %v1784_v55, %v8967_v9  ;;  %v6672_v55 = vor.u32 %v7584_v23, %v6671_v33  ;;  %v6583_v52 = vor.u32 %v7561_v53, %v6582_v49  ;;  %v6571_v33 = vor.u32 %v7558_v45, %v6570_v12  ;;  %v6602_v23 = vld [vmem:[#allocation4 + $0x180] sm:$0xf] }
 0x7c3   :  { %v9025_v45 = vld [vmem:[%s10083_s7 + $0x21] ss:$8 sm:$0x7] }
 0x7c4   :  { %v1808_v50 = vpack.c.bf16 %v8974_v24, %v8971_v27  ;;  %2079 = vmatpush.bf16.msrb.mxu2 %v6583_v52  ;;  %2099 = vmatpush.bf16.msrb.mxu3 %v6611_v16 }
 0x7c5   :  { %2383 = vmatpush.bf16.msrb.mxu0 %v6708_v63  ;;  %v6660_v63 = vor.u32 %v7581_v61, %v6659_v22 }
 0x7c6   :  { %1905 = vmatmul.bf16.vlgmr.msra.gmra.mxu0 %v1808_v50  ;;  %1924 = vmatmul.bf16.vlgmr.msrb.gmra.mxu1 %v1808_v50  ;;  %v6673_v50 = vld [vmem:[#allocation2 + $0x1f8] sm:$0xf0] }
 0x7c7   :  { %v6676_v28 = vor.u32 %v7583_v18, %v6673_v50  ;;  %v7566_v18 = vld [vmem:[#allocation4 + $0x194] sm:$0xf0] }
 0x7c8   :  { %2080 = vmatpush.bf16.msrb.mxu2 %v6579_v7  ;;  %2100 = vmatpush.bf16.msrb.mxu3 %v6607_v51 }
 0x7c9   :  { %2384 = vmatpush.bf16.msrb.mxu0 %v6696_v59  ;;  %2400 = vmatpush.bf16.msra.mxu1 %v6676_v28  ;;  %v7577_v59 = vld [vmem:[#allocation2 + $0xa8] sm:$0xf] }
 0x7cd   :  { %2385 = vmatpush.bf16.msrb.mxu0 %v6684_v29  ;;  %2401 = vmatpush.bf16.msra.mxu1 %v6664_v41  ;;  %v7574_v29 = vld [vmem:[#allocation2 + $0x20] sm:$0xf] }
 0x7ce   :  { %v6640_v39 = vor.u32 %v7574_v29, %v6637_v14 }
 0x7d1   :  { %2386 = vmatpush.bf16.msrb.mxu0 %v6672_v55 }
 0x7d5   :  { %2387 = vmatpush.bf16.msrb.mxu0 %v6660_v63 }
 0x7d9   :  { %2388 = vmatpush.bf16.msrb.mxu0 %v6648_v34  ;;  %v7594_v34 = vld [vmem:[#allocation2 + $0x394] sm:$0xf0] }
 0x7dd   :  { %2389 = vmatpush.bf16.msrb.mxu0 %v6636_v32 }
 0x819   :  { %v1729_v10 = vpop.xlane.xlu0 %1728 }
 0x81a   :  { %v1734_v48 = vmul.f32 %v1729_v10, %v8919_v60  ;;  %v6652_v10 = vor.u32 %v7577_v59, %v6649_v42  ;;  %v7597_v59 = vld [vmem:[#allocation2 + $0x41c] sm:$0xf0] }
 0x81b   :  { %v6728_v42 = vor.u32 %v7597_v59, %v6727_v8 }
 0x81c   :  { %v8979_v44 = vadd.f32 1e-05, %v1734_v48  ;;  %v6575_v48 = vor.u32 %v7559_v4, %v6574_v3  ;;  %2402 = vmatpush.bf16.msra.mxu1 %v6652_v10  ;;  %v6703_v3 = vld [vmem:[#allocation2 + $0x2cc] sm:$0xf]  ;;  %v7591_v4 = vld [vmem:[#allocation2 + $0x30c] sm:$0xf0] }
 0x81e   :  { %8070 = vrsqrt.f32 %v8979_v44  ;;  %2081 = vmatpush.bf16.msrb.mxu2 %v6575_v48  ;;  %vm1766_vm15 = vweird.f32 %v8979_v44  ;;  %v6704_v48 = vor.u32 %v7591_v4, %v6703_v3 }
 0x820   :  { %2403 = vmatpush.bf16.msra.mxu1 %v6640_v39 }
 0x821   :  { %v1731_v58 = vpop.xlane.xlu2 %1730 }
 0x822   :  { %v1735_v57 = vmul.f32 %v1731_v58, %v8919_v60  ;;  %v6603_v58 = vor.u32 %v7566_v18, %v6602_v23  ;;  %2082 = vmatpush.bf16.msrb.mxu2 %v6571_v33  ;;  %v6667_v23 = vld [vmem:[#allocation2 + $0x134] sm:$0xf]  ;;  %v7582_v18 = vld [vmem:[#allocation2 + $0x174] sm:$0xf0] }
 0x824   :  { %v8983_v62 = vpop.eup %8070  ;;  %v8985_v2 = vadd.f32 1e-05, %v1735_v57  ;;  %2101 = vmatpush.bf16.msrb.mxu3 %v6603_v58 }
 0x825   :  { %v1761_v37 = vmul.f32 %v8983_v62, %v8979_v44  ;;  %vm1767_vm14 = vweird.f32 %v8983_v62 }
 0x826   :  { %8072 = vrsqrt.f32 %v8985_v2  ;;  %vm1768_vm7 = vmor %vm1766_vm15, %vm1767_vm14  ;;  %vm1776_vm9 = vweird.f32 %v8985_v2  ;;  %2410 = vmatpush.bf16.msra.mxu2 %v6728_v42 }
 0x827   :  { %v1762_v21 = vmul.f32 %v8983_v62, %v1761_v37 }
 0x829   :  { %v1763_v31 = vmul.f32 0.5, %v1762_v21 }
 0x82b   :  { %v1764_v47 = vsub.f32 1.5, %v1763_v31  ;;  %v6715_v31 = vld [vmem:[#allocation2 + $0x354] sm:$0xf] }
 0x82c   :  { %v8073_v40 = vpop.eup %8072  ;;  %v6716_v10 = vor.u32 %v7594_v34, %v6715_v31 }
 0x82d   :  { %v1765_v36 = vmul.f32 %v8983_v62, %v1764_v47  ;;  %v1771_v1 = vmul.f32 %v8073_v40, %v8985_v2  ;;  %vm1777_vm8 = vweird.f32 %v8073_v40  ;;  %v6503_v2 = vld [vmem:[%s10083_s7 + $0x5] ss:$8 sm:$0x3] }
 0x82e   :  { %vm1778_vm10 = vmor %vm1776_vm9, %vm1777_vm8  ;;  %v1813_v22 = vperm.slane %v6503_v2, 0  ;;  %v1814_v37 = vperm.slane %v6503_v2, 1  ;;  %2411 = vmatpush.bf16.msra.mxu2 %v6716_v10 }
 0x82f   :  { %v1772_v35 = vmul.f32 %v8073_v40, %v1771_v1  ;;  %v1769_v55 = vsel %vm1768_vm7, %v8983_v62, %v1765_v36  ;;  %v6680_v1 = vor.u32 %v7585_v19, %v6679_v13  ;;  %v9071_v19 = vld [vmem:[%s10077_s1] ss:$0 sm:$0xff] }
 0x830   :  { %v1782_v28 = vmul.f32 %v1769_v55, %v8945_v25 }
 0x831   :  { %v1773_v50 = vmul.f32 0.5, %v1772_v35 }
 0x832   :  { %v1786_v52 = vmul.f32 %v1782_v28, %v8960_v26  ;;  %2412 = vmatpush.bf16.msra.mxu2 %v6704_v48  ;;  %v7579_v28 = vld [vmem:[#allocation2 + $0xec] sm:$0xf0] }
 0x833   :  { %v1774_v57 = vsub.f32 1.5, %v1773_v50  ;;  %v6668_v50 = vor.u32 %v7582_v18, %v6667_v23 }
 0x834   :  { %v9002_v20 = vadd.f32 %v1786_v52, %v8967_v9  ;;  %v2249_v52 = vperm.slane %v9025_v45, 1 }
 0x835   :  { %v1775_v49 = vmul.f32 %v8073_v40, %v1774_v57  ;;  %v6655_v57 = vld [vmem:[#allocation2 + $0xac] sm:$0xf] }
 0x837   :  { %v1779_v44 = vsel %vm1778_vm10, %v8073_v40, %v1775_v49  ;;  %v7588_v40 = vld [vmem:[#allocation2 + $0x284] sm:$0xf0] }
 0x838   :  { %v1783_v53 = vmul.f32 %v1779_v44, %v8952_v5  ;;  %v6692_v51 = vor.u32 %v7588_v40, %v6691_v30 }
 0x83a   :  { %v1787_v38 = vmul.f32 %v1783_v53, %v8960_v26  ;;  %v66_v26 = vld [vmem:[%s10076_s0] sm:$0xff]  ;;  %2413 = vmatpush.bf16.msra.mxu2 %v6692_v51  ;;  %v2248_v53 = vperm.slane %v9025_v45, 0 }
 0x83c   :  { %v9005_v62 = vadd.f32 %v1787_v38, %v8967_v9  ;;  %v67_v9 = vld [vmem:[%s10076_s0 + $0x8] sm:$0xff]  ;;  %v6656_v38 = vor.u32 %v7579_v28, %v6655_v57 }
 0x83d   :  { %v9018_v46 = vpack.c.bf16 %v67_v9, %v66_v26 }
 0x83e   :  { %v1809_v25 = vpack.c.bf16 %v9005_v62, %v9002_v20  ;;  %2414 = vmatpush.bf16.msra.mxu2 %v6680_v1 }
 0x840   :  { %1910 = vmatmul.bf16.gmra.mxu0 %v1809_v25  ;;  %1929 = vmatmul.bf16.gmra.mxu1 %v1809_v25 }
 0x842   :  { %2415 = vmatpush.bf16.msra.mxu2 %v6668_v50 }
 0x843   :  { %v1906_v5 = vpop.f32.mrf.mxu0  ;;  %v1925_v6 = vpop.f32.mrf.mxu1 }
 0x844   :  { %v1907_v61 = vadd.f32 %v1906_v5, %v1813_v22  ;;  %v1926_v0 = vadd.f32 %v1925_v6, %v1814_v37 }
 0x846   :  { %v1935_v21 = vmax.f32 %v1907_v61, 0.0  ;;  %v1936_v7 = vmax.f32 %v1926_v0, 0.0  ;;  %2416 = vmatpush.bf16.msra.mxu2 %v6656_v38 }
 0x84b   :  { %v1908_v11 = vpop.f32.mrf.mxu0  ;;  %v1927_v63 = vpop.f32.mrf.mxu1 }
 0x84c   :  { %v1909_v41 = vadd.f32 %v1908_v11, %v1813_v22  ;;  %v1928_v56 = vadd.f32 %v1927_v63, %v1814_v37 }
 0x84e   :  { %v1937_v17 = vmax.f32 %v1909_v41, 0.0  ;;  %v1938_v43 = vmax.f32 %v1928_v56, 0.0 }
 0x850   :  { %v1975_v15 = vpack.c.bf16 %v1937_v17, %v1935_v21  ;;  %v1976_v16 = vpack.c.bf16 %v1938_v43, %v1936_v7  ;;  %2390 = vmatmul.bf16.vlgmr.msrb.gmra.mxu0 %v9018_v46  ;;  %2404 = vmatmul.bf16.vlgmr.msra.gmra.mxu1 %v9018_v46 }
 0x852   :  { %2083 = vmatmul.bf16.vlgmr.msrb.gmra.mxu2 %v1975_v15  ;;  %2102 = vmatmul.bf16.vlgmr.msrb.gmra.mxu3 %v1976_v16 }
 0x8bd   :  { %v1911_v54 = vpop.f32.mrf.mxu0  ;;  %v1930_v47 = vpop.f32.mrf.mxu1 }
 0x8be   :  { %v1912_v29 = vadd.f32 %v1911_v54, %v1813_v22  ;;  %v1931_v36 = vadd.f32 %v1930_v47, %v1814_v37 }
 0x8c0   :  { %v1939_v35 = vmax.f32 %v1912_v29, 0.0  ;;  %v1940_v33 = vmax.f32 %v1931_v36, 0.0 }
 0x8c5   :  { %v1913_v32 = vpop.f32.mrf.mxu0  ;;  %v1932_v14 = vpop.f32.mrf.mxu1 }
 0x8c6   :  { %v1914_v39 = vadd.f32 %v1913_v32, %v1813_v22  ;;  %v1933_v12 = vadd.f32 %v1932_v14, %v1814_v37  ;;  %v6643_v22 = vld [vmem:[#allocation2 + $0x24] sm:$0xf]  ;;  %v7576_v37 = vld [vmem:[#allocation2 + $0x64] sm:$0xf0] }
 0x8c7   :  { %v6644_v61 = vor.u32 %v7576_v37, %v6643_v22 }
 0x8c8   :  { %v1941_v58 = vmax.f32 %v1914_v39, 0.0  ;;  %v1942_v55 = vmax.f32 %v1933_v12, 0.0 }
 0x8c9   :  { %2417 = vmatpush.bf16.msra.mxu2 %v6644_v61 }
 0x8ca   :  { %v1977_v49 = vpack.c.bf16 %v1941_v58, %v1939_v35  ;;  %v1978_v44 = vpack.c.bf16 %v1942_v55, %v1940_v33  ;;  %v2250_v35 = vperm.slane %v9025_v45, 2 }
 0x8cc   :  { %2088 = vmatmul.bf16.gmra.mxu2 %v1977_v49  ;;  %2107 = vmatmul.bf16.gmra.mxu3 %v1978_v44 }
 0x8cd   :  { %v2391_v25 = vpop.f32.mrf.mxu0  ;;  %v2405_v2 = vpop.f32.mrf.mxu1 }
 0x8ce   :  { %v2392_v5 = vadd.f32 %v2391_v25, %v2248_v53  ;;  %v2406_v6 = vadd.f32 %v2405_v2, %v2249_v52 }
 0x8d0   :  { %v2424_v26 = vpack.c.bf16 %v2392_v5, %v2392_v5  ;;  %v2425_v9 = vpack.c.bf16 %v2406_v6, %v2406_v6 }
 0x8d2   :  { %v2447_v0 = vunpack.c.l.b16 %v2424_v26  ;;  %v2431_v11 = vsel %vm369_vm1, %v2425_v9, 0  ;;  %v2452_v63 = vunpack.c.l.b16 %v2425_v9 }
 0x8d3   :  { %2440 = vmatpush.bf16.xpose.msra.mxu0 %v2431_v11 }
 0x8d4   :  { %v2448_v41 = vpack.c.b16 %v2447_v0, %v2447_v0  ;;  %v2453_v56 = vpack.c.b16 %v2452_v63, %v2452_v63 }
 0x8d5   :  { %v2084_v21 = vpop.f32.mrf.mxu2  ;;  %v2103_v7 = vpop.f32.mrf.mxu3 }
 0x8d6   :  { %v9034_v17 = vadd.f32 %v2103_v7, %v2084_v21  ;;  %2500 = vrot.lane.b32.xlu0 %v2453_v56, %s8292_s30  ;;  %2477 = vrot.lane.b32.xlu1 %v2453_v56, %s8293_s9  ;;  %v9061_v54 = vpop.f32.mrf.mxu0  ;;  %v2407_v2 = vpop.f32.mrf.mxu1 }
 0x8d7   :  { %2475 = vrot.lane.b32.xlu2 %v2448_v41, %s8293_s9 }
 0x8da   :  { %6729 = vmatmul.msk.bf16.vlgmr.msra.gmra.mxu0 %vm369_vm1, %v2424_v26 }
 0x8dc   :  { %2418 = vmatmul.bf16.vlgmr.msra.gmra.mxu2 %v9018_v46 }
 0x8dd   :  { %v9054_v8 = vpop.f32.mrf.mxu2  ;;  %v9056_v59 = vpop.f32.mrf.mxu3 }
 0x8de   :  { %2569 = vrot.lane.b32.xlu1 %v2453_v56, %s8295_s11  ;;  %2498 = vrot.lane.b32.xlu0 %v2448_v41, %s8292_s30 }
 0x8df   :  { %2454 = vrot.lane.b32.xlu2 %v2453_v56, %s8294_s10 }
 0x8e6   :  { %2567 = vrot.lane.b32.xlu1 %v2448_v41, %s8295_s11  ;;  %2592 = vrot.lane.b32.xlu0 %v2453_v56, %s8290_s28 }
 0x8e7   :  { %2449 = vrot.lane.b32.xlu2 %v2448_v41, %s8294_s10 }
 0x8ee   :  { %2523 = vrot.lane.b32.xlu1 %v2453_v56, %s8291_s29  ;;  %2590 = vrot.lane.b32.xlu0 %v2448_v41, %s8290_s28 }
 0x8ef   :  { %2546 = vrot.lane.b32.xlu2 %v2453_v56, %s8296_s12 }
 0x8f6   :  { %2544 = vrot.lane.b32.xlu1 %v2448_v41, %s8296_s12  ;;  %2521 = vrot.lane.b32.xlu0 %v2448_v41, %s8291_s29 }
 0x931   :  { %v2476_v46 = vpop.permute.xlu2 %2475 }
 0x939   :  { %v2455_v43 = vpop.permute.xlu2 %2454 }
 0x93a   :  { %v2460_v15 = vsel %vm369_vm1, %v2455_v43, 0 }
 0x93b   :  { %2469 = vmatpush.bf16.xpose.msrb.mxu1 %v2460_v15 }
 0x941   :  { %v2450_v16 = vpop.permute.xlu2 %2449 }
 0x942   :  { %6730 = vmatmul.msk.bf16.vlgmr.msrb.gmra.mxu1 %vm369_vm1, %v2450_v16 }
 0x948   :  { %v2501_v42 = vpop.permute.xlu0 %2500  ;;  %v2478_v31 = vpop.permute.xlu1 %2477 }
 0x949   :  { %v2506_v34 = vsel %vm369_vm1, %v2501_v42, 0  ;;  %v2483_v10 = vsel %vm369_vm1, %v2478_v31, 0  ;;  %v2547_v3 = vpop.permute.xlu2 %2546 }
 0x94a   :  { %v2552_v4 = vsel %vm369_vm1, %v2547_v3, 0  ;;  %2492 = vmatpush.bf16.xpose.msrb.mxu2 %v2483_v10  ;;  %2515 = vmatpush.bf16.xpose.msra.mxu3 %v2506_v34 }
 0x94b   :  { %2561 = vmatpush.bf16.xpose.msra.mxu1 %v2552_v4 }
 0x94f   :  { %v2089_v47 = vpop.f32.mrf.mxu2  ;;  %v2108_v48 = vpop.f32.mrf.mxu3 }
 0x950   :  { %v9063_v30 = vadd.f32 %v2108_v48, %v2089_v47  ;;  %v2570_v40 = vpop.permute.xlu1 %2569  ;;  %v2499_v51 = vpop.permute.xlu0 %2498 }
 0x951   :  { %v2575_v13 = vsel %vm369_vm1, %v2570_v40, 0  ;;  %6731 = vmatmul.msk.bf16.vlgmr.msrb.gmra.mxu2 %vm369_vm1, %v2476_v46  ;;  %6732 = vmatmul.msk.bf16.vlgmr.msra.gmra.mxu3 %vm369_vm1, %v2499_v51 }
 0x952   :  { %2584 = vmatpush.bf16.xpose.msra.mxu2 %v2575_v13 }
 0x957   :  { %v9073_v29 = vpop.f32.mrf.mxu2  ;;  %v2442_v36 = vpop.f32.mrf.mxu0 }
 0x958   :  { %v2568_v1 = vpop.permute.xlu1 %2567  ;;  %v9076_v32 = vadd.f32 %v9071_v19, %v2442_v36  ;;  %v2593_v14 = vpop.permute.xlu0 %2592 }
 0x959   :  { %v2598_v39 = vsel %vm369_vm1, %v2593_v14, 0  ;;  %v9105_v26 = vpop.f32.mrf.mxu3 }
 0x95a   :  { %2607 = vmatpush.bf16.xpose.msrb.mxu3 %v2598_v39  ;;  %v2625_v12 = vsel %vm2624_vm11, %v9076_v32, -inf }
 0x95b   :  { %2626 = vmax.xlane.f32.xlu1 %v2625_v12 }
 0x95f   :  { %v2419_v33 = vpop.f32.mrf.mxu2  ;;  %v2444_v23 = vpop.f32.mrf.mxu0 }
 0x960   :  { %v2524_v18 = vpop.permute.xlu1 %2523  ;;  %v2420_v58 = vadd.f32 %v2419_v33, %v2250_v35  ;;  %v2591_v50 = vpop.permute.xlu0 %2590 }
 0x961   :  { %v2529_v55 = vsel %vm369_vm1, %v2524_v18, 0  ;;  %6735 = vmatmul.msk.bf16.vlgmr.msra.gmra.mxu2 %vm369_vm1, %v2568_v1  ;;  %6736 = vmatmul.msk.bf16.vlgmr.msrb.gmra.mxu3 %vm369_vm1, %v2591_v50 }
 0x962   :  { %2538 = vmatpush.bf16.xpose.msrb.mxu0 %v2529_v55  ;;  %v2426_v57 = vpack.c.bf16 %v2420_v58, %v2420_v58 }
 0x964   :  { %v2719_v28 = vsel %vm2717_vm12, %v2426_v57, 0  ;;  %v2736_v49 = vunpack.c.l.b16 %v2426_v57 }
 0x966   :  { %v9088_v44 = vpack.c.b16 %v2736_v49, %v2736_v49 }
 0x967   :  { %v9107_v9 = vpop.f32.mrf.mxu2 }
 0x968   :  { %v2545_v38 = vpop.permute.xlu1 %2544  ;;  %2760 = vrot.lane.b32.xlu0 %v9088_v44, %s8293_s9  ;;  %2848 = vrot.lane.b32.xlu2 %v9088_v44, %s8295_s11  ;;  %v2522_v25 = vpop.permute.xlu0 %2521 }
 0x969   :  { %6734 = vmatmul.msk.bf16.vlgmr.msra.gmra.mxu1 %vm369_vm1, %v2545_v38  ;;  %6733 = vmatmul.msk.bf16.vlgmr.msrb.gmra.mxu0 %vm369_vm1, %v2522_v25  ;;  %v2394_v38 = vadd.f32 %v9061_v54, %v2248_v53 }
 0x96a   :  { %2728 = vmatpush.bf16.msra.mxu0 %v2719_v28 }
 0x974   :  { %2782 = vrot.lane.b32.xlu1 %v9088_v44, %s8292_s30 }
 0x97c   :  { %2738 = vrot.lane.b32.xlu1 %v9088_v44, %s8294_s10 }
 0x9bf   :  { %v2471_v5 = vpop.f32.mrf.mxu1 }
 0x9c0   :  { %v9101_v6 = vadd.f32 %v9071_v19, %v2471_v5  ;;  %v9147_v5 = vpack.c.bf16 %v2394_v38, %v2394_v38 }
 0x9c2   :  { %v2628_v22 = vsel %vm2624_vm11, %v9101_v6, -inf  ;;  %v2849_v41 = vpop.permute.xlu2 %2848 }
 0x9c3   :  { %2629 = vmax.xlane.f32.xlu2 %v2628_v22  ;;  %v2854_v21 = vsel %vm2717_vm12, %v2849_v41, 0 }
 0x9c7   :  { %v2473_v37 = vpop.f32.mrf.mxu1 }
 0x9c8   :  { %v2949_v37 = vunpack.c.l.b16 %v9147_v5 }
 0x9ce   :  { %v2627_v15 = vpop.xlane.xlu1 %2626 }
 0x9cf   :  { %v2649_v51 = vsub.f32 %v9076_v32, %v2627_v15 }
 0x9d1   :  { %v2657_v14 = vmul.f32 1.442695, %v2649_v51 }
 0x9d3   :  { %8074 = vpow2.f32 %v2657_v14 }
 0x9d4   :  { %v2494_v61 = vpop.f32.mrf.mxu2  ;;  %v2517_v0 = vpop.f32.mrf.mxu3 }
 0x9d5   :  { %v9110_v11 = vadd.f32 %v9071_v19, %v2517_v0  ;;  %v2618_v33 = vadd.f32 %v9071_v19, %v2494_v61  ;;  %v9154_v61 = vpack.c.b16 %v2949_v37, %v2949_v37 }
 0x9d7   :  { %v2634_v63 = vsel %vm2624_vm11, %v9110_v11, -inf  ;;  %v2631_v50 = vsel %vm2624_vm11, %v2618_v33, -inf }
 0x9d8   :  { %2635 = vmax.xlane.f32.xlu0 %v2634_v63 }
 0x9d9   :  { %v8075_v57 = vpop.eup %8074 }
 0x9da   :  { %v2761_v56 = vpop.permute.xlu0 %2760  ;;  %v2673_v28 = vsel %vm2624_vm11, %v8075_v57, 0.0 }
 0x9db   :  { %v2766_v7 = vsel %vm2717_vm12, %v2761_v56, 0 }
 0x9dc   :  { %v2496_v46 = vpop.f32.mrf.mxu2  ;;  %v2519_v43 = vpop.f32.mrf.mxu3  ;;  %2775 = vmatpush.bf16.msrb.mxu2 %v2766_v7 }
 0x9e0   :  { %2863 = vmatpush.bf16.msra.mxu2 %v2854_v21 }
 0x9e4   :  { %v2586_v16 = vpop.f32.mrf.mxu2  ;;  %v2609_v42 = vpop.f32.mrf.mxu3 }
 0x9e5   :  { %v9117_v31 = vadd.f32 %v9071_v19, %v2609_v42  ;;  %v2622_v39 = vadd.f32 %v9071_v19, %v2586_v16 }
 0x9e6   :  { %v2563_v34 = vpop.f32.mrf.mxu1  ;;  %v2540_v10 = vpop.f32.mrf.mxu0 }
 0x9e7   :  { %v9120_v3 = vadd.f32 %v9071_v19, %v2563_v34  ;;  %v2783_v4 = vpop.permute.xlu1 %2782  ;;  %v2620_v47 = vadd.f32 %v9071_v19, %v2540_v10  ;;  %v2646_v48 = vsel %vm2624_vm11, %v9117_v31, -inf  ;;  %v2643_v55 = vsel %vm2624_vm11, %v2622_v39, -inf }
 0x9e8   :  { %v2788_v40 = vsel %vm2717_vm12, %v2783_v4, 0  ;;  %2647 = vmax.xlane.f32.xlu1 %v2646_v48  ;;  %v2408_v19 = vadd.f32 %v2407_v2, %v2249_v52 }
 0x9e9   :  { %v2640_v13 = vsel %vm2624_vm11, %v9120_v3, -inf  ;;  %2797 = vmatpush.bf16.msra.mxu3 %v2788_v40  ;;  %v2637_v36 = vsel %vm2624_vm11, %v2620_v47, -inf }
 0x9ea   :  { %2641 = vmax.xlane.f32.xlu0 %v2640_v13  ;;  %2638 = vmax.xlane.f32.xlu2 %v2637_v36  ;;  %v2927_v49 = vpack.c.bf16 %v2408_v19, %v2408_v19 }
 0x9ec   :  { %v2588_v1 = vpop.f32.mrf.mxu2  ;;  %v2611_v12 = vpop.f32.mrf.mxu3  ;;  %v2954_v25 = vunpack.c.l.b16 %v2927_v49 }
 0x9ee   :  { %v2565_v23 = vpop.f32.mrf.mxu1  ;;  %v2542_v18 = vpop.f32.mrf.mxu0  ;;  %v9149_v22 = vpack.c.b16 %v2954_v25, %v2954_v25  ;;  %v2422_v25 = vadd.f32 %v9107_v9, %v2250_v35 }
 0x9ef   :  { %v2739_v58 = vpop.permute.xlu1 %2738 }
 0x9f0   :  { %v2744_v32 = vsel %vm2717_vm12, %v2739_v58, 0 }
 0x9f1   :  { %2753 = vmatpush.bf16.msrb.mxu1 %v2744_v32 }
 0x9f2   :  { %2644 = vmax.xlane.f32.xlu0 %v2643_v55  ;;  %2632 = vmax.xlane.f32.xlu2 %v2631_v50 }
 0x9fa   :  { %2674 = vadd.xlane.f32.xlu2 %v2673_v28 }
 0xa01   :  { %2870 = vrot.lane.b32.xlu1 %v9088_v44, %s8290_s28 }
 0xa06   :  { %2804 = vrot.lane.b32.xlu0 %v9088_v44, %s8291_s29 }
 0xa0e   :  { %2826 = vrot.lane.b32.xlu0 %v9088_v44, %s8296_s12 }
 0xa16   :  { %3002 = vrot.lane.b32.xlu0 %v9149_v22, %s8292_s30 }
 0xa1e   :  { %3000 = vrot.lane.b32.xlu0 %v9154_v61, %s8292_s30 }
 0xa26   :  { %2956 = vrot.lane.b32.xlu0 %v9149_v22, %s8294_s10 }
 0xa36   :  { %v2630_v52 = vpop.xlane.xlu2 %2629 }
 0xa37   :  { %v2650_v53 = vsub.f32 %v9101_v6, %v2630_v52  ;;  %v9208_v52 = vpack.c.bf16 %v2422_v25, %v2422_v25 }
 0xa39   :  { %v2659_v54 = vmul.f32 1.442695, %v2650_v53  ;;  %v3236_v53 = vunpack.c.l.b16 %v9208_v52 }
 0xa3b   :  { %8076 = vpow2.f32 %v2659_v54  ;;  %v9215_v54 = vpack.c.b16 %v3236_v53, %v3236_v53 }
 0xa41   :  { %v9161_v44 = vpop.eup %8076 }
 0xa42   :  { %v2676_v2 = vsel %vm2624_vm11, %v9161_v44, 0.0 }
 0xa43   :  { %2677 = vadd.xlane.f32.xlu2 %v2676_v2 }
 0xa4b   :  { %v2636_v0 = vpop.xlane.xlu0 %2635 }
 0xa4c   :  { %v2652_v51 = vsub.f32 %v9110_v11, %v2636_v0  ;;  %v2933_v11 = vsel %vm369_vm1, %v2927_v49, 0 }
 0xa5b   :  { %2977 = vrot.lane.b32.xlu2 %v9154_v61, %s8293_s9  ;;  %v2648_v10 = vpop.xlane.xlu1 %2647 }
 0xa5c   :  { %v2656_v28 = vsub.f32 %v9117_v31, %v2648_v10 }
 0xa5d   :  { %v2642_v63 = vpop.xlane.xlu0 %2641  ;;  %v2639_v41 = vpop.xlane.xlu2 %2638 }
 0xa5e   :  { %v2653_v56 = vsub.f32 %v2620_v47, %v2639_v41  ;;  %v2654_v58 = vsub.f32 %v9120_v3, %v2642_v63  ;;  %v2671_v3 = vmul.f32 1.442695, %v2656_v28 }
 0xa60   :  { %v2665_v21 = vmul.f32 1.442695, %v2653_v56  ;;  %v2667_v32 = vmul.f32 1.442695, %v2654_v58 }
 0xa62   :  { %8078 = vpow2.f32 %v2665_v21 }
 0xa65   :  { %v2645_v7 = vpop.xlane.xlu0 %2644  ;;  %v2633_v46 = vpop.xlane.xlu2 %2632 }
 0xa66   :  { %v2655_v6 = vsub.f32 %v2622_v39, %v2645_v7  ;;  %v2651_v43 = vsub.f32 %v2618_v33, %v2633_v46  ;;  %v2663_v39 = vmul.f32 1.442695, %v2652_v51 }
 0xa68   :  { %v2669_v15 = vmul.f32 1.442695, %v2655_v6  ;;  %v9167_v16 = vpop.eup %8078  ;;  %v2661_v42 = vmul.f32 1.442695, %v2651_v43 }
 0xa69   :  { %v2685_v34 = vsel %vm2624_vm11, %v9167_v16, 0.0 }
 0xa6a   :  { %8080 = vpow2.f32 %v2669_v15  ;;  %2686 = vadd.xlane.f32.xlu1 %v2685_v34 }
 0xa6b   :  { %8082 = vpow2.f32 %v2661_v42 }
 0xa6d   :  { %v2675_v4 = vpop.xlane.xlu2 %2674 }
 0xa6e   :  { %8084 = vrcp.f32 %v2675_v4 }
 0xa6f   :  { %8086 = vpow2.f32 %v2663_v39 }
 0xa70   :  { %v9171_v47 = vpop.eup %8080  ;;  %8088 = vpow2.f32 %v2667_v32 }
 0xa71   :  { %v9173_v48 = vpop.eup %8082  ;;  %v2691_v40 = vsel %vm2624_vm11, %v9171_v47, 0.0  ;;  %8090 = vpow2.f32 %v2671_v3 }
 0xa72   :  { %v2679_v13 = vsel %vm2624_vm11, %v9173_v48, 0.0  ;;  %2692 = vadd.xlane.f32.xlu0 %v2691_v40 }
 0xa73   :  { %2680 = vadd.xlane.f32.xlu1 %v2679_v13  ;;  %v2871_v36 = vpop.permute.xlu1 %2870 }
 0xa74   :  { %v8085_v1 = vpop.eup %8084  ;;  %v2876_v14 = vsel %vm2717_vm12, %v2871_v36, 0 }
 0xa75   :  { %v2705_v12 = vmul.f32 %v8085_v1, %v8075_v57  ;;  %2885 = vmatpush.bf16.msrb.mxu3 %v2876_v14  ;;  %v9185_v55 = vpop.eup %8086 }
 0xa76   :  { %v2682_v19 = vsel %vm2624_vm11, %v9185_v55, 0.0  ;;  %v9193_v49 = vpop.eup %8088 }
 0xa77   :  { %v2713_v33 = vpack.c.bf16 %v2705_v12, %v2705_v12  ;;  %v2688_v38 = vsel %vm2624_vm11, %v9193_v49, 0.0  ;;  %v9201_v31 = vpop.eup %8090 }
 0xa78   :  { %v2805_v23 = vpop.permute.xlu0 %2804  ;;  %v2694_v37 = vsel %vm2624_vm11, %v9201_v31, 0.0 }
 0xa79   :  { %v2810_v18 = vsel %vm2717_vm12, %v2805_v23, 0  ;;  %6737 = vmatmul.msk.bf16.vlgmr.msra.gmra.mxu0 %vm2624_vm11, %v2713_v33 }
 0xa7a   :  { %2819 = vmatpush.bf16.msrb.mxu0 %v2810_v18 }
 0xa7e   :  { %2942 = vmatpush.bf16.xpose.msra.mxu0 %v2933_v11 }
 0xa80   :  { %v2827_v50 = vpop.permute.xlu0 %2826 }
 0xa81   :  { %v2832_v57 = vsel %vm2717_vm12, %v2827_v50, 0 }
 0xa82   :  { %2841 = vmatpush.bf16.msra.mxu1 %v2832_v57 }
 0xa84   :  { %2683 = vadd.xlane.f32.xlu2 %v2682_v19 }
 0xa86   :  { %3094 = vrot.lane.b32.xlu0 %v9149_v22, %s8290_s28 }
 0xa88   :  { %v3003_v45 = vpop.permute.xlu0 %3002 }
 0xa89   :  { %v3008_v33 = vsel %vm369_vm1, %v3003_v45, 0 }
 0xa8c   :  { %2979 = vrot.lane.b32.xlu1 %v9149_v22, %s8293_s9  ;;  %2689 = vadd.xlane.f32.xlu2 %v2688_v38 }
 0xa8e   :  { %3092 = vrot.lane.b32.xlu0 %v9154_v61, %s8290_s28 }
 0xa90   :  { %v9229_v35 = vpop.permute.xlu0 %3000 }
 0xa94   :  { %3071 = vrot.lane.b32.xlu1 %v9149_v22, %s8295_s11  ;;  %2695 = vadd.xlane.f32.xlu2 %v2694_v37 }
 0xa96   :  { %3023 = vrot.lane.b32.xlu0 %v9154_v61, %s8291_s29 }
 0xa98   :  { %v2957_v63 = vpop.permute.xlu0 %2956 }
 0xa99   :  { %v2962_v56 = vsel %vm369_vm1, %v2957_v63, 0 }
 0xa9c   :  { %2951 = vrot.lane.b32.xlu1 %v9154_v61, %s8294_s10 }
 0xa9e   :  { %3282 = vrot.lane.b32.xlu0 %v9215_v54, %s8292_s30 }
 0xaa4   :  { %3025 = vrot.lane.b32.xlu1 %v9149_v22, %s8291_s29 }
 0xaac   :  { %3046 = vrot.lane.b32.xlu1 %v9154_v61, %s8296_s12  ;;  %3069 = vrot.lane.b32.xlu2 %v9154_v61, %s8295_s11 }
 0xab4   :  { %3048 = vrot.lane.b32.xlu2 %v9149_v22, %s8296_s12 }
 0xab6   :  { %v2678_v9 = vpop.xlane.xlu2 %2677 }
 0xab7   :  { %8092 = vrcp.f32 %v2678_v9 }
 0xabd   :  { %v8093_v2 = vpop.eup %8092 }
 0xabe   :  { %v2706_v0 = vmul.f32 %v8093_v2, %v9161_v44  ;;  %v2978_v43 = vpop.permute.xlu2 %2977 }
 0xac0   :  { %v2734_v41 = vpack.c.bf16 %v2706_v0, %v2706_v0 }
 0xac2   :  { %6738 = vmatmul.msk.bf16.vlgmr.msrb.gmra.mxu1 %vm2624_vm11, %v2734_v41 }
 0xac3   :  { %2971 = vmatpush.bf16.xpose.msrb.mxu1 %v2962_v56  ;;  %v7935_v56 = vld [vmem:[%s10077_s1 + $0x1] ss:$0 sm:$0xff] }
 0xadd   :  { %v2687_v21 = vpop.xlane.xlu1 %2686 }
 0xade   :  { %8094 = vrcp.f32 %v2687_v21 }
 0xae4   :  { %v8095_v61 = vpop.eup %8094 }
 0xae5   :  { %v2709_v7 = vmul.f32 %v8095_v61, %v9167_v16  ;;  %v2693_v42 = vpop.xlane.xlu0 %2692 }
 0xae6   :  { %v2681_v22 = vpop.xlane.xlu1 %2680 }
 0xae7   :  { %8096 = vrcp.f32 %v2681_v22  ;;  %v2803_v46 = vpack.c.bf16 %v2709_v7, %v2709_v7 }
 0xae8   :  { %8098 = vrcp.f32 %v2693_v42 }
 0xae9   :  { %6741 = vmatmul.msk.bf16.vlgmr.msrb.gmra.mxu0 %vm2624_vm11, %v2803_v46 }
 0xaed   :  { %v8097_v6 = vpop.eup %8096 }
 0xaee   :  { %v2707_v44 = vmul.f32 %v8097_v6, %v9173_v48  ;;  %v8099_v4 = vpop.eup %8098 }
 0xaef   :  { %v2711_v16 = vmul.f32 %v8099_v4, %v9171_v47 }
 0xaf0   :  { %v2759_v15 = vpack.c.bf16 %v2707_v44, %v2707_v44 }
 0xaf1   :  { %v2847_v14 = vpack.c.bf16 %v2711_v16, %v2711_v16 }
 0xaf2   :  { %6739 = vmatmul.msk.bf16.vlgmr.msrb.gmra.mxu2 %vm2624_vm11, %v2759_v15 }
 0xaf6   :  { %v9238_v10 = vpop.f32.mrf.mxu0 }
 0xaf7   :  { %v2684_v34 = vpop.xlane.xlu2 %2683 }
 0xaf8   :  { %8100 = vrcp.f32 %v2684_v34  ;;  %v3095_v12 = vpop.permute.xlu0 %3094 }
 0xaf9   :  { %6745 = vmatmul.msk.bf16.vlgmr.msra.gmra.mxu0 %vm369_vm1, %v9147_v5  ;;  %v3100_v3 = vsel %vm369_vm1, %v3095_v12, 0 }
 0xafe   :  { %v8101_v40 = vpop.eup %8100  ;;  %v2980_v51 = vpop.permute.xlu1 %2979 }
 0xaff   :  { %v2708_v48 = vmul.f32 %v8101_v40, %v9185_v55  ;;  %v2985_v13 = vsel %vm369_vm1, %v2980_v51, 0  ;;  %v2690_v36 = vpop.xlane.xlu2 %2689  ;;  %v2732_v1 = vpop.f32.mrf.mxu0 }
 0xb00   :  { %8102 = vrcp.f32 %v2690_v36  ;;  %2994 = vmatpush.bf16.xpose.msrb.mxu2 %v2985_v13  ;;  %v3093_v32 = vpop.permute.xlu0 %3092 }
 0xb01   :  { %v2781_v39 = vpack.c.bf16 %v2708_v48, %v2708_v48 }
 0xb02   :  { %6743 = vmatmul.msk.bf16.vlgmr.msra.gmra.mxu2 %vm2624_vm11, %v2847_v14 }
 0xb03   :  { %6740 = vmatmul.msk.bf16.vlgmr.msra.gmra.mxu3 %vm2624_vm11, %v2781_v39 }
 0xb04   :  { %3017 = vmatpush.bf16.xpose.msra.mxu3 %v3008_v33 }
 0xb06   :  { %v8103_v5 = vpop.eup %8102  ;;  %v3072_v47 = vpop.permute.xlu1 %3071 }
 0xb07   :  { %v2710_v23 = vmul.f32 %v8103_v5, %v9193_v49  ;;  %v3077_v18 = vsel %vm369_vm1, %v3072_v47, 0  ;;  %v2696_v58 = vpop.xlane.xlu2 %2695 }
 0xb08   :  { %8104 = vrcp.f32 %v2696_v58  ;;  %3086 = vmatpush.bf16.xpose.msra.mxu2 %v3077_v18  ;;  %v3024_v49 = vpop.permute.xlu0 %3023 }
 0xb09   :  { %v2825_v11 = vpack.c.bf16 %v2710_v23, %v2710_v23 }
 0xb0b   :  { %6742 = vmatmul.msk.bf16.vlgmr.msra.gmra.mxu1 %vm2624_vm11, %v2825_v11 }
 0xb0e   :  { %v8105_v55 = vpop.eup %8104  ;;  %v2952_v50 = vpop.permute.xlu1 %2951 }
 0xb0f   :  { %v2712_v57 = vmul.f32 %v8105_v55, %v9201_v31  ;;  %v3070_v28 = vpop.permute.xlu2 %3069  ;;  %v3219_v31 = vsel %vm2717_vm12, %v9208_v52, 0 }
 0xb10   :  { %v3283_v45 = vpop.permute.xlu0 %3282 }
 0xb11   :  { %v2869_v19 = vpack.c.bf16 %v2712_v57, %v2712_v57  ;;  %v3288_v9 = vsel %vm2717_vm12, %v3283_v45, 0 }
 0xb12   :  { %6747 = vmatmul.msk.bf16.vlgmr.msrb.gmra.mxu2 %vm369_vm1, %v2978_v43 }
 0xb13   :  { %6744 = vmatmul.msk.bf16.vlgmr.msrb.gmra.mxu3 %vm2624_vm11, %v2869_v19 }
 0xb14   :  { %3109 = vmatpush.bf16.xpose.msrb.mxu3 %v3100_v3 }
 0xb16   :  { %v3026_v38 = vpop.permute.xlu1 %3025 }
 0xb17   :  { %v3031_v25 = vsel %vm369_vm1, %v3026_v38, 0  ;;  %v3049_v37 = vpop.permute.xlu2 %3048 }
 0xb18   :  { %v3054_v53 = vsel %vm369_vm1, %v3049_v37, 0  ;;  %3040 = vmatpush.bf16.xpose.msrb.mxu0 %v3031_v25 }
 0xb19   :  { %3063 = vmatpush.bf16.xpose.msra.mxu1 %v3054_v53 }
 0xb1b   :  { %6746 = vmatmul.msk.bf16.vlgmr.msrb.gmra.mxu1 %vm369_vm1, %v2952_v50 }
 0xb1e   :  { %v3047_v2 = vpop.permute.xlu1 %3046 }
 0xb1f   :  { %6749 = vmatmul.msk.bf16.vlgmr.msrb.gmra.mxu0 %vm369_vm1, %v3024_v49 }
 0xb20   :  { %3228 = vmatpush.bf16.msra.mxu0 %v3219_v31 }
 0xb22   :  { %6751 = vmatmul.msk.bf16.vlgmr.msra.gmra.mxu2 %vm369_vm1, %v3070_v28 }
 0xb23   :  { %6748 = vmatmul.msk.bf16.vlgmr.msra.gmra.mxu3 %vm369_vm1, %v9229_v35 }
 0xb24   :  { %3297 = vmatpush.bf16.msra.mxu3 %v3288_v9 }
 0xb2b   :  { %6750 = vmatmul.msk.bf16.vlgmr.msra.gmra.mxu1 %vm369_vm1, %v3047_v2 }
 0xb33   :  { %6752 = vmatmul.msk.bf16.vlgmr.msrb.gmra.mxu3 %vm369_vm1, %v3093_v32 }
 0xb3f   :  { %v9267_v52 = vpop.f32.mrf.mxu1 }
 0xb47   :  { %v2757_v0 = vpop.f32.mrf.mxu1 }
 0xb66   :  { %v9269_v63 = vpop.f32.mrf.mxu0 }
 0xb6e   :  { %v2823_v41 = vpop.f32.mrf.mxu0 }
 0xb75   :  { %v9274_v21 = vpop.f32.mrf.mxu2 }
 0xb76   :  { %v2944_v61 = vpop.f32.mrf.mxu0 }
 0xb77   :  { %v3118_v35 = vadd.f32 %v7935_v56, %v2944_v61 }
 0xb79   :  { %v3126_v7 = vsel %vm2624_vm11, %v3118_v35, -inf }
 0xb7a   :  { %3127 = vmax.xlane.f32.xlu1 %v3126_v7 }
 0xb7d   :  { %v2779_v22 = vpop.f32.mrf.mxu2 }
 0xb7e   :  { %v2946_v46 = vpop.f32.mrf.mxu0 }
 0xb85   :  { %v9277_v6 = vpop.f32.mrf.mxu2 }
 0xb86   :  { %v9279_v44 = vpop.f32.mrf.mxu3 }
 0xb88   :  { %v9281_v43 = vpop.f32.mrf.mxu1 }
 0xb8d   :  { %v2867_v15 = vpop.f32.mrf.mxu2 }
 0xb8e   :  { %v2801_v42 = vpop.f32.mrf.mxu3 }
 0xb90   :  { %v2845_v34 = vpop.f32.mrf.mxu1 }
 0xb93   :  { %3238 = vrot.lane.b32.xlu1 %v9215_v54, %s8294_s10 }
 0xb95   :  { %v2996_v4 = vpop.f32.mrf.mxu2 }
 0xb96   :  { %v9285_v16 = vpop.f32.mrf.mxu3  ;;  %v3120_v23 = vadd.f32 %v7935_v56, %v2996_v4 }
 0xb98   :  { %v2973_v40 = vpop.f32.mrf.mxu1  ;;  %v3132_v32 = vsel %vm2624_vm11, %v3120_v23, -inf }
 0xb99   :  { %v3119_v51 = vadd.f32 %v7935_v56, %v2973_v40 }
 0xb9b   :  { %v3129_v48 = vsel %vm2624_vm11, %v3119_v51, -inf }
 0xb9c   :  { %3130 = vmax.xlane.f32.xlu2 %v3129_v48  ;;  %v3042_v13 = vpop.f32.mrf.mxu0 }
 0xb9d   :  { %v2998_v36 = vpop.f32.mrf.mxu2  ;;  %v3122_v14 = vadd.f32 %v7935_v56, %v3042_v13 }
 0xb9e   :  { %v2889_v1 = vpop.f32.mrf.mxu3 }
 0xb9f   :  { %v3138_v12 = vsel %vm2624_vm11, %v3122_v14, -inf }
 0xba0   :  { %v2975_v39 = vpop.f32.mrf.mxu1 }
 0xba4   :  { %3139 = vmax.xlane.f32.xlu2 %v3138_v12  ;;  %v3044_v33 = vpop.f32.mrf.mxu0 }
 0xba5   :  { %v3088_v5 = vpop.f32.mrf.mxu2 }
 0xba6   :  { %v3019_v47 = vpop.f32.mrf.mxu3  ;;  %v3124_v3 = vadd.f32 %v7935_v56, %v3088_v5 }
 0xba7   :  { %v3121_v18 = vadd.f32 %v7935_v56, %v3019_v47 }
 0xba8   :  { %v3065_v58 = vpop.f32.mrf.mxu1  ;;  %v3144_v25 = vsel %vm2624_vm11, %v3124_v3, -inf }
 0xba9   :  { %v3135_v11 = vsel %vm2624_vm11, %v3121_v18, -inf  ;;  %v3123_v55 = vadd.f32 %v7935_v56, %v3065_v58 }
 0xbaa   :  { %3136 = vmax.xlane.f32.xlu0 %v3135_v11 }
 0xbab   :  { %v3141_v19 = vsel %vm2624_vm11, %v3123_v55, -inf }
 0xbac   :  { %3133 = vmax.xlane.f32.xlu2 %v3132_v32 }
 0xbad   :  { %v3090_v50 = vpop.f32.mrf.mxu2 }
 0xbae   :  { %v3021_v57 = vpop.f32.mrf.mxu3 }
 0xbb0   :  { %v3067_v28 = vpop.f32.mrf.mxu1 }
 0xbb2   :  { %3142 = vmax.xlane.f32.xlu0 %v3141_v19 }
 0xbb6   :  { %v3111_v49 = vpop.f32.mrf.mxu3 }
 0xbb7   :  { %v3125_v38 = vadd.f32 %v7935_v56, %v3111_v49 }
 0xbb9   :  { %v3147_v37 = vsel %vm2624_vm11, %v3125_v38, -inf }
 0xbba   :  { %3145 = vmax.xlane.f32.xlu0 %v3144_v25 }
 0xbbd   :  { %3148 = vmax.xlane.f32.xlu1 %v3147_v37 }
 0xbbe   :  { %v3113_v53 = vpop.f32.mrf.mxu3 }
 0xbc4   :  { %3260 = vrot.lane.b32.xlu2 %v9215_v54, %s8293_s9 }
 0xbce   :  { %3348 = vrot.lane.b32.xlu0 %v9215_v54, %s8295_s11 }
 0xbed   :  { %v3128_v31 = vpop.xlane.xlu1 %3127 }
 0xbee   :  { %v3150_v45 = vsub.f32 %v3118_v35, %v3128_v31 }
 0xbf0   :  { %v3158_v9 = vmul.f32 1.442695, %v3150_v45 }
 0xbf2   :  { %8106 = vpow2.f32 %v3158_v9 }
 0xbf8   :  { %v9298_v2 = vpop.eup %8106 }
 0xbf9   :  { %v3174_v0 = vsel %vm2624_vm11, %v9298_v2, 0.0 }
 0xbfa   :  { %3175 = vadd.xlane.f32.xlu0 %v3174_v0 }
 0xc05   :  { %v3239_v41 = vpop.permute.xlu1 %3238 }
 0xc06   :  { %v3244_v56 = vsel %vm2717_vm12, %v3239_v41, 0 }
 0xc07   :  { %3253 = vmatpush.bf16.msrb.mxu1 %v3244_v56 }
 0xc0f   :  { %v3131_v61 = vpop.xlane.xlu2 %3130 }
 0xc10   :  { %v3151_v7 = vsub.f32 %v3119_v51, %v3131_v61 }
 0xc12   :  { %v3160_v22 = vmul.f32 1.442695, %v3151_v7 }
 0xc14   :  { %8108 = vpow2.f32 %v3160_v22 }
 0xc17   :  { %v3140_v46 = vpop.xlane.xlu2 %3139 }
 0xc18   :  { %v3154_v15 = vsub.f32 %v3122_v14, %v3140_v46 }
 0xc1a   :  { %v8109_v42 = vpop.eup %8108  ;;  %v3166_v35 = vmul.f32 1.442695, %v3154_v15 }
 0xc1b   :  { %v3177_v34 = vsel %vm2624_vm11, %v8109_v42, 0.0 }
 0xc1c   :  { %8110 = vpow2.f32 %v3166_v35  ;;  %3178 = vadd.xlane.f32.xlu1 %v3177_v34 }
 0xc1d   :  { %v3137_v4 = vpop.xlane.xlu0 %3136 }
 0xc1e   :  { %v3153_v40 = vsub.f32 %v3121_v18, %v3137_v4 }
 0xc1f   :  { %v3134_v48 = vpop.xlane.xlu2 %3133 }
 0xc20   :  { %v3164_v13 = vmul.f32 1.442695, %v3153_v40  ;;  %v3152_v36 = vsub.f32 %v3120_v23, %v3134_v48 }
 0xc22   :  { %v9304_v1 = vpop.eup %8110  ;;  %8112 = vpow2.f32 %v3164_v13  ;;  %v3162_v39 = vmul.f32 1.442695, %v3152_v36 }
 0xc23   :  { %v3186_v51 = vsel %vm2624_vm11, %v9304_v1, 0.0 }
 0xc24   :  { %8114 = vpow2.f32 %v3162_v39  ;;  %3187 = vadd.xlane.f32.xlu1 %v3186_v51 }
 0xc25   :  { %v3143_v14 = vpop.xlane.xlu0 %3142 }
 0xc26   :  { %v3155_v12 = vsub.f32 %v3123_v55, %v3143_v14 }
 0xc27   :  { %v3261_v33 = vpop.permute.xlu2 %3260 }
 0xc28   :  { %v8113_v5 = vpop.eup %8112  ;;  %v3168_v47 = vmul.f32 1.442695, %v3155_v12  ;;  %v3266_v58 = vsel %vm2717_vm12, %v3261_v33, 0 }
 0xc29   :  { %3275 = vmatpush.bf16.msrb.mxu2 %v3266_v58  ;;  %v3183_v18 = vsel %vm2624_vm11, %v8113_v5, 0.0 }
 0xc2a   :  { %v8115_v23 = vpop.eup %8114  ;;  %8116 = vpow2.f32 %v3168_v47  ;;  %3184 = vadd.xlane.f32.xlu2 %v3183_v18 }
 0xc2b   :  { %v3180_v11 = vsel %vm2624_vm11, %v8115_v23, 0.0 }
 0xc2c   :  { %3181 = vadd.xlane.f32.xlu1 %v3180_v11 }
 0xc2d   :  { %v3146_v32 = vpop.xlane.xlu0 %3145 }
 0xc2e   :  { %v3156_v50 = vsub.f32 %v3124_v3, %v3146_v32 }
 0xc30   :  { %v9311_v57 = vpop.eup %8116  ;;  %v3170_v28 = vmul.f32 1.442695, %v3156_v50  ;;  %v3149_v55 = vpop.xlane.xlu1 %3148 }
 0xc31   :  { %v3189_v19 = vsel %vm2624_vm11, %v9311_v57, 0.0  ;;  %v3157_v49 = vsub.f32 %v3125_v38, %v3149_v55 }
 0xc32   :  { %8118 = vpow2.f32 %v3170_v28  ;;  %3190 = vadd.xlane.f32.xlu2 %v3189_v19 }
 0xc33   :  { %v3172_v25 = vmul.f32 1.442695, %v3157_v49 }
 0xc35   :  { %8120 = vpow2.f32 %v3172_v25 }
 0xc38   :  { %v8119_v37 = vpop.eup %8118 }
 0xc39   :  { %v3192_v53 = vsel %vm2624_vm11, %v8119_v37, 0.0 }
 0xc3a   :  { %3193 = vadd.xlane.f32.xlu0 %v3192_v53 }
 0xc3b   :  { %v8121_v31 = vpop.eup %8120 }
 0xc3c   :  { %v3195_v45 = vsel %vm2624_vm11, %v8121_v31, 0.0 }
 0xc3d   :  { %3196 = vadd.xlane.f32.xlu2 %v3195_v45 }
 0xc40   :  { %v3349_v3 = vpop.permute.xlu0 %3348 }
 0xc41   :  { %v3354_v9 = vsel %vm2717_vm12, %v3349_v3, 0 }
 0xc42   :  { %3363 = vmatpush.bf16.msra.mxu2 %v3354_v9 }
 0xc45   :  { %3304 = vrot.lane.b32.xlu1 %v9215_v54, %s8291_s29 }
 0xc4e   :  { %3326 = vrot.lane.b32.xlu0 %v9215_v54, %s8296_s12 }
 0xc55   :  { %3370 = vrot.lane.b32.xlu2 %v9215_v54, %s8290_s28 }
 0xc6d   :  { %v3176_v38 = vpop.xlane.xlu0 %3175 }
 0xc6e   :  { %8122 = vrcp.f32 %v3176_v38 }
 0xc74   :  { %v8123_v0 = vpop.eup %8122 }
 0xc75   :  { %v3206_v41 = vmul.f32 %v8123_v0, %v9298_v2 }
 0xc77   :  { %v3214_v56 = vpack.c.bf16 %v3206_v41, %v3206_v41 }
 0xc79   :  { %6753 = vmatmul.msk.bf16.vlgmr.msra.gmra.mxu0 %vm2624_vm11, %v3214_v56 }
 0xc8f   :  { %v3179_v61 = vpop.xlane.xlu1 %3178 }
 0xc90   :  { %8124 = vrcp.f32 %v3179_v61 }
 0xc96   :  { %v8125_v7 = vpop.eup %8124 }
 0xc97   :  { %v3207_v22 = vmul.f32 %v8125_v7, %v8109_v42  ;;  %v3188_v46 = vpop.xlane.xlu1 %3187 }
 0xc99   :  { %v3234_v15 = vpack.c.bf16 %v3207_v22, %v3207_v22 }
 0xc9b   :  { %6754 = vmatmul.msk.bf16.vlgmr.msrb.gmra.mxu1 %vm2624_vm11, %v3234_v15 }
 0xc9d   :  { %v3185_v35 = vpop.xlane.xlu2 %3184 }
 0xc9e   :  { %8126 = vrcp.f32 %v3185_v35 }
 0xc9f   :  { %v3182_v34 = vpop.xlane.xlu1 %3181 }
 0xca0   :  { %8128 = vrcp.f32 %v3182_v34 }
 0xca1   :  { %8130 = vrcp.f32 %v3188_v46 }
 0xca4   :  { %v8127_v54 = vpop.eup %8126 }
 0xca5   :  { %v3209_v4 = vmul.f32 %v8127_v54, %v8113_v5  ;;  %v3191_v36 = vpop.xlane.xlu2 %3190 }
 0xca6   :  { %v8129_v40 = vpop.eup %8128 }
 0xca7   :  { %v3281_v48 = vpack.c.bf16 %v3209_v4, %v3209_v4  ;;  %v3208_v2 = vmul.f32 %v8129_v40, %v8115_v23  ;;  %v8131_v51 = vpop.eup %8130  ;;  %v2106_v4 = vadd.f32 %v9056_v59, %v9054_v8  ;;  %v2113_v40 = vadd.f32 %v9034_v17, %v8971_v27  ;;  %v6791_v8 = vld [vmem:[#allocation2 + $0x3e0] sm:$0xf]  ;;  %v6787_v27 = vld [vmem:[#allocation2 + $0x358] sm:$0xf]  ;;  %v7604_v17 = vld [vmem:[#allocation2 + $0x398] sm:$0xf0] }
 0xca8   :  { %v3210_v33 = vmul.f32 %v8131_v51, %v9304_v1  ;;  %v7602_v51 = vld [vmem:[#allocation2 + $0x288] sm:$0xf0] }
 0xca9   :  { %v3259_v13 = vpack.c.bf16 %v3208_v2, %v3208_v2  ;;  %6756 = vmatmul.msk.bf16.vlgmr.msra.gmra.mxu3 %vm2624_vm11, %v3281_v48  ;;  %v6788_v2 = vor.u32 %v7604_v17, %v6787_v27 }
 0xcaa   :  { %v3303_v32 = vpack.c.bf16 %v3210_v33, %v3210_v33  ;;  %v7601_v33 = vld [vmem:[#allocation2 + $0x200] sm:$0xf0] }
 0xcab   :  { %6755 = vmatmul.msk.bf16.vlgmr.msrb.gmra.mxu2 %vm2624_vm11, %v3259_v13  ;;  %v6783_v13 = vld [vmem:[#allocation2 + $0x2d0] sm:$0xf] }
 0xcad   :  { %v3194_v42 = vpop.xlane.xlu0 %3193 }
 0xcae   :  { %8132 = vrcp.f32 %v3194_v42 }
 0xcb0   :  { %v3197_v39 = vpop.xlane.xlu2 %3196 }
 0xcb1   :  { %8134 = vrcp.f32 %v3197_v39  ;;  %v6779_v39 = vld [vmem:[#allocation2 + $0x248] sm:$0xf] }
 0xcb2   :  { %8136 = vrcp.f32 %v3191_v36  ;;  %v7603_v36 = vld [vmem:[#allocation2 + $0x310] sm:$0xf0] }
 0xcb3   :  { %v6784_v42 = vor.u32 %v7603_v36, %v6783_v13 }
 0xcb4   :  { %v8133_v14 = vpop.eup %8132 }
 0xcb5   :  { %v3212_v12 = vmul.f32 %v8133_v14, %v8119_v37  ;;  %v6780_v14 = vor.u32 %v7602_v51, %v6779_v39 }
 0xcb7   :  { %v3305_v5 = vpop.permute.xlu1 %3304  ;;  %v8135_v47 = vpop.eup %8134  ;;  %v3347_v18 = vpack.c.bf16 %v3212_v12, %v3212_v12  ;;  %v6775_v12 = vld [vmem:[#allocation2 + $0x1c0] sm:$0xf] }
 0xcb8   :  { %v3310_v58 = vsel %vm2717_vm12, %v3305_v5, 0  ;;  %v3213_v23 = vmul.f32 %v8135_v47, %v8121_v31  ;;  %v3371_v11 = vpop.permute.xlu2 %3370  ;;  %v8137_v55 = vpop.eup %8136  ;;  %v6776_v5 = vor.u32 %v7601_v33, %v6775_v12  ;;  %v6771_v47 = vld [vmem:[#allocation2 + $0x138] sm:$0xf]  ;;  %v8230_v12 = vld [vmem:[%s10076_s0] sm:$0xff] }
 0xcb9   :  { %3319 = vmatpush.bf16.msrb.mxu0 %v3310_v58  ;;  %v3376_v50 = vsel %vm2717_vm12, %v3371_v11, 0  ;;  %v3211_v1 = vmul.f32 %v8137_v55, %v9311_v57  ;;  %v7600_v58 = vld [vmem:[#allocation2 + $0x178] sm:$0xf0]  ;;  %v7599_v11 = vld [vmem:[#allocation2 + $0xf0] sm:$0xf0] }
 0xcba   :  { %v3369_v28 = vpack.c.bf16 %v3213_v23, %v3213_v23  ;;  %3385 = vmatpush.bf16.msrb.mxu3 %v3376_v50  ;;  %v6767_v23 = vld [vmem:[#allocation2 + $0xb0] sm:$0xf]  ;;  %v6763_v50 = vld [vmem:[#allocation2 + $0x28] sm:$0xf] }
 0xcbb   :  { %6759 = vmatmul.msk.bf16.vlgmr.msra.gmra.mxu2 %vm2624_vm11, %v3347_v18  ;;  %v3325_v25 = vpack.c.bf16 %v3211_v1, %v3211_v1  ;;  %v6772_v18 = vor.u32 %v7600_v58, %v6771_v47 }
 0xcbc   :  { %6757 = vmatmul.msk.bf16.vlgmr.msrb.gmra.mxu0 %vm2624_vm11, %v3303_v32  ;;  %v6768_v32 = vor.u32 %v7599_v11, %v6767_v23 }
 0xcbd   :  { %6760 = vmatmul.msk.bf16.vlgmr.msrb.gmra.mxu3 %vm2624_vm11, %v3369_v28  ;;  %v7598_v28 = vld [vmem:[#allocation2 + $0x68] sm:$0xf0] }
 0xcbe   :  { %v6764_v55 = vor.u32 %v7598_v28, %v6763_v50  ;;  %v2115_v50 = vadd.f32 %v9063_v30, %v9002_v20  ;;  %v6884_v28 = vld [vmem:[#allocation2 + $0x3e8] sm:$0xf]  ;;  %v6868_v20 = vld [vmem:[#allocation2 + $0x2d8] sm:$0xf]  ;;  %v7625_v30 = vld [vmem:[#allocation2 + $0x318] sm:$0xf0] }
 0xcc0   :  { %v3327_v19 = vpop.permute.xlu0 %3326 }
 0xcc1   :  { %v3332_v49 = vsel %vm2717_vm12, %v3327_v19, 0 }
 0xcc2   :  { %3341 = vmatpush.bf16.msra.mxu1 %v3332_v49 }
 0xcc5   :  { %6758 = vmatmul.msk.bf16.vlgmr.msra.gmra.mxu1 %vm2624_vm11, %v3325_v25 }
 0xcf6   :  { %v9338_v37 = vpop.f32.mrf.mxu0 }
 0xcfe   :  { %v3232_v53 = vpop.f32.mrf.mxu0 }
 0xd18   :  { %v3255_v31 = vpop.f32.mrf.mxu1 }
 0xd19   :  { %v7861_v45 = vpack.i.bf16 %v3255_v31, %v9267_v52 }
 0xd1b   :  { %7862 = vrot.lane.b32.xlu0 %v7861_v45, %s8290_s28 }
 0xd20   :  { %v3257_v3 = vpop.f32.mrf.mxu1 }
 0xd2c   :  { %v3299_v9 = vpop.f32.mrf.mxu3 }
 0xd2d   :  { %v7881_v38 = vpack.i.bf16 %v3299_v9, %v9279_v44 }
 0xd2e   :  { %v3277_v57 = vpop.f32.mrf.mxu2 }
 0xd2f   :  { %v7871_v0 = vpack.i.bf16 %v3277_v57, %v9274_v21  ;;  %7882 = vrot.lane.b32.xlu1 %v7881_v38, %s8296_s12 }
 0xd31   :  { %7872 = vrot.lane.b32.xlu2 %v7871_v0, %s8295_s11 }
 0xd34   :  { %v3301_v41 = vpop.f32.mrf.mxu3 }
 0xd36   :  { %v3279_v56 = vpop.f32.mrf.mxu2 }
 0xd39   :  { %v3321_v61 = vpop.f32.mrf.mxu0 }
 0xd3a   :  { %v7866_v7 = vpack.i.bf16 %v3321_v61, %v9269_v63 }
 0xd3c   :  { %7867 = vrot.lane.b32.xlu0 %v7866_v7, %s8291_s29 }
 0xd3e   :  { %v3365_v52 = vpop.f32.mrf.mxu2 }
 0xd3f   :  { %v7886_v22 = vpack.i.bf16 %v3365_v52, %v9277_v6  ;;  %v2114_v6 = vadd.f32 %v2106_v4, %v8974_v24  ;;  %v7605_v24 = vld [vmem:[#allocation2 + $0x420] sm:$0xf0] }
 0xd40   :  { %v3387_v46 = vpop.f32.mrf.mxu3  ;;  %v6792_v59 = vor.u32 %v7605_v24, %v6791_v8 }
 0xd41   :  { %7887 = vrot.lane.b32.xlu1 %v7886_v22, %s8293_s9  ;;  %v3323_v44 = vpop.f32.mrf.mxu0  ;;  %v7891_v21 = vpack.i.bf16 %v3387_v46, %v9285_v16  ;;  %v9362_v16 = vld [vmem:[%s10083_s7 + $0x6] ss:$0 sm:$0xff] }
 0xd42   :  { %v3343_v15 = vpop.f32.mrf.mxu1  ;;  %v9369_v48 = vadd.f32 %v9362_v16, %v2113_v40  ;;  %3491 = vmatpush.bf16.msra.mxu0 %v6792_v59 }
 0xd43   :  { %v7876_v35 = vpack.i.bf16 %v3343_v15, %v9281_v43  ;;  %v9365_v43 = vadd.f32 %v9362_v16, %v2114_v6 }
 0xd44   :  { %7892 = vrot.lane.b32.xlu0 %v7891_v21, %s8294_s10 }
 0xd45   :  { %7877 = vrot.lane.b32.xlu2 %v7876_v35, %s8292_s30 }
 0xd46   :  { %v3367_v34 = vpop.f32.mrf.mxu2  ;;  %3492 = vmatpush.bf16.msra.mxu0 %v6788_v2 }
 0xd48   :  { %v3389_v63 = vpop.f32.mrf.mxu3 }
 0xd4a   :  { %v3345_v54 = vpop.f32.mrf.mxu1  ;;  %3493 = vmatpush.bf16.msra.mxu0 %v6784_v42 }
 0xd4e   :  { %3494 = vmatpush.bf16.msra.mxu0 %v6780_v14  ;;  %v3507_v14 = vld [vmem:[%s10083_s7 + $0x22] ss:$0 sm:$0xff] }
 0xd52   :  { %3495 = vmatpush.bf16.msra.mxu0 %v6776_v5 }
 0xd56   :  { %3496 = vmatpush.bf16.msra.mxu0 %v6772_v18  ;;  %v8231_v18 = vld [vmem:[%s10076_s0 + $0x8] sm:$0xff] }
 0xd5a   :  { %3497 = vmatpush.bf16.msra.mxu0 %v6768_v32 }
 0xd5e   :  { %3498 = vmatpush.bf16.msra.mxu0 %v6764_v55  ;;  %v7629_v55 = vld [vmem:[#allocation2 + $0x428] sm:$0xf0] }
 0xd6b   :  { %2126 = vadd.xlane.f32.xlu1 %v9365_v43 }
 0xd6e   :  { %2124 = vadd.xlane.f32.xlu2 %v9369_v48 }
 0xd8b   :  { %v7873_v19 = vpop.permute.xlu2 %7872 }
 0xd8c   :  { %v7875_v57 = vunpack.i.h.bf16 %v7873_v19  ;;  %v7874_v0 = vunpack.i.l.bf16 %v7873_v19  ;;  %v6885_v19 = vor.u32 %v7629_v55, %v6884_v28 }
 0xd8d   :  { %v7863_v1 = vpop.permute.xlu0 %7862 }
 0xd8e   :  { %v7865_v49 = vunpack.i.h.bf16 %v7863_v1  ;;  %v7864_v25 = vunpack.i.l.bf16 %v7863_v1  ;;  %v7628_v1 = vld [vmem:[#allocation2 + $0x3ec] sm:$0xf]  ;;  %3741 = vmatpush.bf16.msrb.mxu2 %v6885_v19 }
 0xd90   :  { %v2919_v45 = vsel %vm369_vm1, %v9238_v10, %v7864_v25  ;;  %v3419_v3 = vsel %vm369_vm1, %v9338_v37, %v7865_v49  ;;  %v6886_v49 = vld [vmem:[#allocation2 + $0x42c] sm:$0xf0] }
 0xd91   :  { %v2920_v7 = vsel %vm963_vm2, %v2919_v45, %v7874_v0  ;;  %v3420_v52 = vsel %vm963_vm2, %v3419_v3, %v7875_v57  ;;  %v6889_v25 = vor.u32 %v7628_v1, %v6886_v49  ;;  %v7626_v45 = vld [vmem:[#allocation2 + $0x364] sm:$0xf]  ;;  %v7624_v57 = vld [vmem:[#allocation2 + $0x2dc] sm:$0xf]  ;;  %v6869_v0 = vor.u32 %v7625_v30, %v6868_v20 }
 0xd92   :  { %v2111_v1 = vadd.f32 %v9105_v26, %v9073_v29 }
 0xd93   :  { %3760 = vmatpush.bf16.msra.mxu3 %v6889_v25 }
 0xd9f   :  { %v7878_v61 = vpop.permute.xlu2 %7877 }
 0xda0   :  { %v7880_v35 = vunpack.i.h.bf16 %v7878_v61  ;;  %v7879_v34 = vunpack.i.l.bf16 %v7878_v61 }
 0xda1   :  { %v7883_v53 = vpop.permute.xlu1 %7882 }
 0xda2   :  { %v7885_v9 = vunpack.i.h.bf16 %v7883_v53  ;;  %v7884_v38 = vunpack.i.l.bf16 %v7883_v53  ;;  %v6876_v53 = vld [vmem:[#allocation2 + $0x360] sm:$0xf] }
 0xda4   :  { %v2921_v22 = vsel %vm99_vm0, %v2920_v7, %v7884_v38  ;;  %v3421_v44 = vsel %vm99_vm0, %v3420_v52, %v7885_v9  ;;  %v6878_v9 = vld [vmem:[#allocation2 + $0x3a4] sm:$0xf0]  ;;  %v6860_v7 = vld [vmem:[#allocation2 + $0x250] sm:$0xf]  ;;  %v7623_v52 = vld [vmem:[#allocation2 + $0x290] sm:$0xf0] }
 0xda5   :  { %v6881_v38 = vor.u32 %v7626_v45, %v6878_v9 }
 0xda7   :  { %3761 = vmatpush.bf16.msra.mxu3 %v6881_v38 }
 0xdae   :  { %v7868_v31 = vpop.permute.xlu0 %7867 }
 0xdaf   :  { %v7870_v41 = vunpack.i.h.bf16 %v7868_v31  ;;  %v7869_v56 = vunpack.i.l.bf16 %v7868_v31  ;;  %v7627_v31 = vld [vmem:[#allocation2 + $0x3a0] sm:$0xf0] }
 0xdb0   :  { %v6877_v3 = vor.u32 %v7627_v31, %v6876_v53 }
 0xdb1   :  { %v3422_v10 = vsel %vm968_vm3, %v3421_v44, %v7870_v41  ;;  %v2922_v37 = vsel %vm968_vm3, %v2921_v22, %v7869_v56  ;;  %v6870_v41 = vld [vmem:[#allocation2 + $0x31c] sm:$0xf0]  ;;  %v7622_v22 = vld [vmem:[#allocation2 + $0x254] sm:$0xf] }
 0xdb2   :  { %v2923_v54 = vsel %vm971_vm4, %v2922_v37, %v7879_v34  ;;  %v3423_v4 = vsel %vm971_vm4, %v3422_v10, %v7880_v35  ;;  %3742 = vmatpush.bf16.msrb.mxu2 %v6877_v3  ;;  %v6873_v61 = vor.u32 %v7624_v57, %v6870_v41  ;;  %v6862_v10 = vld [vmem:[#allocation2 + $0x294] sm:$0xf0]  ;;  %v7620_v35 = vld [vmem:[#allocation2 + $0x1cc] sm:$0xf] }
 0xdb3   :  { %v7888_v46 = vpop.permute.xlu1 %7887  ;;  %v6865_v37 = vor.u32 %v7622_v22, %v6862_v10 }
 0xdb4   :  { %v7890_v21 = vunpack.i.h.bf16 %v7888_v46  ;;  %v7889_v15 = vunpack.i.l.bf16 %v7888_v46  ;;  %3762 = vmatpush.bf16.msra.mxu3 %v6873_v61  ;;  %v6861_v46 = vor.u32 %v7623_v52, %v6860_v7 }
 0xdb6   :  { %v7893_v63 = vpop.permute.xlu0 %7892  ;;  %v2924_v8 = vsel %vm974_vm5, %v2923_v54, %v7889_v15  ;;  %v3424_v24 = vsel %vm974_vm5, %v3423_v4, %v7890_v21  ;;  %3743 = vmatpush.bf16.msrb.mxu2 %v6869_v0  ;;  %v6852_v21 = vld [vmem:[#allocation2 + $0x1c8] sm:$0xf]  ;;  %v7621_v15 = vld [vmem:[#allocation2 + $0x208] sm:$0xf0]  ;;  %v6854_v54 = vld [vmem:[#allocation2 + $0x20c] sm:$0xf0] }
 0xdb7   :  { %v7895_v6 = vunpack.i.h.bf16 %v7893_v63  ;;  %v7894_v40 = vunpack.i.l.bf16 %v7893_v63  ;;  %v6853_v63 = vor.u32 %v7621_v15, %v6852_v21  ;;  %v6857_v4 = vor.u32 %v7620_v35, %v6854_v54  ;;  %v9464_v21 = vld [vmem:[%s10083_s7 + $0x20] ss:$0 sm:$0xff]  ;;  %v6823_v54 = vld [vmem:[#allocation2 + $0x3e4] sm:$0xf] }
 0xdb8   :  { %3763 = vmatpush.bf16.msra.mxu3 %v6865_v37 }
 0xdb9   :  { %v2925_v59 = vsel %vm977_vm6, %v2924_v8, %v7894_v40  ;;  %v3425_v27 = vsel %vm977_vm6, %v3424_v24, %v7895_v6  ;;  %v6844_v6 = vld [vmem:[#allocation2 + $0x140] sm:$0xf]  ;;  %v7619_v40 = vld [vmem:[#allocation2 + $0x180] sm:$0xf0] }
 0xdba   :  { %v3442_v17 = vpack.c.bf16 %v3425_v27, %v2925_v59  ;;  %3744 = vmatpush.bf16.msrb.mxu2 %v6861_v46  ;;  %v7618_v8 = vld [vmem:[#allocation2 + $0x144] sm:$0xf]  ;;  %v6845_v24 = vor.u32 %v7619_v40, %v6844_v6  ;;  %v6846_v59 = vld [vmem:[#allocation2 + $0x184] sm:$0xf0]  ;;  %v7612_v40 = vld [vmem:[#allocation2 + $0x39c] sm:$0xf0] }
 0xdbb   :  { %v6849_v27 = vor.u32 %v7618_v8, %v6846_v59  ;;  %v7611_v59 = vld [vmem:[#allocation2 + $0x314] sm:$0xf0] }
 0xdbc   :  { %3499 = vmatmul.bf16.vlgmr.msra.gmra.mxu0 %v3442_v17  ;;  %3764 = vmatpush.bf16.msra.mxu3 %v6857_v4  ;;  %v6836_v17 = vld [vmem:[#allocation2 + $0xb8] sm:$0xf]  ;;  %v7613_v4 = vld [vmem:[#allocation2 + $0x424] sm:$0xf0] }
 0xdbd   :  { %v6824_v6 = vor.u32 %v7613_v4, %v6823_v54 }
 0xdbe   :  { %3745 = vmatpush.bf16.msrb.mxu2 %v6853_v63 }
 0xdbf   :  { %3622 = vmatpush.bf16.msrb.mxu1 %v6824_v6 }
 0xdc0   :  { %3765 = vmatpush.bf16.msra.mxu3 %v6849_v27 }
 0xdc2   :  { %3746 = vmatpush.bf16.msrb.mxu2 %v6845_v24  ;;  %v6815_v24 = vld [vmem:[#allocation2 + $0x2d4] sm:$0xf] }
 0xdc3   :  { %v6816_v27 = vor.u32 %v7611_v59, %v6815_v24 }
 0xdde   :  { %v2127_v39 = vpop.xlane.xlu1 %2126 }
 0xddf   :  { %v2133_v5 = vmul.f32 %v2127_v39, %v8919_v60  ;;  %v6838_v39 = vld [vmem:[#allocation2 + $0xfc] sm:$0xf0] }
 0xde1   :  { %v2125_v2 = vpop.xlane.xlu2 %2124 }
 0xde2   :  { %v2132_v13 = vmul.f32 %v2125_v2, %v8919_v60  ;;  %v7617_v2 = vld [vmem:[#allocation2 + $0xf8] sm:$0xf0] }
 0xde4   :  { %v9390_v36 = vsub.f32 %v9369_v48, %v2132_v13  ;;  %v9405_v48 = vsub.f32 %v9365_v43, %v2133_v5  ;;  %v9418_v43 = vadd.f32 %v9362_v16, %v2115_v50  ;;  %v7616_v13 = vld [vmem:[#allocation2 + $0xbc] sm:$0xf]  ;;  %v6828_v5 = vld [vmem:[#allocation2 + $0x30] sm:$0xf]  ;;  %v6830_v50 = vld [vmem:[#allocation2 + $0x74] sm:$0xf0] }
 0xde6   :  { %v2140_v42 = vmul.f32 %v9390_v36, %v9390_v36  ;;  %v2141_v32 = vmul.f32 %v9405_v48, %v9405_v48 }
 0xde8   :  { %2144 = vadd.xlane.f32.xlu1 %v2140_v42  ;;  %v6837_v42 = vor.u32 %v7617_v2, %v6836_v17  ;;  %v6811_v17 = vld [vmem:[#allocation2 + $0x24c] sm:$0xf]  ;;  %v7610_v2 = vld [vmem:[#allocation2 + $0x28c] sm:$0xf0] }
 0xdea   :  { %3747 = vmatpush.bf16.msrb.mxu2 %v6837_v42  ;;  %v6807_v42 = vld [vmem:[#allocation2 + $0x1c4] sm:$0xf] }
 0xe39   :  { %v3500_v51 = vpop.f32.mrf.mxu0 }
 0xe3a   :  { %v3505_v33 = vadd.f32 %v8230_v12, %v3500_v51 }
 0xe3c   :  { %v9401_v47 = vadd.f32 %v3507_v14, %v3505_v33 }
 0xe3e   :  { %3512 = vadd.xlane.f32.xlu0 %v9401_v47 }
 0xe41   :  { %v3502_v58 = vpop.f32.mrf.mxu0 }
 0xe42   :  { %v3506_v23 = vadd.f32 %v8231_v18, %v3502_v58  ;;  %v7615_v58 = vld [vmem:[#allocation2 + $0x70] sm:$0xf0] }
 0xe43   :  { %v7614_v18 = vld [vmem:[#allocation2 + $0x34] sm:$0xf] }
 0xe44   :  { %v9410_v11 = vadd.f32 %v3507_v14, %v3506_v23  ;;  %v6841_v14 = vor.u32 %v7616_v13, %v6838_v39  ;;  %v6833_v55 = vor.u32 %v7614_v18, %v6830_v50  ;;  %v6812_v13 = vor.u32 %v7610_v2, %v6811_v17  ;;  %v7609_v39 = vld [vmem:[#allocation2 + $0x204] sm:$0xf0] }
 0xe46   :  { %2146 = vadd.xlane.f32.xlu0 %v2141_v32  ;;  %3514 = vadd.xlane.f32.xlu2 %v9410_v11  ;;  %v6829_v32 = vor.u32 %v7615_v58, %v6828_v5  ;;  %v6799_v5 = vld [vmem:[#allocation2 + $0xb4] sm:$0xf]  ;;  %v7607_v58 = vld [vmem:[#allocation2 + $0xf4] sm:$0xf0] }
 0xe47   :  { %3766 = vmatpush.bf16.msra.mxu3 %v6841_v14  ;;  %v6803_v14 = vld [vmem:[#allocation2 + $0x13c] sm:$0xf]  ;;  %v6800_v18 = vor.u32 %v7607_v58, %v6799_v5 }
 0xe48   :  { %3748 = vmatpush.bf16.msrb.mxu2 %v6829_v32 }
 0xe4b   :  { %3767 = vmatpush.bf16.msra.mxu3 %v6833_v55  ;;  %v7606_v55 = vld [vmem:[#allocation2 + $0x6c] sm:$0xf0] }
 0xe4e   :  { %2128 = vadd.xlane.f32.xlu0 %v9418_v43 }
 0xe5b   :  { %v2145_v56 = vpop.xlane.xlu1 %2144 }
 0xe5c   :  { %v2152_v44 = vmul.f32 %v2145_v56, %v8919_v60 }
 0xe5e   :  { %v9422_v34 = vadd.f32 1e-05, %v2152_v44 }
 0xe60   :  { %8138 = vrsqrt.f32 %v9422_v34  ;;  %vm2166_vm14 = vweird.f32 %v9422_v34 }
 0xe66   :  { %v8139_v12 = vpop.eup %8138 }
 0xe67   :  { %v2161_v28 = vmul.f32 %v8139_v12, %v9422_v34  ;;  %vm2167_vm13 = vweird.f32 %v8139_v12 }
 0xe68   :  { %vm2168_vm15 = vmor %vm2166_vm14, %vm2167_vm13 }
 0xe69   :  { %v2162_v49 = vmul.f32 %v8139_v12, %v2161_v28  ;;  %v6795_v28 = vld [vmem:[#allocation2 + $0x2c] sm:$0xf] }
 0xe6b   :  { %v2163_v29 = vmul.f32 0.5, %v2162_v49 }
 0xeb1   :  { %v3513_v51 = vpop.xlane.xlu0 %3512 }
 0xeb2   :  { %v3516_v33 = vmul.f32 %v3513_v51, %v8919_v60  ;;  %v6808_v51 = vor.u32 %v7609_v39, %v6807_v42 }
 0xeb4   :  { %v9427_v23 = vsub.f32 %v9401_v47, %v3516_v33  ;;  %v2116_v47 = vadd.f32 %v2111_v1, %v9005_v62  ;;  %v2164_v62 = vsub.f32 1.5, %v2163_v29 }
 0xeb6   :  { %v3520_v19 = vmul.f32 %v9427_v23, %v9427_v23  ;;  %v9443_v38 = vadd.f32 %v9362_v16, %v2116_v47 }
 0xeb8   :  { %3522 = vadd.xlane.f32.xlu2 %v3520_v19  ;;  %v6796_v19 = vor.u32 %v7606_v55, %v6795_v28 }
 0xeb9   :  { %v2147_v25 = vpop.xlane.xlu0 %2146  ;;  %v3515_v53 = vpop.xlane.xlu2 %3514 }
 0xeba   :  { %v2153_v31 = vmul.f32 %v2147_v25, %v8919_v60  ;;  %v3517_v45 = vmul.f32 %v3515_v53, %v8919_v60 }
 0xebc   :  { %v2157_v3 = vadd.f32 1e-05, %v2153_v31  ;;  %v9438_v9 = vsub.f32 %v9410_v11, %v3517_v45  ;;  %v2165_v11 = vmul.f32 %v8139_v12, %v2164_v62 }
 0xebe   :  { %8140 = vrsqrt.f32 %v2157_v3  ;;  %v3521_v26 = vmul.f32 %v9438_v9, %v9438_v9  ;;  %v2169_v61 = vsel %vm2168_vm15, %v8139_v12, %v2165_v11  ;;  %vm2176_vm8 = vweird.f32 %v2157_v3  ;;  %v7608_v12 = vld [vmem:[#allocation2 + $0x17c] sm:$0xf0] }
 0xebf   :  { %v2200_v22 = vmul.f32 %v2169_v61, %v9390_v36  ;;  %v6804_v33 = vor.u32 %v7608_v12, %v6803_v14 }
 0xec0   :  { %3524 = vadd.xlane.f32.xlu1 %v3521_v26  ;;  %2130 = vadd.xlane.f32.xlu2 %v9443_v38 }
 0xec1   :  { %v2129_v20 = vpop.xlane.xlu0 %2128 }
 0xec2   :  { %v2134_v30 = vmul.f32 %v2129_v20, %v8919_v60 }
 0xec4   :  { %v8141_v57 = vpop.eup %8140  ;;  %v9448_v0 = vsub.f32 %v9418_v43, %v2134_v30  ;;  %v9457_v43 = vld [vmem:[%s10083_s7 + $0x7] ss:$0 sm:$0xff] }
 0xec5   :  { %v2171_v41 = vmul.f32 %v8141_v57, %v2157_v3  ;;  %vm2177_vm7 = vweird.f32 %v8141_v57  ;;  %v2204_v10 = vmul.f32 %v2200_v22, %v9457_v43 }
 0xec6   :  { %v2142_v56 = vmul.f32 %v9448_v0, %v9448_v0  ;;  %vm2178_vm9 = vmor %vm2176_vm8, %vm2177_vm7 }
 0xec7   :  { %v2172_v16 = vmul.f32 %v8141_v57, %v2171_v41  ;;  %v2208_v15 = vadd.f32 %v2204_v10, %v9464_v21 }
 0xec8   :  { %2148 = vadd.xlane.f32.xlu1 %v2142_v56 }
 0xec9   :  { %v2173_v7 = vmul.f32 0.5, %v2172_v16 }
 0xecb   :  { %v2174_v52 = vsub.f32 1.5, %v2173_v7 }
 0xecd   :  { %v2175_v44 = vmul.f32 %v8141_v57, %v2174_v52  ;;  %v3510_v52 = vld [vmem:[%s10083_s7 + $0x23] ss:$0 sm:$0xff] }
 0xecf   :  { %v2179_v46 = vsel %vm2178_vm9, %v8141_v57, %v2175_v44 }
 0xed0   :  { %v2201_v37 = vmul.f32 %v2179_v46, %v9405_v48  ;;  %v6819_v48 = vld [vmem:[#allocation2 + $0x35c] sm:$0xf] }
 0xed1   :  { %v6820_v8 = vor.u32 %v7612_v40, %v6819_v48 }
 0xed2   :  { %v2205_v36 = vmul.f32 %v2201_v37, %v9457_v43  ;;  %v3511_v37 = vld [vmem:[%s10083_s7 + $0x24] ss:$0 sm:$0xff] }
 0xed3   :  { %3623 = vmatpush.bf16.msrb.mxu1 %v6820_v8 }
 0xed4   :  { %v2209_v35 = vadd.f32 %v2205_v36, %v9464_v21 }
 0xed6   :  { %v9469_v34 = vadd.f32 %v2209_v35, %v2208_v15  ;;  %v3652_v63 = vpack.c.bf16 %v2209_v35, %v2208_v15 }
 0xed7   :  { %3624 = vmatpush.bf16.msrb.mxu1 %v6816_v27 }
 0xed8   :  { %3749 = vmatmul.bf16.vlgmr.msrb.gmra.mxu2 %v3652_v63  ;;  %3768 = vmatmul.bf16.vlgmr.msra.gmra.mxu3 %v3652_v63  ;;  %v9496_v63 = vld [vmem:[%s10083_s7 + $0x26] ss:$8 sm:$0x3] }
 0xedb   :  { %3625 = vmatpush.bf16.msrb.mxu1 %v6812_v13 }
 0xedf   :  { %3626 = vmatpush.bf16.msrb.mxu1 %v6808_v51 }
 0xee3   :  { %3627 = vmatpush.bf16.msrb.mxu1 %v6804_v33 }
 0xee7   :  { %3628 = vmatpush.bf16.msrb.mxu1 %v6800_v18 }
 0xeeb   :  { %3629 = vmatpush.bf16.msrb.mxu1 %v6796_v19  ;;  %v5234_v19 = vrot.slane %v9469_v34, 4 }
 0xf2b   :  { %v3523_v32 = vpop.xlane.xlu2 %3522 }
 0xf2c   :  { %v3526_v50 = vmul.f32 %v3523_v32, %v8919_v60 }
 0xf2e   :  { %v3528_v1 = vadd.f32 1e-05, %v3526_v50  ;;  %v8298_v50 = vmov 16.0  }
 0xf30   :  { %8142 = vrsqrt.f32 %v3528_v1  ;;  %vm3536_vm11 = vweird.f32 %v3528_v1 }
 0xf33   :  { %v3525_v49 = vpop.xlane.xlu1 %3524  ;;  %v2131_v25 = vpop.xlane.xlu2 %2130 }
 0xf34   :  { %v3527_v53 = vmul.f32 %v3525_v49, %v8919_v60  ;;  %v2135_v47 = vmul.f32 %v2131_v25, %v8919_v60 }
 0xf36   :  { %v8143_v31 = vpop.eup %8142  ;;  %v3529_v45 = vadd.f32 1e-05, %v3527_v53  ;;  %v9475_v3 = vsub.f32 %v9443_v38, %v2135_v47 }
 0xf37   :  { %v3531_v29 = vmul.f32 %v8143_v31, %v3528_v1  ;;  %vm3537_vm10 = vweird.f32 %v8143_v31 }
 0xf38   :  { %8144 = vrsqrt.f32 %v3529_v45  ;;  %v2143_v26 = vmul.f32 %v9475_v3, %v9475_v3  ;;  %vm3538_vm12 = vmor %vm3536_vm11, %vm3537_vm10  ;;  %vm3546_vm14 = vweird.f32 %v3529_v45 }
 0xf39   :  { %v3532_v62 = vmul.f32 %v8143_v31, %v3531_v29 }
 0xf3a   :  { %2150 = vadd.xlane.f32.xlu0 %v2143_v26 }
 0xf3b   :  { %v3533_v20 = vmul.f32 0.5, %v3532_v62  ;;  %v2149_v2 = vpop.xlane.xlu1 %2148 }
 0xf3c   :  { %v2154_v13 = vmul.f32 %v2149_v2, %v8919_v60 }
 0xf3d   :  { %v3534_v30 = vsub.f32 1.5, %v3533_v20 }
 0xf3e   :  { %v8145_v57 = vpop.eup %8144  ;;  %v2158_v42 = vadd.f32 1e-05, %v2154_v13 }
 0xf3f   :  { %v3535_v11 = vmul.f32 %v8143_v31, %v3534_v30  ;;  %v3541_v41 = vmul.f32 %v8145_v57, %v3529_v45  ;;  %vm3547_vm13 = vweird.f32 %v8145_v57 }
 0xf40   :  { %vm3548_vm15 = vmor %vm3546_vm14, %vm3547_vm13  ;;  %8146 = vrsqrt.f32 %v2158_v42  ;;  %vm2186_vm8 = vweird.f32 %v2158_v42  ;;  %vm5328_vm14 = vcmask 1041409  }
 0xf41   :  { %v3542_v56 = vmul.f32 %v8145_v57, %v3541_v41  ;;  %v3539_v16 = vsel %vm3538_vm12, %v8143_v31, %v3535_v11  ;;  %v5235_v31 = vadd.f32 %v5234_v19, %v9469_v34 }
 0xf42   :  { %v3550_v7 = vmul.f32 %v3539_v16, %v9427_v23 }
 0xf43   :  { %v3543_v61 = vmul.f32 0.5, %v3542_v56  ;;  %v5236_v20 = vrot.slane %v5235_v31, 2 }
 0xf44   :  { %v3552_v46 = vmul.f32 %v3550_v7, %v3510_v52 }
 0xf45   :  { %v3544_v38 = vsub.f32 1.5, %v3543_v61  ;;  %v5237_v34 = vadd.f32 %v5236_v20, %v5235_v31 }
 0xf46   :  { %v9487_v15 = vadd.f32 %v3552_v46, %v3511_v37  ;;  %v8147_v39 = vpop.eup %8146 }
 0xf47   :  { %v3545_v22 = vmul.f32 %v8145_v57, %v3544_v38  ;;  %v2181_v51 = vmul.f32 %v8147_v39, %v2158_v42  ;;  %vm2187_vm7 = vweird.f32 %v8147_v39 }
 0xf48   :  { %vm2188_vm9 = vmor %vm2186_vm8, %vm2187_vm7 }
 0xf49   :  { %v3549_v44 = vsel %vm3548_vm15, %v8145_v57, %v3545_v22  ;;  %v2182_v14 = vmul.f32 %v8147_v39, %v2181_v51 }
 0xf4a   :  { %v3551_v10 = vmul.f32 %v3549_v44, %v9438_v9  ;;  %v9499_v9 = vperm.slane %v9496_v63, 0  ;;  %v5238_v44 = vrot.slane %v5237_v34, 1 }
 0xf4b   :  { %v2183_v58 = vmul.f32 0.5, %v2182_v14 }
 0xf4c   :  { %v3553_v36 = vmul.f32 %v3551_v10, %v3510_v52 }
 0xf4d   :  { %v2184_v18 = vsub.f32 1.5, %v2183_v58 }
 0xf4e   :  { %v9489_v35 = vadd.f32 %v3553_v36, %v3511_v37 }
 0xf4f   :  { %v2185_v28 = vmul.f32 %v8147_v39, %v2184_v18 }
 0xf50   :  { %v3572_v23 = vpack.c.bf16 %v9489_v35, %v9487_v15 }
 0xf51   :  { %v2189_v49 = vsel %vm2188_vm9, %v8147_v39, %v2185_v28 }
 0xf52   :  { %3630 = vmatmul.bf16.vlgmr.msrb.gmra.mxu1 %v3572_v23  ;;  %v2202_v45 = vmul.f32 %v2189_v49, %v9448_v0 }
 0xf54   :  { %v2206_v57 = vmul.f32 %v2202_v45, %v9457_v43 }
 0xf56   :  { %v2210_v0 = vadd.f32 %v2206_v57, %v9464_v21 }
 0xf5b   :  { %v3750_v54 = vpop.f32.mrf.mxu2  ;;  %v3769_v16 = vpop.f32.mrf.mxu3 }
 0xf5c   :  { %v3751_v4 = vadd.f32 %v3750_v54, %v9499_v9 }
 0xf5e   :  { %v3780_v48 = vpack.c.bf16 %v3751_v4, %v3751_v4  ;;  %v5239_v4 = vadd.f32 %v5238_v44, %v5237_v34 }
 0xf60   :  { %v3786_v24 = vunpack.c.l.b16 %v3780_v48 }
 0xf63   :  { %v3752_v6 = vpop.f32.mrf.mxu2 }
 0xf64   :  { %v3753_v40 = vadd.f32 %v3752_v6, %v9499_v9  ;;  %v3771_v6 = vpop.f32.mrf.mxu3 }
 0xf66   :  { %v3781_v8 = vpack.c.bf16 %v3753_v40, %v3753_v40  ;;  %v9534_v40 = vperm.slane %v9496_v63, 1 }
 0xf68   :  { %v3787_v59 = vunpack.c.l.b16 %v3781_v8  ;;  %v3770_v42 = vadd.f32 %v3769_v16, %v9534_v40 }
 0xf6a   :  { %v9503_v27 = vpack.c.b16 %v3787_v59, %v3786_v24  ;;  %v3772_v59 = vadd.f32 %v3771_v6, %v9534_v40 }
 0xf6c   :  { %3813 = vrot.lane.b32.xlu2 %v9503_v27, %s8294_s10  ;;  %3882 = vrot.lane.b32.xlu0 %v9503_v27, %s8291_s29  ;;  %v3793_v17 = vsel %vm369_vm1, %v9503_v27, 0  ;;  %v3783_v14 = vpack.c.bf16 %v3772_v59, %v3772_v59 }
 0xf6d   :  { %3802 = vmatpush.bf16.xpose.msrb.mxu0 %v3793_v17 }
 0xf6e   :  { %v4064_v58 = vunpack.c.l.b16 %v3783_v14 }
 0xf74   :  { %3905 = vrot.lane.b32.xlu2 %v9503_v27, %s8296_s12  ;;  %3836 = vrot.lane.b32.xlu0 %v9503_v27, %s8293_s9 }
 0xfad   :  { %v2151_v12 = vpop.xlane.xlu0 %2150 }
 0xfae   :  { %v2155_v33 = vmul.f32 %v2151_v12, %v8919_v60 }
 0xfb0   :  { %v2159_v5 = vadd.f32 1e-05, %v2155_v33  ;;  %v3782_v33 = vpack.c.bf16 %v3770_v42, %v3770_v42 }
 0xfb2   :  { %8148 = vrsqrt.f32 %v2159_v5  ;;  %vm2196_vm11 = vweird.f32 %v2159_v5 }
 0xfb3   :  { %8150 = vrcp.f32 %v8298_v50  ;;  %v4063_v50 = vunpack.c.l.b16 %v3782_v33 }
 0xfb5   :  { %v9546_v19 = vpack.c.b16 %v4064_v58, %v4063_v50 }
 0xfb8   :  { %v8149_v32 = vpop.eup %8148 }
 0xfb9   :  { %v2191_v55 = vmul.f32 %v8149_v32, %v2159_v5  ;;  %v8151_v53 = vpop.eup %8150  ;;  %vm2197_vm10 = vweird.f32 %v8149_v32 }
 0xfba   :  { %v5248_v26 = vmul.f32 16.0, %v8151_v53  ;;  %vm2198_vm12 = vmor %vm2196_vm11, %vm2197_vm10  ;;  %vm5252_vm13 = vweird.f32 %v8151_v53 }
 0xfbb   :  { %v2192_v1 = vmul.f32 %v8149_v32, %v2191_v55 }
 0xfbc   :  { %v5249_v11 = vsub.f32 1.0, %v5248_v26 }
 0xfbd   :  { %v2193_v25 = vmul.f32 0.5, %v2192_v1 }
 0xfbe   :  { %v5250_v7 = vmul.f32 %v8151_v53, %v5249_v11 }
 0xfbf   :  { %v2194_v47 = vsub.f32 1.5, %v2193_v25 }
 0xfc0   :  { %v5251_v46 = vadd.f32 %v8151_v53, %v5250_v7 }
 0xfc1   :  { %v2195_v29 = vmul.f32 %v8149_v32, %v2194_v47 }
 0xfc2   :  { %v5253_v48 = vsel %vm5252_vm13, %v8151_v53, %v5251_v46 }
 0xfc3   :  { %v2199_v62 = vsel %vm2198_vm12, %v8149_v32, %v2195_v29  ;;  %v5254_v13 = vmul.f32 %v5253_v48, %v5239_v4 }
 0xfc4   :  { %v2203_v30 = vmul.f32 %v2199_v62, %v9475_v3 }
 0xfc5   :  { %v5322_v63 = vpack.c.bf16 %v5254_v13, %v5254_v13 }
 0xfc6   :  { %v3814_v41 = vpop.permute.xlu2 %3813  ;;  %v2207_v56 = vmul.f32 %v2203_v30, %v9457_v43  ;;  %v9529_v43 = vld [vmem:[%s10083_s7 + $0x25] ss:$0 sm:$0xff] }
 0xfc7   :  { %v3819_v61 = vsel %vm369_vm1, %v3814_v41, 0  ;;  %v5326_v18 = vunpack.c.l.b16 %v5322_v63 }
 0xfc8   :  { %3828 = vmatpush.bf16.xpose.msra.mxu1 %v3819_v61  ;;  %v2211_v38 = vadd.f32 %v2207_v56, %v9464_v21 }
 0xfca   :  { %v3653_v52 = vpack.c.bf16 %v2211_v38, %v2210_v0  ;;  %v5240_v22 = vadd.f32 %v2211_v38, %v2210_v0 }
 0xfcc   :  { %3754 = vmatmul.bf16.gmra.mxu2 %v3653_v52  ;;  %v5241_v3 = vrot.slane %v5240_v22, 4  ;;  %3773 = vmatmul.bf16.gmra.mxu3 %v3653_v52 }
 0xfce   :  { %v5242_v10 = vadd.f32 %v5241_v3, %v5240_v22  ;;  %v3906_v37 = vpop.permute.xlu2 %3905 }
 0xfcf   :  { %v3911_v36 = vsel %vm369_vm1, %v3906_v37, 0  ;;  %v3631_v23 = vpop.f32.mrf.mxu1 }
 0xfd0   :  { %v5243_v21 = vrot.slane %v5242_v10, 2  ;;  %v3632_v54 = vadd.f32 %v3631_v23, %v9529_v43  ;;  %3920 = vmatpush.bf16.xpose.msrb.mxu3 %v3911_v36 }
 0xfd2   :  { %v5244_v8 = vadd.f32 %v5243_v21, %v5242_v10  ;;  %v3779_v24 = vpack.c.bf16 %v3632_v54, %v3632_v54 }
 0xfd4   :  { %v5245_v17 = vrot.slane %v5244_v8, 1  ;;  %v3809_v2 = vunpack.c.l.b16 %v3779_v24  ;;  %6890 = vmatmul.msk.bf16.vlgmr.msrb.gmra.mxu0 %vm369_vm1, %v3779_v24 }
 0xfd6   :  { %v5246_v39 = vadd.f32 %v5245_v17, %v5244_v8  ;;  %v3810_v51 = vpack.c.b16 %v3809_v2, %v3809_v2 }
 0xfd7   :  { %v3633_v23 = vpop.f32.mrf.mxu1 }
 0xfd8   :  { %v5255_v12 = vmul.f32 %v5253_v48, %v5246_v39  ;;  %3811 = vrot.lane.b32.xlu1 %v3810_v51, %s8294_s10  ;;  %3880 = vrot.lane.b32.xlu2 %v3810_v51, %s8291_s29  ;;  %v3634_v21 = vadd.f32 %v3633_v23, %v9529_v43 }
 0xfd9   :  { %3903 = vrot.lane.b32.xlu0 %v3810_v51, %s8296_s12 }
 0xfda   :  { %v5323_v5 = vpack.c.bf16 %v5255_v12, %v5255_v12  ;;  %v9595_v54 = vpack.c.bf16 %v3634_v21, %v3634_v21 }
 0xfdc   :  { %v5327_v32 = vunpack.c.l.b16 %v5323_v5  ;;  %v4288_v4 = vunpack.c.l.b16 %v9595_v54 }
 0xfde   :  { %v3883_v28 = vpop.permute.xlu0 %3882  ;;  %v9543_v55 = vsel %vm5328_vm14, %v5327_v32, %v5326_v18  ;;  %v9600_v6 = vpack.c.b16 %v4288_v4, %v4288_v4 }
 0xfdf   :  { %v3888_v1 = vsel %vm369_vm1, %v3883_v28, 0 }
 0xfe0   :  { %3859 = vrot.lane.b32.xlu1 %v9503_v27, %s8292_s30  ;;  %3857 = vrot.lane.b32.xlu2 %v3810_v51, %s8292_s30 }
 0xfe1   :  { %3928 = vrot.lane.b32.xlu0 %v9503_v27, %s8295_s11  ;;  %3897 = vmatpush.bf16.xpose.msra.mxu2 %v3888_v1 }
 0xfe6   :  { %v3837_v49 = vpop.permute.xlu0 %3836 }
 0xfe7   :  { %v3842_v25 = vsel %vm369_vm1, %v3837_v49, 0 }
 0xfe8   :  { %3834 = vrot.lane.b32.xlu1 %v3810_v51, %s8293_s9  ;;  %3926 = vrot.lane.b32.xlu2 %v3810_v51, %s8295_s11 }
 0xfe9   :  { %4077 = vmatpush.bf16.msrb.mxu2 %v9546_v19  ;;  %3949 = vrot.lane.b32.xlu0 %v3810_v51, %s8290_s28 }
 0xfea   :  { %3851 = vmatpush.bf16.xpose.msra.mxu0 %v3842_v25 }
 0xff0   :  { %3951 = vrot.lane.b32.xlu1 %v9503_v27, %s8290_s28  ;;  %4084 = vrot.lane.b32.xlu2 %v9546_v19, %s8294_s10 }
 0xff1   :  { %4104 = vrot.lane.b32.xlu0 %v9546_v19, %s8293_s9 }
 0xff8   :  { %4124 = vrot.lane.b32.xlu1 %v9546_v19, %s8292_s30  ;;  %4144 = vrot.lane.b32.xlu2 %v9546_v19, %s8291_s29 }
0x1000   :  { %4164 = vrot.lane.b32.xlu2 %v9546_v19, %s8296_s12 }
0x1032   :  { %v3881_v53 = vpop.permute.xlu2 %3880 }
0x1033   :  { %6894 = vmatmul.msk.bf16.vlgmr.msra.gmra.mxu2 %vm369_vm1, %v3881_v53 }
0x103a   :  { %v3858_v47 = vpop.permute.xlu2 %3857 }
0x1042   :  { %v3927_v27 = vpop.permute.xlu2 %3926 }
0x104a   :  { %v3812_v31 = vpop.permute.xlu1 %3811  ;;  %v4085_v45 = vpop.permute.xlu2 %4084 }
0x104b   :  { %v3904_v29 = vpop.permute.xlu0 %3903  ;;  %6891 = vmatmul.msk.bf16.vlgmr.msra.gmra.mxu1 %vm369_vm1, %v3812_v31  ;;  %4097 = vmatpush.bf16.msra.mxu3 %v4085_v45 }
0x104c   :  { %6895 = vmatmul.msk.bf16.vlgmr.msrb.gmra.mxu3 %vm369_vm1, %v3904_v29 }
0x104f   :  { %v3755_v26 = vpop.f32.mrf.mxu2  ;;  %v9606_v24 = vpop.f32.mrf.mxu3 }
0x1050   :  { %v3756_v41 = vadd.f32 %v3755_v26, %v9499_v9 }
0x1051   :  { %v9573_v62 = vpop.f32.mrf.mxu0 }
0x1052   :  { %v3860_v20 = vpop.permute.xlu1 %3859  ;;  %v4145_v30 = vpop.permute.xlu2 %4144  ;;  %v4259_v61 = vpack.c.bf16 %v3756_v41, %v3756_v41  ;;  %v3972_v48 = vsel %vm369_vm1, %v9573_v62, -inf }
0x1053   :  { %v3865_v57 = vsel %vm369_vm1, %v3860_v20, 0  ;;  %v3929_v11 = vpop.permute.xlu0 %3928  ;;  %4157 = vmatpush.bf16.msra.mxu2 %v4145_v30 }
0x1054   :  { %v3934_v56 = vsel %vm369_vm1, %v3929_v11, 0  ;;  %3874 = vmatpush.bf16.xpose.msrb.mxu1 %v3865_v57  ;;  %v4265_v3 = vunpack.c.l.b16 %v4259_v61 }
0x1055   :  { %3943 = vmatpush.bf16.xpose.msrb.mxu0 %v3934_v56 }
0x1057   :  { %v3757_v16 = vpop.f32.mrf.mxu2  ;;  %v9608_v59 = vpop.f32.mrf.mxu3 }
0x1058   :  { %v3758_v34 = vadd.f32 %v3757_v16, %v9499_v9 }
0x1059   :  { %v3806_v0 = vpop.f32.mrf.mxu0 }
0x105a   :  { %v4260_v38 = vpack.c.bf16 %v3758_v34, %v3758_v34  ;;  %v3835_v7 = vpop.permute.xlu1 %3834  ;;  %v4165_v52 = vpop.permute.xlu2 %4164 }
0x105b   :  { %v3950_v22 = vpop.permute.xlu0 %3949  ;;  %6892 = vmatmul.msk.bf16.vlgmr.msra.gmra.mxu0 %vm369_vm1, %v3835_v7  ;;  %6893 = vmatmul.msk.bf16.vlgmr.msrb.gmra.mxu1 %vm369_vm1, %v3858_v47 }
0x105c   :  { %v4266_v44 = vunpack.c.l.b16 %v4260_v38  ;;  %4177 = vmatpush.bf16.msrb.mxu3 %v4165_v52 }
0x105e   :  { %v9581_v46 = vpack.c.b16 %v4266_v44, %v4265_v3 }
0x1060   :  { %4338 = vrot.lane.b32.xlu0 %v9581_v46, %s8292_s30  ;;  %4292 = vrot.lane.b32.xlu1 %v9581_v46, %s8294_s10 }
0x1062   :  { %v3952_v9 = vpop.permute.xlu1 %3951 }
0x1063   :  { %v3957_v10 = vsel %vm369_vm1, %v3952_v9, 0  ;;  %v4105_v37 = vpop.permute.xlu0 %4104 }
0x1064   :  { %4117 = vmatpush.bf16.msra.mxu0 %v4105_v37  ;;  %3966 = vmatpush.bf16.xpose.msra.mxu1 %v3957_v10 }
0x1068   :  { %4184 = vrot.lane.b32.xlu1 %v9546_v19, %s8295_s11 }
0x106a   :  { %v4125_v36 = vpop.permute.xlu1 %4124 }
0x106b   :  { %6896 = vmatmul.msk.bf16.vlgmr.msrb.gmra.mxu0 %vm369_vm1, %v3927_v27  ;;  %6897 = vmatmul.msk.bf16.vlgmr.msra.gmra.mxu1 %vm369_vm1, %v3950_v22 }
0x106c   :  { %4137 = vmatpush.bf16.msrb.mxu1 %v4125_v36 }
0x1070   :  { %4204 = vrot.lane.b32.xlu1 %v9546_v19, %s8290_s28 }
0x1078   :  { %4315 = vrot.lane.b32.xlu1 %v9581_v46, %s8293_s9 }
0x1080   :  { %4290 = vrot.lane.b32.xlu1 %v9600_v6, %s8294_s10 }
0x10aa   :  { %3973 = vmax.xlane.f32.xlu1 %v3972_v48 }
0x10b6   :  { %v3899_v8 = vpop.f32.mrf.mxu2 }
0x10b7   :  { %v3984_v39 = vsel %vm369_vm1, %v3899_v8, -inf }
0x10be   :  { %v3901_v43 = vpop.f32.mrf.mxu2 }
0x10c8   :  { %v3830_v17 = vpop.f32.mrf.mxu1 }
0x10c9   :  { %v3975_v2 = vsel %vm369_vm1, %v3830_v17, -inf }
0x10ca   :  { %3976 = vmax.xlane.f32.xlu2 %v3975_v2 }
0x10cf   :  { %v3922_v13 = vpop.f32.mrf.mxu3 }
0x10d0   :  { %v3832_v42 = vpop.f32.mrf.mxu1  ;;  %v3987_v50 = vsel %vm369_vm1, %v3922_v13, -inf }
0x10d2   :  { %v9612_v51 = vpop.permute.xlu1 %4292  ;;  %3985 = vmax.xlane.f32.xlu2 %v3984_v39  ;;  %v9632_v56 = vpop.permute.xlu0 %4338 }
0x10d7   :  { %v3924_v14 = vpop.f32.mrf.mxu3 }
0x10d8   :  { %v3853_v12 = vpop.f32.mrf.mxu0  ;;  %v3876_v63 = vpop.f32.mrf.mxu1 }
0x10d9   :  { %v3978_v33 = vsel %vm369_vm1, %v3853_v12, -inf  ;;  %v3981_v5 = vsel %vm369_vm1, %v3876_v63, -inf }
0x10da   :  { %v4185_v58 = vpop.permute.xlu1 %4184  ;;  %3979 = vmax.xlane.f32.xlu0 %v3978_v33  ;;  %3982 = vmax.xlane.f32.xlu1 %v3981_v5 }
0x10db   :  { %4197 = vmatpush.bf16.msrb.mxu0 %v4185_v58 }
0x10e0   :  { %v3855_v18 = vpop.f32.mrf.mxu0  ;;  %v3878_v32 = vpop.f32.mrf.mxu1 }
0x10e2   :  { %v4205_v28 = vpop.permute.xlu1 %4204  ;;  %3988 = vmax.xlane.f32.xlu0 %v3987_v50 }
0x10e3   :  { %4217 = vmatpush.bf16.msra.mxu1 %v4205_v28 }
0x10e8   :  { %v9617_v1 = vpop.f32.mrf.mxu0  ;;  %v3968_v19 = vpop.f32.mrf.mxu1 }
0x10e9   :  { %v3993_v49 = vsel %vm369_vm1, %v3968_v19, -inf  ;;  %v3990_v25 = vsel %vm369_vm1, %v9617_v1, -inf }
0x10ea   :  { %3994 = vmax.xlane.f32.xlu2 %v3993_v49  ;;  %3991 = vmax.xlane.f32.xlu1 %v3990_v25  ;;  %v9626_v27 = vpop.permute.xlu1 %4315 }
0x10f0   :  { %v3947_v53 = vpop.f32.mrf.mxu0  ;;  %v3970_v47 = vpop.f32.mrf.mxu1 }
0x10f2   :  { %v9628_v31 = vpop.permute.xlu1 %4290 }
0x1102   :  { %4361 = vrot.lane.b32.xlu2 %v9581_v46, %s8291_s29 }
0x1103   :  { %4384 = vrot.lane.b32.xlu1 %v9581_v46, %s8296_s12 }
0x111d   :  { %v3974_v45 = vpop.xlane.xlu1 %3973 }
0x111e   :  { %v3996_v29 = vsub.f32 %v9573_v62, %v3974_v45  ;;  %v4298_v45 = vsel %vm369_vm1, %v9612_v51, 0 }
0x1120   :  { %v4004_v26 = vmul.f32 1.442695, %v3996_v29 }
0x1122   :  { %8152 = vpow2.f32 %v4004_v26 }
0x1128   :  { %v8153_v20 = vpop.eup %8152 }
0x1129   :  { %v4020_v30 = vsel %vm369_vm1, %v8153_v20, 0.0 }
0x112a   :  { %4021 = vadd.xlane.f32.xlu0 %v4020_v30 }
0x113d   :  { %v3977_v57 = vpop.xlane.xlu2 %3976 }
0x113e   :  { %v3997_v11 = vsub.f32 %v3830_v17, %v3977_v57  ;;  %v4321_v57 = vsel %vm369_vm1, %v9626_v27, 0 }
0x1140   :  { %v4006_v41 = vmul.f32 1.442695, %v3997_v11 }
0x1142   :  { %8154 = vpow2.f32 %v4006_v41 }
0x1145   :  { %v3986_v34 = vpop.xlane.xlu2 %3985 }
0x1146   :  { %v4000_v38 = vsub.f32 %v3899_v8, %v3986_v34 }
0x1148   :  { %v9634_v16 = vpop.eup %8154  ;;  %v4012_v52 = vmul.f32 1.442695, %v4000_v38 }
0x1149   :  { %v4023_v61 = vsel %vm369_vm1, %v9634_v16, 0.0 }
0x114a   :  { %4024 = vadd.xlane.f32.xlu1 %v4023_v61 }
0x114d   :  { %v3980_v62 = vpop.xlane.xlu0 %3979  ;;  %v3983_v22 = vpop.xlane.xlu1 %3982 }
0x114e   :  { %v3998_v0 = vsub.f32 %v3853_v12, %v3980_v62  ;;  %v3999_v10 = vsub.f32 %v3876_v63, %v3983_v22 }
0x1150   :  { %v4008_v7 = vmul.f32 1.442695, %v3998_v0  ;;  %v4010_v23 = vmul.f32 1.442695, %v3999_v10 }
0x1152   :  { %8156 = vpow2.f32 %v4008_v7 }
0x1153   :  { %8158 = vpow2.f32 %v4012_v52  ;;  %v3777_v52 = vadd.f32 %v9608_v59, %v9534_v40 }
0x1155   :  { %v3989_v3 = vpop.xlane.xlu0 %3988  ;;  %v4262_v10 = vpack.c.bf16 %v3777_v52, %v3777_v52 }
0x1156   :  { %v4001_v44 = vsub.f32 %v3922_v13, %v3989_v3  ;;  %v3775_v3 = vadd.f32 %v9606_v24, %v9534_v40 }
0x1158   :  { %v8157_v9 = vpop.eup %8156  ;;  %v4014_v37 = vmul.f32 1.442695, %v4001_v44 }
0x1159   :  { %v4026_v36 = vsel %vm369_vm1, %v8157_v9, 0.0  ;;  %v9639_v4 = vpop.eup %8158 }
0x115a   :  { %8160 = vpow2.f32 %v4014_v37  ;;  %4027 = vadd.xlane.f32.xlu0 %v4026_v36  ;;  %v4032_v2 = vsel %vm369_vm1, %v9639_v4, 0.0  ;;  %v4344_v37 = vsel %vm369_vm1, %v9632_v56, 0  ;;  %v4261_v36 = vpack.c.bf16 %v3775_v3, %v3775_v3 }
0x115b   :  { %8162 = vpow2.f32 %v4010_v23  ;;  %v4543_v23 = vunpack.c.l.b16 %v4262_v10 }
0x115d   :  { %v3995_v21 = vpop.xlane.xlu2 %3994  ;;  %v3992_v12 = vpop.xlane.xlu1 %3991 }
0x115e   :  { %v4003_v48 = vsub.f32 %v3968_v19, %v3995_v21  ;;  %v4002_v63 = vsub.f32 %v9617_v1, %v3992_v12  ;;  %v4272_v1 = vsel %vm369_vm1, %v9581_v46, 0  ;;  %v4542_v21 = vunpack.c.l.b16 %v4261_v36 }
0x1160   :  { %v8161_v8 = vpop.eup %8160  ;;  %v4018_v43 = vmul.f32 1.442695, %v4003_v48  ;;  %v4016_v33 = vmul.f32 1.442695, %v4002_v63  ;;  %v9696_v59 = vpack.c.b16 %v4543_v23, %v4542_v21 }
0x1161   :  { %v4035_v17 = vsel %vm369_vm1, %v8161_v8, 0.0  ;;  %v9644_v13 = vpop.eup %8162 }
0x1162   :  { %4036 = vadd.xlane.f32.xlu1 %v4035_v17  ;;  %4033 = vadd.xlane.f32.xlu0 %v4032_v2  ;;  %8164 = vpow2.f32 %v4018_v43  ;;  %v4029_v39 = vsel %vm369_vm1, %v9644_v13, 0.0 }
0x1163   :  { %8166 = vpow2.f32 %v4016_v33 }
0x1165   :  { %v4362_v34 = vpop.permute.xlu2 %4361 }
0x1166   :  { %v4367_v7 = vsel %vm369_vm1, %v4362_v34, 0 }
0x1168   :  { %v9646_v42 = vpop.eup %8164 }
0x1169   :  { %v4041_v14 = vsel %vm369_vm1, %v9646_v42, 0.0  ;;  %v9665_v5 = vpop.eup %8166 }
0x116a   :  { %4030 = vadd.xlane.f32.xlu1 %v4029_v39  ;;  %4042 = vadd.xlane.f32.xlu2 %v4041_v14  ;;  %v4038_v18 = vsel %vm369_vm1, %v9665_v5, 0.0 }
0x1175   :  { %v4385_v19 = vpop.permute.xlu1 %4384 }
0x1176   :  { %4336 = vrot.lane.b32.xlu0 %v9600_v6, %s8292_s30  ;;  %v4390_v38 = vsel %vm369_vm1, %v4385_v19, 0 }
0x1182   :  { %4382 = vrot.lane.b32.xlu2 %v9600_v6, %s8296_s12 }
0x1183   :  { %4313 = vrot.lane.b32.xlu1 %v9600_v6, %s8293_s9 }
0x118a   :  { %4405 = vrot.lane.b32.xlu2 %v9600_v6, %s8295_s11 }
0x118b   :  { %4359 = vrot.lane.b32.xlu1 %v9600_v6, %s8291_s29 }
0x1193   :  { %4430 = vrot.lane.b32.xlu1 %v9581_v46, %s8290_s28 }
0x119d   :  { %v4022_v58 = vpop.xlane.xlu0 %4021 }
0x119e   :  { %8168 = vrcp.f32 %v4022_v58 }
0x11a0   :  { %4039 = vadd.xlane.f32.xlu0 %v4038_v18 }
0x11a4   :  { %v8169_v32 = vpop.eup %8168 }
0x11a5   :  { %v4052_v50 = vmul.f32 %v8169_v32, %v8153_v20 }
0x11a7   :  { %v4060_v28 = vpack.c.bf16 %v4052_v50, %v4052_v50 }
0x11a9   :  { %6898 = vmatmul.msk.bf16.vlgmr.msrb.gmra.mxu2 %vm369_vm1, %v4060_v28 }
0x11aa   :  { %4281 = vmatpush.bf16.xpose.msrb.mxu2 %v4272_v1 }
0x11b4   :  { %4407 = vrot.lane.b32.xlu0 %v9581_v46, %s8295_s11 }
0x11bc   :  { %4428 = vrot.lane.b32.xlu0 %v9600_v6, %s8290_s28 }
0x11bd   :  { %v4025_v49 = vpop.xlane.xlu1 %4024 }
0x11be   :  { %8170 = vrcp.f32 %v4025_v49 }
0x11c4   :  { %v8171_v25 = vpop.eup %8170 }
0x11c5   :  { %v4053_v53 = vmul.f32 %v8171_v25, %v9634_v16 }
0x11c7   :  { %v4083_v47 = vpack.c.bf16 %v4053_v53, %v4053_v53 }
0x11c9   :  { %6899 = vmatmul.msk.bf16.vlgmr.msra.gmra.mxu3 %vm369_vm1, %v4083_v47 }
0x11ca   :  { %4307 = vmatpush.bf16.xpose.msra.mxu3 %v4298_v45 }
0x11cd   :  { %v4028_v29 = vpop.xlane.xlu0 %4027 }
0x11ce   :  { %8172 = vrcp.f32 %v4028_v29 }
0x11d4   :  { %v8173_v26 = vpop.eup %8172 }
0x11d5   :  { %v4054_v46 = vmul.f32 %v8173_v26, %v8157_v9  ;;  %v4037_v20 = vpop.xlane.xlu1 %4036  ;;  %v4034_v30 = vpop.xlane.xlu0 %4033 }
0x11d6   :  { %8174 = vrcp.f32 %v4037_v20 }
0x11d7   :  { %v4103_v6 = vpack.c.bf16 %v4054_v46, %v4054_v46  ;;  %8176 = vrcp.f32 %v4034_v30 }
0x11d9   :  { %6900 = vmatmul.msk.bf16.vlgmr.msra.gmra.mxu0 %vm369_vm1, %v4103_v6 }
0x11da   :  { %4330 = vmatpush.bf16.xpose.msra.mxu0 %v4321_v57 }
0x11dc   :  { %v8175_v11 = vpop.eup %8174 }
0x11dd   :  { %v8177_v51 = vpop.eup %8176  ;;  %v4057_v41 = vmul.f32 %v8175_v11, %v8161_v8  ;;  %v4031_v16 = vpop.xlane.xlu1 %4030 }
0x11de   :  { %v4056_v61 = vmul.f32 %v8177_v51, %v9639_v4  ;;  %8178 = vrcp.f32 %v4031_v16  ;;  %v4043_v9 = vpop.xlane.xlu2 %4042 }
0x11df   :  { %v4163_v62 = vpack.c.bf16 %v4057_v41, %v4057_v41  ;;  %8180 = vrcp.f32 %v4043_v9 }
0x11e0   :  { %v4143_v0 = vpack.c.bf16 %v4056_v61, %v4056_v61 }
0x11e1   :  { %6903 = vmatmul.msk.bf16.vlgmr.msrb.gmra.mxu3 %vm369_vm1, %v4163_v62 }
0x11e2   :  { %6902 = vmatmul.msk.bf16.vlgmr.msra.gmra.mxu2 %vm369_vm1, %v4143_v0  ;;  %4399 = vmatpush.bf16.xpose.msrb.mxu3 %v4390_v38 }
0x11e3   :  { %4376 = vmatpush.bf16.xpose.msra.mxu2 %v4367_v7 }
0x11e4   :  { %v8179_v27 = vpop.eup %8178 }
0x11e5   :  { %v4055_v22 = vmul.f32 %v8179_v27, %v9644_v13  ;;  %v8181_v4 = vpop.eup %8180 }
0x11e6   :  { %v4059_v40 = vmul.f32 %v8181_v4, %v9646_v42  ;;  %v4383_v8 = vpop.permute.xlu2 %4382 }
0x11e7   :  { %v4123_v44 = vpack.c.bf16 %v4055_v22, %v4055_v22 }
0x11e8   :  { %v4203_v56 = vpack.c.bf16 %v4059_v40, %v4059_v40  ;;  %v4337_v17 = vpop.permute.xlu0 %4336 }
0x11e9   :  { %6901 = vmatmul.msk.bf16.vlgmr.msrb.gmra.mxu1 %vm369_vm1, %v4123_v44 }
0x11ea   :  { %4353 = vmatpush.bf16.xpose.msrb.mxu1 %v4344_v37 }
0x11ee   :  { %v4406_v58 = vpop.permute.xlu2 %4405 }
0x11f1   :  { %6907 = vmatmul.msk.bf16.vlgmr.msra.gmra.mxu3 %vm369_vm1, %v9628_v31 }
0x11f2   :  { %6906 = vmatmul.msk.bf16.vlgmr.msrb.gmra.mxu2 %vm369_vm1, %v9595_v54 }
0x11f3   :  { %4556 = vmatpush.bf16.msrb.mxu2 %v9696_v59 }
0x11f5   :  { %v4314_v24 = vpop.permute.xlu1 %4313 }
0x11f9   :  { %6905 = vmatmul.msk.bf16.vlgmr.msra.gmra.mxu1 %vm369_vm1, %v4203_v56 }
0x11fd   :  { %v4360_v48 = vpop.permute.xlu1 %4359 }
0x1201   :  { %6911 = vmatmul.msk.bf16.vlgmr.msrb.gmra.mxu3 %vm369_vm1, %v4383_v8 }
0x1202   :  { %6910 = vmatmul.msk.bf16.vlgmr.msra.gmra.mxu2 %vm369_vm1, %v4360_v48 }
0x1205   :  { %v4431_v43 = vpop.permute.xlu1 %4430 }
0x1206   :  { %v4436_v31 = vsel %vm369_vm1, %v4431_v43, 0 }
0x1207   :  { %4445 = vmatpush.bf16.xpose.msra.mxu1 %v4436_v31 }
0x1209   :  { %6909 = vmatmul.msk.bf16.vlgmr.msrb.gmra.mxu1 %vm369_vm1, %v4337_v17 }
0x1213   :  { %v4040_v54 = vpop.xlane.xlu0 %4039 }
0x1214   :  { %8182 = vrcp.f32 %v4040_v54 }
0x121a   :  { %v8183_v2 = vpop.eup %8182 }
0x121b   :  { %v4058_v13 = vmul.f32 %v8183_v2, %v9665_v5 }
0x121d   :  { %v4183_v42 = vpack.c.bf16 %v4058_v13, %v4058_v13 }
0x121f   :  { %6904 = vmatmul.msk.bf16.vlgmr.msrb.gmra.mxu0 %vm369_vm1, %v4183_v42 }
0x1226   :  { %v4408_v39 = vpop.permute.xlu0 %4407 }
0x1227   :  { %v4413_v14 = vsel %vm369_vm1, %v4408_v39, 0 }
0x1228   :  { %4422 = vmatpush.bf16.xpose.msrb.mxu0 %v4413_v14 }
0x122c   :  { %v9712_v12 = vpop.f32.mrf.mxu2 }
0x122e   :  { %v4429_v63 = vpop.permute.xlu0 %4428 }
0x122f   :  { %6908 = vmatmul.msk.bf16.vlgmr.msra.gmra.mxu0 %vm369_vm1, %v4314_v24  ;;  %6913 = vmatmul.msk.bf16.vlgmr.msra.gmra.mxu1 %vm369_vm1, %v4429_v63 }
0x1234   :  { %v4081_v33 = vpop.f32.mrf.mxu2 }
0x123f   :  { %6912 = vmatmul.msk.bf16.vlgmr.msrb.gmra.mxu0 %vm369_vm1, %v4406_v58 }
0x124c   :  { %v9717_v18 = vpop.f32.mrf.mxu3 }
0x1254   :  { %v4101_v5 = vpop.f32.mrf.mxu3 }
0x1256   :  { %v9719_v32 = vpop.f32.mrf.mxu0 }
0x125e   :  { %v4121_v50 = vpop.f32.mrf.mxu0 }
0x1264   :  { %v9721_v28 = vpop.f32.mrf.mxu3 }
0x1265   :  { %v9723_v1 = vpop.f32.mrf.mxu2 }
0x1266   :  { %v9725_v19 = vpop.f32.mrf.mxu1 }
0x126c   :  { %v4181_v49 = vpop.f32.mrf.mxu3 }
0x126d   :  { %v4161_v25 = vpop.f32.mrf.mxu2 }
0x126e   :  { %v4141_v53 = vpop.f32.mrf.mxu1 }
0x1274   :  { %v4309_v47 = vpop.f32.mrf.mxu3 }
0x1275   :  { %v4283_v45 = vpop.f32.mrf.mxu2  ;;  %v4454_v29 = vsel %vm369_vm1, %v4309_v47, -inf }
0x1276   :  { %v4451_v26 = vsel %vm369_vm1, %v4283_v45, -inf  ;;  %4455 = vmax.xlane.f32.xlu2 %v4454_v29  ;;  %v9729_v46 = vpop.f32.mrf.mxu1 }
0x1277   :  { %4452 = vmax.xlane.f32.xlu1 %v4451_v26 }
0x127c   :  { %v4311_v20 = vpop.f32.mrf.mxu3 }
0x127d   :  { %v4285_v30 = vpop.f32.mrf.mxu2 }
0x127e   :  { %v4221_v6 = vpop.f32.mrf.mxu1 }
0x1284   :  { %v4401_v57 = vpop.f32.mrf.mxu3 }
0x1285   :  { %v4378_v11 = vpop.f32.mrf.mxu2  ;;  %v4466_v9 = vsel %vm369_vm1, %v4401_v57, -inf }
0x1286   :  { %v4463_v51 = vsel %vm369_vm1, %v4378_v11, -inf  ;;  %v4355_v41 = vpop.f32.mrf.mxu1 }
0x1287   :  { %4464 = vmax.xlane.f32.xlu2 %v4463_v51  ;;  %v4460_v16 = vsel %vm369_vm1, %v4355_v41, -inf }
0x1288   :  { %4461 = vmax.xlane.f32.xlu1 %v4460_v16 }
0x128c   :  { %v4403_v61 = vpop.f32.mrf.mxu3 }
0x128d   :  { %v4380_v34 = vpop.f32.mrf.mxu2 }
0x128e   :  { %v4357_v62 = vpop.f32.mrf.mxu1 }
0x129c   :  { %v9733_v0 = vpop.f32.mrf.mxu0 }
0x12a4   :  { %v4201_v38 = vpop.f32.mrf.mxu0 }
0x12ac   :  { %v4332_v7 = vpop.f32.mrf.mxu0  ;;  %v9735_v27 = vpop.f32.mrf.mxu1 }
0x12ad   :  { %v4457_v52 = vsel %vm369_vm1, %v4332_v7, -inf  ;;  %v4472_v22 = vsel %vm369_vm1, %v9735_v27, -inf }
0x12ae   :  { %4458 = vmax.xlane.f32.xlu0 %v4457_v52  ;;  %4473 = vmax.xlane.f32.xlu2 %v4472_v22 }
0x12b4   :  { %v4334_v3 = vpop.f32.mrf.mxu0  ;;  %v4449_v44 = vpop.f32.mrf.mxu1 }
0x12b6   :  { %4467 = vmax.xlane.f32.xlu0 %v4466_v9 }
0x12bc   :  { %v4424_v10 = vpop.f32.mrf.mxu0 }
0x12bd   :  { %v4469_v37 = vsel %vm369_vm1, %v4424_v10, -inf }
0x12be   :  { %4470 = vmax.xlane.f32.xlu1 %v4469_v37 }
0x12c4   :  { %v4426_v36 = vpop.f32.mrf.mxu0 }
0x12e9   :  { %v4456_v23 = vpop.xlane.xlu2 %4455 }
0x12ea   :  { %v4453_v21 = vpop.xlane.xlu1 %4452  ;;  %v4476_v4 = vsub.f32 %v4309_v47, %v4456_v23 }
0x12eb   :  { %v4475_v40 = vsub.f32 %v4283_v45, %v4453_v21 }
0x12ec   :  { %v4485_v24 = vmul.f32 1.442695, %v4476_v4 }
0x12ed   :  { %v4483_v56 = vmul.f32 1.442695, %v4475_v40 }
0x12ee   :  { %8184 = vpow2.f32 %v4485_v24 }
0x12ef   :  { %8186 = vpow2.f32 %v4483_v56 }
0x12f4   :  { %v9742_v48 = vpop.eup %8184 }
0x12f5   :  { %v8187_v8 = vpop.eup %8186  ;;  %v4502_v43 = vsel %vm369_vm1, %v9742_v48, 0.0 }
0x12f6   :  { %v4499_v31 = vsel %vm369_vm1, %v8187_v8, 0.0  ;;  %4503 = vadd.xlane.f32.xlu1 %v4502_v43 }
0x12f7   :  { %4500 = vadd.xlane.f32.xlu0 %v4499_v31 }
0x12fa   :  { %v4465_v54 = vpop.xlane.xlu2 %4464 }
0x12fb   :  { %v4462_v17 = vpop.xlane.xlu1 %4461  ;;  %v4479_v39 = vsub.f32 %v4378_v11, %v4465_v54 }
0x12fc   :  { %v4478_v42 = vsub.f32 %v4355_v41, %v4462_v17 }
0x12fd   :  { %v4491_v33 = vmul.f32 1.442695, %v4479_v39 }
0x12fe   :  { %v4489_v63 = vmul.f32 1.442695, %v4478_v42 }
0x130b   :  { %4603 = vrot.lane.b32.xlu0 %v9696_v59, %s8292_s30 }
0x130f   :  { %4563 = vrot.lane.b32.xlu1 %v9696_v59, %s8294_s10 }
0x1321   :  { %v4459_v2 = vpop.xlane.xlu0 %4458  ;;  %v4474_v41 = vpop.xlane.xlu2 %4473 }
0x1322   :  { %v4477_v13 = vsub.f32 %v4332_v7, %v4459_v2  ;;  %v4482_v16 = vsub.f32 %v9735_v27, %v4474_v41 }
0x1324   :  { %v4487_v14 = vmul.f32 1.442695, %v4477_v13  ;;  %v4497_v61 = vmul.f32 1.442695, %v4482_v16 }
0x1326   :  { %8188 = vpow2.f32 %v4487_v14 }
0x1327   :  { %8190 = vpow2.f32 %v4489_v63 }
0x1328   :  { %8192 = vpow2.f32 %v4491_v33 }
0x1329   :  { %v4468_v58 = vpop.xlane.xlu0 %4467 }
0x132a   :  { %v4480_v5 = vsub.f32 %v4401_v57, %v4468_v58 }
0x132c   :  { %v8189_v50 = vpop.eup %8188  ;;  %v4493_v25 = vmul.f32 1.442695, %v4480_v5 }
0x132d   :  { %v4505_v49 = vsel %vm369_vm1, %v8189_v50, 0.0  ;;  %v8191_v53 = vpop.eup %8190 }
0x132e   :  { %4506 = vadd.xlane.f32.xlu2 %v4505_v49  ;;  %v8193_v45 = vpop.eup %8192  ;;  %8194 = vpow2.f32 %v4493_v25  ;;  %v4508_v20 = vsel %vm369_vm1, %v8191_v53, 0.0 }
0x132f   :  { %v4511_v30 = vsel %vm369_vm1, %v8193_v45, 0.0 }
0x1331   :  { %v4471_v47 = vpop.xlane.xlu1 %4470 }
0x1332   :  { %v4481_v29 = vsub.f32 %v4424_v10, %v4471_v47 }
0x1334   :  { %v4495_v26 = vmul.f32 1.442695, %v4481_v29  ;;  %v8195_v6 = vpop.eup %8194 }
0x1335   :  { %4509 = vadd.xlane.f32.xlu0 %v4508_v20  ;;  %v4514_v11 = vsel %vm369_vm1, %v8195_v6, 0.0 }
0x1336   :  { %8196 = vpow2.f32 %v4495_v26  ;;  %4512 = vadd.xlane.f32.xlu2 %v4511_v30 }
0x133c   :  { %v9754_v57 = vpop.eup %8196 }
0x133d   :  { %4515 = vadd.xlane.f32.xlu0 %v4514_v11  ;;  %v4517_v51 = vsel %vm369_vm1, %v9754_v57, 0.0 }
0x133e   :  { %4518 = vadd.xlane.f32.xlu1 %v4517_v51 }
0x134e   :  { %4583 = vrot.lane.b32.xlu2 %v9696_v59, %s8293_s9 }
0x1351   :  { %4623 = vrot.lane.b32.xlu0 %v9696_v59, %s8291_s29 }
0x1359   :  { %4643 = vrot.lane.b32.xlu0 %v9696_v59, %s8296_s12 }
0x1361   :  { %4663 = vrot.lane.b32.xlu0 %v9696_v59, %s8295_s11 }
0x1369   :  { %4683 = vrot.lane.b32.xlu0 %v9696_v59, %s8290_s28  ;;  %v4504_v52 = vpop.xlane.xlu1 %4503 }
0x136a   :  { %v4501_v34 = vpop.xlane.xlu0 %4500 }
0x136b   :  { %8198 = vrcp.f32 %v4501_v34 }
0x136c   :  { %8200 = vpow2.f32 %v4497_v61 }
0x136d   :  { %8202 = vrcp.f32 %v4504_v52 }
0x1371   :  { %v8199_v62 = vpop.eup %8198 }
0x1372   :  { %v4531_v38 = vmul.f32 %v8199_v62, %v8187_v8  ;;  %v8201_v7 = vpop.eup %8200 }
0x1373   :  { %v4520_v3 = vsel %vm369_vm1, %v8201_v7, 0.0  ;;  %v8203_v44 = vpop.eup %8202 }
0x1374   :  { %v4539_v22 = vpack.c.bf16 %v4531_v38, %v4531_v38  ;;  %v4532_v9 = vmul.f32 %v8203_v44, %v9742_v48 }
0x1376   :  { %6914 = vmatmul.msk.bf16.vlgmr.msrb.gmra.mxu2 %vm369_vm1, %v4539_v22  ;;  %v4562_v10 = vpack.c.bf16 %v4532_v9, %v4532_v9  ;;  %v7637_v9 = vld [vmem:[#allocation2 + $0x430] sm:$0xf0] }
0x1377   :  { %4521 = vadd.xlane.f32.xlu2 %v4520_v3 }
0x137d   :  { %v4604_v27 = vpop.permute.xlu0 %4603 }
0x137e   :  { %4616 = vmatpush.bf16.msrb.mxu1 %v4604_v27  ;;  %v6952_v27 = vld [vmem:[#allocation2 + $0x3f0] sm:$0xf] }
0x1381   :  { %v4564_v59 = vpop.permute.xlu1 %4563 }
0x1382   :  { %4576 = vmatpush.bf16.msra.mxu3 %v4564_v59  ;;  %v6953_v59 = vor.u32 %v7637_v9, %v6952_v27  ;;  %v4818_v9 = vld [vmem:[%s10083_s7 + $0x27] ss:$0 sm:$0xff] }
0x1385   :  { %6915 = vmatmul.msk.bf16.vlgmr.msra.gmra.mxu3 %vm369_vm1, %v4562_v10  ;;  %v7636_v10 = vld [vmem:[#allocation2 + $0x3a8] sm:$0xf0] }
0x13a1   :  { %v4507_v37 = vpop.xlane.xlu2 %4506 }
0x13a2   :  { %8204 = vrcp.f32 %v4507_v37  ;;  %v6944_v37 = vld [vmem:[#allocation2 + $0x2e0] sm:$0xf] }
0x13a8   :  { %v4510_v36 = vpop.xlane.xlu0 %4509  ;;  %v8205_v21 = vpop.eup %8204 }
0x13a9   :  { %8206 = vrcp.f32 %v4510_v36  ;;  %v4513_v23 = vpop.xlane.xlu2 %4512  ;;  %v4533_v40 = vmul.f32 %v8205_v21, %v8189_v50  ;;  %v6940_v21 = vld [vmem:[#allocation2 + $0x258] sm:$0xf] }
0x13aa   :  { %8208 = vrcp.f32 %v4513_v23  ;;  %v7635_v23 = vld [vmem:[#allocation2 + $0x320] sm:$0xf0] }
0x13ab   :  { %v4582_v43 = vpack.c.bf16 %v4533_v40, %v4533_v40 }
0x13af   :  { %v8207_v4 = vpop.eup %8206 }
0x13b0   :  { %v4534_v24 = vmul.f32 %v8207_v4, %v8191_v53  ;;  %v4516_v48 = vpop.xlane.xlu0 %4515  ;;  %v8209_v31 = vpop.eup %8208  ;;  %v7634_v4 = vld [vmem:[#allocation2 + $0x298] sm:$0xf0] }
0x13b1   :  { %v4584_v56 = vpop.permute.xlu2 %4583  ;;  %8210 = vrcp.f32 %v4516_v48  ;;  %v4535_v17 = vmul.f32 %v8209_v31, %v8193_v45  ;;  %v4519_v13 = vpop.xlane.xlu1 %4518  ;;  %v6941_v40 = vor.u32 %v7634_v4, %v6940_v21  ;;  %v6928_v31 = vld [vmem:[#allocation2 + $0xc0] sm:$0xf]  ;;  %v7652_v21 = vld [vmem:[#allocation2 + $0x3f8] sm:$0xf] }
0x13b2   :  { %v4602_v8 = vpack.c.bf16 %v4534_v24, %v4534_v24  ;;  %4596 = vmatpush.bf16.msra.mxu0 %v4584_v56  ;;  %8212 = vrcp.f32 %v4519_v13  ;;  %v6936_v24 = vld [vmem:[#allocation2 + $0x1d0] sm:$0xf]  ;;  %v6924_v13 = vld [vmem:[#allocation2 + $0x38] sm:$0xf] }
0x13b3   :  { %v4622_v2 = vpack.c.bf16 %v4535_v17, %v4535_v17  ;;  %v7631_v17 = vld [vmem:[#allocation2 + $0x100] sm:$0xf0] }
0x13b4   :  { %6917 = vmatmul.msk.bf16.vlgmr.msrb.gmra.mxu1 %vm369_vm1, %v4602_v8  ;;  %v6932_v8 = vld [vmem:[#allocation2 + $0x148] sm:$0xf] }
0x13b5   :  { %6916 = vmatmul.msk.bf16.vlgmr.msra.gmra.mxu0 %vm369_vm1, %v4582_v43  ;;  %v7632_v43 = vld [vmem:[#allocation2 + $0x188] sm:$0xf0] }
0x13b6   :  { %v6933_v48 = vor.u32 %v7632_v43, %v6932_v8  ;;  %v7650_v8 = vld [vmem:[#allocation2 + $0x370] sm:$0xf]  ;;  %v7007_v43 = vld [vmem:[#allocation2 + $0x3b0] sm:$0xf0] }
0x13b7   :  { %v8211_v42 = vpop.eup %8210 }
0x13b8   :  { %v4536_v39 = vmul.f32 %v8211_v42, %v8195_v6  ;;  %v8213_v33 = vpop.eup %8212  ;;  %v7630_v42 = vld [vmem:[#allocation2 + $0x78] sm:$0xf0] }
0x13b9   :  { %v4537_v58 = vmul.f32 %v8213_v33, %v9754_v57 }
0x13ba   :  { %v4642_v63 = vpack.c.bf16 %v4536_v39, %v4536_v39  ;;  %v6925_v39 = vor.u32 %v7630_v42, %v6924_v13 }
0x13bb   :  { %v4662_v50 = vpack.c.bf16 %v4537_v58, %v4537_v58 }
0x13c3   :  { %v4624_v54 = vpop.permute.xlu0 %4623 }
0x13c4   :  { %4636 = vmatpush.bf16.msra.mxu2 %v4624_v54  ;;  %v6929_v54 = vor.u32 %v7631_v17, %v6928_v31 }
0x13c7   :  { %6918 = vmatmul.msk.bf16.vlgmr.msra.gmra.mxu2 %vm369_vm1, %v4622_v2 }
0x13c8   :  { %4802 = vmatpush.bf16.msrb.mxu2 %v6953_v59 }
0x13cb   :  { %v4644_v14 = vpop.permute.xlu0 %4643 }
0x13cc   :  { %4656 = vmatpush.bf16.msrb.mxu3 %v4644_v14 }
0x13cf   :  { %6919 = vmatmul.msk.bf16.vlgmr.msrb.gmra.mxu3 %vm369_vm1, %v4642_v63 }
0x13d3   :  { %v4664_v5 = vpop.permute.xlu0 %4663 }
0x13d4   :  { %4676 = vmatpush.bf16.msrb.mxu0 %v4664_v5 }
0x13d7   :  { %6920 = vmatmul.msk.bf16.vlgmr.msrb.gmra.mxu0 %vm369_vm1, %v4662_v50 }
0x13db   :  { %v4684_v49 = vpop.permute.xlu0 %4683 }
0x13dc   :  { %4696 = vmatpush.bf16.msra.mxu1 %v4684_v49 }
0x13ea   :  { %v4522_v25 = vpop.xlane.xlu2 %4521 }
0x13eb   :  { %8214 = vrcp.f32 %v4522_v25 }
0x13f1   :  { %v8215_v53 = vpop.eup %8214 }
0x13f2   :  { %v4538_v47 = vmul.f32 %v8215_v53, %v8201_v7 }
0x13f4   :  { %v4682_v45 = vpack.c.bf16 %v4538_v47, %v4538_v47 }
0x13f6   :  { %6921 = vmatmul.msk.bf16.vlgmr.msra.gmra.mxu1 %vm369_vm1, %v4682_v45 }
0x13f9   :  { %v9781_v29 = vpop.f32.mrf.mxu2 }
0x1401   :  { %v4560_v26 = vpop.f32.mrf.mxu2 }
0x1408   :  { %v4578_v20 = vpop.f32.mrf.mxu3 }
0x1409   :  { %v7901_v30 = vpack.i.bf16 %v4578_v20, %v9717_v18 }
0x140b   :  { %7902 = vrot.lane.b32.xlu0 %v7901_v30, %s8290_s28 }
0x1410   :  { %v4580_v6 = vpop.f32.mrf.mxu3 }
0x1431   :  { %v4618_v57 = vpop.f32.mrf.mxu1 }
0x1432   :  { %v7906_v11 = vpack.i.bf16 %v4618_v57, %v9725_v19  ;;  %v4598_v51 = vpop.f32.mrf.mxu0 }
0x1433   :  { %v7896_v41 = vpack.i.bf16 %v4598_v51, %v9719_v32 }
0x1434   :  { %7907 = vrot.lane.b32.xlu0 %v7906_v11, %s8296_s12 }
0x1435   :  { %7897 = vrot.lane.b32.xlu1 %v7896_v41, %s8295_s11 }
0x1439   :  { %v4620_v16 = vpop.f32.mrf.mxu1 }
0x143a   :  { %v4600_v61 = vpop.f32.mrf.mxu0 }
0x144a   :  { %v4638_v34 = vpop.f32.mrf.mxu2 }
0x144b   :  { %v7911_v62 = vpack.i.bf16 %v4638_v34, %v9723_v1 }
0x144d   :  { %7912 = vrot.lane.b32.xlu2 %v7911_v62, %s8291_s29 }
0x1452   :  { %v4640_v18 = vpop.f32.mrf.mxu2  ;;  %v4658_v38 = vpop.f32.mrf.mxu3 }
0x1453   :  { %v7916_v7 = vpack.i.bf16 %v4658_v38, %v9721_v28  ;;  %v6948_v28 = vld [vmem:[#allocation2 + $0x368] sm:$0xf] }
0x1454   :  { %v4678_v52 = vpop.f32.mrf.mxu0  ;;  %v6949_v36 = vor.u32 %v7636_v10, %v6948_v28 }
0x1455   :  { %7917 = vrot.lane.b32.xlu0 %v7916_v7, %s8292_s30  ;;  %v7921_v32 = vpack.i.bf16 %v4678_v52, %v9733_v0  ;;  %v6945_v0 = vor.u32 %v7635_v23, %v6944_v37  ;;  %v7013_v23 = vld [vmem:[#allocation2 + $0x3f4] sm:$0xf] }
0x1456   :  { %4803 = vmatpush.bf16.msrb.mxu2 %v6949_v36 }
0x145a   :  { %v4660_v19 = vpop.f32.mrf.mxu3  ;;  %4804 = vmatpush.bf16.msrb.mxu2 %v6945_v0  ;;  %v7653_v0 = vld [vmem:[#allocation2 + $0x434] sm:$0xf0] }
0x145b   :  { %v7014_v4 = vor.u32 %v7653_v0, %v7013_v23  ;;  %v7181_v23 = vld [vmem:[#allocation4 + $0x2a8] sm:$0xf]  ;;  %v7728_v0 = vld [vmem:[#allocation4 + $0x2bc] sm:$0xf0] }
0x145c   :  { %v4680_v22 = vpop.f32.mrf.mxu0 }
0x145d   :  { %7922 = vrot.lane.b32.xlu0 %v7921_v32, %s8293_s9  ;;  %4971 = vmatpush.bf16.msra.mxu3 %v7014_v4  ;;  %v7182_v4 = vor.u32 %v7728_v0, %v7181_v23  ;;  %v7077_v23 = vld [vmem:[#allocation4 + $0x2a4] sm:$0xf] }
0x145e   :  { %4805 = vmatpush.bf16.msrb.mxu2 %v6941_v40  ;;  %v7015_v40 = vld [vmem:[#allocation2 + $0x438] sm:$0xf0] }
0x1473   :  { %v4698_v3 = vpop.f32.mrf.mxu1 }
0x1474   :  { %v7926_v44 = vpack.i.bf16 %v4698_v3, %v9729_v46  ;;  %v7633_v46 = vld [vmem:[#allocation2 + $0x210] sm:$0xf0] }
0x1475   :  { %v6937_v56 = vor.u32 %v7633_v46, %v6936_v24  ;;  %v7005_v24 = vld [vmem:[#allocation2 + $0x36c] sm:$0xf]  ;;  %v7651_v46 = vld [vmem:[#allocation2 + $0x3ac] sm:$0xf0] }
0x1476   :  { %7927 = vrot.lane.b32.xlu1 %v7926_v44, %s8294_s10 }
0x1477   :  { %4806 = vmatpush.bf16.msrb.mxu2 %v6937_v56  ;;  %v7018_v56 = vor.u32 %v7652_v21, %v7015_v40  ;;  %v7726_v21 = vld [vmem:[#allocation4 + $0x2ac] sm:$0xf]  ;;  %v7183_v40 = vld [vmem:[#allocation4 + $0x2c0] sm:$0xf0] }
0x1479   :  { %4985 = vmatpush.bf16.msra.mxu0 %v7018_v56  ;;  %v7724_v56 = vld [vmem:[#allocation4 + $0x28c] sm:$0xf0] }
0x147b   :  { %v4700_v1 = vpop.f32.mrf.mxu1  ;;  %4807 = vmatpush.bf16.msrb.mxu2 %v6933_v48  ;;  %v7006_v48 = vor.u32 %v7651_v46, %v7005_v24  ;;  %v7186_v24 = vor.u32 %v7726_v21, %v7183_v40  ;;  %v7165_v46 = vld [vmem:[#allocation4 + $0x278] sm:$0xf]  ;;  %v7668_v40 = vld [vmem:[#allocation4 + $0x2b8] sm:$0xf0] }
0x147d   :  { %v7903_v2 = vpop.permute.xlu0 %7902  ;;  %4972 = vmatpush.bf16.msra.mxu3 %v7006_v48  ;;  %v7166_v48 = vor.u32 %v7724_v56, %v7165_v46  ;;  %v7661_v46 = vld [vmem:[#allocation4 + $0x168] sm:$0xf0] }
0x147e   :  { %v7905_v58 = vunpack.i.h.bf16 %v7903_v2  ;;  %v7904_v5 = vunpack.i.l.bf16 %v7903_v2 }
0x147f   :  { %4808 = vmatpush.bf16.msrb.mxu2 %v6929_v54 }
0x1480   :  { %v4730_v25 = vsel %vm369_vm1, %v9781_v29, %v7905_v58  ;;  %v4251_v53 = vsel %vm369_vm1, %v9712_v12, %v7904_v5  ;;  %v6999_v5 = vld [vmem:[#allocation2 + $0x328] sm:$0xf0] }
0x1483   :  { %4809 = vmatpush.bf16.msrb.mxu2 %v6925_v39 }
0x14a6   :  { %v7908_v14 = vpop.permute.xlu0 %7907 }
0x14a7   :  { %v7898_v33 = vpop.permute.xlu1 %7897  ;;  %v7910_v26 = vunpack.i.h.bf16 %v7908_v14  ;;  %v7909_v20 = vunpack.i.l.bf16 %v7908_v14  ;;  %v7913_v30 = vpop.permute.xlu2 %7912  ;;  %v6997_v14 = vld [vmem:[#allocation2 + $0x2e4] sm:$0xf] }
0x14a8   :  { %v7900_v50 = vunpack.i.h.bf16 %v7898_v33  ;;  %v7899_v49 = vunpack.i.l.bf16 %v7898_v33  ;;  %v7915_v16 = vunpack.i.h.bf16 %v7913_v30  ;;  %v7914_v61 = vunpack.i.l.bf16 %v7913_v30  ;;  %v7648_v33 = vld [vmem:[#allocation2 + $0x2e8] sm:$0xf]  ;;  %v7645_v30 = vld [vmem:[#allocation2 + $0x214] sm:$0xf0] }
0x14aa   :  { %v4731_v47 = vsel %vm963_vm2, %v4730_v25, %v7900_v50  ;;  %v4252_v45 = vsel %vm963_vm2, %v4251_v53, %v7899_v49  ;;  %v7002_v50 = vor.u32 %v7648_v33, %v6999_v5  ;;  %v6989_v49 = vld [vmem:[#allocation2 + $0x25c] sm:$0xf]  ;;  %v7647_v25 = vld [vmem:[#allocation2 + $0x29c] sm:$0xf0]  ;;  %v7716_v5 = vld [vmem:[#allocation4 + $0x22c] sm:$0xf0] }
0x14ab   :  { %v4732_v57 = vsel %vm99_vm0, %v4731_v47, %v7910_v26  ;;  %v4253_v11 = vsel %vm99_vm0, %v4252_v45, %v7909_v20  ;;  %v7646_v53 = vld [vmem:[#allocation2 + $0x260] sm:$0xf]  ;;  %v6990_v47 = vor.u32 %v7647_v25, %v6989_v49  ;;  %v6991_v45 = vld [vmem:[#allocation2 + $0x2a0] sm:$0xf0]  ;;  %v6981_v20 = vld [vmem:[#allocation2 + $0x1d4] sm:$0xf] }
0x14ac   :  { %v4254_v12 = vsel %vm968_vm3, %v4253_v11, %v7914_v61  ;;  %v4733_v62 = vsel %vm968_vm3, %v4732_v57, %v7915_v16  ;;  %v6994_v26 = vor.u32 %v7646_v53, %v6991_v45  ;;  %v6982_v57 = vor.u32 %v7645_v30, %v6981_v20  ;;  %v6983_v11 = vld [vmem:[#allocation2 + $0x218] sm:$0xf0]  ;;  %v7643_v16 = vld [vmem:[#allocation2 + $0x18c] sm:$0xf0]  ;;  %v7135_v53 = vld [vmem:[#allocation4 + $0x230] sm:$0xf0] }
0x14ad   :  { %v7642_v61 = vld [vmem:[#allocation2 + $0x150] sm:$0xf]  ;;  %v7712_v45 = vld [vmem:[#allocation4 + $0x1fc] sm:$0xf0]  ;;  %v7710_v30 = vld [vmem:[#allocation4 + $0x1ec] sm:$0xf] }
0x14c7   :  { %v7918_v63 = vpop.permute.xlu0 %7917 }
0x14c8   :  { %v7920_v51 = vunpack.i.h.bf16 %v7918_v63  ;;  %v7919_v41 = vunpack.i.l.bf16 %v7918_v63  ;;  %v7649_v63 = vld [vmem:[#allocation2 + $0x324] sm:$0xf0] }
0x14c9   :  { %v6998_v58 = vor.u32 %v7649_v63, %v6997_v14  ;;  %v7718_v14 = vld [vmem:[#allocation4 + $0x24c] sm:$0xf]  ;;  %v7151_v63 = vld [vmem:[#allocation4 + $0x260] sm:$0xf0] }
0x14ca   :  { %v4255_v38 = vsel %vm971_vm4, %v4254_v12, %v7919_v41  ;;  %v4734_v7 = vsel %vm971_vm4, %v4733_v62, %v7920_v51  ;;  %v6973_v41 = vld [vmem:[#allocation2 + $0x14c] sm:$0xf]  ;;  %v6965_v62 = vld [vmem:[#allocation2 + $0xc4] sm:$0xf]  ;;  %v7154_v33 = vor.u32 %v7718_v14, %v7151_v63  ;;  %v7041_v14 = vld [vmem:[#allocation4 + $0xf4] sm:$0xf] }
0x14cb   :  { %4973 = vmatpush.bf16.msra.mxu3 %v6998_v58  ;;  %v7133_v58 = vld [vmem:[#allocation4 + $0x218] sm:$0xf]  ;;  %v7659_v63 = vld [vmem:[#allocation4 + $0x108] sm:$0xf0] }
0x14cc   :  { %v7134_v25 = vor.u32 %v7716_v5, %v7133_v58 }
0x14cf   :  { %v7923_v6 = vpop.permute.xlu0 %7922  ;;  %4974 = vmatpush.bf16.msra.mxu3 %v6990_v47  ;;  %v7117_v47 = vld [vmem:[#allocation4 + $0x1e8] sm:$0xf] }
0x14d0   :  { %v7925_v29 = vunpack.i.h.bf16 %v7923_v6  ;;  %v7924_v34 = vunpack.i.l.bf16 %v7923_v6  ;;  %v7644_v6 = vld [vmem:[#allocation2 + $0x1d8] sm:$0xf] }
0x14d1   :  { %v6986_v51 = vor.u32 %v7644_v6, %v6983_v11  ;;  %v7119_v6 = vld [vmem:[#allocation4 + $0x200] sm:$0xf0] }
0x14d2   :  { %v4256_v32 = vsel %vm974_vm5, %v4255_v38, %v7924_v34  ;;  %v4735_v22 = vsel %vm974_vm5, %v4734_v7, %v7925_v29  ;;  %v6974_v29 = vor.u32 %v7643_v16, %v6973_v41  ;;  %v6975_v34 = vld [vmem:[#allocation2 + $0x190] sm:$0xf0]  ;;  %v7640_v38 = vld [vmem:[#allocation2 + $0xc8] sm:$0xf]  ;;  %v7122_v41 = vor.u32 %v7710_v30, %v7119_v6  ;;  %v7101_v16 = vld [vmem:[#allocation4 + $0x1b8] sm:$0xf] }
0x14d3   :  { %4975 = vmatpush.bf16.msra.mxu3 %v6982_v57  ;;  %v6978_v12 = vor.u32 %v7642_v61, %v6975_v34  ;;  %v7118_v57 = vor.u32 %v7712_v45, %v7117_v47  ;;  %v7708_v61 = vld [vmem:[#allocation4 + $0x1cc] sm:$0xf0]  ;;  %v7706_v34 = vld [vmem:[#allocation4 + $0x1bc] sm:$0xf]  ;;  %v7037_v45 = vld [vmem:[#allocation4 + $0xc4] sm:$0xf] }
0x14d7   :  { %4976 = vmatpush.bf16.msra.mxu3 %v6974_v29 }
0x14e8   :  { %v7928_v18 = vpop.permute.xlu1 %7927 }
0x14e9   :  { %v7930_v52 = vunpack.i.h.bf16 %v7928_v18  ;;  %v7929_v19 = vunpack.i.l.bf16 %v7928_v18  ;;  %v7641_v18 = vld [vmem:[#allocation2 + $0x104] sm:$0xf0] }
0x14ea   :  { %v6966_v7 = vor.u32 %v7641_v18, %v6965_v62  ;;  %v7102_v18 = vor.u32 %v7708_v61, %v7101_v16  ;;  %v7657_v16 = vld [vmem:[#allocation4 + $0xa8] sm:$0xf0] }
0x14eb   :  { %v4257_v3 = vsel %vm977_vm6, %v4256_v32, %v7929_v19  ;;  %v4736_v44 = vsel %vm977_vm6, %v4735_v22, %v7930_v52  ;;  %v6967_v52 = vld [vmem:[#allocation2 + $0x108] sm:$0xf0]  ;;  %v6957_v32 = vld [vmem:[#allocation2 + $0x3c] sm:$0xf]  ;;  %v7639_v22 = vld [vmem:[#allocation2 + $0x7c] sm:$0xf0] }
0x14ec   :  { %v4753_v1 = vpack.c.bf16 %v4736_v44, %v4257_v3  ;;  %v6970_v19 = vor.u32 %v7640_v38, %v6967_v52  ;;  %4977 = vmatpush.bf16.msra.mxu3 %v6966_v7  ;;  %v7638_v3 = vld [vmem:[#allocation2 + $0x40] sm:$0xf]  ;;  %v6958_v44 = vor.u32 %v7639_v22, %v6957_v32  ;;  %v7085_v7 = vld [vmem:[#allocation4 + $0x188] sm:$0xf]  ;;  %v7702_v32 = vld [vmem:[#allocation4 + $0x18c] sm:$0xf] }
0x14ed   :  { %v7704_v52 = vld [vmem:[#allocation4 + $0x19c] sm:$0xf0]  ;;  %v7087_v22 = vld [vmem:[#allocation4 + $0x1a0] sm:$0xf0] }
0x14ee   :  { %4810 = vmatmul.bf16.vlgmr.msrb.gmra.mxu2 %v4753_v1  ;;  %v6959_v1 = vld [vmem:[#allocation2 + $0x80] sm:$0xf0] }
0x14f0   :  { %4978 = vmatpush.bf16.msra.mxu3 %v6958_v44  ;;  %v7086_v44 = vor.u32 %v7704_v52, %v7085_v7  ;;  %v7057_v7 = vld [vmem:[#allocation4 + $0x1b4] sm:$0xf]  ;;  %v7663_v52 = vld [vmem:[#allocation4 + $0x1c8] sm:$0xf0] }
0x1571   :  { %v4811_v27 = vpop.f32.mrf.mxu2 }
0x1572   :  { %v4816_v59 = vadd.f32 %v4811_v27, %v9487_v15  ;;  %v7010_v15 = vor.u32 %v7650_v8, %v7007_v43  ;;  %v7197_v27 = vld [vmem:[#allocation4 + $0x2d8] sm:$0xf]  ;;  %v7722_v8 = vld [vmem:[#allocation4 + $0x27c] sm:$0xf] }
0x1574   :  { %v4819_v28 = vadd.f32 %v4818_v9, %v4816_v59  ;;  %4986 = vmatpush.bf16.msra.mxu0 %v7010_v15  ;;  %v6962_v59 = vor.u32 %v7638_v3, %v6959_v1  ;;  %v7167_v15 = vld [vmem:[#allocation4 + $0x290] sm:$0xf0] }
0x1576   :  { %4823 = vadd.xlane.f32.xlu0 %v4819_v28 }
0x1578   :  { %4987 = vmatpush.bf16.msra.mxu0 %v7002_v50  ;;  %v7714_v50 = vld [vmem:[#allocation4 + $0x21c] sm:$0xf] }
0x1579   :  { %v4813_v10 = vpop.f32.mrf.mxu2  ;;  %v7138_v20 = vor.u32 %v7714_v50, %v7135_v53  ;;  %v7042_v53 = vor.u32 %v7659_v63, %v7041_v14  ;;  %v7715_v63 = vld [vmem:[#allocation4 + $0x224] sm:$0xf] }
0x157a   :  { %v4817_v37 = vadd.f32 %v4813_v10, %v9489_v35  ;;  %v7730_v10 = vld [vmem:[#allocation4 + $0x2dc] sm:$0xf] }
0x157c   :  { %v4820_v36 = vadd.f32 %v4818_v9, %v4817_v37  ;;  %4988 = vmatpush.bf16.msra.mxu0 %v6994_v26  ;;  %v7732_v9 = vld [vmem:[#allocation4 + $0x2ec] sm:$0xf0]  ;;  %v7199_v37 = vld [vmem:[#allocation4 + $0x2f0] sm:$0xf0] }
0x157e   :  { %4825 = vadd.xlane.f32.xlu2 %v4820_v36 }
0x1580   :  { %4989 = vmatpush.bf16.msra.mxu0 %v6986_v51 }
0x1584   :  { %4990 = vmatpush.bf16.msra.mxu0 %v6978_v12  ;;  %v7103_v12 = vld [vmem:[#allocation4 + $0x1d0] sm:$0xf0] }
0x1585   :  { %v7106_v38 = vor.u32 %v7706_v34, %v7103_v12  ;;  %v7664_v34 = vld [vmem:[#allocation4 + $0x1f8] sm:$0xf0] }
0x1588   :  { %4991 = vmatpush.bf16.msra.mxu0 %v6970_v19 }
0x158c   :  { %4992 = vmatpush.bf16.msra.mxu0 %v6962_v59 }
0x15e9   :  { %v4824_v31 = vpop.xlane.xlu0 %4823 }
0x15ea   :  { %v4827_v35 = vmul.f32 %v4824_v31, %v8919_v60 }
0x15ec   :  { %v9819_v17 = vsub.f32 %v4819_v28, %v4827_v35  ;;  %v7198_v28 = vor.u32 %v7732_v9, %v7197_v27  ;;  %v7170_v35 = vor.u32 %v7722_v8, %v7167_v15  ;;  %v7090_v27 = vor.u32 %v7702_v32, %v7087_v22  ;;  %v7660_v15 = vld [vmem:[#allocation4 + $0x138] sm:$0xf0]  ;;  %v7053_v22 = vld [vmem:[#allocation4 + $0x184] sm:$0xf] }
0x15ed   :  { %v7078_v8 = vor.u32 %v7668_v40, %v7077_v23  ;;  %v7058_v32 = vor.u32 %v7663_v52, %v7057_v7  ;;  %v7191_v23 = vld [vmem:[#allocation4 + $0x2c8] sm:$0xf0]  ;;  %v7205_v40 = vld [vmem:[#allocation4 + $0x2e0] sm:$0xf] }
0x15ee   :  { %v4831_v54 = vmul.f32 %v9819_v17, %v9819_v17  ;;  %5492 = vmatpush.bf16.msrb.mxu3 %v7198_v28  ;;  %v7025_v28 = vld [vmem:[#allocation4 + $0x34] sm:$0xf]  ;;  %v6954_v7 = vld [vmem:[%s10083_s7 + $0x42] ss:$8 sm:$0x3] }
0x15f0   :  { %4833 = vadd.xlane.f32.xlu1 %v4831_v54 }
0x15f1   :  { %v4826_v2 = vpop.xlane.xlu2 %4825 }
0x15f2   :  { %v4828_v13 = vmul.f32 %v4826_v2, %v8919_v60  ;;  %5493 = vmatpush.bf16.msrb.mxu3 %v7182_v4  ;;  %v7149_v2 = vld [vmem:[#allocation4 + $0x248] sm:$0xf] }
0x15f4   :  { %v9824_v42 = vsub.f32 %v4820_v36, %v4828_v13  ;;  %v7202_v36 = vor.u32 %v7730_v10, %v7199_v37  ;;  %v7720_v13 = vld [vmem:[#allocation4 + $0x25c] sm:$0xf0]  ;;  %v7081_v37 = vld [vmem:[#allocation4 + $0x2d4] sm:$0xf] }
0x15f6   :  { %v4832_v39 = vmul.f32 %v9824_v42, %v9824_v42  ;;  %5505 = vmatpush.bf16.msrb.mxu0 %v7202_v36  ;;  %5494 = vmatpush.bf16.msrb.mxu3 %v7166_v48  ;;  %v7669_v36 = vld [vmem:[#allocation4 + $0x2e8] sm:$0xf0]  ;;  %v7045_v48 = vld [vmem:[#allocation4 + $0x124] sm:$0xf] }
0x15f7   :  { %v7082_v4 = vor.u32 %v7669_v36, %v7081_v37  ;;  %v7727_v36 = vld [vmem:[#allocation4 + $0x2b4] sm:$0xf] }
0x15f8   :  { %4835 = vadd.xlane.f32.xlu2 %v4832_v39  ;;  %v7150_v39 = vor.u32 %v7720_v13, %v7149_v2  ;;  %v4821_v2 = vld [vmem:[%s10083_s7 + $0x40] ss:$0 sm:$0xff] }
0x15f9   :  { %5147 = vmatpush.bf16.msra.mxu2 %v7082_v4  ;;  %v7654_v4 = vld [vmem:[#allocation4 + $0x18] sm:$0xf0] }
0x15fa   :  { %5506 = vmatpush.bf16.msrb.mxu0 %v7186_v24  ;;  %5495 = vmatpush.bf16.msrb.mxu3 %v7150_v39  ;;  %v7049_v24 = vld [vmem:[#allocation4 + $0x154] sm:$0xf]  ;;  %v7046_v39 = vor.u32 %v7660_v15, %v7045_v48  ;;  %v7189_v48 = vld [vmem:[#allocation4 + $0x2b0] sm:$0xf]  ;;  %v7729_v15 = vld [vmem:[#allocation4 + $0x2c4] sm:$0xf0] }
0x15fd   :  { %5148 = vmatpush.bf16.msra.mxu2 %v7078_v8  ;;  %v7175_v8 = vld [vmem:[#allocation4 + $0x298] sm:$0xf0] }
0x15fe   :  { %5507 = vmatpush.bf16.msrb.mxu0 %v7170_v35  ;;  %5496 = vmatpush.bf16.msrb.mxu3 %v7134_v25  ;;  %v7073_v35 = vld [vmem:[#allocation4 + $0x274] sm:$0xf]  ;;  %v4822_v25 = vld [vmem:[%s10083_s7 + $0x41] ss:$0 sm:$0xff] }
0x1602   :  { %5508 = vmatpush.bf16.msrb.mxu0 %v7154_v33  ;;  %5497 = vmatpush.bf16.msrb.mxu3 %v7118_v57  ;;  %v7065_v57 = vld [vmem:[#allocation4 + $0x214] sm:$0xf] }
0x1606   :  { %5509 = vmatpush.bf16.msrb.mxu0 %v7138_v20  ;;  %5498 = vmatpush.bf16.msrb.mxu3 %v7102_v18  ;;  %v7656_v18 = vld [vmem:[#allocation4 + $0x78] sm:$0xf0] }
0x160a   :  { %5510 = vmatpush.bf16.msrb.mxu0 %v7122_v41  ;;  %5499 = vmatpush.bf16.msrb.mxu3 %v7086_v44  ;;  %v7033_v41 = vld [vmem:[#allocation4 + $0x94] sm:$0xf] }
0x160b   :  { %v7034_v12 = vor.u32 %v7657_v16, %v7033_v41  ;;  %v7703_v41 = vld [vmem:[#allocation4 + $0x194] sm:$0xf] }
0x160e   :  { %5511 = vmatpush.bf16.msrb.mxu0 %v7106_v38 }
0x1612   :  { %5512 = vmatpush.bf16.msrb.mxu0 %v7090_v27  ;;  %v7731_v27 = vld [vmem:[#allocation4 + $0x2e4] sm:$0xf] }
0x1663   :  { %v4834_v43 = vpop.xlane.xlu1 %4833 }
0x1664   :  { %v4837_v31 = vmul.f32 %v4834_v43, %v8919_v60  ;;  %v7050_v43 = vor.u32 %v7661_v46, %v7049_v24  ;;  %v7733_v24 = vld [vmem:[#allocation4 + $0x2f4] sm:$0xf0] }
0x1665   :  { %v7206_v46 = vor.u32 %v7733_v24, %v7205_v40 }
0x1666   :  { %v4839_v54 = vadd.f32 1e-05, %v4837_v31  ;;  %5133 = vmatpush.bf16.msrb.mxu1 %v7050_v43 }
0x1668   :  { %8216 = vrsqrt.f32 %v4839_v54  ;;  %vm4847_vm2 = vweird.f32 %v4839_v54 }
0x166a   :  { %5134 = vmatpush.bf16.msrb.mxu1 %v7046_v39  ;;  %v7725_v39 = vld [vmem:[#allocation4 + $0x294] sm:$0xf0] }
0x166b   :  { %v4836_v49 = vpop.xlane.xlu2 %4835 }
0x166c   :  { %v4838_v26 = vmul.f32 %v4836_v49, %v8919_v60  ;;  %v7666_v49 = vld [vmem:[#allocation4 + $0x258] sm:$0xf0] }
0x166e   :  { %v8217_v11 = vpop.eup %8216  ;;  %v4840_v51 = vadd.f32 1e-05, %v4838_v26  ;;  %v7658_v26 = vld [vmem:[#allocation4 + $0xd8] sm:$0xf0]  ;;  %5135 = vmatpush.bf16.msrb.mxu1 %v7042_v53 }
0x166f   :  { %v4842_v29 = vmul.f32 %v8217_v11, %v4839_v54  ;;  %vm4848_vm0 = vweird.f32 %v8217_v11  ;;  %v7667_v54 = vld [vmem:[#allocation4 + $0x288] sm:$0xf0] }
0x1670   :  { %8218 = vrsqrt.f32 %v4840_v51  ;;  %vm9830_vm4 = vmor %vm4847_vm2, %vm4848_vm0  ;;  %vm4857_vm6 = vweird.f32 %v4840_v51  ;;  %v7074_v58 = vor.u32 %v7667_v54, %v7073_v35  ;;  %v7719_v35 = vld [vmem:[#allocation4 + $0x254] sm:$0xf]  ;;  %v7159_v54 = vld [vmem:[#allocation4 + $0x268] sm:$0xf0] }
0x1671   :  { %v4843_v62 = vmul.f32 %v8217_v11, %v4842_v29  ;;  %v7061_v29 = vld [vmem:[#allocation4 + $0x1e4] sm:$0xf] }
0x1672   :  { %5149 = vmatpush.bf16.msra.mxu2 %v7074_v58  ;;  %v7062_v38 = vor.u32 %v7664_v34, %v7061_v29  ;;  %v7109_v34 = vld [vmem:[#allocation4 + $0x1c0] sm:$0xf] }
0x1673   :  { %v4844_v19 = vmul.f32 0.5, %v4843_v62  ;;  %v7029_v62 = vld [vmem:[#allocation4 + $0x64] sm:$0xf] }
0x1675   :  { %v4845_v3 = vsub.f32 1.5, %v4844_v19  ;;  %v7030_v19 = vor.u32 %v7656_v18, %v7029_v62  ;;  %v7093_v18 = vld [vmem:[#allocation4 + $0x190] sm:$0xf] }
0x1676   :  { %v8219_v1 = vpop.eup %8218 }
0x1677   :  { %v4846_v9 = vmul.f32 %v8217_v11, %v4845_v3  ;;  %v4852_v59 = vmul.f32 %v8219_v1, %v4840_v51  ;;  %vm4858_vm5 = vweird.f32 %v8219_v1  ;;  %v7662_v3 = vld [vmem:[#allocation4 + $0x198] sm:$0xf0] }
0x1678   :  { %vm4859_vm15 = vmor %vm4857_vm6, %vm4858_vm5  ;;  %v7054_v44 = vor.u32 %v7662_v3, %v7053_v22 }
0x1679   :  { %v4853_v10 = vmul.f32 %v8219_v1, %v4852_v59  ;;  %v4850_v0 = vsel %vm9830_vm4, %v8217_v11, %v4846_v9  ;;  %v7665_v11 = vld [vmem:[#allocation4 + $0x228] sm:$0xf0]  ;;  %v7207_v9 = vld [vmem:[#allocation4 + $0x2f8] sm:$0xf0] }
0x167a   :  { %v4861_v31 = vmul.f32 %v4850_v0, %v9819_v17  ;;  %v7069_v17 = vld [vmem:[#allocation4 + $0x244] sm:$0xf]  ;;  %v7066_v61 = vor.u32 %v7665_v11, %v7065_v57  ;;  %v7210_v59 = vor.u32 %v7731_v27, %v7207_v9  ;;  %v7111_v57 = vld [vmem:[#allocation4 + $0x1d8] sm:$0xf0]  ;;  %v4887_v27 = vperm.slane %v6954_v7, 0 }
0x167b   :  { %v4854_v21 = vmul.f32 0.5, %v4853_v10  ;;  %v7070_v20 = vor.u32 %v7666_v49, %v7069_v17  ;;  %v7655_v10 = vld [vmem:[#allocation4 + $0x48] sm:$0xf0]  ;;  %v7021_v0 = vld [vmem:[#allocation4 + $0x4] sm:$0xf] }
0x167c   :  { %v4863_v5 = vmul.f32 %v4861_v31, %v4821_v2  ;;  %v7026_v37 = vor.u32 %v7655_v10, %v7025_v28  ;;  %v7190_v31 = vor.u32 %v7729_v15, %v7189_v48  ;;  %v7711_v49 = vld [vmem:[#allocation4 + $0x1f4] sm:$0xf]  ;;  %v5163_v48 = vld [vmem:[%s10083_s7 + $0x43] ss:$0 sm:$0xff] }
0x167d   :  { %v4855_v56 = vsub.f32 1.5, %v4854_v21  ;;  %5150 = vmatpush.bf16.msra.mxu2 %v7070_v20  ;;  %v7194_v21 = vor.u32 %v7727_v36, %v7191_v23  ;;  %v7707_v20 = vld [vmem:[#allocation4 + $0x1c4] sm:$0xf] }
0x167e   :  { %v9844_v30 = vadd.f32 %v4863_v5, %v4822_v25  ;;  %v7157_v5 = vld [vmem:[#allocation4 + $0x250] sm:$0xf]  ;;  %v7114_v11 = vor.u32 %v7707_v20, %v7111_v57  ;;  %v7327_v20 = vld [vmem:[#allocation4 + $0x170] sm:$0xf0]  ;;  %v7333_v57 = vld [vmem:[#allocation4 + $0x160] sm:$0xf] }
0x167f   :  { %v4856_v13 = vmul.f32 %v8219_v1, %v4855_v56  ;;  %v7723_v56 = vld [vmem:[#allocation4 + $0x284] sm:$0xf] }
0x1680   :  { %v7178_v43 = vor.u32 %v7723_v56, %v7175_v8 }
0x1681   :  { %v4860_v33 = vsel %vm4859_vm15, %v8219_v1, %v4856_v13  ;;  %5151 = vmatpush.bf16.msra.mxu2 %v7066_v61  ;;  %v9852_v1 = vpack.c.b16 %v9543_v55, %v9543_v55  ;;  %v7022_v55 = vor.u32 %v7654_v4, %v7021_v0  ;;  %v7173_v13 = vld [vmem:[#allocation4 + $0x280] sm:$0xf]  ;;  %v7095_v61 = vld [vmem:[#allocation4 + $0x1a8] sm:$0xf0] }
0x1682   :  { %v4862_v50 = vmul.f32 %v4860_v33, %v9824_v42  ;;  %v7038_v42 = vor.u32 %v7658_v26, %v7037_v45  ;;  %v7174_v14 = vor.u32 %v7725_v39, %v7173_v13  ;;  %v7143_v33 = vld [vmem:[#allocation4 + $0x238] sm:$0xf0]  ;;  %v7717_v45 = vld [vmem:[#allocation4 + $0x234] sm:$0xf0]  ;;  %v7098_v29 = vor.u32 %v7703_v41, %v7095_v61  ;;  %v7699_v41 = vld [vmem:[#allocation4 + $0x164] sm:$0xf] }
0x1683   :  { %v7146_v58 = vor.u32 %v7715_v63, %v7143_v33 }
0x1684   :  { %v4864_v47 = vmul.f32 %v4862_v50, %v4821_v2  ;;  %5136 = vmatpush.bf16.msrb.mxu1 %v7038_v42  ;;  %v7162_v2 = vor.u32 %v7719_v35, %v7159_v54  ;;  %v7721_v50 = vld [vmem:[#allocation4 + $0x264] sm:$0xf0]  ;;  %v7125_v42 = vld [vmem:[#allocation4 + $0x1f0] sm:$0xf] }
0x1685   :  { %5152 = vmatpush.bf16.msra.mxu2 %v7062_v38  ;;  %v7158_v17 = vor.u32 %v7721_v50, %v7157_v5  ;;  %v7705_v38 = vld [vmem:[#allocation4 + $0x1a4] sm:$0xf0] }
0x1686   :  { %v9846_v6 = vadd.f32 %v4864_v47, %v4822_v25  ;;  %v7127_v25 = vld [vmem:[#allocation4 + $0x208] sm:$0xf0]  ;;  %v7141_v47 = vld [vmem:[#allocation4 + $0x220] sm:$0xf] }
0x1687   :  { %v7130_v53 = vor.u32 %v7711_v49, %v7127_v25  ;;  %v7142_v26 = vor.u32 %v7717_v45, %v7141_v47  ;;  %v7700_v47 = vld [vmem:[#allocation4 + $0x16c] sm:$0xf0]  ;;  %v7698_v45 = vld [vmem:[#allocation4 + $0x15c] sm:$0xf] }
0x1688   :  { %v4883_v51 = vpack.c.bf16 %v9846_v6, %v9844_v30  ;;  %5137 = vmatpush.bf16.msrb.mxu1 %v7034_v12  ;;  %v7709_v12 = vld [vmem:[#allocation4 + $0x1d4] sm:$0xf0] }
0x1689   :  { %5153 = vmatpush.bf16.msra.mxu2 %v7058_v32  ;;  %v7110_v62 = vor.u32 %v7709_v12, %v7109_v34  ;;  %v4888_v32 = vperm.slane %v6954_v7, 1  ;;  %v7696_v34 = vld [vmem:[#allocation4 + $0x13c] sm:$0xf0]  ;;  %v7694_v12 = vld [vmem:[#allocation4 + $0x12c] sm:$0xf] }
0x168a   :  { %4979 = vmatmul.bf16.vlgmr.msra.gmra.mxu3 %v4883_v51  ;;  %4993 = vmatmul.bf16.vlgmr.msra.gmra.mxu0 %v4883_v51  ;;  %v7713_v51 = vld [vmem:[#allocation4 + $0x204] sm:$0xf0] }
0x168b   :  { %v7126_v16 = vor.u32 %v7713_v51, %v7125_v42  ;;  %v7330_v42 = vor.u32 %v7698_v45, %v7327_v20  ;;  %v7697_v7 = vld [vmem:[#allocation4 + $0x144] sm:$0xf0]  ;;  %v7263_v45 = vld [vmem:[#allocation4 + $0xb0] sm:$0xf0] }
0x168c   :  { %5138 = vmatpush.bf16.msrb.mxu1 %v7030_v19  ;;  %v7094_v19 = vor.u32 %v7705_v38, %v7093_v18  ;;  %v7311_v18 = vld [vmem:[#allocation4 + $0x140] sm:$0xf0]  ;;  %v7317_v38 = vld [vmem:[#allocation4 + $0x130] sm:$0xf] }
0x168d   :  { %5154 = vmatpush.bf16.msra.mxu2 %v7054_v44  ;;  %5724 = vmatpush.bf16.msra.mxu0 %v7330_v42  ;;  %v7271_v42 = vld [vmem:[#allocation4 + $0xb8] sm:$0xf0] }
0x1690   :  { %5139 = vmatpush.bf16.msrb.mxu1 %v7026_v37 }
0x1691   :  { %5531 = vmatpush.bf16.msrb.mxu2 %v7210_v59 }
0x1694   :  { %5140 = vmatpush.bf16.msrb.mxu1 %v7022_v55 }
0x1695   :  { %5532 = vmatpush.bf16.msrb.mxu2 %v7194_v21 }
0x1698   :  { %5518 = vmatpush.bf16.msra.mxu1 %v7206_v46 }
0x1699   :  { %5533 = vmatpush.bf16.msrb.mxu2 %v7178_v43 }
0x169a   :  { %5500 = vmatmul.bf16.vlgmr.msrb.gmra.mxu3 %v9852_v1  ;;  %5513 = vmatmul.bf16.vlgmr.msrb.gmra.mxu0 %v9852_v1 }
0x169c   :  { %5519 = vmatpush.bf16.msra.mxu1 %v7190_v31 }
0x169d   :  { %5534 = vmatpush.bf16.msrb.mxu2 %v7162_v2 }
0x16a0   :  { %5520 = vmatpush.bf16.msra.mxu1 %v7174_v14 }
0x16a1   :  { %5535 = vmatpush.bf16.msrb.mxu2 %v7146_v58 }
0x16a4   :  { %5521 = vmatpush.bf16.msra.mxu1 %v7158_v17 }
0x16a5   :  { %5536 = vmatpush.bf16.msrb.mxu2 %v7130_v53  ;;  %v7325_v53 = vld [vmem:[#allocation4 + $0x158] sm:$0xf] }
0x16a8   :  { %5522 = vmatpush.bf16.msra.mxu1 %v7142_v26  ;;  %v7326_v26 = vor.u32 %v7700_v47, %v7325_v53 }
0x16a9   :  { %5537 = vmatpush.bf16.msrb.mxu2 %v7114_v11  ;;  %v7701_v11 = vld [vmem:[#allocation4 + $0x174] sm:$0xf0] }
0x16aa   :  { %v7334_v51 = vor.u32 %v7701_v11, %v7333_v57  ;;  %5711 = vmatpush.bf16.msra.mxu3 %v7326_v26  ;;  %v7269_v26 = vld [vmem:[#allocation4 + $0xa0] sm:$0xf]  ;;  %v7683_v11 = vld [vmem:[#allocation4 + $0xa4] sm:$0xf] }
0x16ac   :  { %5523 = vmatpush.bf16.msra.mxu1 %v7126_v16  ;;  %v7335_v16 = vld [vmem:[#allocation4 + $0x178] sm:$0xf0] }
0x16ad   :  { %5538 = vmatpush.bf16.msrb.mxu2 %v7098_v29  ;;  %v7338_v61 = vor.u32 %v7699_v41, %v7335_v16  ;;  %v7309_v29 = vld [vmem:[#allocation4 + $0x128] sm:$0xf]  ;;  %v7274_v41 = vor.u32 %v7683_v11, %v7271_v42 }
0x16ae   :  { %v7245_v16 = vld [vmem:[#allocation4 + $0x68] sm:$0xf] }
0x16af   :  { %v7341_v42 = vld [vmem:[#allocation4 + $0x308] sm:$0xf] }
0x16b0   :  { %5524 = vmatpush.bf16.msra.mxu1 %v7110_v62  ;;  %v7310_v62 = vor.u32 %v7696_v34, %v7309_v29 }
0x16b2   :  { %5712 = vmatpush.bf16.msra.mxu3 %v7310_v62  ;;  %v7247_v62 = vld [vmem:[#allocation4 + $0x80] sm:$0xf0] }
0x16b4   :  { %5525 = vmatpush.bf16.msra.mxu1 %v7094_v19  ;;  %v7314_v19 = vor.u32 %v7694_v12, %v7311_v18  ;;  %v7678_v12 = vld [vmem:[#allocation4 + $0x6c] sm:$0xf]  ;;  %v7253_v18 = vld [vmem:[#allocation4 + $0x70] sm:$0xf] }
0x16b6   :  { %5725 = vmatpush.bf16.msra.mxu0 %v7314_v19  ;;  %v7255_v19 = vld [vmem:[#allocation4 + $0x88] sm:$0xf0] }
0x1707   :  { %v4994_v52 = vpop.f32.mrf.mxu0 }
0x1708   :  { %v4995_v3 = vadd.f32 %v4994_v52, %v4888_v32 }
0x170a   :  { %v5000_v59 = vmax.f32 %v4995_v3, 0.0  ;;  %v7319_v3 = vld [vmem:[#allocation4 + $0x148] sm:$0xf0] }
0x170d   :  { %v4980_v22 = vpop.f32.mrf.mxu3 }
0x170e   :  { %v4981_v10 = vadd.f32 %v4980_v22, %v4887_v27  ;;  %v7695_v22 = vld [vmem:[#allocation4 + $0x134] sm:$0xf] }
0x170f   :  { %v4996_v44 = vpop.f32.mrf.mxu0 }
0x1710   :  { %v4997_v9 = vadd.f32 %v4996_v44, %v4888_v32  ;;  %v4999_v21 = vmax.f32 %v4981_v10, 0.0  ;;  %v7318_v32 = vor.u32 %v7697_v7, %v7317_v38  ;;  %v7250_v38 = vor.u32 %v7678_v12, %v7247_v62  ;;  %v7681_v7 = vld [vmem:[#allocation4 + $0x84] sm:$0xf0] }
0x1712   :  { %v5002_v28 = vmax.f32 %v4997_v9, 0.0  ;;  %v7293_v9 = vld [vmem:[#allocation4 + $0xf8] sm:$0xf] }
0x1714   :  { %v5036_v37 = vpack.c.bf16 %v5002_v28, %v5000_v59  ;;  %v7692_v59 = vld [vmem:[#allocation4 + $0x10c] sm:$0xf0]  ;;  %v7690_v28 = vld [vmem:[#allocation4 + $0xfc] sm:$0xf] }
0x1715   :  { %v4982_v36 = vpop.f32.mrf.mxu3 }
0x1716   :  { %v4983_v23 = vadd.f32 %v4982_v36, %v4887_v27  ;;  %5155 = vmatmul.bf16.vlgmr.msra.gmra.mxu2 %v5036_v37  ;;  %v7322_v27 = vor.u32 %v7695_v22, %v7319_v3  ;;  %v7294_v37 = vor.u32 %v7692_v59, %v7293_v9  ;;  %v7295_v36 = vld [vmem:[#allocation4 + $0x110] sm:$0xf0]  ;;  %v7254_v22 = vor.u32 %v7681_v7, %v7253_v18  ;;  %v7674_v59 = vld [vmem:[#allocation4 + $0x3c] sm:$0xf] }
0x1717   :  { %v9859_v0 = vpop.f32.mrf.mxu0  ;;  %5750 = vmatpush.bf16.msra.mxu2 %v7338_v61  ;;  %v7680_v61 = vld [vmem:[#allocation4 + $0x7c] sm:$0xf0] }
0x1718   :  { %v5001_v4 = vmax.f32 %v4983_v23, 0.0  ;;  %v7301_v23 = vld [vmem:[#allocation4 + $0x100] sm:$0xf]  ;;  %5713 = vmatpush.bf16.msra.mxu3 %v7294_v37  ;;  %v7246_v34 = vor.u32 %v7680_v61, %v7245_v16  ;;  %v7343_v61 = vld [vmem:[#allocation4 + $0x320] sm:$0xf0] }
0x1719   :  { %v7237_v37 = vld [vmem:[#allocation4 + $0x40] sm:$0xf] }
0x171a   :  { %v5035_v55 = vpack.c.bf16 %v5001_v4, %v4999_v21  ;;  %v7298_v21 = vor.u32 %v7690_v28, %v7295_v36  ;;  %v7693_v4 = vld [vmem:[#allocation4 + $0x114] sm:$0xf0]  ;;  %v7231_v28 = vld [vmem:[#allocation4 + $0x50] sm:$0xf0]  ;;  %v8299_v36 = vmov 8.0  }
0x171b   :  { %5751 = vmatpush.bf16.msra.mxu2 %v7322_v27  ;;  %v7676_v27 = vld [vmem:[#allocation4 + $0x4c] sm:$0xf0] }
0x171c   :  { %5141 = vmatmul.bf16.vlgmr.msrb.gmra.mxu1 %v5035_v55  ;;  %v7691_v55 = vld [vmem:[#allocation4 + $0x104] sm:$0xf]  ;;  %5726 = vmatpush.bf16.msra.mxu0 %v7298_v21  ;;  %v7234_v21 = vor.u32 %v7674_v59, %v7231_v28 }
0x171d   :  { %v9861_v40 = vpop.f32.mrf.mxu3  ;;  %5737 = vmatpush.bf16.msrb.mxu1 %v7334_v51 }
0x171f   :  { %v5516_v24 = vpop.f32.mrf.mxu0 }
0x1720   :  { %v7303_v24 = vld [vmem:[#allocation4 + $0x118] sm:$0xf0] }
0x1721   :  { %5738 = vmatpush.bf16.msrb.mxu1 %v7318_v32 }
0x1725   :  { %v5503_v46 = vpop.f32.mrf.mxu3 }
0x1726   :  { %5539 = vmatmul.bf16.vlgmr.msrb.gmra.mxu2 %v9852_v1  ;;  %v7302_v46 = vor.u32 %v7693_v4, %v7301_v23  ;;  %v7677_v4 = vld [vmem:[#allocation4 + $0x54] sm:$0xf0] }
0x1728   :  { %5739 = vmatpush.bf16.msrb.mxu1 %v7302_v46  ;;  %v7238_v46 = vor.u32 %v7677_v4, %v7237_v37 }
0x172c   :  { %5526 = vmatmul.bf16.vlgmr.msra.gmra.mxu1 %v9852_v1 }
0x1799   :  { %v5142_v56 = vpop.f32.mrf.mxu1  ;;  %v5156_v8 = vpop.f32.mrf.mxu2 }
0x179a   :  { %v5157_v43 = vadd.f32 %v5156_v8, %v5142_v56  ;;  %v7306_v56 = vor.u32 %v7691_v55, %v7303_v24  ;;  %v7277_v8 = vld [vmem:[#allocation4 + $0xc8] sm:$0xf]  ;;  %v7675_v55 = vld [vmem:[#allocation4 + $0x44] sm:$0xf] }
0x179c   :  { %v5161_v15 = vadd.f32 %v5157_v43, %v9844_v30  ;;  %v7688_v43 = vld [vmem:[#allocation4 + $0xdc] sm:$0xf0]  ;;  %5752 = vmatpush.bf16.msra.mxu2 %v7306_v56  ;;  %v7239_v56 = vld [vmem:[#allocation4 + $0x58] sm:$0xf0] }
0x179e   :  { %v5164_v31 = vadd.f32 %v5163_v48, %v5161_v15  ;;  %v7278_v15 = vor.u32 %v7688_v43, %v7277_v8  ;;  %v7213_v8 = vld [vmem:[#allocation4 + $0x8] sm:$0xf]  ;;  %v7672_v43 = vld [vmem:[#allocation4 + $0x1c] sm:$0xf0] }
0x17a0   :  { %5168 = vadd.xlane.f32.xlu0 %v5164_v31  ;;  %5714 = vmatpush.bf16.msra.mxu3 %v7278_v15 }
0x17a1   :  { %v5144_v35 = vpop.f32.mrf.mxu1  ;;  %v5158_v54 = vpop.f32.mrf.mxu2 }
0x17a2   :  { %v5159_v2 = vadd.f32 %v5158_v54, %v5144_v35  ;;  %v7285_v35 = vld [vmem:[#allocation4 + $0xd0] sm:$0xf]  ;;  %v7689_v54 = vld [vmem:[#allocation4 + $0xe4] sm:$0xf0] }
0x17a4   :  { %v5162_v13 = vadd.f32 %v5159_v2, %v9846_v6 }
0x17a6   :  { %v5165_v39 = vadd.f32 %v5163_v48, %v5162_v13  ;;  %v7686_v48 = vld [vmem:[#allocation4 + $0xcc] sm:$0xf] }
0x17a8   :  { %5170 = vadd.xlane.f32.xlu1 %v5165_v39 }
0x17a9   :  { %v9870_v14 = vpop.f32.mrf.mxu1  ;;  %v9872_v1 = vpop.f32.mrf.mxu2 }
0x17b1   :  { %v5529_v63 = vpop.f32.mrf.mxu1  ;;  %v5542_v33 = vpop.f32.mrf.mxu2 }
0x17b2   :  { %v7687_v63 = vld [vmem:[#allocation4 + $0xd4] sm:$0xf]  ;;  %v7287_v33 = vld [vmem:[#allocation4 + $0xe8] sm:$0xf0] }
0x1813   :  { %v5169_v58 = vpop.xlane.xlu0 %5168 }
0x1814   :  { %v5172_v5 = vmul.f32 %v5169_v58, %v8919_v60 }
0x1816   :  { %v9875_v50 = vsub.f32 %v5164_v31, %v5172_v5  ;;  %v7279_v31 = vld [vmem:[#allocation4 + $0xe0] sm:$0xf0]  ;;  %v7290_v5 = vor.u32 %v7687_v63, %v7287_v33  ;;  %v7671_v63 = vld [vmem:[#allocation4 + $0x14] sm:$0xf] }
0x1817   :  { %v7282_v13 = vor.u32 %v7686_v48, %v7279_v31  ;;  %v7242_v31 = vor.u32 %v7675_v55, %v7239_v56  ;;  %v5166_v33 = vld [vmem:[%s10083_s7 + $0x44] ss:$0 sm:$0xff] }
0x1818   :  { %v5176_v30 = vmul.f32 %v9875_v50, %v9875_v50  ;;  %5753 = vmatpush.bf16.msra.mxu2 %v7290_v5 }
0x1819   :  { %5727 = vmatpush.bf16.msra.mxu0 %v7282_v13  ;;  %v7214_v13 = vor.u32 %v7672_v43, %v7213_v8  ;;  %v71_v8 = vld [vmem:[%s10079_s3 + $0x1] sm:$0x1] }
0x181a   :  { %5178 = vadd.xlane.f32.xlu2 %v5176_v30  ;;  %v7261_v30 = vld [vmem:[#allocation4 + $0x98] sm:$0xf] }
0x181b   :  { %v5171_v17 = vpop.xlane.xlu1 %5170 }
0x181c   :  { %v5173_v6 = vmul.f32 %v5171_v17, %v8919_v60  ;;  %v7684_v17 = vld [vmem:[#allocation4 + $0xac] sm:$0xf0]  ;;  %5754 = vmatpush.bf16.msra.mxu2 %v7274_v41 }
0x181d   :  { %v7262_v47 = vor.u32 %v7684_v17, %v7261_v30  ;;  %v7223_v30 = vld [vmem:[#allocation4 + $0x28] sm:$0xf0] }
0x181e   :  { %v9880_v49 = vsub.f32 %v5165_v39, %v5173_v6  ;;  %v7286_v39 = vor.u32 %v7689_v54, %v7285_v35  ;;  %v7682_v6 = vld [vmem:[#allocation4 + $0x9c] sm:$0xf]  ;;  %v7670_v35 = vld [vmem:[#allocation4 + $0xc] sm:$0xf]  ;;  %v7215_v54 = vld [vmem:[#allocation4 + $0x20] sm:$0xf0] }
0x181f   :  { %v7266_v57 = vor.u32 %v7682_v6, %v7263_v45  ;;  %5715 = vmatpush.bf16.msra.mxu3 %v7262_v47  ;;  %v7218_v5 = vor.u32 %v7670_v35, %v7215_v54  ;;  %v7226_v45 = vor.u32 %v7671_v63, %v7223_v30  ;;  %v5768_v35 = vpack.c.bf16 %v71_v8, %v71_v8  ;;  %v7753_v63 = vld [vmem:[%s10082_s6 + $0x78] sm:$0xff] }
0x1820   :  { %v5177_v25 = vmul.f32 %v9880_v49, %v9880_v49  ;;  %5740 = vmatpush.bf16.msrb.mxu1 %v7286_v39  ;;  %v7673_v39 = vld [vmem:[#allocation4 + $0x24] sm:$0xf0]  ;;  %v7360_v8 = vld [vmem:[%s10083_s7 + $0x47] ss:$8 sm:$0xf] }
0x1821   :  { %5728 = vmatpush.bf16.msra.mxu0 %v7266_v57 }
0x1822   :  { %5180 = vadd.xlane.f32.xlu0 %v5177_v25 }
0x1823   :  { %5716 = vmatpush.bf16.msra.mxu3 %v7246_v34  ;;  %v7737_v34 = vld [vmem:[#allocation4 + $0x324] sm:$0xf0] }
0x1825   :  { %5729 = vmatpush.bf16.msra.mxu0 %v7250_v38 }
0x1829   :  { %5730 = vmatpush.bf16.msra.mxu0 %v7234_v21 }
0x182d   :  { %5731 = vmatpush.bf16.msra.mxu0 %v7218_v5 }
0x188d   :  { %v5179_v52 = vpop.xlane.xlu2 %5178 }
0x188e   :  { %v5182_v44 = vmul.f32 %v5179_v52, %v8919_v60  ;;  %v7679_v52 = vld [vmem:[#allocation4 + $0x74] sm:$0xf] }
0x188f   :  { %v7258_v3 = vor.u32 %v7679_v52, %v7255_v19 }
0x1890   :  { %v9885_v10 = vadd.f32 1e-05, %v5182_v44  ;;  %v7229_v44 = vld [vmem:[#allocation4 + $0x38] sm:$0xf] }
0x1891   :  { %v7230_v9 = vor.u32 %v7676_v27, %v7229_v44  ;;  %5755 = vmatpush.bf16.msra.mxu2 %v7258_v3 }
0x1892   :  { %8220 = vrsqrt.f32 %v9885_v10  ;;  %vm5192_vm8 = vweird.f32 %v9885_v10 }
0x1893   :  { %5717 = vmatpush.bf16.msra.mxu3 %v7230_v9 }
0x1895   :  { %v5181_v2 = vpop.xlane.xlu0 %5180  ;;  %5756 = vmatpush.bf16.msra.mxu2 %v7242_v31  ;;  %v7351_v31 = vld [vmem:[#allocation4 + $0x328] sm:$0xf0] }
0x1896   :  { %v5183_v58 = vmul.f32 %v5181_v2, %v8919_v60  ;;  %v7685_v60 = vld [vmem:[#allocation4 + $0xb4] sm:$0xf0]  ;;  %v7221_v2 = vld [vmem:[#allocation4 + $0x10] sm:$0xf] }
0x1897   :  { %v7270_v51 = vor.u32 %v7685_v60, %v7269_v26  ;;  %v7222_v47 = vor.u32 %v7673_v39, %v7221_v2  ;;  %v5167_v26 = vld [vmem:[%s10083_s7 + $0x45] ss:$0 sm:$0xff]  ;;  %5718 = vmatpush.bf16.msra.mxu3 %v7214_v13  ;;  %v70_v2 = vld [vmem:[%s10079_s3] sm:$0x1] }
0x1898   :  { %v9889_v25 = vpop.eup %8220  ;;  %v9891_v53 = vadd.f32 1e-05, %v5183_v58 }
0x1899   :  { %v5187_v20 = vmul.f32 %v9889_v25, %v9885_v10  ;;  %5741 = vmatpush.bf16.msrb.mxu1 %v7270_v51  ;;  %vm5193_vm7 = vweird.f32 %v9889_v25  ;;  %5757 = vmatpush.bf16.msra.mxu2 %v7226_v45  ;;  %v7734_v51 = vld [vmem:[#allocation4 + $0x30c] sm:$0xf]  ;;  %v7760_v45 = vld [vmem:[%s10082_s6 + $0xb0] sm:$0xff] }
0x189a   :  { %8222 = vrsqrt.f32 %v9891_v53  ;;  %vm5194_vm9 = vmor %vm5192_vm8, %vm5193_vm7  ;;  %vm5202_vm11 = vweird.f32 %v9891_v53  ;;  %v7346_v62 = vor.u32 %v7734_v51, %v7343_v61  ;;  %v7757_v51 = vld [vmem:[%s10082_s6 + $0x98] sm:$0xff]  ;;  %v7756_v61 = vld [vmem:[%s10082_s6 + $0x90] sm:$0xff] }
0x189b   :  { %v5188_v29 = vmul.f32 %v9889_v25, %v5187_v20  ;;  %8224 = vrcp.f32 %v8299_v36 }
0x189c   :  { %5819 = vmatpush.bf16.msrb.mxu0 %v7346_v62  ;;  %v7755_v62 = vld [vmem:[%s10082_s6 + $0x88] sm:$0xff] }
0x189d   :  { %v5189_v32 = vmul.f32 0.5, %v5188_v29  ;;  %5742 = vmatpush.bf16.msrb.mxu1 %v7254_v22  ;;  %v7349_v29 = vld [vmem:[#allocation4 + $0x310] sm:$0xf] }
0x189e   :  { %v7350_v18 = vor.u32 %v7737_v34, %v7349_v29  ;;  %v7741_v29 = vld [vmem:[%s10082_s6 + $0x18] sm:$0xff] }
0x189f   :  { %v5190_v23 = vsub.f32 1.5, %v5189_v32  ;;  %v7769_v34 = vld [vmem:[%s10082_s6 + $0xf8] sm:$0xff] }
0x18a0   :  { %v8223_v24 = vpop.eup %8222 }
0x18a1   :  { %v5191_v48 = vmul.f32 %v9889_v25, %v5190_v23  ;;  %v5197_v15 = vmul.f32 %v8223_v24, %v9891_v53  ;;  %v8225_v17 = vpop.eup %8224  ;;  %5743 = vmatpush.bf16.msrb.mxu1 %v7238_v46  ;;  %vm5203_vm10 = vweird.f32 %v8223_v24 }
0x18a2   :  { %vm5204_vm12 = vmor %vm5202_vm11, %vm5203_vm10  ;;  %vm5229_vm13 = vweird.f32 %v8225_v17 }
0x18a3   :  { %v5195_v58 = vsel %vm5194_vm9, %v9889_v25, %v5191_v48  ;;  %v5198_v10 = vmul.f32 %v8223_v24, %v5197_v15  ;;  %v5225_v25 = vmul.f32 8.0, %v8225_v17  ;;  %v7735_v15 = vld [vmem:[#allocation4 + $0x314] sm:$0xf] }
0x18a4   :  { %v5206_v6 = vmul.f32 %v5195_v58, %v9875_v50  ;;  %v7736_v50 = vld [vmem:[#allocation4 + $0x31c] sm:$0xf0]  ;;  %v7354_v39 = vor.u32 %v7735_v15, %v7351_v31  ;;  %v5767_v58 = vpack.c.bf16 %v70_v2, %v70_v2  ;;  %v7773_v2 = vld [vmem:[%s10082_s6 + $0x18] sm:$0xff] }
0x18a5   :  { %v5199_v20 = vmul.f32 0.5, %v5198_v10  ;;  %5744 = vmatpush.bf16.msrb.mxu1 %v7222_v47  ;;  %v7342_v16 = vor.u32 %v7736_v50, %v7341_v42  ;;  %v5226_v7 = vsub.f32 1.0, %v5225_v25  ;;  %v5772_v10 = vunpack.c.l.b16 %v5768_v35  ;;  %v7752_v47 = vld [vmem:[%s10082_s6 + $0x70] sm:$0xff]  ;;  %v7750_v25 = vld [vmem:[%s10082_s6 + $0x60] sm:$0xff]  ;;  %v7743_v42 = vld [vmem:[%s10082_s6 + $0x28] sm:$0xff]  ;;  %6258 = vrot.lane.b32.xlu1 %v7773_v2, %s8291_s29 }
0x18a6   :  { %v5208_v57 = vmul.f32 %v5206_v6, %v5166_v33  ;;  %v5771_v5 = vunpack.c.l.b16 %v5767_v58  ;;  %v7749_v50 = vld [vmem:[%s10082_s6 + $0x58] sm:$0xff] }
0x18a7   :  { %v5200_v60 = vsub.f32 1.5, %v5199_v20  ;;  %5806 = vmatpush.bf16.msrb.mxu3 %v7342_v16  ;;  %v5227_v53 = vmul.f32 %v8225_v17, %v5226_v7  ;;  %v5773_v30 = vrot.slane %v5772_v10, 7  ;;  %v7751_v20 = vld [vmem:[%s10082_s6 + $0x68] sm:$0xff]  ;;  %v7748_v16 = vld [vmem:[%s10082_s6 + $0x50] sm:$0xff]  ;;  %v7746_v7 = vld [vmem:[%s10082_s6 + $0x40] sm:$0xff] }
0x18a8   :  { %v5210_v11 = vadd.f32 %v5208_v57, %v5167_v26  ;;  %v7759_v57 = vld [vmem:[%s10082_s6 + $0xa8] sm:$0xff] }
0x18a9   :  { %v5201_v41 = vmul.f32 %v8223_v24, %v5200_v60  ;;  %5832 = vmatpush.bf16.msra.mxu1 %v7350_v18  ;;  %v5228_v59 = vadd.f32 %v8225_v17, %v5227_v53  ;;  %v7744_v60 = vld [vmem:[%s10082_s6 + $0x30] sm:$0xff]  ;;  %v7738_v53 = vld [vmem:[%s10082_s6] sm:$0xff] }
0x18aa   :  { %v5212_v12 = vrot.slane %v5210_v11, 4  ;;  %v7740_v18 = vld [vmem:[%s10082_s6 + $0x10] sm:$0xff] }
0x18ab   :  { %v5205_v38 = vsel %vm5204_vm12, %v8223_v24, %v5201_v41  ;;  %v5230_v23 = vsel %vm5229_vm13, %v8225_v17, %v5228_v59  ;;  %v5774_v17 = vsel %vm5328_vm14, %v5773_v30, %v5771_v5  ;;  %v7742_v41 = vld [vmem:[%s10082_s6 + $0x20] sm:$0xff] }
0x18ac   :  { %v5213_v52 = vadd.f32 %v5212_v12, %v5210_v11  ;;  %v5207_v19 = vmul.f32 %v5205_v38, %v9880_v49  ;;  %v5775_v6 = vpack.c.b16 %v5774_v17, %v5774_v17  ;;  %v7758_v11 = vld [vmem:[%s10082_s6 + $0xa0] sm:$0xff]  ;;  %v7747_v12 = vld [vmem:[%s10082_s6 + $0x48] sm:$0xff]  ;;  %v7768_v38 = vld [vmem:[%s10082_s6 + $0xf0] sm:$0xff] }
0x18ae   :  { %v5214_v32 = vrot.slane %v5213_v52, 2  ;;  %v5209_v22 = vmul.f32 %v5207_v19, %v5166_v33  ;;  %v7761_v33 = vld [vmem:[%s10082_s6 + $0xb8] sm:$0xff]  ;;  %v7739_v19 = vld [vmem:[%s10082_s6 + $0x8] sm:$0xff] }
0x18af   :  { %6191 = vmatpush.bf16.msrb.mxu2 %v7761_v33  ;;  %v7772_v33 = vld [vmem:[%s10082_s6 + $0x10] sm:$0xff] }
0x18b0   :  { %v5215_v3 = vadd.f32 %v5214_v32, %v5213_v52  ;;  %v5211_v44 = vadd.f32 %v5209_v22, %v5167_v26  ;;  %v7745_v26 = vld [vmem:[%s10082_s6 + $0x38] sm:$0xff]  ;;  %v7754_v52 = vld [vmem:[%s10082_s6 + $0x80] sm:$0xff]  ;;  %v7767_v32 = vld [vmem:[%s10082_s6 + $0xe8] sm:$0xff]  ;;  %6256 = vrot.lane.b32.xlu2 %v7772_v33, %s8291_s29 }
0x18b1   :  { %v6281_v33 = vld [vmem:[%s10083_s7 + $0x65] ss:$0 sm:$0xff] }
0x18b2   :  { %v5216_v27 = vrot.slane %v5215_v3, 1  ;;  %v5218_v9 = vrot.slane %v5211_v44, 4 }
0x18b3   :  { %6192 = vmatpush.bf16.msrb.mxu2 %v7760_v45 }
0x18b4   :  { %v5219_v28 = vadd.f32 %v5218_v9, %v5211_v44  ;;  %v5217_v36 = vadd.f32 %v5216_v27, %v5215_v3  ;;  %v7766_v3 = vld [vmem:[%s10082_s6 + $0xe0] sm:$0xff]  ;;  %v7765_v27 = vld [vmem:[%s10082_s6 + $0xd8] sm:$0xff] }
0x18b6   :  { %v5220_v37 = vrot.slane %v5219_v28, 2  ;;  %v5231_v55 = vmul.f32 %v5230_v23, %v5217_v36 }
0x18b7   :  { %6193 = vmatpush.bf16.msrb.mxu2 %v7759_v57 }
0x18b8   :  { %v5221_v21 = vadd.f32 %v5220_v37, %v5219_v28  ;;  %v5288_v46 = vpack.c.bf16 %v5231_v55, %v5231_v55  ;;  %v7764_v37 = vld [vmem:[%s10082_s6 + $0xd0] sm:$0xff] }
0x18ba   :  { %v5222_v4 = vrot.slane %v5221_v21, 1  ;;  %v5546_v43 = vunpack.c.l.b16 %v5288_v46 }
0x18bb   :  { %6194 = vmatpush.bf16.msrb.mxu2 %v7758_v11  ;;  %v5877_v11 = vperm.slane %v7360_v8, 0 }
0x18bc   :  { %v5223_v24 = vadd.f32 %v5222_v4, %v5221_v21  ;;  %v7763_v21 = vld [vmem:[%s10082_s6 + $0xc8] sm:$0xff] }
0x18be   :  { %v5232_v49 = vmul.f32 %v5230_v23, %v5223_v24  ;;  %v7359_v23 = vld [vmem:[%s10083_s7 + $0x46] ss:$8 sm:$0xf] }
0x18bf   :  { %6195 = vmatpush.bf16.msrb.mxu2 %v7757_v51  ;;  %v5858_v30 = vperm.slane %v7359_v23, 0 }
0x18c0   :  { %v5289_v56 = vpack.c.bf16 %v5232_v49, %v5232_v49  ;;  %v5859_v49 = vperm.slane %v7359_v23, 1 }
0x18c2   :  { %v5547_v48 = vunpack.c.l.b16 %v5289_v56 }
0x18c3   :  { %6196 = vmatpush.bf16.msrb.mxu2 %v7756_v61 }
0x18c4   :  { %v5548_v54 = vsel %vm5328_vm14, %v5547_v48, %v5546_v43  ;;  %v5860_v43 = vperm.slane %v7359_v23, 2  ;;  %v7762_v48 = vld [vmem:[%s10082_s6 + $0xc0] sm:$0xff] }
0x18c5   :  { %v5549_v13 = vpack.c.b16 %v5548_v54, %v5548_v54 }
0x18c7   :  { %5719 = vmatmul.bf16.vlgmr.msra.gmra.mxu3 %v5549_v13  ;;  %5732 = vmatmul.bf16.vlgmr.msra.gmra.mxu0 %v5549_v13 }
0x18c8   :  { %5745 = vmatmul.bf16.vlgmr.msrb.gmra.mxu1 %v5549_v13  ;;  %5758 = vmatmul.bf16.vlgmr.msra.gmra.mxu2 %v5549_v13  ;;  %v7771_v13 = vld [vmem:[%s10082_s6 + $0x8] sm:$0xff] }
0x18c9   :  { %5845 = vmatpush.bf16.msra.mxu3 %v7354_v39  ;;  %6178 = vmatpush.bf16.msrb.mxu1 %v7753_v63  ;;  %v5879_v63 = vperm.slane %v7360_v8, 2 }
0x18ca   :  { %6165 = vmatpush.bf16.msra.mxu0 %v7745_v26  ;;  %6197 = vmatpush.bf16.msrb.mxu2 %v7755_v62 }
0x18cb   :  { %6254 = vrot.lane.b32.xlu0 %v7771_v13, %s8291_s29  ;;  %v6231_v13 = vld [vmem:[%s10083_s7 + $0x64] ss:$0 sm:$0xff] }
0x18cd   :  { %6179 = vmatpush.bf16.msrb.mxu1 %v7752_v47 }
0x18ce   :  { %6166 = vmatpush.bf16.msra.mxu0 %v7744_v60  ;;  %6198 = vmatpush.bf16.msrb.mxu2 %v7754_v52 }
0x18d1   :  { %6180 = vmatpush.bf16.msrb.mxu1 %v7751_v20 }
0x18d2   :  { %6167 = vmatpush.bf16.msra.mxu0 %v7743_v42  ;;  %v7770_v42 = vld [vmem:[%s10082_s6] sm:$0xff] }
0x18d3   :  { %6252 = vrot.lane.b32.xlu1 %v7770_v42, %s8291_s29 }
0x18d5   :  { %6181 = vmatpush.bf16.msrb.mxu1 %v7750_v25 }
0x18d6   :  { %6168 = vmatpush.bf16.msra.mxu0 %v7742_v41 }
0x18d7   :  { %7355 = vmatmul.msk.bf16.vlgmr.msrb.gmra.mxu3 %vm369_vm1, %v5775_v6  ;;  %7356 = vmatmul.msk.bf16.vlgmr.msrb.gmra.mxu0 %vm369_vm1, %v5775_v6 }
0x18d8   :  { %7357 = vmatmul.msk.bf16.vlgmr.msra.gmra.mxu1 %vm369_vm1, %v5775_v6  ;;  %6204 = vmatpush.bf16.msrb.mxu3 %v7769_v34 }
0x18d9   :  { %6182 = vmatpush.bf16.msrb.mxu1 %v7749_v50 }
0x18da   :  { %6169 = vmatpush.bf16.msra.mxu0 %v7741_v29 }
0x18dc   :  { %6205 = vmatpush.bf16.msrb.mxu3 %v7768_v38  ;;  %v5861_v38 = vperm.slane %v7359_v23, 3 }
0x18dd   :  { %6183 = vmatpush.bf16.msrb.mxu1 %v7748_v16 }
0x18de   :  { %6170 = vmatpush.bf16.msra.mxu0 %v7740_v18 }
0x18e0   :  { %6206 = vmatpush.bf16.msrb.mxu3 %v7767_v32  ;;  %v5880_v32 = vperm.slane %v7360_v8, 3 }
0x18e1   :  { %6184 = vmatpush.bf16.msrb.mxu1 %v7747_v12 }
0x18e2   :  { %6171 = vmatpush.bf16.msra.mxu0 %v7739_v19 }
0x18e4   :  { %6207 = vmatpush.bf16.msrb.mxu3 %v7766_v3 }
0x18e5   :  { %6185 = vmatpush.bf16.msrb.mxu1 %v7746_v7 }
0x18e6   :  { %6172 = vmatpush.bf16.msra.mxu0 %v7738_v53 }
0x18e7   :  { %7358 = vmatmul.msk.bf16.vlgmr.msra.gmra.mxu3 %vm369_vm1, %v5775_v6  ;;  %vm6283_vm1 = vcmask 254976  }
0x18e8   :  { %6208 = vmatpush.bf16.msrb.mxu3 %v7765_v27 }
0x18ec   :  { %6209 = vmatpush.bf16.msrb.mxu3 %v7764_v37 }
0x18f0   :  { %6210 = vmatpush.bf16.msrb.mxu3 %v7763_v21 }
0x18f4   :  { %6211 = vmatpush.bf16.msrb.mxu3 %v7762_v48 }
0x190a   :  { %v6257_v37 = vpop.permute.xlu2 %6256 }
0x193d   :  { %v6255_v21 = vpop.permute.xlu0 %6254 }
0x1944   :  { %v5733_v22 = vpop.f32.mrf.mxu0 }
0x1945   :  { %v5746_v44 = vpop.f32.mrf.mxu1  ;;  %v5734_v55 = vadd.f32 %v5733_v22, %v9859_v0  ;;  %v7361_v0 = vld [vmem:[%s10083_s7 + $0x60] ss:$8 sm:$0xf] }
0x1946   :  { %v5747_v46 = vadd.f32 %v5746_v44, %v9870_v14  ;;  %v5878_v14 = vperm.slane %v7360_v8, 1  ;;  %v5893_v5 = vperm.slane %v7361_v0, 1  ;;  %v5894_v6 = vperm.slane %v7361_v0, 2 }
0x1947   :  { %v5892_v16 = vperm.slane %v7361_v0, 0  ;;  %v5895_v53 = vperm.slane %v7361_v0, 3  ;;  %v6220_v0 = vld [vmem:[%s10083_s7 + $0x63] ss:$0 sm:$0xff] }
0x194a   :  { %v5720_v9 = vpop.f32.mrf.mxu3 }
0x194b   :  { %v5759_v59 = vpop.f32.mrf.mxu2  ;;  %v5721_v58 = vadd.f32 %v5720_v9, %v9861_v40 }
0x194c   :  { %v5735_v28 = vpop.f32.mrf.mxu0  ;;  %v5760_v18 = vadd.f32 %v5759_v59, %v9872_v1 }
0x194d   :  { %v5748_v36 = vpop.f32.mrf.mxu1  ;;  %v6259_v28 = vpop.permute.xlu1 %6258 }
0x194e   :  { %6271 = vmatpush.bf16.msrb.mxu0 %v6259_v28 }
0x1952   :  { %v5722_v4 = vpop.f32.mrf.mxu3  ;;  %6272 = vmatpush.bf16.msrb.mxu0 %v6257_v37 }
0x1953   :  { %v5761_v24 = vpop.f32.mrf.mxu2 }
0x1954   :  { %v5821_v56 = vpop.f32.mrf.mxu0 }
0x1955   :  { %v5852_v15 = vadd.f32 %v5821_v56, %v5734_v55  ;;  %v5834_v31 = vpop.f32.mrf.mxu1  ;;  %v6253_v1 = vpop.permute.xlu1 %6252 }
0x1956   :  { %v5853_v35 = vadd.f32 %v5834_v31, %v5747_v46  ;;  %6273 = vmatpush.bf16.msrb.mxu0 %v6255_v21 }
0x1957   :  { %v5867_v54 = vadd.f32 %v5859_v49, %v5852_v15  ;;  %v5972_v49 = vld [vmem:[%s10083_s7 + $0x61] ss:$0 sm:$0xff]  ;;  %v6218_v15 = vld [vmem:[%s10083_s7 + $0x62] ss:$0 sm:$0xff] }
0x1958   :  { %v5868_v39 = vadd.f32 %v5860_v43, %v5853_v35 }
0x1959   :  { %v5871_v10 = vmax.f32 %v5867_v54, 0.0 }
0x195a   :  { %v5872_v17 = vmax.f32 %v5868_v39, 0.0  ;;  %v5808_v47 = vpop.f32.mrf.mxu3  ;;  %6274 = vmatpush.bf16.msrb.mxu0 %v6253_v1 }
0x195b   :  { %v5886_v45 = vmul.f32 %v5878_v14, %v5871_v10  ;;  %v5851_v26 = vadd.f32 %v5808_v47, %v5721_v58 }
0x195c   :  { %v5887_v20 = vmul.f32 %v5879_v63, %v5872_v17  ;;  %v5823_v57 = vpop.f32.mrf.mxu0  ;;  %v8300_v17 = vmov 0  }
0x195d   :  { %v5901_v60 = vadd.f32 %v5893_v5, %v5886_v45  ;;  %v5866_v25 = vadd.f32 %v5858_v30, %v5851_v26  ;;  %v5836_v40 = vpop.f32.mrf.mxu1  ;;  %7931 = vset.pattern.permute.xlu2 %v8300_v17  ;;  %7932 = vset.pattern.permute.xlu1 %v8300_v17 }
0x195e   :  { %v5902_v50 = vadd.f32 %v5894_v6, %v5887_v20  ;;  %7933 = vset.pattern.permute.xlu0 %v8300_v17  ;;  %v6287_v6 = vld [vmem:[%s10083_s7 + $0x66] ss:$0 sm:$0xff] }
0x195f   :  { %v5969_v51 = vpack.c.bf16 %v5901_v60, %v5901_v60  ;;  %v5870_v41 = vmax.f32 %v5866_v25, 0.0 }
0x1960   :  { %v5970_v61 = vpack.c.bf16 %v5902_v50, %v5902_v50 }
0x1961   :  { %v5885_v29 = vmul.f32 %v5877_v11, %v5870_v41  ;;  %6186 = vmatmul.bf16.vlgmr.msrb.gmra.mxu1 %v5969_v51 }
0x1962   :  { %6199 = vmatmul.bf16.vlgmr.msrb.gmra.mxu2 %v5970_v61  ;;  %v5810_v34 = vpop.f32.mrf.mxu3 }
0x1963   :  { %v5900_v12 = vadd.f32 %v5892_v16, %v5885_v29 }
0x1965   :  { %v5968_v62 = vpack.c.bf16 %v5900_v12, %v5900_v12 }
0x1967   :  { %6173 = vmatmul.bf16.vlgmr.msra.gmra.mxu0 %v5968_v62 }
0x196a   :  { %v5847_v7 = vpop.f32.mrf.mxu3 }
0x196b   :  { %v5854_v52 = vadd.f32 %v5847_v7, %v5760_v18 }
0x196d   :  { %v5869_v19 = vadd.f32 %v5861_v38, %v5854_v52 }
0x196f   :  { %v5873_v22 = vmax.f32 %v5869_v19, 0.0 }
0x1971   :  { %v5888_v3 = vmul.f32 %v5880_v32, %v5873_v22 }
0x1972   :  { %v5849_v44 = vpop.f32.mrf.mxu3 }
0x1973   :  { %v5903_v27 = vadd.f32 %v5895_v53, %v5888_v3 }
0x1975   :  { %v5971_v9 = vpack.c.bf16 %v5903_v27, %v5903_v27 }
0x1977   :  { %6212 = vmatmul.bf16.vlgmr.msrb.gmra.mxu3 %v5971_v9 }
0x19de   :  { %v6187_v36 = vpop.f32.mrf.mxu1 }
0x19e4   :  { %v6174_v59 = vpop.f32.mrf.mxu0 }
0x19e5   :  { %v6200_v23 = vpop.f32.mrf.mxu2  ;;  %v6175_v46 = vadd.f32 %v6174_v59, %v5972_v49 }
0x19e6   :  { %v6189_v4 = vpop.f32.mrf.mxu1 }
0x19e7   :  { %v6188_v56 = vadd.f32 %v6187_v36, %v6175_v46 }
0x19e9   :  { %v6201_v8 = vadd.f32 %v6200_v23, %v6188_v56 }
0x19ec   :  { %v6176_v55 = vpop.f32.mrf.mxu0 }
0x19ed   :  { %v6202_v24 = vpop.f32.mrf.mxu2 }
0x19fa   :  { %v6213_v43 = vpop.f32.mrf.mxu3 }
0x19fb   :  { %v6214_v48 = vadd.f32 %v6213_v43, %v6201_v8 }
0x19fd   :  { %v6217_v31 = vmax.f32 %v6214_v48, 0.0 }
0x19ff   :  { %v6219_v35 = vmul.f32 %v6218_v15, %v6217_v31 }
0x1a01   :  { %v6221_v54 = vadd.f32 %v6220_v0, %v6219_v35 }
0x1a02   :  { %v6215_v14 = vpop.f32.mrf.mxu3 }
0x1a03   :  { %v6230_v2 = vpack.c.bf16 %v6221_v54, %v6221_v54 }
0x1a05   :  { %7506 = vmatmul.msk.bf16.vlgmr.msrb.gmra.mxu0 %vm968_vm3, %v6230_v2 }
0x1a82   :  { %v6276_v39 = vpop.f32.mrf.mxu0 }
0x1a83   :  { %v6277_v63 = vadd.f32 %v6276_v39, %v6231_v13 }
0x1a85   :  { %v6280_v58 = vmax.f32 %v6277_v63, 0.0 }
0x1a87   :  { %v6282_v10 = vmul.f32 %v6281_v33, %v6280_v58 }
0x1a89   :  { %v6284_v5 = vsel %vm6283_vm1, %v6282_v10, 0.0 }
0x1a8a   :  { %v6278_v30 = vpop.f32.mrf.mxu0  ;;  %6285 = vadd.xlane.f32.xlu0 %v6284_v5 }
0x1afd   :  { %v6286_v47 = vpop.xlane.xlu0 %6285 }
0x1afe   :  { %v6288_v45 = vadd.f32 %v6287_v6, %v6286_v47 }
0x1b00   :  { %v6289_v26 = vsub.f32 0.0, %v6288_v45 }
0x1b02   :  { %v6290_v20 = vmul.f32 1.442695, %v6289_v26 }
0x1b04   :  { %8226 = vpow2.f32 %v6290_v20 }
0x1b0a   :  { %v8227_v57 = vpop.eup %8226 }
0x1b0b   :  { %v6292_v60 = vadd.f32 1.0, %v8227_v57 }
0x1b0d   :  { %8228 = vrcp.f32 %v6292_v60  ;;  %v6304_v42 = vand.u32 2147483648, %v6292_v60  ;;  %v6302_v51 = vand.u32 2147483647, %v6292_v60  ;;  %vm6298_vm14 = vweird.f32 %v6292_v60 }
0x1b0f   :  { %v6305_v16 = vor.u32 1.1754944e-38, %v6304_v42  ;;  %vm6303_vm2 = vcmp.eq.f32.partialorder %v6302_v51, 8.507059e+37 }
0x1b13   :  { %v8229_v25 = vpop.eup %8228 }
0x1b14   :  { %v6294_v11 = vmul.f32 %v8229_v25, %v6292_v60  ;;  %vm6299_vm3 = vweird.f32 %v8229_v25 }
0x1b15   :  { %vm6300_vm0 = vmor %vm6298_vm14, %vm6299_vm3 }
0x1b16   :  { %v6295_v40 = vsub.f32 1.0, %v6294_v11 }
0x1b18   :  { %v6296_v50 = vmul.f32 %v8229_v25, %v6295_v40 }
0x1b1a   :  { %v6297_v41 = vadd.f32 %v8229_v25, %v6296_v50 }
0x1b1c   :  { %v6301_v61 = vsel %vm6300_vm0, %v8229_v25, %v6297_v41 }
0x1b1d   :  { %v6306_v29 = vsel %vm6303_vm2, %v6305_v16, %v6301_v61 }
0x1b1e   :  { %6311 = vperm.xlu2 %7931, %v6306_v29   ;;  %v6309_v34 = vrot.slane %v6306_v29, 1 }
0x1b20   :  { %6316 = vperm.xlu1 %7932, %v6309_v34  }
0x1b78   :  { %v6312_v12 = vpop.permute.xlu2 %6311 }
0x1b79   :  { %v6314_v62 = vperm.slane %v6312_v12, 0 }
0x1b7b   :  { %6320 = vst [vmem:[%s10084_s8] sm:$0x1] %v6314_v62 }
0x1b92   :  { %v6317_v18 = vpop.permute.xlu1 %6316 }
0x1b93   :  { %v6319_v38 = vperm.slane %v6317_v18, 0 }
0x1b95   :  { %6321 = vst [vmem:[%s10084_s8 + $0x1] sm:$0x1] %v6319_v38 }
0x1b96   :  { %6326 = vsyncpa [#allocation3], 1 }
0x1b97   :  { %6327 = vsyncpa [#allocation5], 1 }

</bundles_post_ra>
